<compile_context>
chip_gen: v7x
topology: tpu7x:2x2x1
jax: 0.10.0
libtpu: 0.0.40
codegen_flags: <defaults>
</compile_context>

<pallas_src>
import jax
import jax.numpy as jnp
from jax.experimental import pallas as pl
from jax.experimental.pallas import tpu as pltpu

VGG19_CFG = [64, 64, 'M', 128, 128, 'M', 256, 256, 256, 256, 'M',
             512, 512, 512, 512, 'M', 512, 512, 512, 512, 'M']

ACT_DTYPE = jnp.bfloat16     # activations & weights (HBM + MXU operands)
ACC_DTYPE = jnp.float32      # accumulator, bias, final output


# --------------------------------------------------------------------------- #
# Truncation logic (mirrors TruncatedVGG19.__init__)
# --------------------------------------------------------------------------- #

def truncated_vgg19_layers(i, j):
    layers = []
    in_ch = 3
    for v in VGG19_CFG:
        if v == 'M':
            layers.append(('maxpool', None, None))
        else:
            layers.append(('conv', in_ch, v))
            layers.append(('relu', None, None))
            in_ch = v
    maxpool_counter = 0
    conv_counter = 0
    truncate_at = 0
    found = False
    for layer in layers:
        truncate_at += 1
        if layer[0] == 'conv':
            conv_counter += 1
        if layer[0] == 'maxpool':
            maxpool_counter += 1
            conv_counter = 0
        if maxpool_counter == i - 1 and conv_counter == j:
            found = True
            break
    assert found, f'invalid (i={i}, j={j}) for VGG19'
    # +1 keeps the ReLU right after the j-th conv (feature map *after* activation)
    return layers[:truncate_at + 1]


def make_plan(layers):
    """Collapse the layer list into conv stages: [(cin, cout, pool_after)]."""
    plan = []
    k = 0
    while k < len(layers):
        assert layers[k][0] == 'conv', layers[k]
        cin, cout = layers[k][1], layers[k][2]
        k += 1
        assert k < len(layers) and layers[k][0] == 'relu'
        k += 1
        pool = k < len(layers) and layers[k][0] == 'maxpool'
        if pool:
            k += 1
        plan.append((cin, cout, pool))
    return plan


# --------------------------------------------------------------------------- #
# Fused network kernel
# --------------------------------------------------------------------------- #

def _build_fused_call(plan, N, H, W):
    S = len(plan)

    # per-stage input spatial sizes
    Hi, Wi = [], []
    h, w = H, W
    for (_cin, _cout, pool) in plan:
        Hi.append(h)
        Wi.append(w)
        if pool:
            assert h % 2 == 0 and w % 2 == 0
            h, w = h // 2, w // 2
    Hf, Wf, Cf = h, w, plan[-1][1]
    K0 = 9 * plan[0][0]

    # scratch bookkeeping: dy-grouped padded input scratch per stage >= 1,
    # plus an f32 row-pool scratch per pooled stage.
    scratch_shapes = []
    in_scr = {}
    pool_scr = {}
    for s in range(1, S):
        in_scr[s] = len(scratch_shapes)
        scratch_shapes.append(
            pltpu.VMEM((Hi[s], Wi[s] + 2, 3 * plan[s][0]), ACT_DTYPE))
    for s in range(S):
        if plan[s][2]:
            pool_scr[s] = len(scratch_shapes)
            scratch_shapes.append(
                pltpu.VMEM((Hi[s] // 2, Wi[s], plan[s][1]), ACC_DTYPE))

    def kernel(*refs):
        x_ref = refs[0]                    # (1, H*W, 9*Cin0) bf16 folded input
        o_ref = refs[1 + 2 * S]            # (1, Hf*Wf, Cf)   f32
        scr = refs[2 + 2 * S:]

        # Zero only the padding border of every dy-grouped scratch; interiors
        # are fully rewritten by the producer stage within this grid step.
        for s in range(1, S):
            dst = scr[in_scr[s]]
            hs, ws, cs = Hi[s], Wi[s], plan[s][0]
            zc = jnp.zeros((hs, 1, 3 * cs), ACT_DTYPE)
            dst[:, 0:1, :] = zc                              # left pad column
            dst[:, ws + 1:ws + 2, :] = zc                    # right pad column
            zr = jnp.zeros((1, ws, cs), ACT_DTYPE)
            dst[0:1, 1:ws + 1, 0:cs] = zr                    # dy=0 group: P row 0
            dst[hs - 1:hs, 1:ws + 1, 2 * cs:3 * cs] = zr     # dy=2 group: P row H+1

        for s in range(S):
            cin, cout, pool = plan[s]
            w_ref = refs[1 + 2 * s]
            b_ref = refs[2 + 2 * s]
            h, w = Hi[s], Wi[s]

            if s == 0:
                # first conv: one dense K = 9*Cin matmul over the folded input
                acc = jnp.dot(x_ref[0], w_ref[...],
                              preferred_element_type=ACC_DTYPE)
            else:
                src = scr[in_scr[s]]
                acc = jnp.zeros((h * w, cout), ACC_DTYPE)
                for dx in range(3):                   # 3 taps, each K = 3*Cin
                    lhs = src[:, pl.ds(dx, w), :]     # (h, w, 3*cin) ref load
                    if w % 16 != 0:
                        # route the (h,w,K)->(h*w,K) collapse through f32
                        # (sublane-native for w % 8 == 0), then back to bf16;
                        # only hit at tiny test widths, never at 224/112.
                        lhs = (lhs.astype(ACC_DTYPE)
                                  .reshape(h * w, 3 * cin).astype(ACT_DTYPE))
                    else:
                        lhs = lhs.reshape(h * w, 3 * cin)
                    acc = acc + jnp.dot(lhs, w_ref[dx],
                                        preferred_element_type=ACC_DTYPE)

            y = jnp.maximum(acc + b_ref[...], 0.0)        # (h*w, cout) f32

            if pool:                                      # fused 2x2 maxpool
                pr = scr[pool_scr[s]]
                y4 = y.reshape(h // 2, 2, w, cout)
                pr[...] = jnp.maximum(y4[:, 0], y4[:, 1])            # row pool
                h, w = h // 2, w // 2
                y = jnp.maximum(pr[:, pl.ds(0, w, 2), :],
                                pr[:, pl.ds(1, w, 2), :])            # col pool

            if s == S - 1:
                o_ref[0] = y.reshape(h * w, cout).astype(o_ref.dtype)
            else:
                # write the 3 dy-shifted copies straight into the next stage's
                # padded scratch (channel-grouped) so its taps have K = 3*Cin.
                y3 = y.reshape(h, w, cout).astype(ACT_DTYPE)
                dst = scr[in_scr[s + 1]]
                dst[1:h, 1:w + 1, 0:cout] = y3[:h - 1]               # dy = 0
                dst[0:h, 1:w + 1, cout:2 * cout] = y3                # dy = 1
                dst[0:h - 1, 1:w + 1, 2 * cout:3 * cout] = y3[1:]    # dy = 2

    # BlockSpecs: batch-sliced input/output, resident weights & biases.
    in_specs = [pl.BlockSpec((1, H * W, K0), lambda n: (n, 0, 0))]
    for s, (cin, cout, _pool) in enumerate(plan):
        if s == 0:
            in_specs.append(pl.BlockSpec((K0, cout), lambda n: (0, 0)))
        else:
            in_specs.append(pl.BlockSpec((3, 3 * cin, cout),
                                         lambda n: (0, 0, 0)))
        in_specs.append(pl.BlockSpec((1, cout), lambda n: (0, 0)))
    out_specs = pl.BlockSpec((1, Hf * Wf, Cf), lambda n: (n, 0, 0))

    # Scoped-VMEM budget: weights + scratches + double-buffered in/out blocks
    # + f32 accumulator temporaries + headroom, clamped to 3/4 of physical VMEM.
    weight_bytes = K0 * plan[0][1] * 2 + plan[0][1] * 4
    for s in range(1, S):
        weight_bytes += 3 * 3 * plan[s][0] * plan[s][1] * 2 + plan[s][1] * 4
    scratch_bytes = 0
    for s in range(1, S):
        scratch_bytes += Hi[s] * (Wi[s] + 2) * 3 * plan[s][0] * 2
    for s in range(S):
        if plan[s][2]:
            scratch_bytes += (Hi[s] // 2) * Wi[s] * plan[s][1] * 4
    io_bytes = 2 * (H * W * K0 * 2 + Hf * Wf * Cf * 4)
    acc_bytes = 4 * max(Hi[s] * Wi[s] * plan[s][1] * 4 for s in range(S))
    need = weight_bytes + scratch_bytes + io_bytes + acc_bytes + (8 << 20)
    try:
        cap = int(pltpu.get_tpu_info().vmem_capacity_bytes)
    except Exception:
        cap = 64 << 20
    vmem_limit = int(max(32 << 20, min(need, (cap * 3) // 4)))

    call = pl.pallas_call(
        kernel,
        out_shape=jax.ShapeDtypeStruct((N, Hf * Wf, Cf), ACC_DTYPE),
        grid=(N,),
        in_specs=in_specs,
        out_specs=out_specs,
        scratch_shapes=scratch_shapes,
        compiler_params=pltpu.CompilerParams(
            dimension_semantics=("parallel",),
            vmem_limit_bytes=vmem_limit),
    )
    return call, (Hf, Wf, Cf)


# --------------------------------------------------------------------------- #
# Parameters, forward pass, plain-JAX reference
# --------------------------------------------------------------------------- #

def init_params(plan, key):
    params = []
    for (cin, cout, _pool) in plan:
        key, kw, kb = jax.random.split(key, 3)
        scale = 1.0 / jnp.sqrt(9.0 * cin)
        w = jax.random.normal(kw, (3, 3, cin, cout), jnp.float32) * scale  # HWIO
        b = jax.random.normal(kb, (cout,), jnp.float32) * 0.01
        params.append((w, b))
    return params


def truncated_vgg19_forward(x_nchw, plan, params):
    """PyTorch-style NCHW in / NCHW out; compute runs in a single fused NHWC
    Pallas kernel (bf16 operands, f32 accumulation, f32 output)."""
    N, C, H, W = x_nchw.shape
    assert C == plan[0][0]
    x = jnp.transpose(x_nchw, (0, 2, 3, 1)).astype(ACT_DTYPE)

    # Fold the 3x3 window of the tiny Cin=3 first conv into channels (im2col),
    # tap-major (dy, dx, c): one dense K=27 matmul inside the kernel.
    xp = jnp.pad(x, ((0, 0), (1, 1), (1, 1), (0, 0)))
    x9 = jnp.concatenate(
        [xp[:, dy:dy + H, dx:dx + W, :] for dy in range(3) for dx in range(3)],
        axis=-1)
    inputs = [x9.reshape(N, H * W, 9 * C)]

    for s, (cin, cout, _pool) in enumerate(plan):
        w, b = params[s]                           # w: (3, 3, cin, cout) HWIO
        if s == 0:
            wk = w.reshape(9 * cin, cout)
        else:
            # dx-major tap groups, each (3*cin, cout) with rows ordered (dy, c)
            wk = jnp.transpose(w, (1, 0, 2, 3)).reshape(3, 3 * cin, cout)
        inputs.append(wk.astype(ACT_DTYPE))
        inputs.append(b.reshape(1, cout).astype(ACC_DTYPE))

    call, (Hf, Wf, Cf) = _build_fused_call(plan, N, H, W)
    out = call(*inputs)                            # (N, Hf*Wf, Cf) f32
    out = out.reshape(N, Hf, Wf, Cf)
    return jnp.transpose(out, (0, 3, 1, 2))        # NCHW, f32


def reference_forward(x_nchw, plan, params):
    """Plain-JAX reference with the same dtype policy (bf16 storage between
    layers, f32 accumulation, f32 final output)."""
    x = jnp.transpose(x_nchw, (0, 2, 3, 1)).astype(ACT_DTYPE)
    for s, (_cin, _cout, pool) in enumerate(plan):
        w, b = params[s]
        y = jax.lax.conv_general_dilated(
            x, w.astype(ACT_DTYPE), (1, 1), 'SAME',
            dimension_numbers=('NHWC', 'HWIO', 'NHWC'),
            preferred_element_type=jnp.float32)
        y = jnp.maximum(y + b, 0.0)
        if pool:
            y = jax.lax.reduce_window(y, -jnp.inf, jax.lax.max,
                                      (1, 2, 2, 1), (1, 2, 2, 1), 'VALID')
        x = y if s == len(plan) - 1 else y.astype(ACT_DTYPE)
    return jnp.transpose(x, (0, 3, 1, 2)).astype(jnp.float32)


if __name__ == "__main__":
    i, j = 2, 2                                    # valid (i, j) for VGG19
    layers = truncated_vgg19_layers(i, j)
    plan = make_plan(layers)

    key = jax.random.PRNGKey(0)
    key, kx = jax.random.split(key)
    x = jax.random.normal(kx, (2, 3, 16, 16), jnp.float32)   # NCHW like PyTorch
    params = init_params(plan, key)

    out = truncated_vgg19_forward(x, plan, params)
    out = jax.block_until_ready(out)

    ref = reference_forward(x, plan, params)
    assert out.shape == ref.shape == (2, 128, 8, 8), out.shape
    max_err = float(jnp.max(jnp.abs(out - ref)))
    # bf16 operands / f32 accumulation in both paths; tolerance covers rare
    # bf16 rounding-boundary flips from differing f32 accumulation order.
    assert bool(jnp.allclose(out, ref, atol=5e-3, rtol=5e-3)), max_err
    print("KERNEL_OK")
</pallas_src>

<mosaic_0001>
module attributes {stable_mosaic.version = 11 : i64} {
  func.func @kernel(%arg0: i32, %arg1: memref<1x256x27xbf16, #tpu.memory_space<vmem>>, %arg2: memref<27x64xbf16, #tpu.memory_space<vmem>>, %arg3: memref<1x64xf32, #tpu.memory_space<vmem>>, %arg4: memref<3x192x64xbf16, #tpu.memory_space<vmem>>, %arg5: memref<1x64xf32, #tpu.memory_space<vmem>>, %arg6: memref<3x192x128xbf16, #tpu.memory_space<vmem>>, %arg7: memref<1x128xf32, #tpu.memory_space<vmem>>, %arg8: memref<3x384x128xbf16, #tpu.memory_space<vmem>>, %arg9: memref<1x128xf32, #tpu.memory_space<vmem>>, %arg10: memref<1x64x128xf32, #tpu.memory_space<vmem>>, %arg11: memref<16x18x192xbf16, #tpu.memory_space<vmem>>, %arg12: memref<8x10x192xbf16, #tpu.memory_space<vmem>>, %arg13: memref<8x10x384xbf16, #tpu.memory_space<vmem>>, %arg14: memref<8x16x64xf32, #tpu.memory_space<vmem>>) attributes {dimension_semantics = [#tpu.dimension_semantics<parallel>], iteration_bounds = array<i64: 2>, scalar_prefetch = 0 : i64, scratch_operands = 4 : i64, tpu.core_type = #tpu.core_type<tc>, window_params = [{transform_indices = @transform_0, window_bounds = array<i64: 1, 256, 27>}, {pipeline_mode = #tpu.pipeline_mode<synchronous>, transform_indices = @transform_1, window_bounds = array<i64: 27, 64>}, {pipeline_mode = #tpu.pipeline_mode<synchronous>, transform_indices = @transform_2, window_bounds = array<i64: 1, 64>}, {pipeline_mode = #tpu.pipeline_mode<synchronous>, transform_indices = @transform_3, window_bounds = array<i64: 3, 192, 64>}, {pipeline_mode = #tpu.pipeline_mode<synchronous>, transform_indices = @transform_4, window_bounds = array<i64: 1, 64>}, {pipeline_mode = #tpu.pipeline_mode<synchronous>, transform_indices = @transform_5, window_bounds = array<i64: 3, 192, 128>}, {pipeline_mode = #tpu.pipeline_mode<synchronous>, transform_indices = @transform_6, window_bounds = array<i64: 1, 128>}, {pipeline_mode = #tpu.pipeline_mode<synchronous>, transform_indices = @transform_7, window_bounds = array<i64: 3, 384, 128>}, {pipeline_mode = #tpu.pipeline_mode<synchronous>, transform_indices = @transform_8, window_bounds = array<i64: 1, 128>}, {transform_indices = @transform_9, window_bounds = array<i64: 1, 64, 128>}]} {
    %cst = arith.constant 0.000000e+00 : bf16
    %0 = vector.broadcast %cst : bf16 to vector<16x1x192xbf16>
    %c0 = arith.constant 0 : index
    %c0_0 = arith.constant 0 : index
    %c0_1 = arith.constant 0 : index
    %1 = vector.load %arg11[%c0, %c0_0, %c0_1] : memref<16x18x192xbf16, #tpu.memory_space<vmem>>, vector<16x1x192xbf16>
    tpu.vector_store %arg11[%c0, %c0_0, %c0_1], %0 {strides = array<i32>} : memref<16x18x192xbf16, #tpu.memory_space<vmem>>, vector<16x1x192xbf16>,
    %c0_2 = arith.constant 0 : index
    %c17 = arith.constant 17 : index
    %c0_3 = arith.constant 0 : index
    %2 = vector.load %arg11[%c0_2, %c17, %c0_3] : memref<16x18x192xbf16, #tpu.memory_space<vmem>>, vector<16x1x192xbf16>
    tpu.vector_store %arg11[%c0_2, %c17, %c0_3], %0 {strides = array<i32>} : memref<16x18x192xbf16, #tpu.memory_space<vmem>>, vector<16x1x192xbf16>,
    %cst_4 = arith.constant 0.000000e+00 : bf16
    %3 = vector.broadcast %cst_4 : bf16 to vector<1x16x64xbf16>
    %c0_5 = arith.constant 0 : index
    %c1 = arith.constant 1 : index
    %c0_6 = arith.constant 0 : index
    %4 = vector.load %arg11[%c0_5, %c1, %c0_6] : memref<16x18x192xbf16, #tpu.memory_space<vmem>>, vector<1x16x64xbf16>
    tpu.vector_store %arg11[%c0_5, %c1, %c0_6], %3 {strides = array<i32>} : memref<16x18x192xbf16, #tpu.memory_space<vmem>>, vector<1x16x64xbf16>,
    %c15 = arith.constant 15 : index
    %c1_7 = arith.constant 1 : index
    %c128 = arith.constant 128 : index
    %5 = vector.load %arg11[%c15, %c1_7, %c128] : memref<16x18x192xbf16, #tpu.memory_space<vmem>>, vector<1x16x64xbf16>
    tpu.vector_store %arg11[%c15, %c1_7, %c128], %3 {strides = array<i32>} : memref<16x18x192xbf16, #tpu.memory_space<vmem>>, vector<1x16x64xbf16>,
    %cst_8 = arith.constant 0.000000e+00 : bf16
    %6 = vector.broadcast %cst_8 : bf16 to vector<8x1x192xbf16>
    %c0_9 = arith.constant 0 : index
    %c0_10 = arith.constant 0 : index
    %c0_11 = arith.constant 0 : index
    %7 = vector.load %arg12[%c0_9, %c0_10, %c0_11] : memref<8x10x192xbf16, #tpu.memory_space<vmem>>, vector<8x1x192xbf16>
    tpu.vector_store %arg12[%c0_9, %c0_10, %c0_11], %6 {strides = array<i32>} : memref<8x10x192xbf16, #tpu.memory_space<vmem>>, vector<8x1x192xbf16>,
    %c0_12 = arith.constant 0 : index
    %c9 = arith.constant 9 : index
    %c0_13 = arith.constant 0 : index
    %8 = vector.load %arg12[%c0_12, %c9, %c0_13] : memref<8x10x192xbf16, #tpu.memory_space<vmem>>, vector<8x1x192xbf16>
    tpu.vector_store %arg12[%c0_12, %c9, %c0_13], %6 {strides = array<i32>} : memref<8x10x192xbf16, #tpu.memory_space<vmem>>, vector<8x1x192xbf16>,
    %cst_14 = arith.constant 0.000000e+00 : bf16
    %9 = vector.broadcast %cst_14 : bf16 to vector<1x8x64xbf16>
    %c0_15 = arith.constant 0 : index
    %c1_16 = arith.constant 1 : index
    %c0_17 = arith.constant 0 : index
    %10 = vector.load %arg12[%c0_15, %c1_16, %c0_17] : memref<8x10x192xbf16, #tpu.memory_space<vmem>>, vector<1x8x64xbf16>
    tpu.vector_store %arg12[%c0_15, %c1_16, %c0_17], %9 {strides = array<i32>} : memref<8x10x192xbf16, #tpu.memory_space<vmem>>, vector<1x8x64xbf16>,
    %c7 = arith.constant 7 : index
    %c1_18 = arith.constant 1 : index
    %c128_19 = arith.constant 128 : index
    %11 = vector.load %arg12[%c7, %c1_18, %c128_19] : memref<8x10x192xbf16, #tpu.memory_space<vmem>>, vector<1x8x64xbf16>
    tpu.vector_store %arg12[%c7, %c1_18, %c128_19], %9 {strides = array<i32>} : memref<8x10x192xbf16, #tpu.memory_space<vmem>>, vector<1x8x64xbf16>,
    %cst_20 = arith.constant 0.000000e+00 : bf16
    %12 = vector.broadcast %cst_20 : bf16 to vector<8x1x384xbf16>
    %c0_21 = arith.constant 0 : index
    %c0_22 = arith.constant 0 : index
    %c0_23 = arith.constant 0 : index
    %13 = vector.load %arg13[%c0_21, %c0_22, %c0_23] : memref<8x10x384xbf16, #tpu.memory_space<vmem>>, vector<8x1x384xbf16>
    tpu.vector_store %arg13[%c0_21, %c0_22, %c0_23], %12 {strides = array<i32>} : memref<8x10x384xbf16, #tpu.memory_space<vmem>>, vector<8x1x384xbf16>,
    %c0_24 = arith.constant 0 : index
    %c9_25 = arith.constant 9 : index
    %c0_26 = arith.constant 0 : index
    %14 = vector.load %arg13[%c0_24, %c9_25, %c0_26] : memref<8x10x384xbf16, #tpu.memory_space<vmem>>, vector<8x1x384xbf16>
    tpu.vector_store %arg13[%c0_24, %c9_25, %c0_26], %12 {strides = array<i32>} : memref<8x10x384xbf16, #tpu.memory_space<vmem>>, vector<8x1x384xbf16>,
    %cst_27 = arith.constant 0.000000e+00 : bf16
    %15 = vector.broadcast %cst_27 : bf16 to vector<1x8x128xbf16>
    %c0_28 = arith.constant 0 : index
    %c1_29 = arith.constant 1 : index
    %c0_30 = arith.constant 0 : index
    %16 = vector.load %arg13[%c0_28, %c1_29, %c0_30] : memref<8x10x384xbf16, #tpu.memory_space<vmem>>, vector<1x8x128xbf16>
    tpu.vector_store %arg13[%c0_28, %c1_29, %c0_30], %15 {strides = array<i32>} : memref<8x10x384xbf16, #tpu.memory_space<vmem>>, vector<1x8x128xbf16>,
    %c7_31 = arith.constant 7 : index
    %c1_32 = arith.constant 1 : index
    %c256 = arith.constant 256 : index
    %17 = vector.load %arg13[%c7_31, %c1_32, %c256] : memref<8x10x384xbf16, #tpu.memory_space<vmem>>, vector<1x8x128xbf16>
    tpu.vector_store %arg13[%c7_31, %c1_32, %c256], %15 {strides = array<i32>} : memref<8x10x384xbf16, #tpu.memory_space<vmem>>, vector<1x8x128xbf16>,
    %c0_33 = arith.constant 0 : index
    %c0_34 = arith.constant 0 : index
    %c0_35 = arith.constant 0 : index
    %18 = vector.load %arg1[%c0_33, %c0_34, %c0_35] : memref<1x256x27xbf16, #tpu.memory_space<vmem>>, vector<1x256x27xbf16>
    %19 = vector.shape_cast %18 : vector<1x256x27xbf16> to vector<256x27xbf16>
    %c0_36 = arith.constant 0 : index
    %c0_37 = arith.constant 0 : index
    %20 = vector.load %arg2[%c0_36, %c0_37] : memref<27x64xbf16, #tpu.memory_space<vmem>>, vector<27x64xbf16>
    %cst_38 = arith.constant dense<0.000000e+00> : vector<256x64xf32>
    %21 = tpu.matmul %19, %20, %cst_38 {dimension_numbers = #tpu.dot_dimension_numbers<[1], [0], [0], [1], [0, 0, 1, 1], [], []>} : vector<256x27xbf16>, vector<27x64xbf16>, vector<256x64xf32> -> vector<256x64xf32>
    %c0_39 = arith.constant 0 : index
    %c0_40 = arith.constant 0 : index
    %22 = vector.load %arg3[%c0_39, %c0_40] : memref<1x64xf32, #tpu.memory_space<vmem>>, vector<1x64xf32>
    %23 = vector.broadcast %22 : vector<1x64xf32> to vector<256x64xf32>
    %24 = arith.addf %21, %23 : vector<256x64xf32>
    %cst_41 = arith.constant 0.000000e+00 : f32
    %25 = vector.broadcast %cst_41 : f32 to vector<256x64xf32>
    %26 = arith.maximumf %24, %25 : vector<256x64xf32>
    %27 = vector.shape_cast %26 : vector<256x64xf32> to vector<16x16x64xf32>
    %28 = arith.truncf %27 : vector<16x16x64xf32> to vector<16x16x64xbf16>
    %29 = vector.extract_strided_slice %28 {offsets = [0, 0, 0], sizes = [15, 16, 64], strides = [1, 1, 1]} : vector<16x16x64xbf16> to vector<15x16x64xbf16>
    %c1_42 = arith.constant 1 : index
    %c1_43 = arith.constant 1 : index
    %c0_44 = arith.constant 0 : index
    %30 = vector.load %arg11[%c1_42, %c1_43, %c0_44] : memref<16x18x192xbf16, #tpu.memory_space<vmem>>, vector<15x16x64xbf16>
    tpu.vector_store %arg11[%c1_42, %c1_43, %c0_44], %29 {strides = array<i32>} : memref<16x18x192xbf16, #tpu.memory_space<vmem>>, vector<15x16x64xbf16>,
    %c0_45 = arith.constant 0 : index
    %c1_46 = arith.constant 1 : index
    %c64 = arith.constant 64 : index
    %31 = vector.load %arg11[%c0_45, %c1_46, %c64] : memref<16x18x192xbf16, #tpu.memory_space<vmem>>, vector<16x16x64xbf16>
    tpu.vector_store %arg11[%c0_45, %c1_46, %c64], %28 {strides = array<i32>} : memref<16x18x192xbf16, #tpu.memory_space<vmem>>, vector<16x16x64xbf16>,
    %32 = vector.extract_strided_slice %28 {offsets = [1, 0, 0], sizes = [15, 16, 64], strides = [1, 1, 1]} : vector<16x16x64xbf16> to vector<15x16x64xbf16>
    %c0_47 = arith.constant 0 : index
    %c1_48 = arith.constant 1 : index
    %c128_49 = arith.constant 128 : index
    %33 = vector.load %arg11[%c0_47, %c1_48, %c128_49] : memref<16x18x192xbf16, #tpu.memory_space<vmem>>, vector<15x16x64xbf16>
    tpu.vector_store %arg11[%c0_47, %c1_48, %c128_49], %32 {strides = array<i32>} : memref<16x18x192xbf16, #tpu.memory_space<vmem>>, vector<15x16x64xbf16>,
    %cst_50 = arith.constant 0.000000e+00 : f32
    %34 = vector.broadcast %cst_50 : f32 to vector<256x64xf32>
    %c0_51 = arith.constant 0 : index
    %c0_52 = arith.constant 0 : index
    %c0_53 = arith.constant 0 : index
    %35 = vector.load %arg11[%c0_51, %c0_52, %c0_53] : memref<16x18x192xbf16, #tpu.memory_space<vmem>>, vector<16x16x192xbf16>
    %36 = vector.shape_cast %35 : vector<16x16x192xbf16> to vector<256x192xbf16>
    %c0_54 = arith.constant 0 : index
    %c0_55 = arith.constant 0 : index
    %c0_56 = arith.constant 0 : index
    %37 = vector.load %arg4[%c0_54, %c0_55, %c0_56] : memref<3x192x64xbf16, #tpu.memory_space<vmem>>, vector<1x192x64xbf16>
    %38 = vector.shape_cast %37 : vector<1x192x64xbf16> to vector<192x64xbf16>
    %cst_57 = arith.constant dense<0.000000e+00> : vector<256x64xf32>
    %39 = tpu.matmul %36, %38, %cst_57 {dimension_numbers = #tpu.dot_dimension_numbers<[1], [0], [0], [1], [0, 0, 1, 1], [], []>} : vector<256x192xbf16>, vector<192x64xbf16>, vector<256x64xf32> -> vector<256x64xf32>
    %40 = arith.addf %34, %39 : vector<256x64xf32>
    %c0_58 = arith.constant 0 : index
    %c1_59 = arith.constant 1 : index
    %c0_60 = arith.constant 0 : index
    %41 = vector.load %arg11[%c0_58, %c1_59, %c0_60] : memref<16x18x192xbf16, #tpu.memory_space<vmem>>, vector<16x16x192xbf16>
    %42 = vector.shape_cast %41 : vector<16x16x192xbf16> to vector<256x192xbf16>
    %c1_61 = arith.constant 1 : index
    %c0_62 = arith.constant 0 : index
    %c0_63 = arith.constant 0 : index
    %43 = vector.load %arg4[%c1_61, %c0_62, %c0_63] : memref<3x192x64xbf16, #tpu.memory_space<vmem>>, vector<1x192x64xbf16>
    %44 = vector.shape_cast %43 : vector<1x192x64xbf16> to vector<192x64xbf16>
    %cst_64 = arith.constant dense<0.000000e+00> : vector<256x64xf32>
    %45 = tpu.matmul %42, %44, %cst_64 {dimension_numbers = #tpu.dot_dimension_numbers<[1], [0], [0], [1], [0, 0, 1, 1], [], []>} : vector<256x192xbf16>, vector<192x64xbf16>, vector<256x64xf32> -> vector<256x64xf32>
    %46 = arith.addf %40, %45 : vector<256x64xf32>
    %c0_65 = arith.constant 0 : index
    %c2 = arith.constant 2 : index
    %c0_66 = arith.constant 0 : index
    %47 = vector.load %arg11[%c0_65, %c2, %c0_66] : memref<16x18x192xbf16, #tpu.memory_space<vmem>>, vector<16x16x192xbf16>
    %48 = vector.shape_cast %47 : vector<16x16x192xbf16> to vector<256x192xbf16>
    %c2_67 = arith.constant 2 : index
    %c0_68 = arith.constant 0 : index
    %c0_69 = arith.constant 0 : index
    %49 = vector.load %arg4[%c2_67, %c0_68, %c0_69] : memref<3x192x64xbf16, #tpu.memory_space<vmem>>, vector<1x192x64xbf16>
    %50 = vector.shape_cast %49 : vector<1x192x64xbf16> to vector<192x64xbf16>
    %cst_70 = arith.constant dense<0.000000e+00> : vector<256x64xf32>
    %51 = tpu.matmul %48, %50, %cst_70 {dimension_numbers = #tpu.dot_dimension_numbers<[1], [0], [0], [1], [0, 0, 1, 1], [], []>} : vector<256x192xbf16>, vector<192x64xbf16>, vector<256x64xf32> -> vector<256x64xf32>
    %52 = arith.addf %46, %51 : vector<256x64xf32>
    %c0_71 = arith.constant 0 : index
    %c0_72 = arith.constant 0 : index
    %53 = vector.load %arg5[%c0_71, %c0_72] : memref<1x64xf32, #tpu.memory_space<vmem>>, vector<1x64xf32>
    %54 = vector.broadcast %53 : vector<1x64xf32> to vector<256x64xf32>
    %55 = arith.addf %52, %54 : vector<256x64xf32>
    %cst_73 = arith.constant 0.000000e+00 : f32
    %56 = vector.broadcast %cst_73 : f32 to vector<256x64xf32>
    %57 = arith.maximumf %55, %56 : vector<256x64xf32>
    %58 = vector.shape_cast %57 : vector<256x64xf32> to vector<8x2x16x64xf32>
    %59 = vector.extract_strided_slice %58 {offsets = [0, 0, 0, 0], sizes = [8, 1, 16, 64], strides = [1, 1, 1, 1]} : vector<8x2x16x64xf32> to vector<8x1x16x64xf32>
    %60 = vector.shape_cast %59 : vector<8x1x16x64xf32> to vector<8x16x64xf32>
    %61 = vector.extract_strided_slice %58 {offsets = [0, 1, 0, 0], sizes = [8, 1, 16, 64], strides = [1, 1, 1, 1]} : vector<8x2x16x64xf32> to vector<8x1x16x64xf32>
    %62 = vector.shape_cast %61 : vector<8x1x16x64xf32> to vector<8x16x64xf32>
    %63 = arith.maximumf %60, %62 : vector<8x16x64xf32>
    %c0_74 = arith.constant 0 : index
    %c0_75 = arith.constant 0 : index
    %c0_76 = arith.constant 0 : index
    %64 = vector.load %arg14[%c0_74, %c0_75, %c0_76] : memref<8x16x64xf32, #tpu.memory_space<vmem>>, vector<8x16x64xf32>
    tpu.vector_store %arg14[%c0_74, %c0_75, %c0_76], %63 {strides = array<i32>} : memref<8x16x64xf32, #tpu.memory_space<vmem>>, vector<8x16x64xf32>,
    %c0_77 = arith.constant 0 : index
    %c0_78 = arith.constant 0 : index
    %c0_79 = arith.constant 0 : index
    %65 = tpu.strided_load %arg14[%c0_77, %c0_78, %c0_79] {strides = array<i32: 1, 2, 1>} : memref<8x16x64xf32, #tpu.memory_space<vmem>>, vector<8x8x64xf32>
    %c0_80 = arith.constant 0 : index
    %c1_81 = arith.constant 1 : index
    %c0_82 = arith.constant 0 : index
    %66 = tpu.strided_load %arg14[%c0_80, %c1_81, %c0_82] {strides = array<i32: 1, 2, 1>} : memref<8x16x64xf32, #tpu.memory_space<vmem>>, vector<8x8x64xf32>
    %67 = arith.maximumf %65, %66 : vector<8x8x64xf32>
    %68 = arith.truncf %67 : vector<8x8x64xf32> to vector<8x8x64xbf16>
    %69 = vector.extract_strided_slice %68 {offsets = [0, 0, 0], sizes = [7, 8, 64], strides = [1, 1, 1]} : vector<8x8x64xbf16> to vector<7x8x64xbf16>
    %c1_83 = arith.constant 1 : index
    %c1_84 = arith.constant 1 : index
    %c0_85 = arith.constant 0 : index
    %70 = vector.load %arg12[%c1_83, %c1_84, %c0_85] : memref<8x10x192xbf16, #tpu.memory_space<vmem>>, vector<7x8x64xbf16>
    tpu.vector_store %arg12[%c1_83, %c1_84, %c0_85], %69 {strides = array<i32>} : memref<8x10x192xbf16, #tpu.memory_space<vmem>>, vector<7x8x64xbf16>,
    %c0_86 = arith.constant 0 : index
    %c1_87 = arith.constant 1 : index
    %c64_88 = arith.constant 64 : index
    %71 = vector.load %arg12[%c0_86, %c1_87, %c64_88] : memref<8x10x192xbf16, #tpu.memory_space<vmem>>, vector<8x8x64xbf16>
    tpu.vector_store %arg12[%c0_86, %c1_87, %c64_88], %68 {strides = array<i32>} : memref<8x10x192xbf16, #tpu.memory_space<vmem>>, vector<8x8x64xbf16>,
    %72 = vector.extract_strided_slice %68 {offsets = [1, 0, 0], sizes = [7, 8, 64], strides = [1, 1, 1]} : vector<8x8x64xbf16> to vector<7x8x64xbf16>
    %c0_89 = arith.constant 0 : index
    %c1_90 = arith.constant 1 : index
    %c128_91 = arith.constant 128 : index
    %73 = vector.load %arg12[%c0_89, %c1_90, %c128_91] : memref<8x10x192xbf16, #tpu.memory_space<vmem>>, vector<7x8x64xbf16>
    tpu.vector_store %arg12[%c0_89, %c1_90, %c128_91], %72 {strides = array<i32>} : memref<8x10x192xbf16, #tpu.memory_space<vmem>>, vector<7x8x64xbf16>,
    %cst_92 = arith.constant 0.000000e+00 : f32
    %74 = vector.broadcast %cst_92 : f32 to vector<64x128xf32>
    %c0_93 = arith.constant 0 : index
    %c0_94 = arith.constant 0 : index
    %c0_95 = arith.constant 0 : index
    %75 = vector.load %arg12[%c0_93, %c0_94, %c0_95] : memref<8x10x192xbf16, #tpu.memory_space<vmem>>, vector<8x8x192xbf16>
    %76 = arith.extf %75 : vector<8x8x192xbf16> to vector<8x8x192xf32>
    %77 = vector.shape_cast %76 : vector<8x8x192xf32> to vector<64x192xf32>
    %78 = arith.truncf %77 : vector<64x192xf32> to vector<64x192xbf16>
    %c0_96 = arith.constant 0 : index
    %c0_97 = arith.constant 0 : index
    %c0_98 = arith.constant 0 : index
    %79 = vector.load %arg6[%c0_96, %c0_97, %c0_98] : memref<3x192x128xbf16, #tpu.memory_space<vmem>>, vector<1x192x128xbf16>
    %80 = vector.shape_cast %79 : vector<1x192x128xbf16> to vector<192x128xbf16>
    %cst_99 = arith.constant dense<0.000000e+00> : vector<64x128xf32>
    %81 = tpu.matmul %78, %80, %cst_99 {dimension_numbers = #tpu.dot_dimension_numbers<[1], [0], [0], [1], [0, 0, 1, 1], [], []>} : vector<64x192xbf16>, vector<192x128xbf16>, vector<64x128xf32> -> vector<64x128xf32>
    %82 = arith.addf %74, %81 : vector<64x128xf32>
    %c0_100 = arith.constant 0 : index
    %c1_101 = arith.constant 1 : index
    %c0_102 = arith.constant 0 : index
    %83 = vector.load %arg12[%c0_100, %c1_101, %c0_102] : memref<8x10x192xbf16, #tpu.memory_space<vmem>>, vector<8x8x192xbf16>
    %84 = arith.extf %83 : vector<8x8x192xbf16> to vector<8x8x192xf32>
    %85 = vector.shape_cast %84 : vector<8x8x192xf32> to vector<64x192xf32>
    %86 = arith.truncf %85 : vector<64x192xf32> to vector<64x192xbf16>
    %c1_103 = arith.constant 1 : index
    %c0_104 = arith.constant 0 : index
    %c0_105 = arith.constant 0 : index
    %87 = vector.load %arg6[%c1_103, %c0_104, %c0_105] : memref<3x192x128xbf16, #tpu.memory_space<vmem>>, vector<1x192x128xbf16>
    %88 = vector.shape_cast %87 : vector<1x192x128xbf16> to vector<192x128xbf16>
    %cst_106 = arith.constant dense<0.000000e+00> : vector<64x128xf32>
    %89 = tpu.matmul %86, %88, %cst_106 {dimension_numbers = #tpu.dot_dimension_numbers<[1], [0], [0], [1], [0, 0, 1, 1], [], []>} : vector<64x192xbf16>, vector<192x128xbf16>, vector<64x128xf32> -> vector<64x128xf32>
    %90 = arith.addf %82, %89 : vector<64x128xf32>
    %c0_107 = arith.constant 0 : index
    %c2_108 = arith.constant 2 : index
    %c0_109 = arith.constant 0 : index
    %91 = vector.load %arg12[%c0_107, %c2_108, %c0_109] : memref<8x10x192xbf16, #tpu.memory_space<vmem>>, vector<8x8x192xbf16>
    %92 = arith.extf %91 : vector<8x8x192xbf16> to vector<8x8x192xf32>
    %93 = vector.shape_cast %92 : vector<8x8x192xf32> to vector<64x192xf32>
    %94 = arith.truncf %93 : vector<64x192xf32> to vector<64x192xbf16>
    %c2_110 = arith.constant 2 : index
    %c0_111 = arith.constant 0 : index
    %c0_112 = arith.constant 0 : index
    %95 = vector.load %arg6[%c2_110, %c0_111, %c0_112] : memref<3x192x128xbf16, #tpu.memory_space<vmem>>, vector<1x192x128xbf16>
    %96 = vector.shape_cast %95 : vector<1x192x128xbf16> to vector<192x128xbf16>
    %cst_113 = arith.constant dense<0.000000e+00> : vector<64x128xf32>
    %97 = tpu.matmul %94, %96, %cst_113 {dimension_numbers = #tpu.dot_dimension_numbers<[1], [0], [0], [1], [0, 0, 1, 1], [], []>} : vector<64x192xbf16>, vector<192x128xbf16>, vector<64x128xf32> -> vector<64x128xf32>
    %98 = arith.addf %90, %97 : vector<64x128xf32>
    %c0_114 = arith.constant 0 : index
    %c0_115 = arith.constant 0 : index
    %99 = vector.load %arg7[%c0_114, %c0_115] : memref<1x128xf32, #tpu.memory_space<vmem>>, vector<1x128xf32>
    %100 = vector.broadcast %99 : vector<1x128xf32> to vector<64x128xf32>
    %101 = arith.addf %98, %100 : vector<64x128xf32>
    %cst_116 = arith.constant 0.000000e+00 : f32
    %102 = vector.broadcast %cst_116 : f32 to vector<64x128xf32>
    %103 = arith.maximumf %101, %102 : vector<64x128xf32>
    %104 = vector.shape_cast %103 : vector<64x128xf32> to vector<8x8x128xf32>
    %105 = arith.truncf %104 : vector<8x8x128xf32> to vector<8x8x128xbf16>
    %106 = vector.extract_strided_slice %105 {offsets = [0, 0, 0], sizes = [7, 8, 128], strides = [1, 1, 1]} : vector<8x8x128xbf16> to vector<7x8x128xbf16>
    %c1_117 = arith.constant 1 : index
    %c1_118 = arith.constant 1 : index
    %c0_119 = arith.constant 0 : index
    %107 = vector.load %arg13[%c1_117, %c1_118, %c0_119] : memref<8x10x384xbf16, #tpu.memory_space<vmem>>, vector<7x8x128xbf16>
    tpu.vector_store %arg13[%c1_117, %c1_118, %c0_119], %106 {strides = array<i32>} : memref<8x10x384xbf16, #tpu.memory_space<vmem>>, vector<7x8x128xbf16>,
    %c0_120 = arith.constant 0 : index
    %c1_121 = arith.constant 1 : index
    %c128_122 = arith.constant 128 : index
    %108 = vector.load %arg13[%c0_120, %c1_121, %c128_122] : memref<8x10x384xbf16, #tpu.memory_space<vmem>>, vector<8x8x128xbf16>
    tpu.vector_store %arg13[%c0_120, %c1_121, %c128_122], %105 {strides = array<i32>} : memref<8x10x384xbf16, #tpu.memory_space<vmem>>, vector<8x8x128xbf16>,
    %109 = vector.extract_strided_slice %105 {offsets = [1, 0, 0], sizes = [7, 8, 128], strides = [1, 1, 1]} : vector<8x8x128xbf16> to vector<7x8x128xbf16>
    %c0_123 = arith.constant 0 : index
    %c1_124 = arith.constant 1 : index
    %c256_125 = arith.constant 256 : index
    %110 = vector.load %arg13[%c0_123, %c1_124, %c256_125] : memref<8x10x384xbf16, #tpu.memory_space<vmem>>, vector<7x8x128xbf16>
    tpu.vector_store %arg13[%c0_123, %c1_124, %c256_125], %109 {strides = array<i32>} : memref<8x10x384xbf16, #tpu.memory_space<vmem>>, vector<7x8x128xbf16>,
    %cst_126 = arith.constant 0.000000e+00 : f32
    %111 = vector.broadcast %cst_126 : f32 to vector<64x128xf32>
    %c0_127 = arith.constant 0 : index
    %c0_128 = arith.constant 0 : index
    %c0_129 = arith.constant 0 : index
    %112 = vector.load %arg13[%c0_127, %c0_128, %c0_129] : memref<8x10x384xbf16, #tpu.memory_space<vmem>>, vector<8x8x384xbf16>
    %113 = arith.extf %112 : vector<8x8x384xbf16> to vector<8x8x384xf32>
    %114 = vector.shape_cast %113 : vector<8x8x384xf32> to vector<64x384xf32>
    %115 = arith.truncf %114 : vector<64x384xf32> to vector<64x384xbf16>
    %c0_130 = arith.constant 0 : index
    %c0_131 = arith.constant 0 : index
    %c0_132 = arith.constant 0 : index
    %116 = vector.load %arg8[%c0_130, %c0_131, %c0_132] : memref<3x384x128xbf16, #tpu.memory_space<vmem>>, vector<1x384x128xbf16>
    %117 = vector.shape_cast %116 : vector<1x384x128xbf16> to vector<384x128xbf16>
    %cst_133 = arith.constant dense<0.000000e+00> : vector<64x128xf32>
    %118 = tpu.matmul %115, %117, %cst_133 {dimension_numbers = #tpu.dot_dimension_numbers<[1], [0], [0], [1], [0, 0, 1, 1], [], []>} : vector<64x384xbf16>, vector<384x128xbf16>, vector<64x128xf32> -> vector<64x128xf32>
    %119 = arith.addf %111, %118 : vector<64x128xf32>
    %c0_134 = arith.constant 0 : index
    %c1_135 = arith.constant 1 : index
    %c0_136 = arith.constant 0 : index
    %120 = vector.load %arg13[%c0_134, %c1_135, %c0_136] : memref<8x10x384xbf16, #tpu.memory_space<vmem>>, vector<8x8x384xbf16>
    %121 = arith.extf %120 : vector<8x8x384xbf16> to vector<8x8x384xf32>
    %122 = vector.shape_cast %121 : vector<8x8x384xf32> to vector<64x384xf32>
    %123 = arith.truncf %122 : vector<64x384xf32> to vector<64x384xbf16>
    %c1_137 = arith.constant 1 : index
    %c0_138 = arith.constant 0 : index
    %c0_139 = arith.constant 0 : index
    %124 = vector.load %arg8[%c1_137, %c0_138, %c0_139] : memref<3x384x128xbf16, #tpu.memory_space<vmem>>, vector<1x384x128xbf16>
    %125 = vector.shape_cast %124 : vector<1x384x128xbf16> to vector<384x128xbf16>
    %cst_140 = arith.constant dense<0.000000e+00> : vector<64x128xf32>
    %126 = tpu.matmul %123, %125, %cst_140 {dimension_numbers = #tpu.dot_dimension_numbers<[1], [0], [0], [1], [0, 0, 1, 1], [], []>} : vector<64x384xbf16>, vector<384x128xbf16>, vector<64x128xf32> -> vector<64x128xf32>
    %127 = arith.addf %119, %126 : vector<64x128xf32>
    %c0_141 = arith.constant 0 : index
    %c2_142 = arith.constant 2 : index
    %c0_143 = arith.constant 0 : index
    %128 = vector.load %arg13[%c0_141, %c2_142, %c0_143] : memref<8x10x384xbf16, #tpu.memory_space<vmem>>, vector<8x8x384xbf16>
    %129 = arith.extf %128 : vector<8x8x384xbf16> to vector<8x8x384xf32>
    %130 = vector.shape_cast %129 : vector<8x8x384xf32> to vector<64x384xf32>
    %131 = arith.truncf %130 : vector<64x384xf32> to vector<64x384xbf16>
    %c2_144 = arith.constant 2 : index
    %c0_145 = arith.constant 0 : index
    %c0_146 = arith.constant 0 : index
    %132 = vector.load %arg8[%c2_144, %c0_145, %c0_146] : memref<3x384x128xbf16, #tpu.memory_space<vmem>>, vector<1x384x128xbf16>
    %133 = vector.shape_cast %132 : vector<1x384x128xbf16> to vector<384x128xbf16>
    %cst_147 = arith.constant dense<0.000000e+00> : vector<64x128xf32>
    %134 = tpu.matmul %131, %133, %cst_147 {dimension_numbers = #tpu.dot_dimension_numbers<[1], [0], [0], [1], [0, 0, 1, 1], [], []>} : vector<64x384xbf16>, vector<384x128xbf16>, vector<64x128xf32> -> vector<64x128xf32>
    %135 = arith.addf %127, %134 : vector<64x128xf32>
    %c0_148 = arith.constant 0 : index
    %c0_149 = arith.constant 0 : index
    %136 = vector.load %arg9[%c0_148, %c0_149] : memref<1x128xf32, #tpu.memory_space<vmem>>, vector<1x128xf32>
    %137 = vector.broadcast %136 : vector<1x128xf32> to vector<64x128xf32>
    %138 = arith.addf %135, %137 : vector<64x128xf32>
    %cst_150 = arith.constant 0.000000e+00 : f32
    %139 = vector.broadcast %cst_150 : f32 to vector<64x128xf32>
    %140 = arith.maximumf %138, %139 : vector<64x128xf32>
    %c0_151 = arith.constant 0 : index
    %c0_152 = arith.constant 0 : index
    %c0_153 = arith.constant 0 : index
    %141 = vector.load %arg10[%c0_151, %c0_152, %c0_153] : memref<1x64x128xf32, #tpu.memory_space<vmem>>, vector<1x64x128xf32>
    %142 = vector.shape_cast %141 : vector<1x64x128xf32> to vector<64x128xf32>
    %143 = vector.shape_cast %140 : vector<64x128xf32> to vector<1x64x128xf32>
    tpu.vector_store %arg10[%c0_151, %c0_152, %c0_153], %143 {strides = array<i32>} : memref<1x64x128xf32, #tpu.memory_space<vmem>>, vector<1x64x128xf32>,
    return
  }
  func.func @transform_0(%arg0: i32) -> (i32, i32, i32) {
    %c0_i32 = arith.constant 0 : i32
    %c0_i32_0 = arith.constant 0 : i32
    %c0_i32_1 = arith.constant 0 : i32
    return %arg0, %c0_i32, %c0_i32_0 : i32, i32, i32
  }
  func.func @transform_1(%arg0: i32) -> (i32, i32) {
    %c0_i32 = arith.constant 0 : i32
    %c0_i32_0 = arith.constant 0 : i32
    %c0_i32_1 = arith.constant 0 : i32
    return %c0_i32, %c0_i32_0 : i32, i32
  }
  func.func @transform_2(%arg0: i32) -> (i32, i32) {
    %c0_i32 = arith.constant 0 : i32
    %c0_i32_0 = arith.constant 0 : i32
    %c0_i32_1 = arith.constant 0 : i32
    return %c0_i32, %c0_i32_0 : i32, i32
  }
  func.func @transform_3(%arg0: i32) -> (i32, i32, i32) {
    %c0_i32 = arith.constant 0 : i32
    %c0_i32_0 = arith.constant 0 : i32
    %c0_i32_1 = arith.constant 0 : i32
    %c0_i32_2 = arith.constant 0 : i32
    return %c0_i32, %c0_i32_0, %c0_i32_1 : i32, i32, i32
  }
  func.func @transform_4(%arg0: i32) -> (i32, i32) {
    %c0_i32 = arith.constant 0 : i32
    %c0_i32_0 = arith.constant 0 : i32
    %c0_i32_1 = arith.constant 0 : i32
    return %c0_i32, %c0_i32_0 : i32, i32
  }
  func.func @transform_5(%arg0: i32) -> (i32, i32, i32) {
    %c0_i32 = arith.constant 0 : i32
    %c0_i32_0 = arith.constant 0 : i32
    %c0_i32_1 = arith.constant 0 : i32
    %c0_i32_2 = arith.constant 0 : i32
    return %c0_i32, %c0_i32_0, %c0_i32_1 : i32, i32, i32
  }
  func.func @transform_6(%arg0: i32) -> (i32, i32) {
    %c0_i32 = arith.constant 0 : i32
    %c0_i32_0 = arith.constant 0 : i32
    %c0_i32_1 = arith.constant 0 : i32
    return %c0_i32, %c0_i32_0 : i32, i32
  }
  func.func @transform_7(%arg0: i32) -> (i32, i32, i32) {
    %c0_i32 = arith.constant 0 : i32
    %c0_i32_0 = arith.constant 0 : i32
    %c0_i32_1 = arith.constant 0 : i32
    %c0_i32_2 = arith.constant 0 : i32
    return %c0_i32, %c0_i32_0, %c0_i32_1 : i32, i32, i32
  }
  func.func @transform_8(%arg0: i32) -> (i32, i32) {
    %c0_i32 = arith.constant 0 : i32
    %c0_i32_0 = arith.constant 0 : i32
    %c0_i32_1 = arith.constant 0 : i32
    return %c0_i32, %c0_i32_0 : i32, i32
  }
  func.func @transform_9(%arg0: i32) -> (i32, i32, i32) {
    %c0_i32 = arith.constant 0 : i32
    %c0_i32_0 = arith.constant 0 : i32
    %c0_i32_1 = arith.constant 0 : i32
    return %arg0, %c0_i32, %c0_i32_0 : i32, i32, i32
  }
}

</mosaic_0001>

<bundles_post_ra>
// kernel: tpu_custom_call.1
= control target key start
LH: loop header
LB: loop body
LE: loop exit
PB: predicated region body
PF: predicated region fallthrough
CT: control target
= control target key end

     0   :  { %14 = vsyncpa [#allocation7], 0  ;;  %s11448_s0 = inlined_call_operand.vmem [shape: bf16[2,256,27], index: 0, kind: input, shape index: {}]   ;;  %s11449_s1 = inlined_call_operand.vmem [shape: bf16[27,64], index: 1, kind: input, shape index: {}]   ;;  %s11450_s2 = inlined_call_operand.vmem [shape: f32[1,64], index: 2, kind: input, shape index: {}]   ;;  %s11451_s3 = inlined_call_operand.vmem [shape: bf16[3,192,64], index: 3, kind: input, shape index: {}]   ;;  %s11452_s4 = inlined_call_operand.vmem [shape: f32[1,64], index: 4, kind: input, shape index: {}]   ;;  %s11453_s5 = inlined_call_operand.hbm [shape: bf16[3,192,128], index: 5, kind: input, shape index: {}]   ;;  %s11454_s6 = inlined_call_operand.vmem [shape: f32[1,128], index: 6, kind: input, shape index: {}]   ;;  %s11455_s7 = inlined_call_operand.vmem [shape: bf16[3,384,128], index: 7, kind: input, shape index: {}]   ;;  %s11456_s8 = inlined_call_operand.vmem [shape: f32[1,128], index: 8, kind: input, shape index: {}]   ;;  %s11457_s9 = inlined_call_operand.hbm [shape: f32[2,64,128], index: 9, kind: output, shape index: {}]  }
   0x1   :  { %15 = vsyncpa [#allocation8], 0 }
   0x2   :  { %17 = vsyncpa [#allocation8 + $0x1], 0  ;;  %s8232_s30 = smov 0   ;;  %s8234_s10 = smov 0  }
   0x3   :  { %s8236_s11 = smov 0   ;;  %s8238_s12 = smov 0  }
   0x4 LB: > { %s8253_s13 = sadd.s32 4294967295, %s8171_s12   ;;  %s6861_s14 = sadd.s32 4294967294, %s8171_s12   ;;  %s8171_s12 = sphi %s8238_s12, %s11641_s12   ;;  %s8167_s11 = sphi %s8236_s11, %s11640_s11   ;;  %s8163_s10 = sphi %s8234_s10, %s11639_s10   ;;  %s8159_s30 = sphi %s8232_s30, %s11638_s30  }
   0x5   : > { %s8257_s15 = sadd.s32 1, %s8171_s12   ;;  %s224_s16 = sadd.s32 1, %s8167_s11 }
   0x6   : > { %s221_s17 = ssub.s32 %s8171_s12, %s8257_s15  ;;  %p234_p0 = scmp.ne.s32.totalorder %s8167_s11, %s8163_s10 }
   0x7   : > { %p222_p1 = scmp.eq.s32.totalorder %s221_s17, 0  ;;  %p235_p2 = scmp.eq.s32.totalorder %s8253_s13, 1 }
   0x8   : > { %p240_p3 = scmp.ne.s32.totalorder %s8163_s10, %s8159_s30  ;;  %p241_p4 = scmp.eq.s32.totalorder %s6861_s14, 1 }
   0x9   : > { %s8268_s18 = scalar_select %p222_p1, %s8167_s11, %s224_s16  }
   0xa   : > { %p8270_p5 = por %p235_p2, %p234_p0  ;;  %p8274_p6 = por %p241_p4, %p240_p3 }
   0xb   : > { %p6862_p7 = scmp.ge.s32.totalorder %s8171_s12, 1  ;;  %p248_p8 = scmp.lt.s32.totalorder %s8171_s12, 3 }
   0xc   : > { %s11499_s19 = scalar_select %p8270_p5, 1, 0 }
   0xd   : > { %s11500_s20 = scalar_select %p8274_p6, 1, 0 }
   0xe   : > { %p11458_p9 = scmp.eq.s32.totalorder %s8253_s13, 0  ;;  %p8281_p10 = pnand %p6862_p7, %p248_p8 }
   0xf   : > { %s8173_s22 = smov [#allocation6]   ;;  %s8077_s27 = scalar_lea.hbm %s11453_s5, 4608 }
  0x10   : > { %s11501_s21 = scalar_select %p8281_p10, 1, 0 }
  0x11   : > { %s272_s23 = sshll.u32 %s8173_s22, 4  ;;  %p7819_p11 = pneg %p8281_p10  ;;  %s273_s23 = int_to_ptr.vmem [resolvable:$true] %s272_s23 }
  0x12   : > { %p8078_p13 = scmp.ne.s32.totalorder %s11453_s5, %s8077_s27  ;;  %p8084_p3 = scmp.lt.u32.totalorder %s8077_s27, %s11453_s5 }
  0x13   : > { %p8289_p12 = pnand %p11458_p9, %p7819_p11 }
  0x15   : > { %p8079_p0 = pneg %p8289_p12 }
  0x17   : > { %p8080_p1 = pnand %p8079_p0, %p8078_p13 }
  0x19   : > { %p8081_p2 = pneg %p8080_p1 }
  0x1b   : > { %p8086_p4 = pnand %p8084_p3, %p8081_p2 }
  0x1d   : > { %8089 = shalt.err (!%p8086_p4)
}
  0x1e   : > { %s8090_s17 = scalar_lea.vmem %s273_s23, 4608  ;;  %p8098_p9 = scmp.lt.s32.totalorder %s273_s23, %s273_s23 }
  0x1f   : > { %p8091_p7 = scmp.ne.s32.totalorder %s273_s23, %s8090_s17  ;;  %p8099_p6 = scmp.lt.s32.totalorder %s8090_s17, %s8090_s17 }
  0x21   : > { %p8093_p8 = pnand %p8091_p7, %p8079_p0  ;;  %p8100_p5 = por %p8099_p6, %p8098_p9 }
  0x23   : > { %p8094_p11 = pneg %p8093_p8 }
  0x25   : > { %p8101_p10 = pnand %p8100_p5, %p8094_p11 }
  0x27   : > { %8104 = shalt.err (!%p8101_p10)
}
  0x28   : > { %s8174_s22 = smov 64   ;;  %s8175_s25 = smov 4  }
  0x29   : > { %7822 = dma.hbm_to_vmem [thread:$0]  (!%p8289_p12), %s11453_s5, 4608, %s273_s23, [#allocation7], %s8174_s22, %s8174_s22, %s8175_s25  }
  0x2a   : > { %p11503_p13 = scmp.ne.s32.totalorder %s11501_s21, 0 }
  0x2c   : > { %305 = sbr.rel (%p11503_p13) target bundleno = 1700 (0x6a4), region = 56 }
  0x33   : > { %p11504_p1 = scmp.eq.s32.totalorder %s8253_s13, 0 }
  0x35   : > { %8150 = dma.done.wait (%p11504_p1), [#allocation7], 4608   ;;  %p11505_p0 = pmov %p11504_p1 }
  0x36   : > { %p341_p5 = scmp.lt.s32.totalorder %s8253_s13, 1  ;;  %vm835_vm0 = vcmask 1044480   ;;  %vm11464_vm1 = vcmask 1045504   ;;  %v8176_v0 = vmov 65535   ;;  %vm786_vm2 = vcmask 220160   ;;  %v7870_v2 = vld [vmem:[%s11449_s1] sm:$0xff]  }
  0x37   : > { %8152 = vsyncadd (%p11505_p0), [#allocation7], 4294962688  ;;  %v837_v1 = vsel %vm835_vm0, 4294967295, %v8176_v0  ;;  %v7871_v4 = vld [vmem:[%s11449_s1 + $0x8] sm:$0x3f]   ;;  %7665 = vmatprep.subr.bf16.mxu0 %v7870_v2  ;;  %vm347_vm3 = vcmask 1040384  }
  0x38   : > { %s342_s27 = scalar_select %p341_p5, %s8253_s13, 1  ;;  %v838_v3 = vsel %vm11464_vm1, %v837_v1, 0  ;;  %7666 = vmatpush3.bf16.msra.mxu0 %v7870_v2  ;;  %vm348_vm4 = vsmask.f32 256  ;;  %vm350_vm5 = vcmask 520196   ;;  %v11506_v22 = vmov 0 }
  0x39   : > { %v840_v6 = vand.u32 %v7871_v4, %v838_v3  ;;  %vm11463_vm6 = vsmask.f32 4352  ;;  %vm8362_vm7 = vmand %vm347_vm3, %vm348_vm4  ;;  %vm11461_vm9 = vsmask.f32 7938  ;;  %vm11462_vm10 = vsmask.f32 7954 }
  0x3a   : > { %s7441_s24 = sshll.u32 %s342_s27, 7  ;;  %v11507_v22 = vsel %vm8362_vm7, 4294967295, %v11506_v22  ;;  %vm352_vm8 = vmand %vm350_vm5, %vm11463_vm6  ;;  %v11509_v23 = vmov 0  ;;  %v357_v24 = vld [vmem:[#allocation2 + $0x18] sm:$0x11]  ;;  %v11512_v26 = vmov 0 }
  0x3b   : > { %s8320_s21 = scalar_lea.vmem %s11448_s0, %s7441_s24  ;;  %7667 = vmatprep.subr.bf16.mxu0 %v840_v6  ;;  %11508 = vst [vmem:[#allocation12_spill] sm:$0xff] %v11507_v22  ;;  %vm8369_vm11 = vmor %vm352_vm8, %vm8362_vm7  ;;  %v354_v27 = vld [vmem:[#allocation2] sm:$0x11]  ;;  %v360_v28 = vld [vmem:[#allocation2 + $0x30] sm:$0x11]  ;;  %v11515_v29 = vmov 0 }
  0x3c   : > { %v7872_v5 = vld [vmem:[%s8320_s21] sm:$0xff]   ;;  %v7873_v7 = vld [vmem:[%s8320_s21 + $0x8] sm:$0xff]   ;;  %7668 = vmatpush3.bf16.msra.mxu0 %v840_v6  ;;  %v7874_v8 = vld [vmem:[%s8320_s21 + $0x10] sm:$0xff]   ;;  %v11510_v23 = vsel %vm8369_vm11, 4294967295, %v11509_v23  ;;  %v358_v25 = vsel %vm8369_vm11, 0, %v357_v24  ;;  %v355_v31 = vsel %vm8369_vm11, 0, %v354_v27 }
  0x3d   : > { %7669 = vmatprep.mubr.msk.bf16.mxu0 %vm786_vm2, %v7872_v5  ;;  %v7875_v9 = vld [vmem:[%s8320_s21 + $0x18] sm:$0xff]   ;;  %v7876_v10 = vld [vmem:[%s8320_s21 + $0x20] sm:$0xff]   ;;  %v7877_v11 = vld [vmem:[%s8320_s21 + $0x28] sm:$0xff]   ;;  %11511 = vst [vmem:[#allocation13_spill] sm:$0xff] %v11510_v23  ;;  %v361_v32 = vsel %vm8369_vm11, 0, %v360_v28  ;;  %vm455_vm15 = vcmask 519168  }
  0x3e   : > { %v7878_v12 = vld [vmem:[%s8320_s21 + $0x30] sm:$0xff]   ;;  %v7879_v13 = vld [vmem:[%s8320_s21 + $0x38] sm:$0xff]   ;;  %v7880_v14 = vld [vmem:[%s8320_s21 + $0x40] sm:$0xff]   ;;  %359 = vst [vmem:[#allocation2 + $0x18] sm:$0x11] %v358_v25  ;;  %s8178_s23 = smov 64  }
  0x3f   : > { %7670 = vmatmul.mubr.msk.bf16.vlgmr.msra.gmra.mrb[0].mxu0 %vm786_vm2, %v7873_v7  ;;  %v7881_v15 = vld [vmem:[%s8320_s21 + $0x48] sm:$0xff]   ;;  %v7882_v16 = vld [vmem:[%s8320_s21 + $0x50] sm:$0xff]   ;;  %v7883_v17 = vld [vmem:[%s8320_s21 + $0x58] sm:$0xff]   ;;  %356 = vst [vmem:[#allocation2] sm:$0x11] %v355_v31  ;;  %s338_s16 = sand.u32 1, %s8163_s10  }
  0x40   : > { %7673 = vmatprep.mubr.msk.bf16.mxu0 %vm786_vm2, %v7874_v8  ;;  %v7884_v18 = vld [vmem:[%s8320_s21 + $0x60] sm:$0xff]   ;;  %v7885_v19 = vld [vmem:[%s8320_s21 + $0x68] sm:$0xff]   ;;  %v7886_v20 = vld [vmem:[%s8320_s21 + $0x70] sm:$0xff]   ;;  %362 = vst [vmem:[#allocation2 + $0x30] sm:$0x11] %v361_v32  ;;  %s6867_s25 = sshll.u32 %s338_s16, 6 }
  0x41   : > { %v7887_v21 = vld [vmem:[%s8320_s21 + $0x78] sm:$0xff]   ;;  %vm8376_vm12 = vmand %vm347_vm3, %vm11461_vm9  ;;  %v410_v30 = vld [vmem:[#allocation2 + $0x28] sm:$0x11]  ;;  %s11384_s26 = scalar_lea.vmem [#allocation9], %s6867_s25  ;;  %s7490_s27 = sshll.u32 %s8253_s13, 10 }
  0x42   : > { %v11513_v26 = vsel %vm8376_vm12, 4294967295, %v11512_v26  ;;  %vm405_vm13 = vmand %vm350_vm5, %vm11462_vm10  ;;  %v407_v34 = vld [vmem:[#allocation2 + $0x10] sm:$0x11]  ;;  %v413_v36 = vld [vmem:[#allocation2 + $0x40] sm:$0x11]  ;;  %vm3277_vm10 = vcmask 1046532   ;;  %s11402_s21 = scalar_lea.hbm %s11457_s9, %s7490_s27 }
  0x43   : > { %11514 = vst [vmem:[#allocation14_spill] sm:$0xff] %v11513_v26  ;;  %vm8383_vm14 = vmor %vm405_vm13, %vm8376_vm12  ;;  %v363_v38 = vld [vmem:[#allocation2 + $0x48] sm:$0x11]  ;;  %v366_v39 = vld [vmem:[#allocation2 + $0x60] sm:$0x11]  ;;  %vm1700_vm13 = vcmask 1043968  }
  0x44   : > { %v11516_v29 = vsel %vm8383_vm14, 4294967295, %v11515_v29  ;;  %v411_v33 = vsel %vm8383_vm14, 0, %v410_v30  ;;  %v408_v35 = vsel %vm8383_vm14, 0, %v407_v34  ;;  %v414_v37 = vsel %vm8383_vm14, 0, %v413_v36  ;;  %v416_v42 = vld [vmem:[#allocation2 + $0x58] sm:$0x11]  ;;  %vm8471_vm0 = vmand %vm455_vm15, %vm11461_vm9 }
  0x45   : > { %11517 = vst [vmem:[#allocation15_spill] sm:$0xff] %v11516_v29  ;;  %412 = vst [vmem:[#allocation2 + $0x28] sm:$0x11] %v411_v33  ;;  %v364_v40 = vsel %vm8369_vm11, 0, %v363_v38  ;;  %v367_v41 = vsel %vm8369_vm11, 0, %v366_v39  ;;  %v417_v44 = vsel %vm8383_vm14, 0, %v416_v42 }
  0x46   : > { %409 = vst [vmem:[#allocation2 + $0x10] sm:$0x11] %v408_v35  ;;  %415 = vst [vmem:[#allocation2 + $0x40] sm:$0x11] %v414_v37  ;;  %v419_v43 = vld [vmem:[#allocation2 + $0x70] sm:$0x11] }
  0x47   : > { %7674 = vmatmul.mubr.msk.bf16.gmra.mrb[4].mxu0 %vm786_vm2, %v7875_v9  ;;  %365 = vst [vmem:[#allocation2 + $0x48] sm:$0x11] %v364_v40  ;;  %368 = vst [vmem:[#allocation2 + $0x60] sm:$0x11] %v367_v41  ;;  %v420_v45 = vsel %vm8383_vm14, 0, %v419_v43  ;;  %v7888_v24 = vld [vmem:[%s11451_s3] sm:$0xff]  }
  0x48   : > { %7677 = vmatprep.mubr.msk.bf16.mxu0 %vm786_vm2, %v7876_v10  ;;  %418 = vst [vmem:[#allocation2 + $0x58] sm:$0x11] %v417_v44  ;;  %421 = vst [vmem:[#allocation2 + $0x70] sm:$0x11] %v420_v45  ;;  %v369_v46 = vld [vmem:[#allocation2 + $0x78] sm:$0x11] }
  0x49   : > { %v372_v47 = vld [vmem:[#allocation2 + $0x90] sm:$0x11]  ;;  %v370_v48 = vsel %vm8369_vm11, 0, %v369_v46  ;;  %v422_v49 = vld [vmem:[#allocation2 + $0x88] sm:$0x11]  ;;  %v7890_v33 = vld [vmem:[%s11451_s3 + $0x60] sm:$0xff]  }
  0x4a   : > { %v373_v50 = vsel %vm8369_vm11, 0, %v372_v47  ;;  %371 = vst [vmem:[#allocation2 + $0x78] sm:$0x11] %v370_v48  ;;  %v423_v51 = vsel %vm8383_vm14, 0, %v422_v49  ;;  %v425_v52 = vld [vmem:[#allocation2 + $0xa0] sm:$0x11] }
  0x4b   : > { %374 = vst [vmem:[#allocation2 + $0x90] sm:$0x11] %v373_v50  ;;  %424 = vst [vmem:[#allocation2 + $0x88] sm:$0x11] %v423_v51  ;;  %v426_v53 = vsel %vm8383_vm14, 0, %v425_v52  ;;  %v7889_v30 = vld [vmem:[%s11451_s3 + $0x8] sm:$0xff]  }
  0x4c   : > { %427 = vst [vmem:[#allocation2 + $0xa0] sm:$0x11] %v426_v53  ;;  %v375_v54 = vld [vmem:[#allocation2 + $0xa8] sm:$0x11]  ;;  %v428_v56 = vld [vmem:[#allocation2 + $0xb8] sm:$0x11] }
  0x4d   : > { %v376_v55 = vsel %vm8369_vm11, 0, %v375_v54  ;;  %v429_v57 = vsel %vm8383_vm14, 0, %v428_v56  ;;  %v378_v58 = vld [vmem:[#allocation2 + $0xc0] sm:$0x11]  ;;  %v431_v60 = vld [vmem:[#allocation2 + $0xd0] sm:$0x11] }
  0x4e   : > { %377 = vst [vmem:[#allocation2 + $0xa8] sm:$0x11] %v376_v55  ;;  %430 = vst [vmem:[#allocation2 + $0xb8] sm:$0x11] %v429_v57  ;;  %v379_v59 = vsel %vm8369_vm11, 0, %v378_v58  ;;  %v432_v61 = vsel %vm8383_vm14, 0, %v431_v60 }
  0x4f   : > { %7678 = vmatmul.mubr.msk.bf16.gmra.mrb[8].mxu0 %vm786_vm2, %v7877_v11  ;;  %380 = vst [vmem:[#allocation2 + $0xc0] sm:$0x11] %v379_v59  ;;  %433 = vst [vmem:[#allocation2 + $0xd0] sm:$0x11] %v432_v61  ;;  %v381_v62 = vld [vmem:[#allocation2 + $0xd8] sm:$0x11] }
  0x50   : > { %7681 = vmatprep.mubr.msk.bf16.mxu0 %vm786_vm2, %v7878_v12  ;;  %v382_v63 = vsel %vm8369_vm11, 0, %v381_v62  ;;  %v434_v0 = vld [vmem:[#allocation2 + $0xe8] sm:$0x11]  ;;  %v384_v2 = vld [vmem:[#allocation2 + $0xf0] sm:$0x11]  ;;  %v11518_v35 = vmov 0 }
  0x51   : > { %383 = vst [vmem:[#allocation2 + $0xd8] sm:$0x11] %v382_v63  ;;  %v435_v1 = vsel %vm8383_vm14, 0, %v434_v0  ;;  %v385_v3 = vsel %vm8369_vm11, 0, %v384_v2  ;;  %v437_v4 = vld [vmem:[#allocation2 + $0x100] sm:$0x11] }
  0x52   : > { %436 = vst [vmem:[#allocation2 + $0xe8] sm:$0x11] %v435_v1  ;;  %386 = vst [vmem:[#allocation2 + $0xf0] sm:$0x11] %v385_v3  ;;  %v438_v5 = vsel %vm8383_vm14, 0, %v437_v4  ;;  %v7891_v34 = vld [vmem:[%s11451_s3 + $0x10] sm:$0xff]  }
  0x53   : > { %439 = vst [vmem:[#allocation2 + $0x100] sm:$0x11] %v438_v5  ;;  %v387_v6 = vld [vmem:[#allocation2 + $0x108] sm:$0x11]  ;;  %v440_v8 = vld [vmem:[#allocation2 + $0x118] sm:$0x11] }
  0x54   : > { %v388_v7 = vsel %vm8369_vm11, 0, %v387_v6  ;;  %v441_v9 = vsel %vm8383_vm14, 0, %v440_v8  ;;  %v390_v10 = vld [vmem:[#allocation2 + $0x120] sm:$0x11]  ;;  %v443_v12 = vld [vmem:[#allocation2 + $0x130] sm:$0x11] }
  0x55   : > { %389 = vst [vmem:[#allocation2 + $0x108] sm:$0x11] %v388_v7  ;;  %442 = vst [vmem:[#allocation2 + $0x118] sm:$0x11] %v441_v9  ;;  %v391_v11 = vsel %vm8369_vm11, 0, %v390_v10  ;;  %v11519_v35 = vsel %vm8471_vm0, 4294967295, %v11518_v35 }
  0x56   : > { %392 = vst [vmem:[#allocation2 + $0x120] sm:$0x11] %v391_v11  ;;  %v399_v27 = vld [vmem:[#allocation2 + $0x168] sm:$0x11]  ;;  %v452_v31 = vld [vmem:[#allocation2 + $0x178] sm:$0x11] }
  0x57   : > { %7682 = vmatmul.mubr.msk.bf16.gmra.mrb[12].mxu0 %vm786_vm2, %v7879_v13  ;;  %v444_v13 = vsel %vm8383_vm14, 0, %v443_v12  ;;  %v400_v28 = vsel %vm8369_vm11, 0, %v399_v27  ;;  %v453_v32 = vsel %vm8383_vm14, 0, %v452_v31  ;;  %11520 = vst [vmem:[#allocation16_spill] sm:$0xff] %v11519_v35  ;;  %v7892_v38 = vld [vmem:[%s11451_s3 + $0x68] sm:$0xff]   ;;  %v7893_v39 = vld [vmem:[%s11451_s3 + $0x18] sm:$0xff]  }
  0x58   : > { %7685 = vmatprep.mubr.msk.bf16.mxu0 %vm786_vm2, %v7880_v14  ;;  %445 = vst [vmem:[#allocation2 + $0x130] sm:$0x11] %v444_v13  ;;  %v393_v14 = vld [vmem:[#allocation2 + $0x138] sm:$0x11]  ;;  %401 = vst [vmem:[#allocation2 + $0x168] sm:$0x11] %v400_v28 }
  0x59   : > { %454 = vst [vmem:[#allocation2 + $0x178] sm:$0x11] %v453_v32  ;;  %v7894_v40 = vld [vmem:[%s11451_s3 + $0x70] sm:$0xff]   ;;  %v7895_v41 = vld [vmem:[%s11451_s3 + $0x20] sm:$0xff]   ;;  %v11521_v42 = vmov 0  ;;  %v7896_v45 = vld [vmem:[%s11451_s3 + $0x78] sm:$0xff]  }
  0x5a   : > { %v7897_v46 = vld [vmem:[%s11451_s3 + $0x28] sm:$0xff]   ;;  %v7898_v47 = vld [vmem:[%s11451_s3 + $0x80] sm:$0xff]   ;;  %v7899_v48 = vld [vmem:[%s11451_s3 + $0x30] sm:$0xff]   ;;  %vm1126_vm5 = vsmask.f32 4368  ;;  %s6787_s28 = sshll.u32 %s11384_s26, 4  ;;  %s11396_s28 = int_to_ptr.vmem [resolvable:$true] %s6787_s28 }
  0x5b   : > { %v7900_v49 = vld [vmem:[%s11451_s3 + $0x88] sm:$0xff]   ;;  %v7901_v50 = vld [vmem:[%s11451_s3 + $0x38] sm:$0xff]   ;;  %v8527_v51 = vld [vmem:[%s11450_s2] ss:$0 sm:$0xff]  ;;  %s8105_s14 = scalar_lea.vmem %s11396_s28, 1024  ;;  %p11636_p9 = scmp.ne.s32.totalorder %s11499_s19, 0 }
  0x5c   : > { %v457_v52 = vld [vmem:[#allocation2] sm:$0xf]  ;;  %v464_v57 = vld [vmem:[#allocation2 + $0x10] sm:$0x1]  ;;  %v7904_v8 = vld [vmem:[%s11451_s3 + $0x98] sm:$0xff]   ;;  %p8106_p6 = scmp.ne.s32.totalorder %s11396_s28, %s8105_s14  ;;  %s8179_s13 = smov [#allocation9]  }
  0x5d   : > { %v458_v54 = vsel %vm8471_vm0, 0, %v457_v52  ;;  %v7902_v60 = vld [vmem:[%s11451_s3 + $0x90] sm:$0xff]   ;;  %v7903_v61 = vld [vmem:[%s11451_s3 + $0x40] sm:$0xff]   ;;  %v7905_v9 = vld [vmem:[%s11451_s3 + $0x48] sm:$0xff]   ;;  %s8109_s17 = sshll.u32 %s8179_s13, 4  ;;  %s8110_s17 = int_to_ptr.vmem [resolvable:$false] %s8109_s17 }
  0x5e   : > { %459 = vst [vmem:[#allocation2] sm:$0xf] %v458_v54  ;;  %v1429_v32 = vld [vmem:[#allocation2 + $0x18] sm:$0xf]  ;;  %v1433_v54 = vld [vmem:[#allocation2 + $0x28] sm:$0x1]  ;;  %vm8584_vm8 = vmor %vm348_vm4, %vm1126_vm5  ;;  %p8107_p10 = pnand %p8106_p6, %p11636_p9  ;;  %p8112_p2 = scmp.lt.s32.totalorder %s11396_s28, %s8110_s17 }
  0x5f   : > { %7686 = vmatmul.mubr.msk.bf16.gmra.mrb[16].mxu0 %vm786_vm2, %v7881_v15  ;;  %v394_v15 = vsel %vm8369_vm11, 0, %v393_v14  ;;  %v468_v36 = vld [vmem:[#allocation2 + $0x16c] sm:$0xf]  ;;  %s8111_s22 = scalar_lea.vmem %s8110_s17, 2048 }
  0x60   : > { %7689 = vmatprep.mubr.msk.bf16.mxu0 %vm786_vm2, %v7882_v16  ;;  %395 = vst [vmem:[#allocation2 + $0x138] sm:$0x11] %v394_v15  ;;  %v446_v16 = vld [vmem:[#allocation2 + $0x148] sm:$0x11]  ;;  %v469_v37 = vsel %vm8471_vm0, 0, %v468_v36  ;;  %p8108_p12 = pneg %p8107_p10  ;;  %p8113_p3 = scmp.lt.s32.totalorder %s8111_s22, %s8105_s14 }
  0x61   : > { %470 = vst [vmem:[#allocation2 + $0x16c] sm:$0xf] %v469_v37  ;;  %v472_v43 = vld [vmem:[#allocation2 + $0x17c] sm:$0x1] }
  0x62   : > { %p8114_p4 = por %p8113_p3, %p8112_p2 }
  0x64   : > { %p8115_p7 = pnand %p8114_p4, %p8108_p12 }
  0x67   : > { %7690 = vmatmul.mubr.msk.bf16.gmra.mrb[20].mxu0 %vm786_vm2, %v7883_v17  ;;  %v447_v17 = vsel %vm8383_vm14, 0, %v446_v16 }
  0x68   : > { %7693 = vmatprep.mubr.msk.bf16.mxu0 %vm786_vm2, %v7884_v18  ;;  %448 = vst [vmem:[#allocation2 + $0x148] sm:$0x11] %v447_v17  ;;  %v396_v18 = vld [vmem:[#allocation2 + $0x150] sm:$0x11] }
  0x6f   : > { %7694 = vmatmul.mubr.msk.bf16.gmra.mrb[24].mxu0 %vm786_vm2, %v7885_v19  ;;  %v397_v19 = vsel %vm8369_vm11, 0, %v396_v18 }
  0x70   : > { %7697 = vmatprep.mubr.msk.bf16.mxu0 %vm786_vm2, %v7886_v20  ;;  %398 = vst [vmem:[#allocation2 + $0x150] sm:$0x11] %v397_v19  ;;  %v11465_v20 = vmov 0  }
  0x71   : > { %3067 = vmatprep.subr.bf16.mxu0 %v11465_v20  ;;  %461 = vst.msk [vmem:[#allocation2 + $0x8] sm:$0xf] %vm455_vm15, %v11465_v20  ;;  %471 = vst.msk [vmem:[#allocation2 + $0x174] sm:$0xf] %vm455_vm15, %v11465_v20  ;;  %2642 = vmatprep.subr.bf16.mxu1 %v11465_v20 }
  0x72   : > { %3068 = vmatpush1.bf16.msra.mxu0 %v7888_v24  ;;  %2643 = vmatpush1.bf16.msra.mxu1 %v7890_v33 }
  0x73   : > { %3069 = vmatprep.subr.bf16.mxu0 %v11465_v20  ;;  %2644 = vmatprep.subr.bf16.mxu1 %v11465_v20 }
  0x76   : > { %3070 = vmatpush1.bf16.msra.mxu0 %v7889_v30  ;;  %2645 = vmatpush1.bf16.msra.mxu1 %v7892_v38 }
  0x77   : > { %7698 = vmatmul.mubr.msk.bf16.gmra.mrb[28].mxu0 %vm786_vm2, %v7887_v21  ;;  %v449_v21 = vld [vmem:[#allocation2 + $0x160] sm:$0x11]  ;;  %3071 = vmatprep.subr.bf16.mxu0 %v11465_v20  ;;  %vm462_vm2 = vcmask 516096  }
  0x78   : > { %v450_v25 = vsel %vm8383_vm14, 0, %v449_v21  ;;  %vm8492_vm3 = vmand %vm462_vm2, %vm348_vm4  ;;  %2646 = vmatprep.subr.bf16.mxu1 %v11465_v20 }
  0x79   : > { %451 = vst [vmem:[#allocation2 + $0x160] sm:$0x11] %v450_v25  ;;  %v11522_v42 = vsel %vm8492_vm3, 4294967295, %v11521_v42  ;;  %v473_v44 = vsel %vm8492_vm3, 0, %v472_v43  ;;  %v465_v62 = vsel %vm8492_vm3, 0, %v464_v57  ;;  %vm9080_vm2 = vmand %vm1700_vm13, %vm11461_vm9  ;;  %vm3276_vm9 = vcmask 1042432  }
  0x7a   : > { %3072 = vmatpush1.bf16.msra.mxu0 %v7891_v34  ;;  %11523 = vst [vmem:[#allocation17_spill] sm:$0xff] %v11522_v42  ;;  %474 = vst [vmem:[#allocation2 + $0x17c] sm:$0x1] %v473_v44  ;;  %2647 = vmatpush1.bf16.msra.mxu1 %v7894_v40  ;;  %v7907_v40 = vld [vmem:[%s11451_s3 + $0x50] sm:$0xff]  }
  0x7b   : > { %3073 = vmatprep.subr.bf16.mxu0 %v11465_v20  ;;  %2648 = vmatprep.subr.bf16.mxu1 %v11465_v20  ;;  %466 = vst [vmem:[#allocation2 + $0x10] sm:$0x1] %v465_v62  ;;  %v7908_v62 = vld [vmem:[%s11451_s3 + $0xa8] sm:$0xff]   ;;  %vm9121_vm1 = vmor %vm3276_vm9, %vm3277_vm10 }
  0x7e   : > { %3074 = vmatpush1.bf16.msra.mxu0 %v7893_v39  ;;  %2649 = vmatpush1.bf16.msra.mxu1 %v7896_v45  ;;  %v7906_v39 = vld [vmem:[%s11451_s3 + $0xa0] sm:$0xff]  }
  0x7f   : > { %3075 = vmatprep.subr.bf16.mxu0 %v11465_v20  ;;  %2650 = vmatprep.subr.bf16.mxu1 %v11465_v20 }
  0x82   : > { %3076 = vmatpush1.bf16.msra.mxu0 %v7895_v41  ;;  %2651 = vmatpush1.bf16.msra.mxu1 %v7898_v47 }
  0x83   : > { %3077 = vmatprep.subr.bf16.mxu0 %v11465_v20  ;;  %2652 = vmatprep.subr.bf16.mxu1 %v11465_v20 }
  0x86   : > { %3078 = vmatpush1.bf16.msra.mxu0 %v7897_v46  ;;  %2653 = vmatpush1.bf16.msra.mxu1 %v7900_v49 }
  0x87   : > { %3079 = vmatprep.subr.bf16.mxu0 %v11465_v20  ;;  %2654 = vmatprep.subr.bf16.mxu1 %v11465_v20 }
  0x8a   : > { %3080 = vmatpush1.bf16.msra.mxu0 %v7899_v48  ;;  %2655 = vmatpush1.bf16.msra.mxu1 %v7902_v60 }
  0x8b   : > { %3081 = vmatprep.subr.bf16.mxu0 %v11465_v20  ;;  %2656 = vmatprep.subr.bf16.mxu1 %v11465_v20 }
  0x8e   : > { %3082 = vmatpush1.bf16.msra.mxu0 %v7901_v50  ;;  %2657 = vmatpush1.bf16.msra.mxu1 %v7904_v8 }
  0x8f   : > { %3083 = vmatprep.subr.bf16.mxu0 %v11465_v20  ;;  %2658 = vmatprep.subr.bf16.mxu1 %v11465_v20 }
  0x92   : > { %3084 = vmatpush1.bf16.msra.mxu0 %v7903_v61  ;;  %2659 = vmatpush1.bf16.msra.mxu1 %v7906_v39 }
  0x93   : > { %3085 = vmatprep.subr.bf16.mxu0 %v11465_v20  ;;  %2660 = vmatprep.subr.bf16.mxu1 %v11465_v20 }
  0x96   : > { %3086 = vmatpush1.bf16.msra.mxu0 %v7905_v9  ;;  %2661 = vmatpush1.bf16.msra.mxu1 %v7908_v62 }
  0x97   : > { %3087 = vmatprep.subr.bf16.mxu0 %v11465_v20  ;;  %2662 = vmatprep.subr.bf16.mxu1 %v11465_v20 }
  0x9a   : > { %3088 = vmatpush1.bf16.msra.mxu0 %v7907_v40  ;;  %v1827_v40 = vld [vmem:[#allocation2 + $0x1c] sm:$0xf] }
  0x9b   : > { %3089 = vmatprep.subr.bf16.mxu0 %v11465_v20 }
 0x112   : > { %v7671_v53 = vpop.f32.mrb[0].mxu0 }
 0x113   : > { %v885_v55 = vadd.f32 %v7671_v53, %v8527_v51  ;;  %v876_v56 = vpop.f32.mrb[1].mxu0 }
 0x114   : > { %v877_v58 = vadd.f32 %v8527_v51, %v876_v56  ;;  %v7672_v59 = vpop.f32.mrb[2].mxu0  ;;  %v1436_v56 = vld [vmem:[#allocation2 + $0x30] sm:$0xf] }
 0x115   : > { %v1005_v63 = vmax.f32 %v885_v55, 0.0  ;;  %v888_v0 = vadd.f32 %v7672_v59, %v8527_v51  ;;  %v879_v1 = vpop.f32.mrb[3].mxu0 }
 0x116   : > { %v1003_v2 = vmax.f32 %v877_v58, 0.0  ;;  %v880_v3 = vadd.f32 %v8527_v51, %v879_v1 }
 0x117   : > { %v7444_v4 = vpack.c.bf16 %v1005_v63, %v1005_v63  ;;  %v1006_v5 = vmax.f32 %v888_v0, 0.0  ;;  %v7909_v63 = vld [vmem:[%s11451_s3 + $0x58] sm:$0xff]  }
 0x118   : > { %v7442_v6 = vpack.c.bf16 %v1003_v2, %v1003_v2  ;;  %v1004_v7 = vmax.f32 %v880_v3, 0.0  ;;  %3090 = vmatpush1.bf16.msra.mxu0 %v7909_v63 }
 0x119   : > { %v1146_v10 = vshrl.u32 %v7444_v4, 16  ;;  %v7445_v11 = vpack.c.bf16 %v1006_v5, %v1006_v5  ;;  %v1149_v12 = vshll.u32 %v7444_v4, 16  ;;  %v1820_v4 = vld [vmem:[#allocation2 + $0x4] sm:$0xf]  ;;  %4570 = vmatprep.subr.bf16.mxu0 %v11465_v20 }
 0x11a   : > { %v1129_v13 = vshrl.u32 %v7442_v6, 16  ;;  %v7443_v14 = vpack.c.bf16 %v1004_v7, %v1004_v7  ;;  %v7675_v15 = vpop.f32.mrb[4].mxu0  ;;  %v1132_v16 = vshll.u32 %v7442_v6, 16 }
 0x11b   : > { %v8553_v17 = vrot.slane %v1146_v10, 7  ;;  %v1154_v18 = vshrl.u32 %v7445_v11, 16  ;;  %v1157_v19 = vshll.u32 %v7445_v11, 16  ;;  %v901_v21 = vadd.f32 %v7675_v15, %v8527_v51  ;;  %v892_v24 = vpop.f32.mrb[5].mxu0 }
 0x11c   : > { %v1137_v25 = vshrl.u32 %v7443_v14, 16  ;;  %v1140_v27 = vshll.u32 %v7443_v14, 16  ;;  %v893_v28 = vadd.f32 %v8527_v51, %v892_v24  ;;  %v7676_v30 = vpop.f32.mrb[6].mxu0  ;;  %v1131_v31 = vrot.slane %v1129_v13, 7 }
 0x11d   : > { %v1152_v33 = vrot.slane %v8553_v17, 4  ;;  %v8560_v34 = vrot.slane %v1154_v18, 7  ;;  %v1009_v36 = vmax.f32 %v901_v21, 0.0  ;;  %v904_v37 = vadd.f32 %v7676_v30, %v8527_v51  ;;  %v895_v38 = vpop.f32.mrb[7].mxu0 }
 0x11e   : > { %v1007_v41 = vmax.f32 %v893_v28, 0.0  ;;  %v896_v43 = vadd.f32 %v8527_v51, %v895_v38  ;;  %v1134_v44 = vor.u32 %v1132_v16, %v1131_v31  ;;  %v1135_v45 = vrot.slane %v1131_v31, 4 }
 0x11f   : > { %v1159_v46 = vor.u32 %v1157_v19, %v8560_v34  ;;  %v8571_v47 = vpack.c.bf16 %v1009_v36, %v1009_v36  ;;  %v1010_v48 = vmax.f32 %v904_v37, 0.0  ;;  %v1139_v49 = vrot.slane %v1137_v25, 7  ;;  %v7912_v25 = vld [vmem:[%s11451_s3 + $0xb0] sm:$0xff]  }
 0x120   : > { %v8573_v50 = vpack.c.bf16 %v1007_v41, %v1007_v41  ;;  %v1008_v52 = vmax.f32 %v896_v43, 0.0  ;;  %1556 = vrot.lane.b32.xlu0 %v1134_v44, %s8178_s23  ;;  %v1430_v53 = vsel %vm8471_vm0, %v1134_v44, %v1429_v32  ;;  %v1151_v55 = vor.u32 %v1149_v12, %v8553_v17  ;;  %v1440_v32 = vld [vmem:[#allocation2 + $0x40] sm:$0x1]  ;;  %v1824_v36 = vld [vmem:[#allocation2 + $0x14] sm:$0x1]  ;;  %2663 = vmatpush1.bf16.msra.mxu1 %v7912_v25 }
 0x121   : > { %v1180_v57 = vshrl.u32 %v8571_v47, 16  ;;  %v1183_v58 = vshll.u32 %v8571_v47, 16  ;;  %v7449_v59 = vpack.c.bf16 %v1010_v48, %v1010_v48  ;;  %1431 = vst [vmem:[#allocation2 + $0x18] sm:$0xf] %v1430_v53  ;;  %v1144_v60 = vrot.slane %v1139_v49, 4  ;;  %2664 = vmatprep.subr.bf16.mxu1 %v11465_v20 }
 0x122   : > { %v1163_v0 = vshrl.u32 %v8573_v50, 16  ;;  %v1166_v1 = vshll.u32 %v8573_v50, 16  ;;  %v7447_v2 = vpack.c.bf16 %v1008_v52, %v1008_v52  ;;  %v1142_v3 = vor.u32 %v1140_v27, %v1139_v49  ;;  %v7679_v5 = vpop.f32.mrb[8].mxu0 }
 0x123   : > { %v8597_v6 = vrot.slane %v1180_v57, 7  ;;  %v1188_v7 = vshrl.u32 %v7449_v59, 16  ;;  %v1191_v8 = vshll.u32 %v7449_v59, 16  ;;  %1560 = vrot.lane.b32.xlu1 %v1144_v60, %s8178_s23  ;;  %v1434_v9 = vsel %vm8492_vm3, %v1144_v60, %v1433_v54  ;;  %v908_v10 = vpop.f32.mrb[9].mxu0 }
 0x124   : > { %v1165_v11 = vrot.slane %v1163_v0, 7  ;;  %v1171_v12 = vshrl.u32 %v7447_v2, 16  ;;  %v1174_v13 = vshll.u32 %v7447_v2, 16  ;;  %1435 = vst [vmem:[#allocation2 + $0x28] sm:$0x1] %v1434_v9  ;;  %v1143_v14 = vsel %vm8584_vm8, %v1135_v45, %v1142_v3  ;;  %v7680_v15 = vpop.f32.mrb[10].mxu0 }
 0x125   : > { %v1186_v16 = vrot.slane %v8597_v6, 4  ;;  %v8606_v18 = vrot.slane %v1188_v7, 7  ;;  %1432 = vst.msk [vmem:[#allocation2 + $0x20] sm:$0xf] %vm455_vm15, %v1143_v14  ;;  %1558 = vrot.lane.b32.xlu0 %v1143_v14, %s8178_s23  ;;  %v1437_v19 = vsel %vm8471_vm0, %v1151_v55, %v1436_v56  ;;  %v1821_v21 = vsel %vm8471_vm0, %v1151_v55, %v1820_v4  ;;  %v911_v24 = vpop.f32.mrb[11].mxu0 }
 0x126   : > { %v1169_v27 = vrot.slane %v1165_v11, 4  ;;  %v1173_v28 = vrot.slane %v1171_v12, 7  ;;  %1438 = vst [vmem:[#allocation2 + $0x30] sm:$0xf] %v1437_v19  ;;  %1822 = vst [vmem:[#allocation2 + $0x4] sm:$0xf] %v1821_v21  ;;  %v1160_v30 = vsel %vm8584_vm8, %v1152_v33, %v1159_v46  ;;  %v917_v31 = vadd.f32 %v7679_v5, %v8527_v51 }
 0x127   : > { %v8624_v37 = vor.u32 %v1191_v8, %v8606_v18  ;;  %1562 = vrot.lane.b32.xlu1 %v1151_v55, %s8178_s23  ;;  %1439 = vst.msk [vmem:[#allocation2 + $0x38] sm:$0xf] %vm455_vm15, %v1160_v30  ;;  %1823 = vst.msk [vmem:[#allocation2 + $0xc] sm:$0xf] %vm455_vm15, %v1160_v30  ;;  %v909_v38 = vadd.f32 %v8527_v51, %v908_v10  ;;  %v1161_v17 = vrot.slane %v8560_v34, 4  ;;  %v7914_v46 = vld [vmem:[%s11451_s3 + $0xb8] sm:$0xff]  }
 0x128   : > { %v920_v39 = vadd.f32 %v7680_v15, %v8527_v51  ;;  %v1443_v33 = vld [vmem:[#allocation2 + $0x48] sm:$0xf]  ;;  %v1176_v41 = vor.u32 %v1174_v13, %v1173_v28  ;;  %v1013_v43 = vmax.f32 %v917_v31, 0.0  ;;  %v912_v44 = vadd.f32 %v8527_v51, %v911_v24  ;;  %v1831_v56 = vld [vmem:[#allocation2 + $0x2c] sm:$0x1]  ;;  %2665 = vmatpush1.bf16.msra.mxu1 %v7914_v46 }
 0x129   : > { %v1168_v45 = vor.u32 %v1166_v1, %v1165_v11  ;;  %1564 = vrot.lane.b32.xlu0 %v1160_v30, %s8178_s23  ;;  %v1011_v48 = vmax.f32 %v909_v38, 0.0  ;;  %v1441_v34 = vsel %vm8492_vm3, %v1161_v17, %v1440_v32  ;;  %v1825_v49 = vsel %vm8492_vm3, %v1161_v17, %v1824_v36  ;;  %v1447_v0 = vld [vmem:[#allocation2 + $0x58] sm:$0x1]  ;;  %v1834_v1 = vld [vmem:[#allocation2 + $0x34] sm:$0xf]  ;;  %3648 = vmatprep.subr.bf16.mxu1 %v11465_v20 }
 0x12a   : > { %v1014_v50 = vmax.f32 %v920_v39, 0.0  ;;  %v8642_v52 = vpack.c.bf16 %v1013_v43, %v1013_v43  ;;  %1442 = vst [vmem:[#allocation2 + $0x40] sm:$0x1] %v1441_v34  ;;  %1826 = vst [vmem:[#allocation2 + $0x14] sm:$0x1] %v1825_v49  ;;  %v1012_v53 = vmax.f32 %v912_v44, 0.0  ;;  %v1177_v62 = vsel %vm8584_vm8, %v1169_v27, %v1176_v41 }
 0x12b   : > { %v1444_v54 = vsel %vm8471_vm0, %v1168_v45, %v1443_v33  ;;  %v1828_v55 = vsel %vm8471_vm0, %v1168_v45, %v1827_v40  ;;  %v7683_v57 = vpop.f32.mrb[12].mxu0  ;;  %v8648_v59 = vpack.c.bf16 %v1011_v48, %v1011_v48  ;;  %1566 = vrot.lane.b32.xlu1 %v1161_v17, %s8178_s23  ;;  %v1178_v63 = vrot.slane %v1173_v28, 4  ;;  %1446 = vst.msk [vmem:[#allocation2 + $0x50] sm:$0xf] %vm455_vm15, %v1177_v62  ;;  %v1450_v8 = vld [vmem:[#allocation2 + $0x60] sm:$0xf] }
 0x12c   : > { %v7453_v60 = vpack.c.bf16 %v1014_v50, %v1014_v50  ;;  %1445 = vst [vmem:[#allocation2 + $0x48] sm:$0xf] %v1444_v54  ;;  %1829 = vst [vmem:[#allocation2 + $0x1c] sm:$0xf] %v1828_v55  ;;  %v924_v2 = vpop.f32.mrb[13].mxu0  ;;  %v1214_v3 = vshrl.u32 %v8642_v52, 16  ;;  %v7451_v5 = vpack.c.bf16 %v1012_v53, %v1012_v53  ;;  %v1185_v7 = vor.u32 %v1183_v58, %v8597_v6 }
 0x12d   : > { %v1217_v4 = vshll.u32 %v8642_v52, 16  ;;  %1830 = vst.msk [vmem:[#allocation2 + $0x24] sm:$0xf] %vm455_vm15, %v1177_v62  ;;  %v7684_v9 = vpop.f32.mrb[14].mxu0  ;;  %v1197_v10 = vshrl.u32 %v8648_v59, 16  ;;  %v1200_v11 = vshll.u32 %v8648_v59, 16  ;;  %1568 = vrot.lane.b32.xlu0 %v1168_v45, %s8178_s23  ;;  %v1448_v47 = vsel %vm8492_vm3, %v1178_v63, %v1447_v0 }
 0x12e   : > { %v1222_v12 = vshrl.u32 %v7453_v60, 16  ;;  %v1225_v13 = vshll.u32 %v7453_v60, 16  ;;  %v927_v14 = vpop.f32.mrb[15].mxu0  ;;  %v8664_v15 = vrot.slane %v1214_v3, 7  ;;  %v1205_v19 = vshrl.u32 %v7451_v5, 16 }
 0x12f   : > { %v1208_v21 = vshll.u32 %v7451_v5, 16  ;;  %v1199_v58 = vrot.slane %v1197_v10, 7  ;;  %1570 = vrot.lane.b32.xlu1 %v1177_v62, %s8178_s23  ;;  %1449 = vst [vmem:[#allocation2 + $0x58] sm:$0x1] %v1448_v47  ;;  %v1832_v25 = vsel %vm8492_vm3, %v1178_v63, %v1831_v56  ;;  %v1451_v27 = vsel %vm8471_vm0, %v1185_v7, %v1450_v8  ;;  %v1454_v33 = vld [vmem:[#allocation2 + $0x70] sm:$0x1] }
 0x130   : > { %v8668_v24 = vrot.slane %v1222_v12, 7  ;;  %v1220_v28 = vrot.slane %v8664_v15, 4  ;;  %v1207_v30 = vrot.slane %v1205_v19, 7  ;;  %1833 = vst [vmem:[#allocation2 + $0x2c] sm:$0x1] %v1832_v25  ;;  %v1835_v31 = vsel %vm8471_vm0, %v1185_v7, %v1834_v1 }
 0x131   : > { %1452 = vst [vmem:[#allocation2 + $0x60] sm:$0xf] %v1451_v27  ;;  %v1194_v32 = vsel %vm8584_vm8, %v1186_v16, %v8624_v37  ;;  %v1203_v36 = vrot.slane %v1199_v58, 4  ;;  %1572 = vrot.lane.b32.xlu0 %v1178_v63, %s8178_s23  ;;  %1836 = vst [vmem:[#allocation2 + $0x34] sm:$0xf] %v1835_v31  ;;  %v933_v17 = vadd.f32 %v7683_v57, %v8527_v51  ;;  %v1195_v16 = vrot.slane %v8606_v18, 4 }
 0x132   : > { %v8684_v38 = vor.u32 %v1225_v13, %v8668_v24  ;;  %1453 = vst.msk [vmem:[#allocation2 + $0x68] sm:$0xf] %vm455_vm15, %v1194_v32  ;;  %1837 = vst.msk [vmem:[#allocation2 + $0x3c] sm:$0xf] %vm455_vm15, %v1194_v32  ;;  %v925_v39 = vadd.f32 %v8527_v51, %v924_v2  ;;  %v1838_v6 = vld [vmem:[#allocation2 + $0x44] sm:$0x1]  ;;  %v1210_v40 = vor.u32 %v1208_v21, %v1207_v30 }
 0x133   : > { %v936_v37 = vadd.f32 %v7684_v9, %v8527_v51  ;;  %v928_v41 = vadd.f32 %v8527_v51, %v927_v14  ;;  %v1457_v43 = vld [vmem:[#allocation2 + $0x78] sm:$0xf]  ;;  %v1841_v44 = vld [vmem:[#allocation2 + $0x4c] sm:$0xf]  ;;  %v7687_v45 = vpop.f32.mrb[16].mxu0  ;;  %1574 = vrot.lane.b32.xlu1 %v1185_v7, %s8178_s23  ;;  %v1017_v46 = vmax.f32 %v933_v17, 0.0  ;;  %v1202_v34 = vor.u32 %v1200_v11, %v1199_v58 }
 0x134   : > { %v1015_v48 = vmax.f32 %v925_v39, 0.0  ;;  %v8695_v49 = vrot.slane %v1207_v30, 4  ;;  %v1461_v50 = vld [vmem:[#allocation2 + $0x88] sm:$0x1]  ;;  %v940_v53 = vpop.f32.mrb[17].mxu0  ;;  %v1455_v54 = vsel %vm8492_vm3, %v1195_v16, %v1454_v33  ;;  %v1839_v18 = vsel %vm8492_vm3, %v1195_v16, %v1838_v6 }
 0x135   : > { %v1018_v55 = vmax.f32 %v936_v37, 0.0  ;;  %v1016_v56 = vmax.f32 %v928_v41, 0.0  ;;  %v7688_v57 = vpop.f32.mrb[18].mxu0  ;;  %1576 = vrot.lane.b32.xlu0 %v1194_v32, %s8178_s23  ;;  %v8702_v59 = vpack.c.bf16 %v1017_v46, %v1017_v46  ;;  %1456 = vst [vmem:[#allocation2 + $0x70] sm:$0x1] %v1455_v54  ;;  %v1458_v62 = vsel %vm8471_vm0, %v1202_v34, %v1457_v43 }
 0x136   : > { %v7454_v60 = vpack.c.bf16 %v1015_v48, %v1015_v48  ;;  %1840 = vst [vmem:[#allocation2 + $0x44] sm:$0x1] %v1839_v18  ;;  %v1842_v63 = vsel %vm8471_vm0, %v1202_v34, %v1841_v44  ;;  %v943_v0 = vpop.f32.mrb[19].mxu0  ;;  %1459 = vst [vmem:[#allocation2 + $0x78] sm:$0xf] %v1458_v62  ;;  %v1211_v3 = vsel %vm8584_vm8, %v1203_v36, %v1210_v40  ;;  %v1229_v44 = vrot.slane %v8668_v24, 4 }
 0x137   : > { %v7457_v1 = vpack.c.bf16 %v1018_v55, %v1018_v55  ;;  %v7455_v2 = vpack.c.bf16 %v1016_v56, %v1016_v56  ;;  %1843 = vst [vmem:[#allocation2 + $0x4c] sm:$0xf] %v1842_v63  ;;  %v1462_v5 = vsel %vm8492_vm3, %v8695_v49, %v1461_v50  ;;  %v1845_v7 = vld [vmem:[#allocation2 + $0x5c] sm:$0x1]  ;;  %v1248_v8 = vshrl.u32 %v8702_v59, 16  ;;  %1578 = vrot.lane.b32.xlu1 %v1195_v16, %s8178_s23 }
 0x138   : > { %v1251_v9 = vshll.u32 %v8702_v59, 16  ;;  %v1231_v10 = vshrl.u32 %v7454_v60, 16  ;;  %v1234_v11 = vshll.u32 %v7454_v60, 16  ;;  %1460 = vst.msk [vmem:[#allocation2 + $0x80] sm:$0xf] %vm455_vm15, %v1211_v3  ;;  %v1846_v27 = vsel %vm8492_vm3, %v8695_v49, %v1845_v7 }
 0x139   : > { %1844 = vst.msk [vmem:[#allocation2 + $0x54] sm:$0xf] %vm455_vm15, %v1211_v3  ;;  %1463 = vst [vmem:[#allocation2 + $0x88] sm:$0x1] %v1462_v5  ;;  %v1848_v12 = vld [vmem:[#allocation2 + $0x64] sm:$0xf]  ;;  %1580 = vrot.lane.b32.xlu0 %v1202_v34, %s8178_s23  ;;  %v1219_v30 = vor.u32 %v1217_v4, %v8664_v15  ;;  %v1228_v36 = vsel %vm8584_vm8, %v1220_v28, %v8684_v38  ;;  %v949_v17 = vadd.f32 %v7687_v45, %v8527_v51 }
 0x13a   : > { %v1256_v13 = vshrl.u32 %v7457_v1, 16  ;;  %v1259_v14 = vshll.u32 %v7457_v1, 16  ;;  %v1239_v19 = vshrl.u32 %v7455_v2, 16  ;;  %v1242_v21 = vshll.u32 %v7455_v2, 16  ;;  %v1464_v47 = vld [vmem:[#allocation2 + $0x90] sm:$0xf] }
 0x13b   : > { %v8718_v58 = vrot.slane %v1248_v8, 7  ;;  %v1233_v25 = vrot.slane %v1231_v10, 7  ;;  %1847 = vst [vmem:[#allocation2 + $0x5c] sm:$0x1] %v1846_v27  ;;  %v8735_v39 = vpop.f32.mrb[20].mxu0  ;;  %1582 = vrot.lane.b32.xlu1 %v1211_v3, %s8178_s23  ;;  %v1465_v52 = vsel %vm8471_vm0, %v1219_v30, %v1464_v47  ;;  %v1849_v4 = vsel %vm8471_vm0, %v1219_v30, %v1848_v12 }
 0x13c   : > { %v8727_v31 = vrot.slane %v1256_v13, 7  ;;  %v1241_v32 = vrot.slane %v1239_v19, 7  ;;  %1467 = vst.msk [vmem:[#allocation2 + $0x98] sm:$0xf] %vm455_vm15, %v1228_v36  ;;  %1851 = vst.msk [vmem:[#allocation2 + $0x6c] sm:$0xf] %vm455_vm15, %v1228_v36  ;;  %v941_v16 = vadd.f32 %v8527_v51, %v940_v53  ;;  %v952_v45 = vadd.f32 %v7688_v57, %v8527_v51 }
 0x13d   : > { %v1254_v33 = vrot.slane %v8718_v58, 4  ;;  %v1237_v6 = vrot.slane %v1233_v25, 4  ;;  %v8745_v15 = vpop.f32.mrb[21].mxu0  ;;  %1466 = vst [vmem:[#allocation2 + $0x90] sm:$0xf] %v1465_v52  ;;  %v1021_v40 = vmax.f32 %v949_v17, 0.0  ;;  %1584 = vrot.lane.b32.xlu0 %v8695_v49, %s8178_s23  ;;  %v944_v46 = vadd.f32 %v8527_v51, %v943_v0 }
 0x13e   : > { %v1261_v28 = vor.u32 %v1259_v14, %v8727_v31  ;;  %v1244_v38 = vor.u32 %v1242_v21, %v1241_v32  ;;  %1850 = vst [vmem:[#allocation2 + $0x64] sm:$0xf] %v1849_v4  ;;  %v1468_v37 = vld [vmem:[#allocation2 + $0xa0] sm:$0x1]  ;;  %v1852_v41 = vld [vmem:[#allocation2 + $0x74] sm:$0x1]  ;;  %v1236_v48 = vor.u32 %v1234_v11, %v1233_v25  ;;  %v1253_v52 = vor.u32 %v1251_v9, %v8718_v58 }
 0x13f   : > { %v8749_v43 = vpop.f32.mrb[22].mxu0  ;;  %v1471_v34 = vld [vmem:[#allocation2 + $0xa8] sm:$0xf]  ;;  %v8758_v54 = vpack.c.bf16 %v1021_v40, %v1021_v40  ;;  %v1019_v53 = vmax.f32 %v941_v16, 0.0  ;;  %v1855_v18 = vld [vmem:[#allocation2 + $0x7c] sm:$0xf]  ;;  %1586 = vrot.lane.b32.xlu1 %v1219_v30, %s8178_s23  ;;  %v1469_v24 = vsel %vm8492_vm3, %v1229_v44, %v1468_v37  ;;  %v1853_v57 = vsel %vm8492_vm3, %v1229_v44, %v1852_v41 }
 0x140   : > { %v8756_v50 = vpop.f32.mrb[23].mxu0  ;;  %v1245_v55 = vsel %vm8584_vm8, %v1237_v6, %v1244_v38  ;;  %v8762_v56 = vrot.slane %v1241_v32, 4  ;;  %v1475_v49 = vld [vmem:[#allocation2 + $0xb8] sm:$0x1]  ;;  %v1022_v60 = vmax.f32 %v952_v45, 0.0  ;;  %v1020_v62 = vmax.f32 %v944_v46, 0.0 }
 0x141   : > { %1474 = vst.msk [vmem:[#allocation2 + $0xb0] sm:$0xf] %vm455_vm15, %v1245_v55  ;;  %1858 = vst.msk [vmem:[#allocation2 + $0x84] sm:$0xf] %vm455_vm15, %v1245_v55  ;;  %v1859_v63 = vld [vmem:[#allocation2 + $0x8c] sm:$0x1]  ;;  %v7458_v2 = vpack.c.bf16 %v1019_v53, %v1019_v53  ;;  %v1472_v3 = vsel %vm8471_vm0, %v1236_v48, %v1471_v34  ;;  %1588 = vrot.lane.b32.xlu0 %v1228_v36, %s8178_s23  ;;  %v1856_v8 = vsel %vm8471_vm0, %v1236_v48, %v1855_v18 }
 0x142   : > { %v1282_v0 = vshrl.u32 %v8758_v54, 16  ;;  %v1285_v1 = vshll.u32 %v8758_v54, 16  ;;  %1470 = vst [vmem:[#allocation2 + $0xa0] sm:$0x1] %v1469_v24  ;;  %1854 = vst [vmem:[#allocation2 + $0x74] sm:$0x1] %v1853_v57  ;;  %v7461_v5 = vpack.c.bf16 %v1022_v60, %v1022_v60  ;;  %v7459_v7 = vpack.c.bf16 %v1020_v62, %v1020_v62 }
 0x143   : > { %1473 = vst [vmem:[#allocation2 + $0xa8] sm:$0xf] %v1472_v3  ;;  %v1476_v10 = vsel %vm8492_vm3, %v8762_v56, %v1475_v49  ;;  %v1862_v11 = vld [vmem:[#allocation2 + $0x94] sm:$0xf]  ;;  %v1265_v13 = vshrl.u32 %v7458_v2, 16  ;;  %v1268_v14 = vshll.u32 %v7458_v2, 16  ;;  %v1860_v19 = vsel %vm8492_vm3, %v8762_v56, %v1859_v63  ;;  %1590 = vrot.lane.b32.xlu1 %v1229_v44, %s8178_s23 }
 0x144   : > { %v8781_v12 = vrot.slane %v1282_v0, 7  ;;  %1857 = vst [vmem:[#allocation2 + $0x7c] sm:$0xf] %v1856_v8  ;;  %1477 = vst [vmem:[#allocation2 + $0xb8] sm:$0x1] %v1476_v10  ;;  %v8786_v47 = vpop.f32.mrb[24].mxu0  ;;  %v1262_v4 = vsel %vm8584_vm8, %v1254_v33, %v1261_v28  ;;  %v965_v59 = vadd.f32 %v8735_v39, %v8527_v51  ;;  %v957_v9 = vadd.f32 %v8527_v51, %v8745_v15 }
 0x145   : > { %v1478_v21 = vld [vmem:[#allocation2 + $0xc0] sm:$0xf]  ;;  %v1290_v25 = vshrl.u32 %v7461_v5, 16  ;;  %v1293_v27 = vshll.u32 %v7461_v5, 16  ;;  %v1273_v30 = vshrl.u32 %v7459_v7, 16  ;;  %v1276_v32 = vshll.u32 %v7459_v7, 16  ;;  %1592 = vrot.lane.b32.xlu0 %v1236_v48, %s8178_s23 }
 0x146   : > { %1861 = vst [vmem:[#allocation2 + $0x8c] sm:$0x1] %v1860_v19  ;;  %v8789_v36 = vpop.f32.mrb[25].mxu0  ;;  %v1288_v17 = vrot.slane %v8781_v12, 4  ;;  %v1267_v6 = vrot.slane %v1265_v13, 7  ;;  %v1479_v41 = vsel %vm8471_vm0, %v1253_v52, %v1478_v21  ;;  %v1863_v44 = vsel %vm8471_vm0, %v1253_v52, %v1862_v11 }
 0x147   : > { %v1866_v38 = vld [vmem:[#allocation2 + $0xa4] sm:$0x1]  ;;  %v8799_v40 = vpop.f32.mrb[26].mxu0  ;;  %v8801_v16 = vrot.slane %v1290_v25, 7  ;;  %v1275_v37 = vrot.slane %v1273_v30, 7  ;;  %v1263_v45 = vrot.slane %v8727_v31, 4  ;;  %1594 = vrot.lane.b32.xlu1 %v1245_v55, %s8178_s23  ;;  %v968_v18 = vadd.f32 %v8749_v43, %v8527_v51 }
 0x148   : > { %1481 = vst.msk [vmem:[#allocation2 + $0xc8] sm:$0xf] %vm455_vm15, %v1262_v4  ;;  %1865 = vst.msk [vmem:[#allocation2 + $0x9c] sm:$0xf] %vm455_vm15, %v1262_v4  ;;  %v1482_v58 = vld [vmem:[#allocation2 + $0xd0] sm:$0x1]  ;;  %v960_v31 = vadd.f32 %v8527_v51, %v8756_v50  ;;  %v1270_v24 = vor.u32 %v1268_v14, %v1267_v6  ;;  %v8848_v2 = vor.u32 %v1285_v1, %v8781_v12 }
 0x149   : > { %v8810_v33 = vpop.f32.mrb[27].mxu0  ;;  %v1271_v28 = vrot.slane %v1267_v6, 4  ;;  %v8818_v46 = vor.u32 %v1293_v27, %v8801_v16  ;;  %v1278_v48 = vor.u32 %v1276_v32, %v1275_v37  ;;  %1480 = vst [vmem:[#allocation2 + $0xc0] sm:$0xf] %v1479_v41  ;;  %1864 = vst [vmem:[#allocation2 + $0x94] sm:$0xf] %v1863_v44  ;;  %v1483_v34 = vsel %vm8492_vm3, %v1263_v45, %v1482_v58 }
 0x14a   : > { %v1025_v39 = vmax.f32 %v965_v59, 0.0  ;;  %v1023_v15 = vmax.f32 %v957_v9, 0.0  ;;  %v1867_v53 = vsel %vm8492_vm3, %v1263_v45, %v1866_v38  ;;  %1596 = vrot.lane.b32.xlu0 %v8762_v56, %s8178_s23  ;;  %1484 = vst [vmem:[#allocation2 + $0xd0] sm:$0x1] %v1483_v34  ;;  %v1485_v57 = vld [vmem:[#allocation2 + $0xd8] sm:$0xf]  ;;  %v984_v12 = vadd.f32 %v8799_v40, %v8527_v51 }
 0x14b   : > { %1868 = vst [vmem:[#allocation2 + $0xa4] sm:$0x1] %v1867_v53  ;;  %v1869_v60 = vld [vmem:[#allocation2 + $0xac] sm:$0xf]  ;;  %v8837_v62 = vsel %vm8584_vm8, %v1271_v28, %v1278_v48  ;;  %v1873_v43 = vld [vmem:[#allocation2 + $0xbc] sm:$0x1]  ;;  %1598 = vrot.lane.b32.xlu1 %v1253_v52, %s8178_s23  ;;  %v1486_v54 = vsel %vm8471_vm0, %v1270_v24, %v1485_v57  ;;  %v973_v53 = vadd.f32 %v8527_v51, %v8789_v36 }
 0x14c   : > { %v8831_v55 = vpack.c.bf16 %v1025_v39, %v1025_v39  ;;  %v8833_v49 = vpack.c.bf16 %v1023_v15, %v1023_v15  ;;  %v1026_v63 = vmax.f32 %v968_v18, 0.0  ;;  %v1024_v0 = vmax.f32 %v960_v31, 0.0  ;;  %1488 = vst.msk [vmem:[#allocation2 + $0xe0] sm:$0xf] %vm455_vm15, %v8837_v62  ;;  %1872 = vst.msk [vmem:[#allocation2 + $0xb4] sm:$0xf] %vm455_vm15, %v8837_v62 }
 0x14d   : > { %v8843_v50 = vrot.slane %v1275_v37, 4  ;;  %v1489_v56 = vld [vmem:[#allocation2 + $0xe8] sm:$0x1]  ;;  %v8850_v3 = vpop.f32.mrb[28].mxu0  ;;  %v1870_v1 = vsel %vm8471_vm0, %v1270_v24, %v1869_v60  ;;  %v1492_v19 = vld [vmem:[#allocation2 + $0xf0] sm:$0xf]  ;;  %v1296_v39 = vsel %vm8584_vm8, %v1288_v17, %v8818_v46  ;;  %v976_v17 = vadd.f32 %v8527_v51, %v8810_v33 }
 0x14e   : > { %v1316_v5 = vshrl.u32 %v8831_v55, 16  ;;  %v1319_v7 = vshll.u32 %v8831_v55, 16  ;;  %v1299_v8 = vshrl.u32 %v8833_v49, 16  ;;  %v1302_v10 = vshll.u32 %v8833_v49, 16  ;;  %v8857_v11 = vpop.f32.mrb[29].mxu0  ;;  %1600 = vrot.lane.b32.xlu0 %v1262_v4, %s8178_s23 }
 0x14f   : > { %v7465_v13 = vpack.c.bf16 %v1026_v63, %v1026_v63  ;;  %v7463_v14 = vpack.c.bf16 %v1024_v0, %v1024_v0  ;;  %v1876_v21 = vld [vmem:[#allocation2 + $0xc4] sm:$0xf]  ;;  %v8863_v25 = vpop.f32.mrb[30].mxu0  ;;  %1487 = vst [vmem:[#allocation2 + $0xd8] sm:$0xf] %v1486_v54  ;;  %v1490_v32 = vsel %vm8492_vm3, %v8843_v50, %v1489_v56  ;;  %v1874_v6 = vsel %vm8492_vm3, %v8843_v50, %v1873_v43 }
 0x150   : > { %v8866_v27 = vrot.slane %v1316_v5, 7  ;;  %v1301_v30 = vrot.slane %v1299_v8, 7  ;;  %1871 = vst [vmem:[#allocation2 + $0xac] sm:$0xf] %v1870_v1  ;;  %v8874_v52 = vpop.f32.mrb[31].mxu0  ;;  %1602 = vrot.lane.b32.xlu1 %v1263_v45, %s8178_s23  ;;  %v1493_v28 = vsel %vm8471_vm0, %v8848_v2, %v1492_v19  ;;  %v1877_v41 = vsel %vm8471_vm0, %v8848_v2, %v1876_v21 }
 0x151   : > { %v1324_v38 = vshrl.u32 %v7465_v13, 16  ;;  %v1327_v37 = vshll.u32 %v7465_v13, 16  ;;  %v1307_v59 = vshrl.u32 %v7463_v14, 16  ;;  %v1310_v9 = vshll.u32 %v7463_v14, 16  ;;  %1491 = vst [vmem:[#allocation2 + $0xe8] sm:$0x1] %v1490_v32 }
 0x152   : > { %1875 = vst [vmem:[#allocation2 + $0xbc] sm:$0x1] %v1874_v6  ;;  %v1322_v4 = vrot.slane %v8866_v27, 4  ;;  %v1305_v58 = vrot.slane %v1301_v30, 4  ;;  %1494 = vst [vmem:[#allocation2 + $0xf0] sm:$0xf] %v1493_v28  ;;  %v981_v45 = vadd.f32 %v8786_v47, %v8527_v51  ;;  %1604 = vrot.lane.b32.xlu0 %v1270_v24, %s8178_s23  ;;  %v8904_v57 = vor.u32 %v1302_v10, %v1301_v30 }
 0x153   : > { %v8884_v44 = vrot.slane %v1324_v38, 7  ;;  %v1309_v48 = vrot.slane %v1307_v59, 7  ;;  %1878 = vst [vmem:[#allocation2 + $0xc4] sm:$0xf] %v1877_v41  ;;  %v1496_v15 = vld [vmem:[#allocation2 + $0x100] sm:$0x1]  ;;  %v8933_v1 = vor.u32 %v1319_v7, %v8866_v27  ;;  %v997_v27 = vadd.f32 %v8850_v3, %v8527_v51 }
 0x154   : > { %v1880_v34 = vld [vmem:[#allocation2 + $0xd4] sm:$0x1]  ;;  %1495 = vst.msk [vmem:[#allocation2 + $0xf8] sm:$0xf] %vm455_vm15, %v1296_v39  ;;  %1879 = vst.msk [vmem:[#allocation2 + $0xcc] sm:$0xf] %vm455_vm15, %v1296_v39  ;;  %1606 = vrot.lane.b32.xlu1 %v8837_v62, %s8178_s23 }
 0x155   : > { %v1297_v18 = vrot.slane %v8801_v16, 4  ;;  %v1499_v47 = vld [vmem:[#allocation2 + $0x108] sm:$0xf]  ;;  %v1883_v46 = vld [vmem:[#allocation2 + $0xdc] sm:$0xf]  ;;  %v1329_v31 = vor.u32 %v1327_v37, %v8884_v44  ;;  %v1312_v49 = vor.u32 %v1310_v9, %v1309_v48  ;;  %v1029_v24 = vmax.f32 %v981_v45, 0.0 }
 0x156   : > { %v1027_v36 = vmax.f32 %v973_v53, 0.0  ;;  %v1030_v60 = vmax.f32 %v984_v12, 0.0  ;;  %v1028_v43 = vmax.f32 %v976_v17, 0.0  ;;  %v1500_v63 = vsel %vm8471_vm0, %v8904_v57, %v1499_v47  ;;  %1608 = vrot.lane.b32.xlu0 %v8843_v50, %s8178_s23  ;;  %v1503_v10 = vld [vmem:[#allocation2 + $0x118] sm:$0x1] }
 0x157   : > { %v1497_v16 = vsel %vm8492_vm3, %v1297_v18, %v1496_v15  ;;  %v1881_v40 = vsel %vm8492_vm3, %v1297_v18, %v1880_v34  ;;  %v8912_v33 = vpack.c.bf16 %v1029_v24, %v1029_v24  ;;  %v1884_v62 = vsel %vm8471_vm0, %v8904_v57, %v1883_v46  ;;  %1501 = vst [vmem:[#allocation2 + $0x108] sm:$0xf] %v1500_v63  ;;  %v1887_v50 = vld [vmem:[#allocation2 + $0xec] sm:$0x1]  ;;  %v1506_v19 = vld [vmem:[#allocation2 + $0x120] sm:$0xf] }
 0x158   : > { %1498 = vst [vmem:[#allocation2 + $0x100] sm:$0x1] %v1497_v16  ;;  %1882 = vst [vmem:[#allocation2 + $0xd4] sm:$0x1] %v1881_v40  ;;  %v7466_v0 = vpack.c.bf16 %v1027_v36, %v1027_v36  ;;  %v7469_v56 = vpack.c.bf16 %v1030_v60, %v1030_v60  ;;  %v1313_v5 = vsel %vm8584_vm8, %v1305_v58, %v1312_v49  ;;  %v8924_v8 = vrot.slane %v1309_v48, 4 }
 0x159   : > { %1885 = vst [vmem:[#allocation2 + $0xdc] sm:$0xf] %v1884_v62  ;;  %v1350_v13 = vshrl.u32 %v8912_v33, 16  ;;  %v1353_v14 = vshll.u32 %v8912_v33, 16  ;;  %v7467_v54 = vpack.c.bf16 %v1028_v43, %v1028_v43  ;;  %1502 = vst.msk [vmem:[#allocation2 + $0x110] sm:$0xf] %vm455_vm15, %v1313_v5  ;;  %1610 = vrot.lane.b32.xlu1 %v8848_v2, %s8178_s23  ;;  %v1507_v28 = vsel %vm8471_vm0, %v8933_v1, %v1506_v19 }
 0x15a   : > { %1886 = vst.msk [vmem:[#allocation2 + $0xe4] sm:$0xf] %vm455_vm15, %v1313_v5  ;;  %v1333_v21 = vshrl.u32 %v7466_v0, 16  ;;  %v1336_v30 = vshll.u32 %v7466_v0, 16  ;;  %v1358_v32 = vshrl.u32 %v7469_v56, 16  ;;  %v1361_v6 = vshll.u32 %v7469_v56, 16  ;;  %1612 = vrot.lane.b32.xlu0 %v1296_v39, %s8178_s23 }
 0x15b   : > { %v1890_v38 = vld [vmem:[#allocation2 + $0xf4] sm:$0xf]  ;;  %v8937_v37 = vrot.slane %v1350_v13, 7  ;;  %v1341_v59 = vshrl.u32 %v7467_v54, 16  ;;  %v1344_v9 = vshll.u32 %v7467_v54, 16  ;;  %v1504_v58 = vsel %vm8492_vm3, %v8924_v8, %v1503_v10 }
 0x15c   : > { %v1335_v55 = vrot.slane %v1333_v21, 7  ;;  %v8943_v7 = vrot.slane %v1358_v32, 7  ;;  %1505 = vst [vmem:[#allocation2 + $0x118] sm:$0x1] %v1504_v58  ;;  %v1888_v2 = vsel %vm8492_vm3, %v8924_v8, %v1887_v50  ;;  %1508 = vst [vmem:[#allocation2 + $0x120] sm:$0xf] %v1507_v28  ;;  %v1891_v39 = vsel %vm8471_vm0, %v8933_v1, %v1890_v38 }
 0x15d   : > { %v1356_v41 = vrot.slane %v8937_v37, 4  ;;  %v1343_v48 = vrot.slane %v1341_v59, 7  ;;  %1889 = vst [vmem:[#allocation2 + $0xec] sm:$0x1] %v1888_v2  ;;  %v8959_v45 = vsel %vm8584_vm8, %v1322_v4, %v1329_v31  ;;  %1614 = vrot.lane.b32.xlu1 %v1297_v18, %s8178_s23  ;;  %1892 = vst [vmem:[#allocation2 + $0xf4] sm:$0xf] %v1891_v39  ;;  %v989_v4 = vadd.f32 %v8527_v51, %v8857_v11 }
 0x15e   : > { %v1339_v15 = vrot.slane %v1335_v55, 4  ;;  %v8963_v34 = vor.u32 %v1361_v6, %v8943_v7  ;;  %1509 = vst.msk [vmem:[#allocation2 + $0x128] sm:$0xf] %vm455_vm15, %v8959_v45  ;;  %1893 = vst.msk [vmem:[#allocation2 + $0xfc] sm:$0xf] %vm455_vm15, %v8959_v45  ;;  %v8974_v18 = vrot.slane %v8884_v44, 4  ;;  %v1000_v47 = vadd.f32 %v8863_v25, %v8527_v51  ;;  %1616 = vrot.lane.b32.xlu0 %v8904_v57, %s8178_s23 }
 0x15f   : > { %v1510_v53 = vld [vmem:[#allocation2 + $0x130] sm:$0x1]  ;;  %v1894_v12 = vld [vmem:[#allocation2 + $0x104] sm:$0x1]  ;;  %v1346_v17 = vor.u32 %v1344_v9, %v1343_v48  ;;  %v992_v46 = vadd.f32 %v8527_v51, %v8874_v52  ;;  %v1513_v31 = vld [vmem:[#allocation2 + $0x138] sm:$0xf]  ;;  %v8982_v11 = vor.u32 %v1336_v30, %v1335_v55  ;;  %v1355_v58 = vor.u32 %v1353_v14, %v8937_v37 }
 0x160   : > { %v1897_v49 = vld [vmem:[#allocation2 + $0x10c] sm:$0xf]  ;;  %v1033_v3 = vmax.f32 %v997_v27, 0.0  ;;  %v1031_v24 = vmax.f32 %v989_v4, 0.0  ;;  %v8984_v36 = vrot.slane %v1343_v48, 4  ;;  %v1511_v44 = vsel %vm8492_vm3, %v8974_v18, %v1510_v53 }
 0x161   : > { %v1517_v16 = vld [vmem:[#allocation2 + $0x148] sm:$0x1]  ;;  %v1895_v51 = vsel %vm8492_vm3, %v8974_v18, %v1894_v12  ;;  %v1034_v25 = vmax.f32 %v1000_v47, 0.0  ;;  %v1032_v52 = vmax.f32 %v992_v46, 0.0  ;;  %1618 = vrot.lane.b32.xlu1 %v1313_v5, %s8178_s23  ;;  %1512 = vst [vmem:[#allocation2 + $0x130] sm:$0x1] %v1511_v44  ;;  %v1514_v60 = vsel %vm8471_vm0, %v8982_v11, %v1513_v31 }
 0x162   : > { %v8993_v57 = vpack.c.bf16 %v1033_v3, %v1033_v3  ;;  %v7470_v40 = vpack.c.bf16 %v1031_v24, %v1031_v24  ;;  %1896 = vst [vmem:[#allocation2 + $0x104] sm:$0x1] %v1895_v51  ;;  %v1898_v43 = vsel %vm8471_vm0, %v8982_v11, %v1897_v49  ;;  %1515 = vst [vmem:[#allocation2 + $0x138] sm:$0xf] %v1514_v60  ;;  %v1901_v5 = vld [vmem:[#allocation2 + $0x11c] sm:$0x1]  ;;  %1620 = vrot.lane.b32.xlu0 %v8924_v8, %s8178_s23 }
 0x163   : > { %v7473_v63 = vpack.c.bf16 %v1034_v25, %v1034_v25  ;;  %v7471_v62 = vpack.c.bf16 %v1032_v52, %v1032_v52  ;;  %1899 = vst [vmem:[#allocation2 + $0x10c] sm:$0xf] %v1898_v43  ;;  %v9003_v0 = vsel %vm8584_vm8, %v1339_v15, %v1346_v17  ;;  %v1518_v56 = vsel %vm8492_vm3, %v8984_v36, %v1517_v16  ;;  %v1904_v19 = vld [vmem:[#allocation2 + $0x124] sm:$0xf]  ;;  %v1520_v38 = vld [vmem:[#allocation2 + $0x150] sm:$0xf] }
 0x164   : > { %v1540_v10 = vshrl.u32 %v8993_v57, 16  ;;  %v1543_v13 = vshll.u32 %v8993_v57, 16  ;;  %v1367_v54 = vshrl.u32 %v7470_v40, 16  ;;  %v1370_v50 = vshll.u32 %v7470_v40, 16  ;;  %1516 = vst.msk [vmem:[#allocation2 + $0x140] sm:$0xf] %vm455_vm15, %v9003_v0 }
 0x165   : > { %1900 = vst.msk [vmem:[#allocation2 + $0x114] sm:$0xf] %vm455_vm15, %v9003_v0  ;;  %1519 = vst [vmem:[#allocation2 + $0x148] sm:$0x1] %v1518_v56  ;;  %v1548_v21 = vshrl.u32 %v7473_v63, 16  ;;  %v1551_v30 = vshll.u32 %v7473_v63, 16  ;;  %1622 = vrot.lane.b32.xlu1 %v8933_v1, %s8178_s23  ;;  %v1902_v9 = vsel %vm8492_vm3, %v8984_v36, %v1901_v5  ;;  %v1364_v1 = vsel %vm8584_vm8, %v1356_v41, %v8963_v34 }
 0x166   : > { %v1375_v32 = vshrl.u32 %v7471_v62, 16  ;;  %v1378_v6 = vshll.u32 %v7471_v62, 16  ;;  %v1542_v8 = vrot.slane %v1540_v10, 7  ;;  %v1369_v59 = vrot.slane %v1367_v54, 7  ;;  %v1524_v55 = vld [vmem:[#allocation2 + $0x160] sm:$0x1]  ;;  %1624 = vrot.lane.b32.xlu0 %v8959_v45, %s8178_s23 }
 0x167   : > { %v1908_v2 = vld [vmem:[#allocation2 + $0x134] sm:$0x1]  ;;  %v1550_v28 = vrot.slane %v1548_v21, 7  ;;  %1903 = vst [vmem:[#allocation2 + $0x11c] sm:$0x1] %v1902_v9  ;;  %v1365_v39 = vrot.slane %v8943_v7, 4  ;;  %v1521_v33 = vsel %vm8471_vm0, %v1355_v58, %v1520_v38  ;;  %v1905_v14 = vsel %vm8471_vm0, %v1355_v58, %v1904_v19 }
 0x168   : > { %v1377_v48 = vrot.slane %v1375_v32, 7  ;;  %v1546_v15 = vrot.slane %v1542_v8, 4  ;;  %v1373_v27 = vrot.slane %v1369_v59, 4  ;;  %1523 = vst.msk [vmem:[#allocation2 + $0x158] sm:$0xf] %vm455_vm15, %v1364_v1  ;;  %v1372_v17 = vor.u32 %v1370_v50, %v1369_v59 }
 0x169   : > { %1907 = vst.msk [vmem:[#allocation2 + $0x12c] sm:$0xf] %vm455_vm15, %v1364_v1  ;;  %v1911_v37 = vld [vmem:[#allocation2 + $0x13c] sm:$0xf]  ;;  %v1553_v4 = vor.u32 %v1551_v30, %v1550_v28  ;;  %1522 = vst [vmem:[#allocation2 + $0x150] sm:$0xf] %v1521_v33  ;;  %v1525_v7 = vsel %vm8492_vm3, %v1365_v39, %v1524_v55  ;;  %v1909_v45 = vsel %vm8492_vm3, %v1365_v39, %v1908_v2  ;;  %1626 = vrot.lane.b32.xlu1 %v8974_v18, %s8178_s23 }
 0x16a   : > { %v1380_v41 = vor.u32 %v1378_v6, %v1377_v48  ;;  %1906 = vst [vmem:[#allocation2 + $0x124] sm:$0xf] %v1905_v14  ;;  %v1527_v34 = vld [vmem:[#allocation2 + $0x168] sm:$0xf]  ;;  %v1531_v53 = vld [vmem:[#allocation2 + $0x178] sm:$0x1]  ;;  %v1545_v3 = vor.u32 %v1543_v13, %v1542_v8  ;;  %1628 = vrot.lane.b32.xlu0 %v8982_v11, %s8178_s23  ;;  %v1912_v44 = vsel %vm8471_vm0, %v1372_v17, %v1911_v37 }
 0x16b   : > { %v1915_v12 = vld [vmem:[#allocation2 + $0x14c] sm:$0x1]  ;;  %1526 = vst [vmem:[#allocation2 + $0x160] sm:$0x1] %v1525_v7  ;;  %1910 = vst [vmem:[#allocation2 + $0x134] sm:$0x1] %v1909_v45  ;;  %v1554_v24 = vsel %vm8584_vm8, %v1546_v15, %v1553_v4  ;;  %v1528_v18 = vsel %vm8471_vm0, %v1372_v17, %v1527_v34 }
 0x16c   : > { %v1382_v47 = vrot.slane %v1377_v48, 4  ;;  %v1918_v46 = vld [vmem:[#allocation2 + $0x154] sm:$0xf]  ;;  %v1922_v31 = vld [vmem:[#allocation2 + $0x164] sm:$0x1]  ;;  %v1381_v49 = vsel %vm8584_vm8, %v1373_v27, %v1380_v41  ;;  %v1555_v16 = vrot.slane %v1550_v28, 4 }
 0x16d   : > { %1530 = vst.msk [vmem:[#allocation2 + $0x170] sm:$0xf] %vm455_vm15, %v1381_v49  ;;  %1914 = vst.msk [vmem:[#allocation2 + $0x144] sm:$0xf] %vm455_vm15, %v1381_v49  ;;  %v1919_v11 = vsel %vm8471_vm0, %v1545_v3, %v1918_v46  ;;  %1630 = vrot.lane.b32.xlu1 %v9003_v0, %s8178_s23  ;;  %v1702_v52 = vld [vmem:[#allocation2] sm:$0xf] }
 0x16e   : > { %v1532_v51 = vsel %vm8492_vm3, %v1382_v47, %v1531_v53  ;;  %v1916_v61 = vsel %vm8492_vm3, %v1382_v47, %v1915_v12  ;;  %1921 = vst.msk [vmem:[#allocation2 + $0x15c] sm:$0xf] %vm455_vm15, %v1554_v24  ;;  %1529 = vst [vmem:[#allocation2 + $0x168] sm:$0xf] %v1528_v18  ;;  %v1923_v25 = vsel %vm8492_vm3, %v1555_v16, %v1922_v31  ;;  %1632 = vrot.lane.b32.xlu0 %v8984_v36, %s8178_s23  ;;  %vm1707_vm15 = vcmask 1040896  }
 0x16f   : > { %1913 = vst [vmem:[#allocation2 + $0x13c] sm:$0xf] %v1912_v44  ;;  %1533 = vst [vmem:[#allocation2 + $0x178] sm:$0x1] %v1532_v51  ;;  %v11526_v36 = vmov 0  ;;  %v11529_v40 = vmov 0 }
 0x170   : > { %1917 = vst [vmem:[#allocation2 + $0x14c] sm:$0x1] %v1916_v61  ;;  %1920 = vst [vmem:[#allocation2 + $0x154] sm:$0xf] %v1919_v11  ;;  %v11527_v36 = vsel %vm9080_vm2, 4294967295, %v11526_v36  ;;  %vm2593_vm8 = vcmask 523264  }
 0x171   : > { %1924 = vst [vmem:[#allocation2 + $0x164] sm:$0x1] %v1923_v25  ;;  %1634 = vrot.lane.b32.xlu1 %v1355_v58, %s8178_s23  ;;  %11528 = vst [vmem:[#allocation18_spill] sm:$0xff] %v11527_v36  ;;  %v1709_v43 = vld [vmem:[#allocation2 + $0x10] sm:$0x1] }
 0x172   : > { %1636 = vrot.lane.b32.xlu0 %v1364_v1, %s8178_s23  ;;  %vm9085_vm5 = vmand %vm1707_vm15, %vm348_vm4  ;;  %v1712_v5 = vld [vmem:[#allocation2 + $0x18] sm:$0xf]  ;;  %v1716_v30 = vld [vmem:[#allocation2 + $0x28] sm:$0x1]  ;;  %vm1997_vm4 = vsmask.f32 3328 }
 0x173   : > { %v11530_v40 = vsel %vm9085_vm5, 4294967295, %v11529_v40  ;;  %v1719_v6 = vld [vmem:[#allocation2 + $0x30] sm:$0xf]  ;;  %v1723_v15 = vld [vmem:[#allocation2 + $0x40] sm:$0x1] }
 0x174   : > { %11531 = vst [vmem:[#allocation19_spill] sm:$0xff] %v11530_v40  ;;  %vm1998_vm15 = vsmask.f32 7440  ;;  %v1807_v26 = vld [vmem:[#allocation2 + $0x160] sm:$0x1] }
 0x175   : > { %1638 = vrot.lane.b32.xlu1 %v1365_v39, %s8178_s23  ;;  %vm9113_vm6 = vmor %vm1997_vm4, %vm1998_vm15 }
 0x176   : > { %1640 = vrot.lane.b32.xlu0 %v1372_v17, %s8178_s23 }
 0x179   : > { %1642 = vrot.lane.b32.xlu1 %v1381_v49, %s8178_s23 }
 0x17a   : > { %1644 = vrot.lane.b32.xlu0 %v1382_v47, %s8178_s23 }
 0x17d   : > { %1646 = vrot.lane.b32.xlu1 %v1545_v3, %s8178_s23 }
 0x17e   : > { %1648 = vrot.lane.b32.xlu0 %v1554_v24, %s8178_s23 }
 0x181   : > { %1650 = vrot.lane.b32.xlu1 %v1555_v16, %s8178_s23  ;;  %v1726_v16 = vld [vmem:[#allocation2 + $0x48] sm:$0xf] }
 0x192   : > { %v1557_v57 = vpop.permute.xlu0 %1556 }
 0x193   : > { %v1703_v60 = vsel %vm9080_vm2, %v1557_v57, %v1702_v52 }
 0x194   : > { %1704 = vst [vmem:[#allocation2] sm:$0xf] %v1703_v60 }
 0x195   : > { %v1561_v63 = vpop.permute.xlu1 %1560 }
 0x196   : > { %v1710_v62 = vsel %vm9085_vm5, %v1561_v63, %v1709_v43 }
 0x197   : > { %1711 = vst [vmem:[#allocation2 + $0x10] sm:$0x1] %v1710_v62  ;;  %v1559_v0 = vpop.permute.xlu0 %1558 }
 0x198   : > { %1706 = vst.msk [vmem:[#allocation2 + $0x8] sm:$0xf] %vm1700_vm13, %v1559_v0 }
 0x199   : > { %v1563_v56 = vpop.permute.xlu1 %1562 }
 0x19a   : > { %v1713_v10 = vsel %vm9080_vm2, %v1563_v56, %v1712_v5 }
 0x19b   : > { %1714 = vst [vmem:[#allocation2 + $0x18] sm:$0xf] %v1713_v10  ;;  %v1565_v13 = vpop.permute.xlu0 %1564  ;;  %v1925_v54 = vld [vmem:[#allocation2] sm:$0xff] }
 0x19c   : > { %1715 = vst.msk [vmem:[#allocation2 + $0x20] sm:$0xf] %vm1700_vm13, %v1565_v13  ;;  %v2001_v50 = vshrl.u32 %v1925_v54, 16  ;;  %v2004_v19 = vshll.u32 %v1925_v54, 16  ;;  %v3228_v55 = vld [vmem:[#allocation2] sm:$0xee] }
 0x19d   : > { %v1567_v21 = vpop.permute.xlu1 %1566  ;;  %v7081_v4 = vrot.slane %v3228_v55, 9 }
 0x19e   : > { %v1717_v32 = vsel %vm9085_vm5, %v1567_v21, %v1716_v30  ;;  %v2003_v38 = vrot.slane %v2001_v50, 4  ;;  %v2006_v8 = vrot.slane %v2004_v19, 5  ;;  %v9099_v58 = vld [vmem:[#allocation2 + $0x10] sm:$0x11]  ;;  %v1730_v30 = vld [vmem:[#allocation2 + $0x58] sm:$0x1] }
 0x19f   : > { %1718 = vst [vmem:[#allocation2 + $0x28] sm:$0x1] %v1717_v32  ;;  %v1569_v59 = vpop.permute.xlu0 %1568  ;;  %v1926_v9 = vld [vmem:[#allocation2 + $0x8] sm:$0xff]  ;;  %v2020_v37 = vshll.u32 %v9099_v58, 16  ;;  %v3284_v44 = vrot.slane %v9099_v58, 5 }
 0x1a0   : > { %v1720_v2 = vsel %vm9080_vm2, %v1569_v59, %v1719_v6  ;;  %v7022_v28 = vcombine.high %v1925_v54, %v1926_v9  ;;  %v7021_v48 = vcombine.low %v1925_v54, %v1926_v9  ;;  %v2007_v1 = vor.u32 %v2006_v8, %v2003_v38 }
 0x1a1   : > { %1721 = vst [vmem:[#allocation2 + $0x30] sm:$0xf] %v1720_v2  ;;  %v1571_v39 = vpop.permute.xlu1 %1570  ;;  %v2010_v27 = vshll.u32 %v1926_v9, 16  ;;  %v2014_v33 = vshrl.u32 %v1926_v9, 16  ;;  %v3281_v41 = vrot.slane %v1926_v9, 5  ;;  %v2022_v52 = vrot.slane %v2020_v37, 5 }
 0x1a2   : > { %1722 = vst.msk [vmem:[#allocation2 + $0x38] sm:$0xf] %vm1700_vm13, %v1571_v39  ;;  %7065 = vmatprep.mubr.msk.bf16.mxu0 %vm2593_vm8, %v7022_v28  ;;  %v1927_v14 = vld [vmem:[#allocation2 + $0x18] sm:$0xff]  ;;  %v2008_v49 = vrot.slane %v2007_v1, 4  ;;  %v7916_v28 = vld [vmem:[%s11451_s3 + $0xc0] sm:$0xff]  }
 0x1a3   : > { %v1573_v7 = vpop.permute.xlu0 %1572  ;;  %3100 = vmatmul.mubr.bf16.vlgmr.msra.gmra.mrb[32].mxu0 %v7021_v48  ;;  %v9106_v45 = vld [vmem:[#allocation2 + $0x20] sm:$0xff]  ;;  %v2025_v34 = vshrl.u32 %v1927_v14, 16  ;;  %v2028_v53 = vshll.u32 %v1927_v14, 16  ;;  %v2012_v12 = vrot.slane %v2010_v27, 5  ;;  %v2016_v17 = vrot.slane %v2014_v33, 4 }
 0x1a4   : > { %v1724_v47 = vsel %vm9085_vm5, %v1573_v7, %v1723_v15  ;;  %v7024_v46 = vcombine.high %v1927_v14, %v9106_v45  ;;  %v2034_v3 = vshll.u32 %v9106_v45, 16  ;;  %v7023_v57 = vcombine.low %v1927_v14, %v9106_v45  ;;  %v1733_v1 = vld [vmem:[#allocation2 + $0x60] sm:$0xf] }
 0x1a5   : > { %1725 = vst [vmem:[#allocation2 + $0x40] sm:$0x1] %v1724_v47  ;;  %v1575_v24 = vpop.permute.xlu1 %1574  ;;  %v2017_v18 = vor.u32 %v2016_v17, %v2012_v12  ;;  %v2027_v51 = vrot.slane %v2025_v34, 4  ;;  %v2030_v61 = vrot.slane %v2028_v53, 5  ;;  %v2038_v43 = vshrl.u32 %v9106_v45, 16 }
 0x1a6   : > { %v1727_v25 = vsel %vm9080_vm2, %v1575_v24, %v1726_v16  ;;  %7066 = vmatprep.mubr.msk.bf16.mxu0 %vm2593_vm8, %v7024_v46  ;;  %v9129_v60 = vld [vmem:[#allocation2 + $0x28] sm:$0x11]  ;;  %v2036_v56 = vrot.slane %v2034_v3, 5  ;;  %v2013_v10 = vsel %vm9113_vm6, %v2008_v49, %v2012_v12  ;;  %v9140_v50 = vsel %vm9121_vm1, %v7081_v4, %v3281_v41 }
 0x1a7   : > { %1728 = vst [vmem:[#allocation2 + $0x48] sm:$0xf] %v1727_v25  ;;  %v1577_v63 = vpop.permute.xlu0 %1576  ;;  %v2018_v62 = vrot.slane %v2017_v18, 4  ;;  %v2031_v0 = vor.u32 %v2030_v61, %v2027_v51  ;;  %v2044_v5 = vshll.u32 %v9129_v60, 16  ;;  %v2040_v54 = vrot.slane %v2038_v43, 4  ;;  %v7918_v24 = vld [vmem:[%s11451_s3 + $0xc8] sm:$0xff]  }
 0x1a8   : > { %1729 = vst.msk [vmem:[#allocation2 + $0x50] sm:$0xf] %vm1700_vm13, %v1577_v63  ;;  %v9136_v13 = vld [vmem:[#allocation2 + $0x30] sm:$0xff]  ;;  %v3283_v19 = vrot.slane %v3281_v41, 4  ;;  %v3288_v33 = vrot.slane %v9106_v45, 5 }
 0x1a9   : > { %v1579_v21 = vpop.permute.xlu1 %1578  ;;  %v2023_v32 = vsel %vm9113_vm6, %v2018_v62, %v2022_v52  ;;  %v9144_v6 = vld [vmem:[#allocation2 + $0x38] sm:$0xff]  ;;  %v2049_v38 = vshrl.u32 %v9136_v13, 16  ;;  %v2052_v8 = vshll.u32 %v9136_v13, 16  ;;  %v2032_v59 = vrot.slane %v2031_v0, 4 }
 0x1aa   : > { %v1731_v9 = vsel %vm9085_vm5, %v1579_v21, %v1730_v30  ;;  %v6961_v58 = vcombine.low %v2013_v10, %v2023_v32  ;;  %v6962_v55 = vcombine.high %v2013_v10, %v2023_v32  ;;  %v7026_v2 = vcombine.high %v9136_v13, %v9144_v6  ;;  %v1740_v10 = vld [vmem:[#allocation2 + $0x78] sm:$0xf] }
 0x1ab   : > { %1732 = vst [vmem:[#allocation2 + $0x58] sm:$0x1] %v1731_v9  ;;  %v1581_v48 = vpop.permute.xlu0 %1580  ;;  %3108 = vmatmul.mubr.bf16.gmra.mrb[36].mxu0 %v7023_v57  ;;  %v9157_v39 = vsel %vm9113_vm6, %v2032_v59, %v2036_v56  ;;  %v2041_v15 = vor.u32 %v2040_v54, %v2036_v56  ;;  %v2046_v27 = vrot.slane %v2044_v5, 5  ;;  %v2051_v4 = vrot.slane %v2049_v38, 4  ;;  %v9198_v32 = vld [vmem:[#allocation2 + $0x18] sm:$0xee] }
 0x1ac   : > { %v1734_v14 = vsel %vm9080_vm2, %v1581_v48, %v1733_v1  ;;  %7005 = vmatprep.mubr.msk.bf16.mxu1 %vm2593_vm8, %v6962_v55  ;;  %7067 = vmatprep.mubr.msk.bf16.mxu0 %vm2593_vm8, %v7026_v2  ;;  %v9164_v37 = vld [vmem:[#allocation2 + $0x40] sm:$0x11]  ;;  %v2054_v41 = vrot.slane %v2052_v8, 5  ;;  %v2058_v7 = vshll.u32 %v9144_v6, 16  ;;  %v2062_v12 = vshrl.u32 %v9144_v6, 16 }
 0x1ad   : > { %1735 = vst [vmem:[#allocation2 + $0x60] sm:$0xf] %v1734_v14  ;;  %2675 = vmatmul.mubr.bf16.vlgmr.msra.gmra.mrb[0].mxu1 %v6961_v58  ;;  %v1583_v34 = vpop.permute.xlu1 %1582  ;;  %v2042_v53 = vrot.slane %v2041_v15, 4  ;;  %v2068_v17 = vshll.u32 %v9164_v37, 16  ;;  %v9171_v47 = vsel %vm9121_vm1, %v3283_v19, %v3284_v44  ;;  %v1737_v44 = vld [vmem:[#allocation2 + $0x70] sm:$0x1]  ;;  %v7025_v0 = vcombine.low %v9136_v13, %v9144_v6 }
 0x1ae   : > { %3649 = vmatpush1.bf16.msra.mxu1 %v7916_v28  ;;  %1736 = vst.msk [vmem:[#allocation2 + $0x68] sm:$0xf] %vm1700_vm13, %v1583_v34  ;;  %v9174_v46 = vld [vmem:[#allocation2 + $0x48] sm:$0xff]  ;;  %v2055_v49 = vor.u32 %v2054_v41, %v2051_v4  ;;  %v2060_v3 = vrot.slane %v2058_v7, 5  ;;  %v2064_v43 = vrot.slane %v2062_v12, 4  ;;  %v7920_v58 = vld [vmem:[%s11451_s3 + $0xd0] sm:$0xff]  }
 0x1af   : > { %v1585_v51 = vpop.permute.xlu0 %1584  ;;  %v2047_v61 = vsel %vm9113_vm6, %v2042_v53, %v2046_v27  ;;  %v9185_v25 = vld [vmem:[#allocation2 + $0x50] sm:$0xff]  ;;  %v2073_v52 = vshrl.u32 %v9174_v46, 16  ;;  %v2076_v57 = vshll.u32 %v9174_v46, 16  ;;  %3650 = vmatprep.subr.bf16.mxu1 %v11465_v20  ;;  %v2070_v30 = vrot.slane %v2068_v17, 5  ;;  %v1744_v7 = vld [vmem:[#allocation2 + $0x88] sm:$0x1] }
 0x1b0   : > { %v1738_v63 = vsel %vm9085_vm5, %v1585_v51, %v1737_v44  ;;  %v6964_v62 = vcombine.high %v9157_v39, %v2047_v61  ;;  %v6963_v56 = vcombine.low %v9157_v39, %v2047_v61  ;;  %v7028_v54 = vcombine.high %v9174_v46, %v9185_v25  ;;  %v7923_v51 = vld [vmem:[%s11451_s3 + $0xd8] sm:$0xff]  }
 0x1b1   : > { %1739 = vst [vmem:[#allocation2 + $0x70] sm:$0x1] %v1738_v63  ;;  %v1587_v5 = vpop.permute.xlu1 %1586  ;;  %v2056_v19 = vrot.slane %v2055_v49, 4  ;;  %v2065_v21 = vor.u32 %v2064_v43, %v2060_v3  ;;  %v2075_v8 = vrot.slane %v2073_v52, 4  ;;  %v2078_v59 = vrot.slane %v2076_v57, 5 }
 0x1b2   : > { %7006 = vmatprep.mubr.msk.bf16.mxu1 %vm2593_vm8, %v6964_v62  ;;  %v1741_v38 = vsel %vm9080_vm2, %v1587_v5, %v1740_v10  ;;  %3651 = vmatpush1.bf16.msra.mxu1 %v7918_v24  ;;  %v9203_v13 = vld [vmem:[#allocation2 + $0x58] sm:$0x11]  ;;  %v2082_v9 = vshll.u32 %v9185_v25, 16  ;;  %v2086_v48 = vshrl.u32 %v9185_v25, 16  ;;  %v7082_v14 = vrot.slane %v9198_v32, 9 }
 0x1b3   : > { %1742 = vst [vmem:[#allocation2 + $0x78] sm:$0xf] %v1741_v38  ;;  %v1589_v55 = vpop.permute.xlu0 %1588  ;;  %3116 = vmatmul.mubr.bf16.gmra.mrb[40].mxu0 %v7025_v0  ;;  %v9211_v2 = vsel %vm9113_vm6, %v2056_v19, %v2060_v3  ;;  %v2066_v28 = vrot.slane %v2065_v21, 4  ;;  %v2092_v1 = vshll.u32 %v9203_v13, 16  ;;  %3652 = vmatprep.subr.bf16.mxu1 %v11465_v20  ;;  %v2079_v15 = vor.u32 %v2078_v59, %v2075_v8  ;;  %v1747_v52 = vld [vmem:[#allocation2 + $0x90] sm:$0xf] }
 0x1b4   : > { %1743 = vst.msk [vmem:[#allocation2 + $0x80] sm:$0xf] %vm1700_vm13, %v1589_v55  ;;  %7068 = vmatprep.mubr.msk.bf16.mxu0 %vm2593_vm8, %v7028_v54  ;;  %v9218_v39 = vld [vmem:[#allocation2 + $0x60] sm:$0xff]  ;;  %v2084_v27 = vrot.slane %v2082_v9, 5  ;;  %v3291_v4 = vrot.slane %v9129_v60, 5  ;;  %v2088_v49 = vrot.slane %v2086_v48, 4  ;;  %v7027_v60 = vcombine.low %v9174_v46, %v9185_v25 }
 0x1b5   : > { %2683 = vmatmul.mubr.bf16.gmra.mrb[4].mxu1 %v6963_v56  ;;  %v1591_v41 = vpop.permute.xlu1 %1590  ;;  %v2071_v34 = vsel %vm9113_vm6, %v2066_v28, %v2070_v30  ;;  %v9224_v53 = vld [vmem:[#allocation2 + $0x68] sm:$0xff]  ;;  %v2097_v12 = vshrl.u32 %v9218_v39, 16  ;;  %v2100_v17 = vshll.u32 %v9218_v39, 16  ;;  %v3290_v44 = vrot.slane %v3288_v33, 4  ;;  %v1751_v28 = vld [vmem:[#allocation2 + $0xa0] sm:$0x1] }
 0x1b6   : > { %v1745_v3 = vsel %vm9085_vm5, %v1591_v41, %v1744_v7  ;;  %v6966_v24 = vcombine.high %v9211_v2, %v2071_v34  ;;  %3653 = vmatpush1.bf16.msra.mxu1 %v7920_v58  ;;  %v6965_v57 = vcombine.low %v9211_v2, %v2071_v34  ;;  %v2080_v43 = vrot.slane %v2079_v15, 4  ;;  %v7925_v58 = vld [vmem:[%s11451_s3 + $0xe0] sm:$0xff]  }
 0x1b7   : > { %1746 = vst [vmem:[#allocation2 + $0x88] sm:$0x1] %v1745_v3  ;;  %v1593_v61 = vpop.permute.xlu0 %1592  ;;  %v2089_v63 = vor.u32 %v2088_v49, %v2084_v27  ;;  %v2094_v62 = vrot.slane %v2092_v1, 5  ;;  %3654 = vmatprep.subr.bf16.mxu1 %v11465_v20  ;;  %v2099_v56 = vrot.slane %v2097_v12, 4  ;;  %v2102_v5 = vrot.slane %v2100_v17, 5 }
 0x1b8   : > { %7007 = vmatprep.mubr.msk.bf16.mxu1 %vm2593_vm8, %v6966_v24  ;;  %v1748_v46 = vsel %vm9080_vm2, %v1593_v61, %v1747_v52  ;;  %v9243_v0 = vld [vmem:[#allocation2 + $0x70] sm:$0x11]  ;;  %v2106_v10 = vshll.u32 %v9224_v53, 16  ;;  %v9248_v19 = vsel %vm9113_vm6, %v2080_v43, %v2084_v27  ;;  %v2110_v30 = vshrl.u32 %v9224_v53, 16  ;;  %v1754_v17 = vld [vmem:[#allocation2 + $0xa8] sm:$0xf] }
 0x1b9   : > { %1749 = vst [vmem:[#allocation2 + $0x90] sm:$0xf] %v1748_v46  ;;  %v1595_v54 = vpop.permute.xlu1 %1594  ;;  %v2090_v21 = vrot.slane %v2089_v63, 4  ;;  %v2116_v32 = vshll.u32 %v9243_v0, 16  ;;  %v7030_v38 = vcombine.high %v9218_v39, %v9224_v53  ;;  %v2103_v59 = vor.u32 %v2102_v5, %v2099_v56  ;;  %v3232_v40 = vld [vmem:[#allocation2 + $0x60] sm:$0xee] }
 0x1ba   : > { %1750 = vst.msk [vmem:[#allocation2 + $0x98] sm:$0xf] %vm1700_vm13, %v1595_v54  ;;  %v9255_v8 = vld [vmem:[#allocation2 + $0x78] sm:$0xff]  ;;  %v2108_v9 = vrot.slane %v2106_v10, 5  ;;  %3655 = vmatpush1.bf16.msra.mxu1 %v7923_v51  ;;  %v9262_v55 = vsel %vm9121_vm1, %v3290_v44, %v3291_v4  ;;  %v2112_v41 = vrot.slane %v2110_v30, 4  ;;  %v9282_v34 = vsel %vm9121_vm1, %v7082_v14, %v3288_v33  ;;  %v7927_v14 = vld [vmem:[%s11451_s3 + $0xe8] sm:$0xff]  }
 0x1bb   : > { %3124 = vmatmul.mubr.bf16.gmra.mrb[44].mxu0 %v7027_v60  ;;  %v9266_v48 = vsel %vm9113_vm6, %v2090_v21, %v2094_v62  ;;  %v9268_v1 = vld [vmem:[#allocation2 + $0x80] sm:$0xff]  ;;  %v2121_v15 = vshrl.u32 %v9255_v8, 16  ;;  %v2124_v27 = vshll.u32 %v9255_v8, 16  ;;  %3656 = vmatprep.subr.bf16.mxu1 %v11465_v20  ;;  %v7029_v49 = vcombine.low %v9218_v39, %v9224_v53  ;;  %v1758_v21 = vld [vmem:[#allocation2 + $0xb8] sm:$0x1] }
 0x1bc   : > { %v1597_v2 = vpop.permute.xlu0 %1596  ;;  %7069 = vmatprep.mubr.msk.bf16.mxu0 %vm2593_vm8, %v7030_v38  ;;  %v6968_v7 = vcombine.high %v9248_v19, %v9266_v48  ;;  %v2104_v3 = vrot.slane %v2103_v59, 4  ;;  %v2113_v24 = vor.u32 %v2112_v41, %v2108_v9  ;;  %v2118_v60 = vrot.slane %v2116_v32, 5 }
 0x1bd   : > { %v1752_v4 = vsel %vm9085_vm5, %v1597_v2, %v1751_v28  ;;  %2691 = vmatmul.mubr.bf16.gmra.mrb[8].mxu1 %v6965_v57  ;;  %v1599_v12 = vpop.permute.xlu1 %1598  ;;  %v2123_v44 = vrot.slane %v2121_v15, 4  ;;  %v2126_v61 = vrot.slane %v2124_v27, 5  ;;  %v2130_v33 = vshll.u32 %v9268_v1, 16  ;;  %v7930_v28 = vld [vmem:[%s11451_s3 + $0xf0] sm:$0xff]   ;;  %v1761_v27 = vld [vmem:[#allocation2 + $0xc0] sm:$0xf] }
 0x1be   : > { %1753 = vst [vmem:[#allocation2 + $0xa0] sm:$0x1] %v1752_v4  ;;  %v1755_v51 = vsel %vm9080_vm2, %v1599_v12, %v1754_v17  ;;  %7008 = vmatprep.mubr.msk.bf16.mxu1 %vm2593_vm8, %v6968_v7  ;;  %v1986_v45 = vld [vmem:[#allocation2 + $0x88] sm:$0x11]  ;;  %3657 = vmatpush1.bf16.msra.mxu1 %v7925_v58  ;;  %v9295_v52 = vsel %vm9113_vm6, %v2104_v3, %v2108_v9  ;;  %v2114_v57 = vrot.slane %v2113_v24, 4  ;;  %v2134_v43 = vshrl.u32 %v9268_v1, 16 }
 0x1bf   : > { %1756 = vst [vmem:[#allocation2 + $0xa8] sm:$0xf] %v1755_v51  ;;  %v2140_v63 = vshll.u32 %v1986_v45, 16  ;;  %3658 = vmatprep.subr.bf16.mxu1 %v11465_v20  ;;  %v2127_v46 = vor.u32 %v2126_v61, %v2123_v44  ;;  %v2132_v56 = vrot.slane %v2130_v33, 5  ;;  %v7032_v2 = vcombine.high %v9255_v8, %v9268_v1  ;;  %v7932_v33 = vld [vmem:[%s11451_s3 + $0xf8] sm:$0xff]  }
 0x1c0   : > { %v1601_v39 = vpop.permute.xlu0 %1600  ;;  %v9300_v62 = vld [vmem:[#allocation2 + $0x90] sm:$0xff]  ;;  %v9308_v30 = vsel %vm9113_vm6, %v2114_v57, %v2118_v60  ;;  %v2136_v9 = vrot.slane %v2134_v43, 4  ;;  %v6967_v41 = vcombine.low %v9248_v19, %v9266_v48  ;;  %v7031_v57 = vcombine.low %v9255_v8, %v9268_v1 }
 0x1c1   : > { %1757 = vst.msk [vmem:[#allocation2 + $0xb0] sm:$0xf] %vm1700_vm13, %v1601_v39  ;;  %v9310_v32 = vld [vmem:[#allocation2 + $0x98] sm:$0xff]  ;;  %v2145_v38 = vshrl.u32 %v9300_v62, 16  ;;  %v2148_v59 = vshll.u32 %v9300_v62, 16  ;;  %v6970_v4 = vcombine.high %v9295_v52, %v9308_v30  ;;  %v2128_v60 = vrot.slane %v2127_v46, 4 }
 0x1c2   : > { %v1603_v54 = vpop.permute.xlu1 %1602  ;;  %3659 = vmatpush1.bf16.msra.mxu1 %v7927_v14  ;;  %v2137_v7 = vor.u32 %v2136_v9, %v2132_v56  ;;  %v2154_v24 = vshll.u32 %v9310_v32, 16  ;;  %v2142_v48 = vrot.slane %v2140_v63, 5  ;;  %v2158_v45 = vshrl.u32 %v9310_v32, 16  ;;  %v1765_v39 = vld [vmem:[#allocation2 + $0xd0] sm:$0x1] }
 0x1c3   : > { %v1759_v58 = vsel %vm9085_vm5, %v1603_v54, %v1758_v21  ;;  %3132 = vmatmul.mubr.bf16.gmra.mrb[48].mxu0 %v7029_v49  ;;  %3660 = vmatprep.subr.bf16.mxu1 %v11465_v20  ;;  %v2147_v17 = vrot.slane %v2145_v38, 4  ;;  %v2150_v3 = vrot.slane %v2148_v59, 5  ;;  %v1768_v9 = vld [vmem:[#allocation2 + $0xd8] sm:$0xf]  ;;  %v11549_v31 = vcombine.high %v9282_v34, %v9262_v55 }
 0x1c4   : > { %1760 = vst [vmem:[#allocation2 + $0xb8] sm:$0x1] %v1759_v58  ;;  %v1605_v15 = vpop.permute.xlu0 %1604  ;;  %7070 = vmatprep.mubr.msk.bf16.mxu0 %vm2593_vm8, %v7032_v2  ;;  %v2138_v19 = vrot.slane %v2137_v7, 4  ;;  %v9337_v61 = vrot.slane %v2154_v24, 5  ;;  %v2160_v63 = vrot.slane %v2158_v45, 4  ;;  %v9353_v58 = vsel %vm9113_vm6, %v2128_v60, %v2132_v56 }
 0x1c5   : > { %v1762_v12 = vsel %vm9080_vm2, %v1605_v15, %v1761_v27  ;;  %2699 = vmatmul.mubr.bf16.gmra.mrb[12].mxu1 %v6967_v41  ;;  %v9330_v51 = vld [vmem:[#allocation2 + $0xa0] sm:$0x11]  ;;  %v2151_v21 = vor.u32 %v2150_v3, %v2147_v17  ;;  %v7034_v15 = vcombine.high %v9300_v62, %v9310_v32  ;;  %v3295_v56 = vrot.slane %v9144_v6, 5  ;;  %v1772_v7 = vld [vmem:[#allocation2 + $0xe8] sm:$0x1] }
 0x1c6   : > { %1763 = vst [vmem:[#allocation2 + $0xc0] sm:$0xf] %v1762_v12  ;;  %v1607_v49 = vpop.permute.xlu1 %1606  ;;  %7009 = vmatprep.mubr.msk.bf16.mxu1 %vm2593_vm8, %v6970_v4  ;;  %v9335_v44 = vld [vmem:[#allocation2 + $0xa8] sm:$0xff]  ;;  %3661 = vmatpush1.bf16.msra.mxu1 %v7930_v28  ;;  %v2164_v38 = vshll.u32 %v9330_v51, 16  ;;  %v9357_v8 = vsel %vm9113_vm6, %v2138_v19, %v2142_v48  ;;  %v2161_v2 = vor.u32 %v2160_v63, %v9337_v61  ;;  %v7935_v17 = vld [vmem:[%s11451_s3 + $0x100] sm:$0xff]   ;;  %v3298_v24 = vrot.slane %v9164_v37, 5 }
 0x1c7   : > { %1764 = vst.msk [vmem:[#allocation2 + $0xc8] sm:$0xf] %vm1700_vm13, %v1607_v49  ;;  %3662 = vmatprep.subr.bf16.mxu1 %v11465_v20  ;;  %v2169_v54 = vshrl.u32 %v9335_v44, 16  ;;  %v2172_v1 = vshll.u32 %v9335_v44, 16  ;;  %v6969_v4 = vcombine.low %v9295_v52, %v9308_v30  ;;  %v9374_v3 = vld [vmem:[#allocation2 + $0x30] sm:$0xee]  ;;  %v6972_v52 = vcombine.high %v9353_v58, %v9357_v8 }
 0x1c8   : > { %v1609_v14 = vpop.permute.xlu0 %1608  ;;  %v9344_v43 = vld [vmem:[#allocation2 + $0xb0] sm:$0xff]  ;;  %v2152_v30 = vrot.slane %v2151_v21, 4  ;;  %v2166_v49 = vrot.slane %v2164_v38, 5 }
 0x1c9   : > { %v1766_v46 = vsel %vm9085_vm5, %v1609_v14, %v1765_v39  ;;  %v2178_v27 = vshll.u32 %v9344_v43, 16  ;;  %v2182_v12 = vshrl.u32 %v9344_v43, 16  ;;  %v2171_v48 = vrot.slane %v2169_v54, 4 }
 0x1ca   : > { %1767 = vst [vmem:[#allocation2 + $0xd0] sm:$0x1] %v1766_v46  ;;  %3663 = vmatpush1.bf16.msra.mxu1 %v7932_v33  ;;  %v2162_v33 = vrot.slane %v2161_v2, 4  ;;  %v2174_v37 = vrot.slane %v2172_v1, 5  ;;  %v3297_v54 = vrot.slane %v3295_v56, 4  ;;  %v7940_v1 = vld [vmem:[%s11451_s3 + $0x108] sm:$0xff]  }
 0x1cb   : > { %v1611_v59 = vpop.permute.xlu1 %1610  ;;  %3140 = vmatmul.mubr.bf16.gmra.mrb[52].mxu0 %v7031_v57  ;;  %3664 = vmatprep.subr.bf16.mxu1 %v11465_v20  ;;  %v9383_v19 = vld [vmem:[#allocation2 + $0xb8] sm:$0x11]  ;;  %v9387_v39 = vrot.slane %v2178_v27, 5  ;;  %v2184_v57 = vrot.slane %v2182_v12, 4  ;;  %v7083_v2 = vrot.slane %v9374_v3, 9  ;;  %v7036_v3 = vcombine.high %v9335_v44, %v9344_v43 }
 0x1cc   : > { %v1769_v28 = vsel %vm9080_vm2, %v1611_v59, %v1768_v9  ;;  %v1613_v41 = vpop.permute.xlu0 %1612  ;;  %7071 = vmatprep.mubr.msk.bf16.mxu0 %vm2593_vm8, %v7034_v15  ;;  %v1775_v59 = vld [vmem:[#allocation2 + $0xf0] sm:$0xf]  ;;  %v7033_v9 = vcombine.low %v9300_v62, %v9310_v32  ;;  %v9407_v15 = vsel %vm9113_vm6, %v2152_v30, %v9337_v61  ;;  %v2188_v27 = vshll.u32 %v9383_v19, 16  ;;  %v1779_v61 = vld [vmem:[#allocation2 + $0x100] sm:$0x1] }
 0x1cd   : > { %1770 = vst [vmem:[#allocation2 + $0xd8] sm:$0xf] %v1769_v28  ;;  %1771 = vst.msk [vmem:[#allocation2 + $0xe0] sm:$0xf] %vm1700_vm13, %v1613_v41  ;;  %v9381_v60 = vld [vmem:[#allocation2 + $0xc0] sm:$0xff]  ;;  %2707 = vmatmul.mubr.bf16.gmra.mrb[16].mxu1 %v6969_v4  ;;  %v9414_v4 = vsel %vm9113_vm6, %v2162_v33, %v2166_v49  ;;  %v2185_v12 = vor.u32 %v2184_v57, %v9387_v39  ;;  %v6971_v49 = vcombine.low %v9353_v58, %v9357_v8 }
 0x1ce   : > { %v9385_v14 = vld [vmem:[#allocation2 + $0xc8] sm:$0xff]  ;;  %7010 = vmatprep.mubr.msk.bf16.mxu1 %vm2593_vm8, %v6972_v52  ;;  %v2193_v46 = vshrl.u32 %v9381_v60, 16  ;;  %v2196_v21 = vshll.u32 %v9381_v60, 16  ;;  %3665 = vmatpush1.bf16.msra.mxu1 %v7935_v17  ;;  %v6974_v58 = vcombine.high %v9407_v15, %v9414_v4  ;;  %v3236_v29 = vld [vmem:[#allocation2 + $0xc0] sm:$0xee] }
 0x1cf   : > { %v1615_v45 = vpop.permute.xlu1 %1614  ;;  %v2202_v41 = vshll.u32 %v9385_v14, 16  ;;  %3666 = vmatprep.subr.bf16.mxu1 %v11465_v20  ;;  %v2206_v17 = vshrl.u32 %v9385_v14, 16 }
 0x1d0   : > { %v1773_v63 = vsel %vm9085_vm5, %v1615_v45, %v1772_v7  ;;  %v1617_v38 = vpop.permute.xlu0 %1616  ;;  %v2175_v7 = vor.u32 %v2174_v37, %v2171_v48  ;;  %v2195_v52 = vrot.slane %v2193_v46, 4  ;;  %v2198_v30 = vrot.slane %v2196_v21, 5  ;;  %v7943_v46 = vld [vmem:[%s11451_s3 + $0x110] sm:$0xff]  }
 0x1d1   : > { %1774 = vst [vmem:[#allocation2 + $0xe8] sm:$0x1] %v1773_v63  ;;  %v1776_v28 = vsel %vm9080_vm2, %v1617_v38, %v1775_v59  ;;  %v9423_v45 = vsel %vm9121_vm1, %v3297_v54, %v3298_v24  ;;  %v9429_v33 = vld [vmem:[#allocation2 + $0xd0] sm:$0x11]  ;;  %v9431_v37 = vrot.slane %v2202_v41, 5  ;;  %v2208_v57 = vrot.slane %v2206_v17, 4 }
 0x1d2   : > { %1777 = vst [vmem:[#allocation2 + $0xf0] sm:$0xf] %v1776_v28  ;;  %3667 = vmatpush1.bf16.msra.mxu1 %v7940_v1  ;;  %v1782_v54 = vld [vmem:[#allocation2 + $0x108] sm:$0xf]  ;;  %v2176_v38 = vrot.slane %v2175_v7, 4  ;;  %v2186_v59 = vrot.slane %v2185_v12, 4  ;;  %v9448_v1 = vsel %vm9121_vm1, %v7083_v2, %v3295_v56 }
 0x1d3   : > { %v1619_v62 = vpop.permute.xlu1 %1618  ;;  %3148 = vmatmul.mubr.bf16.gmra.mrb[56].mxu0 %v7033_v9  ;;  %v2190_v9 = vrot.slane %v2188_v27, 5  ;;  %3668 = vmatprep.subr.bf16.mxu1 %v11465_v20  ;;  %v2212_v7 = vshll.u32 %v9429_v33, 16  ;;  %v2209_v6 = vor.u32 %v2208_v57, %v9431_v37  ;;  %v7945_v2 = vld [vmem:[%s11451_s3 + $0x118] sm:$0xff]   ;;  %v7038_v57 = vcombine.high %v9381_v60, %v9385_v14 }
 0x1d4   : > { %1778 = vst.msk [vmem:[#allocation2 + $0xf8] sm:$0xf] %vm1700_vm13, %v1619_v62  ;;  %v1621_v63 = vpop.permute.xlu0 %1620  ;;  %v9427_v48 = vld [vmem:[#allocation2 + $0xd8] sm:$0xff]  ;;  %7072 = vmatprep.mubr.msk.bf16.mxu0 %vm2593_vm8, %v7036_v3  ;;  %v9441_v8 = vld [vmem:[#allocation2 + $0xe0] sm:$0xff]  ;;  %v2199_v62 = vor.u32 %v2198_v30, %v2195_v52 }
 0x1d5   : > { %v1780_v24 = vsel %vm9085_vm5, %v1621_v63, %v1779_v61  ;;  %2715 = vmatmul.mubr.bf16.gmra.mrb[20].mxu1 %v6971_v49  ;;  %v2217_v41 = vshrl.u32 %v9427_v48, 16  ;;  %v2220_v12 = vshll.u32 %v9427_v48, 16  ;;  %v2226_v17 = vshll.u32 %v9441_v8, 16  ;;  %v1786_v63 = vld [vmem:[#allocation2 + $0x118] sm:$0x1] }
 0x1d6   : > { %1781 = vst [vmem:[#allocation2 + $0x100] sm:$0x1] %v1780_v24  ;;  %7011 = vmatprep.mubr.msk.bf16.mxu1 %vm2593_vm8, %v6974_v58  ;;  %v2230_v56 = vshrl.u32 %v9441_v8, 16  ;;  %3669 = vmatpush1.bf16.msra.mxu1 %v7943_v46  ;;  %v7035_v61 = vcombine.low %v9335_v44, %v9344_v43  ;;  %v6973_v49 = vcombine.low %v9407_v15, %v9414_v4  ;;  %v2214_v15 = vrot.slane %v2212_v7, 5 }
 0x1d7   : > { %v1623_v21 = vpop.permute.xlu1 %1622  ;;  %3670 = vmatprep.subr.bf16.mxu1 %v11465_v20  ;;  %v9477_v44 = vsel %vm9113_vm6, %v2176_v38, %v9387_v39  ;;  %v9481_v46 = vsel %vm9113_vm6, %v2186_v59, %v2190_v9  ;;  %v2210_v39 = vrot.slane %v2209_v6, 4  ;;  %v2222_v38 = vrot.slane %v2220_v12, 5  ;;  %v9491_v9 = vld [vmem:[#allocation2 + $0x48] sm:$0xee] }
 0x1d8   : > { %v1783_v28 = vsel %vm9080_vm2, %v1623_v21, %v1782_v54  ;;  %v1625_v27 = vpop.permute.xlu0 %1624  ;;  %v1789_v21 = vld [vmem:[#allocation2 + $0x120] sm:$0xf]  ;;  %v2200_v54 = vrot.slane %v2199_v62, 4  ;;  %v9489_v20 = vrot.slane %v2226_v17, 5  ;;  %v2232_v59 = vrot.slane %v2230_v56, 4 }
 0x1d9   : > { %1784 = vst [vmem:[#allocation2 + $0x108] sm:$0xf] %v1783_v28  ;;  %1785 = vst.msk [vmem:[#allocation2 + $0x110] sm:$0xf] %vm1700_vm13, %v1625_v27  ;;  %v9483_v24 = vld [vmem:[#allocation2 + $0xf0] sm:$0xff]  ;;  %v2219_v28 = vrot.slane %v2217_v41, 4  ;;  %v6976_v62 = vcombine.high %v9477_v44, %v9481_v46  ;;  %v7037_v17 = vcombine.low %v9381_v60, %v9385_v14 }
 0x1da   : > { %3671 = vmatpush1.bf16.msra.mxu1 %v7945_v2  ;;  %v2241_v41 = vshrl.u32 %v9483_v24, 16  ;;  %v2244_v7 = vshll.u32 %v9483_v24, 16  ;;  %v9500_v6 = vld [vmem:[#allocation2 + $0xe8] sm:$0x11] }
 0x1db   : > { %v1627_v30 = vpop.permute.xlu1 %1626  ;;  %v9487_v4 = vld [vmem:[#allocation2 + $0xf8] sm:$0xff]  ;;  %3156 = vmatmul.mubr.bf16.gmra.mrb[60].mxu0 %v7035_v61  ;;  %v6975_v61 = vcombine.low %v9477_v44, %v9481_v46  ;;  %v2233_v44 = vor.u32 %v2232_v59, %v9489_v20  ;;  %v2236_v46 = vshll.u32 %v9500_v6, 16 }
 0x1dc   : > { %v1787_v58 = vsel %vm9085_vm5, %v1627_v30, %v1786_v63  ;;  %v1629_v27 = vpop.permute.xlu0 %1628  ;;  %7073 = vmatprep.mubr.msk.bf16.mxu0 %vm2593_vm8, %v7038_v57  ;;  %v2250_v56 = vshll.u32 %v9487_v4, 16  ;;  %v2254_v2 = vshrl.u32 %v9487_v4, 16  ;;  %v7040_v63 = vcombine.high %v9427_v48, %v9441_v8 }
 0x1dd   : > { %1788 = vst [vmem:[#allocation2 + $0x118] sm:$0x1] %v1787_v58  ;;  %v1790_v30 = vsel %vm9080_vm2, %v1629_v27, %v1789_v21  ;;  %2723 = vmatmul.mubr.bf16.gmra.mrb[24].mxu1 %v6973_v49  ;;  %v9515_v49 = vsel %vm9113_vm6, %v2200_v54, %v9431_v37  ;;  %v1793_v21 = vld [vmem:[#allocation2 + $0x130] sm:$0x1]  ;;  %v9522_v27 = vsel %vm9113_vm6, %v2210_v39, %v2214_v15  ;;  %v1796_v54 = vld [vmem:[#allocation2 + $0x138] sm:$0xf] }
 0x1de   : > { %1791 = vst [vmem:[#allocation2 + $0x120] sm:$0xf] %v1790_v30  ;;  %7012 = vmatprep.mubr.msk.bf16.mxu1 %vm2593_vm8, %v6976_v62  ;;  %v2223_v30 = vor.u32 %v2222_v38, %v2219_v28  ;;  %v2243_v52 = vrot.slane %v2241_v41, 4  ;;  %v2246_v3 = vrot.slane %v2244_v7, 5  ;;  %v9534_v39 = vld [vmem:[#allocation2 + $0x100] sm:$0x11]  ;;  %v11539_v36 = vcombine.low %v9483_v24, %v9487_v4 }
 0x1df   : > { %v1631_v12 = vpop.permute.xlu1 %1630  ;;  %v9536_v38 = vrot.slane %v2250_v56, 5  ;;  %v2256_v59 = vrot.slane %v2254_v2, 4  ;;  %v11467_v7 = vrot.slane %v9185_v25, 5  ;;  %v2234_v16 = vrot.slane %v2233_v44, 4 }
 0x1e0   : > { %1792 = vst.msk [vmem:[#allocation2 + $0x128] sm:$0xf] %vm1700_vm13, %v1631_v12  ;;  %v9517_v60 = vld [vmem:[#allocation2 + $0x108] sm:$0xff]  ;;  %v1633_v58 = vpop.permute.xlu0 %1632  ;;  %v9526_v62 = vld [vmem:[#allocation2 + $0x110] sm:$0xff]  ;;  %v2224_v5 = vrot.slane %v2223_v30, 4  ;;  %v2238_v18 = vrot.slane %v2236_v46, 5  ;;  %v7042_v2 = vcombine.high %v9483_v24, %v9487_v4 }
 0x1e1   : > { %v1794_v37 = vsel %vm9085_vm5, %v1633_v58, %v1793_v21  ;;  %v2265_v15 = vshrl.u32 %v9517_v60, 16  ;;  %v2268_v28 = vshll.u32 %v9517_v60, 16  ;;  %v6978_v21 = vcombine.high %v9515_v49, %v9522_v27  ;;  %v1800_v30 = vld [vmem:[#allocation2 + $0x148] sm:$0x1] }
 0x1e2   : > { %1795 = vst [vmem:[#allocation2 + $0x130] sm:$0x1] %v1794_v37  ;;  %v2274_v41 = vshll.u32 %v9526_v62, 16  ;;  %v2278_v56 = vshrl.u32 %v9526_v62, 16  ;;  %v2257_v44 = vor.u32 %v2256_v59, %v9536_v38  ;;  %v3305_v12 = vrot.slane %v9203_v13, 5 }
 0x1e3   : > { %v1635_v10 = vpop.permute.xlu1 %1634  ;;  %3164 = vmatmul.mubr.bf16.gmra.mrb[64].mxu0 %v7037_v17  ;;  %v1803_v59 = vld [vmem:[#allocation2 + $0x150] sm:$0xf]  ;;  %v9572_v13 = vsel %vm9113_vm6, %v2234_v16, %v2238_v18 }
 0x1e4   : > { %v1797_v58 = vsel %vm9080_vm2, %v1635_v10, %v1796_v54  ;;  %v1637_v37 = vpop.permute.xlu0 %1636  ;;  %7074 = vmatprep.mubr.msk.bf16.mxu0 %vm2593_vm8, %v7040_v63  ;;  %v6977_v10 = vcombine.low %v9515_v49, %v9522_v27  ;;  %v2247_v54 = vor.u32 %v2246_v3, %v2243_v52  ;;  %v2270_v63 = vrot.slane %v2268_v28, 5 }
 0x1e5   : > { %1798 = vst [vmem:[#allocation2 + $0x138] sm:$0xf] %v1797_v58  ;;  %1799 = vst.msk [vmem:[#allocation2 + $0x140] sm:$0xf] %vm1700_vm13, %v1637_v37  ;;  %v2260_v58 = vshll.u32 %v9534_v39, 16  ;;  %v9552_v57 = vld [vmem:[#allocation2 + $0x120] sm:$0xff]  ;;  %2731 = vmatmul.mubr.bf16.gmra.mrb[28].mxu1 %v6975_v61 }
 0x1e6   : > { %v2267_v37 = vrot.slane %v2265_v15, 4  ;;  %7013 = vmatprep.mubr.msk.bf16.mxu1 %vm2593_vm8, %v6978_v21  ;;  %v9561_v3 = vrot.slane %v2274_v41, 5  ;;  %v2280_v52 = vrot.slane %v2278_v56, 4  ;;  %v3304_v61 = vrot.slane %v11467_v7, 4  ;;  %v9576_v41 = vld [vmem:[#allocation2 + $0x118] sm:$0x11] }
 0x1e7   : > { %v1639_v17 = vpop.permute.xlu1 %1638  ;;  %v9555_v46 = vld [vmem:[#allocation2 + $0x128] sm:$0xff]  ;;  %v9568_v15 = vsel %vm9113_vm6, %v2224_v5, %v9489_v20  ;;  %v2289_v28 = vshrl.u32 %v9552_v57, 16  ;;  %v2292_v21 = vshll.u32 %v9552_v57, 16  ;;  %v2262_v16 = vrot.slane %v2260_v58, 5 }
 0x1e8   : > { %v1801_v49 = vsel %vm9085_vm5, %v1639_v17, %v1800_v30  ;;  %v1641_v27 = vpop.permute.xlu0 %1640  ;;  %v2248_v30 = vrot.slane %v2247_v54, 4  ;;  %v2298_v20 = vshll.u32 %v9555_v46, 16  ;;  %v2271_v18 = vor.u32 %v2270_v63, %v2267_v37 }
 0x1e9   : > { %1802 = vst [vmem:[#allocation2 + $0x148] sm:$0x1] %v1801_v49  ;;  %v1804_v56 = vsel %vm9080_vm2, %v1641_v27, %v1803_v59  ;;  %v2258_v49 = vrot.slane %v2257_v44, 4  ;;  %v2302_v7 = vshrl.u32 %v9555_v46, 16  ;;  %v6980_v22 = vcombine.high %v9568_v15, %v9572_v13 }
 0x1ea   : > { %1805 = vst [vmem:[#allocation2 + $0x150] sm:$0xf] %v1804_v56  ;;  %v2281_v27 = vor.u32 %v2280_v52, %v9561_v3  ;;  %v2284_v59 = vshll.u32 %v9576_v41, 16  ;;  %v9593_v56 = vsel %vm9121_vm1, %v3304_v61, %v3305_v12  ;;  %v11536_v44 = vcombine.low %v9427_v48, %v9441_v8 }
 0x1eb   : > { %v1643_v5 = vpop.permute.xlu1 %1642  ;;  %v2291_v63 = vrot.slane %v2289_v28, 4  ;;  %v9600_v17 = vrot.slane %v2298_v20, 5  ;;  %v2304_v52 = vrot.slane %v2302_v7, 4  ;;  %v6979_v12 = vcombine.low %v9568_v15, %v9572_v13 }
 0x1ec   : > { %1806 = vst.msk [vmem:[#allocation2 + $0x158] sm:$0xf] %vm1700_vm13, %v1643_v5  ;;  %v9589_v54 = vld [vmem:[#allocation2 + $0x138] sm:$0xff]  ;;  %v1645_v58 = vpop.permute.xlu0 %1644  ;;  %3172 = vmatmul.mubr.bf16.gmra.mrb[68].mxu0 %v11536_v44  ;;  %v9598_v37 = vld [vmem:[#allocation2 + $0x140] sm:$0xff]  ;;  %v2294_v5 = vrot.slane %v2292_v21, 5  ;;  %v9614_v7 = vsel %vm9113_vm6, %v2248_v30, %v9536_v38  ;;  %v11537_v15 = vrot.slane %v9185_v25, 5 }
 0x1ed   : > { %v1808_v35 = vsel %vm9085_vm5, %v1645_v58, %v1807_v26  ;;  %7075 = vmatprep.mubr.msk.bf16.mxu0 %vm2593_vm8, %v7042_v2  ;;  %v2313_v61 = vshrl.u32 %v9589_v54, 16  ;;  %v2316_v48 = vshll.u32 %v9589_v54, 16  ;;  %v9609_v44 = vld [vmem:[#allocation2 + $0x130] sm:$0x11]  ;;  %2739 = vmatmul.mubr.bf16.gmra.mrb[32].mxu1 %v6977_v10  ;;  %v1810_v21 = vld [vmem:[#allocation2 + $0x168] sm:$0xf]  ;;  %v9618_v26 = vsel %vm9113_vm6, %v2258_v49, %v2262_v16 }
 0x1ee   : > { %1809 = vst [vmem:[#allocation2 + $0x160] sm:$0x1] %v1808_v35  ;;  %v2272_v2 = vrot.slane %v2271_v18, 4  ;;  %v11538_v13 = vrot.slane %v9491_v9, 9  ;;  %7014 = vmatprep.mubr.msk.bf16.mxu1 %vm2593_vm8, %v6980_v22  ;;  %v2282_v38 = vrot.slane %v2281_v27, 4  ;;  %v2286_v30 = vrot.slane %v2284_v59, 5 }
 0x1ef   : > { %v1647_v28 = vpop.permute.xlu1 %1646  ;;  %v2322_v20 = vshll.u32 %v9598_v37, 16  ;;  %v2295_v16 = vor.u32 %v2294_v5, %v2291_v63  ;;  %v2305_v25 = vor.u32 %v2304_v52, %v9600_v17  ;;  %v2308_v9 = vshll.u32 %v9609_v44, 16  ;;  %v1814_v58 = vld [vmem:[#allocation2 + $0x178] sm:$0x1] }
 0x1f0   : > { %v9626_v35 = vsel %vm9121_vm1, %v11538_v13, %v11537_v15  ;;  %v1811_v10 = vsel %vm9080_vm2, %v1647_v28, %v1810_v21  ;;  %v1649_v49 = vpop.permute.xlu0 %1648  ;;  %v2326_v18 = vshrl.u32 %v9598_v37, 16  ;;  %v2315_v28 = vrot.slane %v2313_v61, 4  ;;  %v9654_v27 = vld [vmem:[#allocation2 + $0x148] sm:$0x11] }
 0x1f1   : > { %1812 = vst [vmem:[#allocation2 + $0x168] sm:$0xf] %v1811_v10  ;;  %1813 = vst.msk [vmem:[#allocation2 + $0x170] sm:$0xf] %vm1700_vm13, %v1649_v49  ;;  %v9636_v15 = vld [vmem:[#allocation2 + $0x150] sm:$0xff]  ;;  %v2318_v22 = vrot.slane %v2316_v48, 5  ;;  %v7044_v61 = vcombine.high %v9517_v60, %v9526_v62  ;;  %v6982_v48 = vcombine.high %v9614_v7, %v9618_v26  ;;  %v7043_v59 = vcombine.low %v9517_v60, %v9526_v62 }
 0x1f2   : > { %v2337_v52 = vshrl.u32 %v9636_v15, 16  ;;  %v2340_v21 = vshll.u32 %v9636_v15, 16  ;;  %v2324_v13 = vrot.slane %v2322_v20, 5  ;;  %v2328_v10 = vrot.slane %v2326_v18, 4 }
 0x1f3   : > { %v1651_v63 = vpop.permute.xlu1 %1650  ;;  %v9642_v5 = vld [vmem:[#allocation2 + $0x158] sm:$0xff]  ;;  %v9662_v20 = vsel %vm9113_vm6, %v2272_v2, %v9561_v3  ;;  %v9666_v18 = vsel %vm9113_vm6, %v2282_v38, %v2286_v30  ;;  %v2306_v60 = vrot.slane %v2305_v25, 4  ;;  %v2332_v3 = vshll.u32 %v9654_v27, 16 }
 0x1f4   : > { %v1815_v49 = vsel %vm9085_vm5, %v1651_v63, %v1814_v58  ;;  %3180 = vmatmul.mubr.bf16.gmra.mrb[72].mxu0 %v11539_v36  ;;  %v2296_v58 = vrot.slane %v2295_v16, 4  ;;  %v2310_v63 = vrot.slane %v2308_v9, 5  ;;  %v2346_v42 = vshll.u32 %v9642_v5, 16 }
 0x1f5   : > { %1816 = vst [vmem:[#allocation2 + $0x178] sm:$0x1] %v1815_v49  ;;  %7076 = vmatprep.mubr.msk.bf16.mxu0 %vm2593_vm8, %v7044_v61  ;;  %v2319_v49 = vor.u32 %v2318_v22, %v2315_v28  ;;  %v2350_v36 = vshrl.u32 %v9642_v5, 16  ;;  %2747 = vmatmul.mubr.bf16.gmra.mrb[36].mxu1 %v6979_v12  ;;  %v2329_v24 = vor.u32 %v2328_v10, %v2324_v13  ;;  %v2339_v2 = vrot.slane %v2337_v52, 4  ;;  %v9683_v28 = vld [vmem:[#allocation2 + $0x160] sm:$0x11] }
 0x1f6   : > { %v2342_v23 = vrot.slane %v2340_v21, 5  ;;  %7015 = vmatprep.mubr.msk.bf16.mxu1 %vm2593_vm8, %v6982_v48  ;;  %v6981_v38 = vcombine.low %v9614_v7, %v9618_v26  ;;  %v7046_v30 = vcombine.high %v9552_v57, %v9555_v46  ;;  %v7045_v16 = vcombine.low %v9552_v57, %v9555_v46 }
 0x1f7   : > { %v7085_v25 = vrot.slane %v3232_v40, 9  ;;  %v6984_v12 = vcombine.high %v9662_v20, %v9666_v18  ;;  %v2348_v22 = vrot.slane %v2346_v42, 5  ;;  %v2352_v52 = vrot.slane %v2350_v36, 4 }
 0x1f8   : > { %v9681_v9 = vld [vmem:[#allocation2 + $0x168] sm:$0xff]  ;;  %v3309_v21 = vrot.slane %v9224_v53, 5  ;;  %v9691_v26 = vsel %vm9113_vm6, %v2296_v58, %v9600_v17  ;;  %v9695_v40 = vsel %vm9113_vm6, %v2306_v60, %v2310_v63  ;;  %v2320_v57 = vrot.slane %v2319_v49, 4 }
 0x1f9   : > { %v2330_v10 = vrot.slane %v2329_v24, 4  ;;  %v2334_v61 = vrot.slane %v2332_v3, 5  ;;  %v2343_v48 = vor.u32 %v2342_v23, %v2339_v2  ;;  %v3312_v42 = vrot.slane %v9243_v0, 5  ;;  %v9718_v3 = vld [vmem:[#allocation2 + $0x170] sm:$0xff] }
 0x1fa   : > { %v7048_v53 = vcombine.high %v9589_v54, %v9598_v37  ;;  %v2361_v36 = vshrl.u32 %v9681_v9, 16  ;;  %v2364_v7 = vshll.u32 %v9681_v9, 16  ;;  %v2356_v17 = vshll.u32 %v9683_v28, 16 }
 0x1fb   : > { %v6986_v58 = vcombine.high %v9691_v26, %v9695_v40  ;;  %v2353_v60 = vor.u32 %v2352_v52, %v2348_v22  ;;  %v3311_v23 = vrot.slane %v3309_v21, 4  ;;  %v9714_v24 = vsel %vm9113_vm6, %v2320_v57, %v2324_v13  ;;  %v3234_v13 = vld [vmem:[#allocation2 + $0x90] sm:$0xee] }
 0x1fc   : > { %3188 = vmatmul.mubr.bf16.gmra.mrb[76].mxu0 %v7043_v59  ;;  %v9722_v2 = vsel %vm9113_vm6, %v2330_v10, %v2334_v61  ;;  %v9726_v52 = vsel %vm9121_vm1, %v7085_v25, %v3309_v21  ;;  %v2358_v57 = vrot.slane %v2356_v17, 5  ;;  %v9733_v59 = vrot.slane %v2361_v36, 4  ;;  %v3235_v61 = vld [vmem:[#allocation2 + $0xa8] sm:$0xee]  ;;  %v9739_v49 = vld [vmem:[#allocation2 + $0x178] sm:$0x11] }
 0x1fd   : > { %7077 = vmatprep.mubr.msk.bf16.mxu0 %vm2593_vm8, %v7046_v30  ;;  %2755 = vmatmul.mubr.bf16.gmra.mrb[40].mxu1 %v6981_v38  ;;  %v2344_v30 = vrot.slane %v2343_v48, 4  ;;  %v9730_v0 = vsel %vm9121_vm1, %v3311_v23, %v3312_v42  ;;  %v9735_v38 = vrot.slane %v2364_v7, 5  ;;  %v2354_v48 = vrot.slane %v2353_v60, 4 }
 0x1fe   : > { %11540 = vst [vmem:[#allocation20_spill] sm:$0xff] %v9730_v0  ;;  %7016 = vmatprep.mubr.msk.bf16.mxu1 %vm2593_vm8, %v6984_v12  ;;  %v2370_v25 = vshll.u32 %v9718_v3, 16  ;;  %v2374_v21 = vshrl.u32 %v9718_v3, 16  ;;  %v7052_v7 = vcombine.high %v9681_v9, %v9718_v3  ;;  %v7087_v36 = vrot.slane %v3234_v13, 9 }
 0x1ff   : > { %v3323_v17 = vrot.slane %v9310_v32, 5  ;;  %v9752_v60 = vsel %vm9113_vm6, %v2344_v30, %v2348_v22  ;;  %v3326_v23 = vrot.slane %v9330_v51, 5  ;;  %v7088_v10 = vrot.slane %v3235_v61, 9  ;;  %v3237_v30 = vld [vmem:[#allocation2 + $0xd8] sm:$0xee] }
 0x200   : > { %v3330_v63 = vrot.slane %v9344_v43, 5  ;;  %v2367_v42 = vor.u32 %v9735_v38, %v9733_v59  ;;  %v2380_v12 = vshll.u32 %v9739_v49, 16  ;;  %v3333_v13 = vrot.slane %v9383_v19, 5 }
 0x201   : > { %v3325_v0 = vrot.slane %v3323_v17, 4  ;;  %v9762_v32 = vsel %vm9113_vm6, %v2354_v48, %v2358_v57  ;;  %v9764_v22 = vrot.slane %v2370_v25, 5  ;;  %v9766_v51 = vrot.slane %v2374_v21, 4 }
 0x202   : > { %v9770_v43 = vsel %vm9121_vm1, %v7087_v36, %v3323_v17  ;;  %v9779_v19 = vsel %vm9121_vm1, %v7088_v10, %v3330_v63  ;;  %v7089_v57 = vrot.slane %v3236_v29, 9  ;;  %v11541_v48 = vcombine.low %v9662_v20, %v9666_v18  ;;  %v3238_v36 = vld [vmem:[#allocation2 + $0xf0] sm:$0xee] }
 0x203   : > { %v9775_v61 = vsel %vm9121_vm1, %v3325_v0, %v3326_v23  ;;  %v3337_v21 = vrot.slane %v9385_v14, 5  ;;  %v3340_v0 = vrot.slane %v9429_v33, 5  ;;  %v3344_v20 = vrot.slane %v9441_v8, 5  ;;  %v3240_v14 = vld [vmem:[#allocation2 + $0x120] sm:$0xee] }
 0x204   : > { %3196 = vmatmul.mubr.bf16.gmra.mrb[80].mxu0 %v7045_v16  ;;  %v3332_v16 = vrot.slane %v3330_v63, 4  ;;  %v7134_v25 = vcombine.high %v9770_v43, %v9775_v61  ;;  %v7090_v63 = vrot.slane %v3237_v30, 9  ;;  %v3347_v18 = vrot.slane %v9500_v6, 5 }
 0x205   : > { %7078 = vmatprep.mubr.msk.bf16.mxu0 %vm2593_vm8, %v7048_v53  ;;  %2763 = vmatmul.mubr.bf16.gmra.mrb[44].mxu1 %v11541_v48  ;;  %v7133_v53 = vcombine.low %v9770_v43, %v9775_v61  ;;  %v2377_v10 = vor.u32 %v9766_v51, %v9764_v22  ;;  %v3339_v17 = vrot.slane %v3337_v21, 4  ;;  %v9805_v23 = vsel %vm9121_vm1, %v7089_v57, %v3337_v21 }
 0x206   : > { %7017 = vmatprep.mubr.msk.bf16.mxu1 %vm2593_vm8, %v6986_v58  ;;  %v9793_v29 = vsel %vm9121_vm1, %v3332_v16, %v3333_v13  ;;  %v3239_v58 = vld [vmem:[#allocation2 + $0x108] sm:$0xee]  ;;  %v3346_v13 = vrot.slane %v3344_v20, 4  ;;  %v7091_v30 = vrot.slane %v3238_v36, 9  ;;  %v3351_v8 = vrot.slane %v9487_v4, 5 }
 0x207   : > { %v9810_v6 = vsel %vm9121_vm1, %v3339_v17, %v3340_v0  ;;  %v9814_v16 = vsel %vm9121_vm1, %v7090_v63, %v3344_v20  ;;  %v3354_v48 = vrot.slane %v9534_v39, 5  ;;  %v3358_v33 = vrot.slane %v9526_v62, 5  ;;  %v3241_v36 = vld [vmem:[#allocation2 + $0x138] sm:$0xee] }
 0x208   : > { %v7138_v57 = vcombine.high %v9805_v23, %v9810_v6  ;;  %v9824_v4 = vsel %vm9121_vm1, %v3346_v13, %v3347_v18  ;;  %v7092_v0 = vrot.slane %v3239_v58, 9  ;;  %v11542_v63 = vcombine.low %v9589_v54, %v9598_v37 }
 0x209   : > { %v9835_v20 = vsel %vm9121_vm1, %v7091_v30, %v3351_v8  ;;  %v3353_v17 = vrot.slane %v3351_v8, 4  ;;  %v11543_v18 = vcombine.high %v9636_v15, %v9642_v5  ;;  %v3360_v58 = vrot.slane %v3358_v33, 4 }
 0x20a   : > { %v3361_v54 = vrot.slane %v9576_v41, 5  ;;  %v7093_v13 = vrot.slane %v3240_v14, 9  ;;  %v11544_v62 = vcombine.low %v9691_v26, %v9695_v40  ;;  %v3368_v8 = vrot.slane %v9609_v44, 5 }
 0x20b   : > { %v9848_v30 = vsel %vm9121_vm1, %v3353_v17, %v3354_v48  ;;  %v7094_v39 = vrot.slane %v3241_v36, 9  ;;  %v3372_v21 = vrot.slane %v9598_v37, 5  ;;  %v9862_v26 = vsel %vm9121_vm1, %v7092_v0, %v3358_v33  ;;  %v3242_v37 = vld [vmem:[#allocation2 + $0x150] sm:$0xee] }
 0x20c   : > { %3204 = vmatmul.mubr.bf16.gmra.mrb[84].mxu0 %v11542_v63  ;;  %v3365_v63 = vrot.slane %v9555_v46, 5  ;;  %v7142_v46 = vcombine.high %v9835_v20, %v9848_v30  ;;  %v7141_v41 = vcombine.low %v9835_v20, %v9848_v30  ;;  %v9866_v44 = vsel %vm9121_vm1, %v3360_v58, %v3361_v54 }
 0x20d   : > { %7079 = vmatprep.mubr.msk.bf16.mxu0 %vm2593_vm8, %v11543_v18  ;;  %2771 = vmatmul.mubr.bf16.gmra.mrb[48].mxu1 %v11544_v62  ;;  %v11545_v18 = vcombine.high %v9714_v24, %v9722_v2  ;;  %v7144_v40 = vcombine.high %v9862_v26, %v9866_v44  ;;  %v3243_v62 = vld [vmem:[#allocation2 + $0x168] sm:$0xee]  ;;  %v9878_v33 = vsel %vm9121_vm1, %v7094_v39, %v3372_v21  ;;  %v3374_v0 = vrot.slane %v3372_v21, 4 }
 0x20e   : > { %v9874_v48 = vsel %vm9121_vm1, %v7093_v13, %v3365_v63  ;;  %v3367_v36 = vrot.slane %v3365_v63, 4  ;;  %v3375_v17 = vrot.slane %v9654_v27, 5  ;;  %v3379_v58 = vrot.slane %v9642_v5, 5 }
 0x20f   : > { %7018 = vmatprep.mubr.msk.bf16.mxu1 %vm2593_vm8, %v11545_v18  ;;  %v7095_v18 = vrot.slane %v3242_v37, 9  ;;  %v3382_v14 = vrot.slane %v9683_v28, 5  ;;  %v3386_v13 = vrot.slane %v9718_v3, 5  ;;  %v7096_v21 = vrot.slane %v3243_v62, 9 }
 0x210   : > { %v9884_v54 = vsel %vm9121_vm1, %v3367_v36, %v3368_v8  ;;  %v9894_v27 = vsel %vm9121_vm1, %v3374_v0, %v3375_v17  ;;  %v11546_v8 = vcombine.low %v9636_v15, %v9642_v5  ;;  %v6987_v28 = vcombine.low %v9714_v24, %v9722_v2 }
 0x211   : > { %v7145_v39 = vcombine.low %v9874_v48, %v9884_v54  ;;  %v7148_v37 = vcombine.high %v9878_v33, %v9894_v27  ;;  %v7147_v36 = vcombine.low %v9878_v33, %v9894_v27  ;;  %v3381_v63 = vrot.slane %v3379_v58, 4 }
 0x212   : > { %v6990_v62 = vcombine.high %v9752_v60, %v9762_v32  ;;  %v2368_v15 = vrot.slane %v2367_v42, 4  ;;  %v3388_v5 = vrot.slane %v3386_v13, 4  ;;  %v3389_v24 = vrot.slane %v9739_v49, 5 }
 0x213   : > { %v2378_v2 = vrot.slane %v2377_v10, 4  ;;  %v2382_v0 = vrot.slane %v2380_v12, 5  ;;  %v9926_v17 = vsel %vm9121_vm1, %v3381_v63, %v3382_v14  ;;  %v9935_v49 = vsel %vm9121_vm1, %v7096_v21, %v3386_v13 }
 0x214   : > { %3212 = vmatmul.mubr.bf16.gmra.mrb[88].mxu0 %v11546_v8  ;;  %v9939_v42 = vsel %vm9121_vm1, %v3388_v5, %v3389_v24  ;;  %v7051_v10 = vcombine.low %v9681_v9, %v9718_v3  ;;  %v2373_v14 = vsel %vm9113_vm6, %v2368_v15, %v9764_v22  ;;  %v11547_v9 = vcombine.high %v9140_v50, %v9171_v47  ;;  %v3233_v8 = vld [vmem:[#allocation2 + $0x78] sm:$0xee]  ;;  %v11555_v15 = vld [vmem:[#allocation20_spill] sm:$0xff] }
 0x215   : > { %7080 = vmatprep.mubr.msk.bf16.mxu0 %vm2593_vm8, %v7052_v7  ;;  %2779 = vmatmul.mubr.bf16.gmra.mrb[52].mxu1 %v6987_v28  ;;  %v9922_v7 = vsel %vm9121_vm1, %v7095_v18, %v3379_v58  ;;  %v7152_v12 = vcombine.high %v9935_v49, %v9939_v42  ;;  %v7151_v51 = vcombine.low %v9935_v49, %v9939_v42  ;;  %v8075_v28 = vld [vmem:[#allocation2 + $0x88] sm:$0x11] }
 0x216   : > { %7019 = vmatprep.mubr.msk.bf16.mxu1 %vm2593_vm8, %v6990_v62  ;;  %v7150_v59 = vcombine.high %v9922_v7, %v9926_v17  ;;  %v7149_v38 = vcombine.low %v9922_v7, %v9926_v17  ;;  %v2383_v58 = vsel %vm9113_vm6, %v2378_v2, %v2382_v0  ;;  %v6989_v18 = vcombine.low %v9752_v60, %v9762_v32 }
 0x217   : > { %v6992_v13 = vcombine.high %v2373_v14, %v2383_v58  ;;  %v6991_v63 = vcombine.low %v2373_v14, %v2383_v58  ;;  %v11548_v3 = vcombine.low %v9140_v50, %v9171_v47  ;;  %v11550_v60 = vcombine.low %v9282_v34, %v9262_v55  ;;  %v8074_v47 = vld [vmem:[#allocation2 + $0x80] sm:$0xff] }
 0x218   : > { %v11551_v32 = vcombine.high %v9448_v1, %v9423_v45  ;;  %v11552_v22 = vcombine.low %v9448_v1, %v9423_v45  ;;  %v11553_v50 = vcombine.high %v9626_v35, %v9593_v56  ;;  %v3316_v21 = vrot.slane %v8074_v47, 5 }
 0x219   : > { %v11554_v55 = vcombine.low %v9626_v35, %v9593_v56  ;;  %v3319_v62 = vrot.slane %v8075_v28, 5  ;;  %v11556_v5 = vcombine.high %v9726_v52, %v11555_v15  ;;  %v7086_v45 = vrot.slane %v3233_v8, 9 }
 0x21a   : > { %v3318_v34 = vrot.slane %v3316_v21, 4  ;;  %v11557_v56 = vcombine.low %v9726_v52, %v11555_v15  ;;  %v11558_v11 = vcombine.high %v9779_v19, %v9793_v29  ;;  %v11559_v52 = vcombine.low %v9779_v19, %v9793_v29 }
 0x21b   : > { %v3317_v24 = vsel %vm9121_vm1, %v7086_v45, %v3316_v21  ;;  %v11561_v43 = vcombine.high %v9814_v16, %v9824_v4  ;;  %v11562_v61 = vcombine.low %v9814_v16, %v9824_v4  ;;  %v11563_v20 = vcombine.low %v9862_v26, %v9866_v44 }
 0x21c   : > { %3220 = vmatmul.mubr.bf16.gmra.mrb[92].mxu0 %v7051_v10  ;;  %v3320_v1 = vsel %vm9121_vm1, %v3318_v34, %v3319_v62  ;;  %v11564_v30 = vcombine.high %v9874_v48, %v9884_v54  ;;  %vm4388_vm1 = vcmask 1046528   ;;  %vm11572_vm6 = vcmask 1045504  }
 0x21d   : > { %2787 = vmatmul.mubr.bf16.gmra.mrb[56].mxu1 %v6989_v18  ;;  %v7132_v2 = vcombine.high %v3317_v24, %v3320_v1  ;;  %v7131_v35 = vcombine.low %v3317_v24, %v3320_v1  ;;  %vm11573_vm9 = vmmov %vm11572_vm6 }
 0x21e   : > { %7020 = vmatprep.mubr.msk.bf16.mxu1 %vm2593_vm8, %v6992_v13  ;;  %vm11574_vm10 = vmmov %vm11572_vm6 }
 0x225   : > { %2795 = vmatmul.mubr.bf16.gmra.mrb[60].mxu1 %v6991_v63 }
 0x226   : > { %7165 = vmatprep.mubr.msk.bf16.mxu1 %vm2593_vm8, %v11547_v9 }
 0x22d   : > { %3681 = vmatmul.mubr.bf16.vlgmr.msra.gmra.mrb[64].mxu1 %v11548_v3 }
 0x22e   : > { %7166 = vmatprep.mubr.msk.bf16.mxu1 %vm2593_vm8, %v11549_v31 }
 0x235   : > { %3689 = vmatmul.mubr.bf16.gmra.mrb[68].mxu1 %v11550_v60 }
 0x236   : > { %7167 = vmatprep.mubr.msk.bf16.mxu1 %vm2593_vm8, %v11551_v32 }
 0x23d   : > { %3697 = vmatmul.mubr.bf16.gmra.mrb[72].mxu1 %v11552_v22 }
 0x23e   : > { %7168 = vmatprep.mubr.msk.bf16.mxu1 %vm2593_vm8, %v11553_v50 }
 0x245   : > { %3705 = vmatmul.mubr.bf16.gmra.mrb[76].mxu1 %v11554_v55 }
 0x246   : > { %7169 = vmatprep.mubr.msk.bf16.mxu1 %vm2593_vm8, %v11556_v5 }
 0x24d   : > { %3713 = vmatmul.mubr.bf16.gmra.mrb[80].mxu1 %v11557_v56 }
 0x24e   : > { %7170 = vmatprep.mubr.msk.bf16.mxu1 %vm2593_vm8, %v7132_v2 }
 0x255   : > { %3721 = vmatmul.mubr.bf16.gmra.mrb[84].mxu1 %v7131_v35 }
 0x256   : > { %7171 = vmatprep.mubr.msk.bf16.mxu1 %vm2593_vm8, %v7134_v25  ;;  %v11560_v25 = vcombine.low %v9805_v23, %v9810_v6 }
 0x25d   : > { %3729 = vmatmul.mubr.bf16.gmra.mrb[88].mxu1 %v7133_v53 }
 0x25e   : > { %7172 = vmatprep.mubr.msk.bf16.mxu1 %vm2593_vm8, %v11558_v11 }
 0x265   : > { %3737 = vmatmul.mubr.bf16.gmra.mrb[92].mxu1 %v11559_v52 }
 0x266   : > { %7173 = vmatprep.mubr.msk.bf16.mxu1 %vm2593_vm8, %v7138_v57 }
 0x26d   : > { %3745 = vmatmul.mubr.bf16.gmra.mrb[96].mxu1 %v11560_v25 }
 0x26e   : > { %7174 = vmatprep.mubr.msk.bf16.mxu1 %vm2593_vm8, %v11561_v43 }
 0x275   : > { %3753 = vmatmul.mubr.bf16.gmra.mrb[100].mxu1 %v11562_v61 }
 0x276   : > { %7175 = vmatprep.mubr.msk.bf16.mxu1 %vm2593_vm8, %v7142_v46  ;;  %v3101_v19 = vpop.f32.mrb[32].mxu0 }
 0x277   : > { %v3103_v53 = vpop.f32.mrb[33].mxu0 }
 0x278   : > { %v3104_v29 = vpop.f32.mrb[34].mxu0 }
 0x279   : > { %v3106_v57 = vpop.f32.mrb[35].mxu0 }
 0x27d   : > { %3761 = vmatmul.mubr.bf16.gmra.mrb[104].mxu1 %v7141_v41 }
 0x27e   : > { %7176 = vmatprep.mubr.msk.bf16.mxu1 %vm2593_vm8, %v7144_v40  ;;  %v3109_v23 = vpop.f32.mrb[36].mxu0 }
 0x27f   : > { %v3111_v6 = vpop.f32.mrb[37].mxu0 }
 0x280   : > { %v2676_v16 = vpop.f32.mrb[0].mxu1  ;;  %v3112_v4 = vpop.f32.mrb[38].mxu0 }
 0x281   : > { %v10034_v0 = vadd.f32 %v3101_v19, %v2676_v16  ;;  %v2678_v46 = vpop.f32.mrb[1].mxu1  ;;  %v3114_v10 = vpop.f32.mrb[39].mxu0 }
 0x282   : > { %v2679_v14 = vpop.f32.mrb[2].mxu1 }
 0x283   : > { %v10036_v58 = vadd.f32 %v3104_v29, %v2679_v14  ;;  %v2681_v18 = vpop.f32.mrb[3].mxu1 }
 0x285   : > { %3769 = vmatmul.mubr.bf16.gmra.mrb[108].mxu1 %v11563_v20 }
 0x286   : > { %7177 = vmatprep.mubr.msk.bf16.mxu1 %vm2593_vm8, %v11564_v30  ;;  %v3117_v41 = vpop.f32.mrb[40].mxu0 }
 0x287   : > { %v3119_v40 = vpop.f32.mrb[41].mxu0 }
 0x288   : > { %v2684_v13 = vpop.f32.mrb[4].mxu1  ;;  %v3120_v63 = vpop.f32.mrb[42].mxu0 }
 0x289   : > { %v10045_v9 = vadd.f32 %v3109_v23, %v2684_v13  ;;  %v2686_v3 = vpop.f32.mrb[5].mxu1  ;;  %v3122_v31 = vpop.f32.mrb[43].mxu0 }
 0x28a   : > { %v2687_v60 = vpop.f32.mrb[6].mxu1 }
 0x28b   : > { %v10047_v32 = vadd.f32 %v3112_v4, %v2687_v60  ;;  %v2689_v22 = vpop.f32.mrb[7].mxu1  ;;  %v499_v60 = vld [vmem:[#allocation3 + $0x8] sm:$0x11] }
 0x28c   : > { %v505_v22 = vld [vmem:[#allocation3 + $0x28] sm:$0x11] }
 0x28d   : > { %3777 = vmatmul.mubr.bf16.gmra.mrb[112].mxu1 %v7145_v39 }
 0x28e   : > { %7178 = vmatprep.mubr.msk.bf16.mxu1 %vm2593_vm8, %v7148_v37  ;;  %v3125_v26 = vpop.f32.mrb[44].mxu0 }
 0x28f   : > { %v3127_v44 = vpop.f32.mrb[45].mxu0 }
 0x290   : > { %v2692_v50 = vpop.f32.mrb[8].mxu1  ;;  %v3128_v47 = vpop.f32.mrb[46].mxu0 }
 0x291   : > { %v10056_v21 = vadd.f32 %v3117_v41, %v2692_v50  ;;  %v2694_v8 = vpop.f32.mrb[9].mxu1  ;;  %v3130_v55 = vpop.f32.mrb[47].mxu0  ;;  %v500_v50 = vsel %vm8383_vm14, 0, %v499_v60 }
 0x292   : > { %v2695_v34 = vpop.f32.mrb[10].mxu1  ;;  %v475_v8 = vld [vmem:[#allocation3] sm:$0x11]  ;;  %501 = vst [vmem:[#allocation3 + $0x8] sm:$0x11] %v500_v50 }
 0x293   : > { %v10058_v28 = vadd.f32 %v3120_v63, %v2695_v34  ;;  %v2697_v62 = vpop.f32.mrb[11].mxu1  ;;  %v511_v50 = vld [vmem:[#allocation3 + $0x48] sm:$0x11] }
 0x295   : > { %3785 = vmatmul.mubr.bf16.gmra.mrb[116].mxu1 %v7147_v36 }
 0x296   : > { %7179 = vmatprep.mubr.msk.bf16.mxu1 %vm2593_vm8, %v7150_v59  ;;  %v3133_v48 = vpop.f32.mrb[48].mxu0 }
 0x297   : > { %v3135_v54 = vpop.f32.mrb[49].mxu0 }
 0x298   : > { %v2700_v39 = vpop.f32.mrb[12].mxu1  ;;  %v3136_v37 = vpop.f32.mrb[50].mxu0  ;;  %v481_v54 = vld [vmem:[#allocation3 + $0x20] sm:$0x11] }
 0x299   : > { %v10067_v15 = vadd.f32 %v3125_v26, %v2700_v39  ;;  %v2702_v5 = vpop.f32.mrb[13].mxu1  ;;  %v3138_v45 = vpop.f32.mrb[51].mxu0 }
 0x29a   : > { %v2703_v1 = vpop.f32.mrb[14].mxu1 }
 0x29b   : > { %v10069_v24 = vadd.f32 %v3128_v47, %v2703_v1  ;;  %v2705_v2 = vpop.f32.mrb[15].mxu1  ;;  %v506_v47 = vsel %vm8383_vm14, 0, %v505_v22 }
 0x29c   : > { %507 = vst [vmem:[#allocation3 + $0x28] sm:$0x11] %v506_v47 }
 0x29d   : > { %3793 = vmatmul.mubr.bf16.gmra.mrb[120].mxu1 %v7149_v38  ;;  %v502_v38 = vld [vmem:[#allocation3 + $0x18] sm:$0x11] }
 0x29e   : > { %7180 = vmatprep.mubr.msk.bf16.mxu1 %vm2593_vm8, %v7152_v12  ;;  %v3141_v33 = vpop.f32.mrb[52].mxu0  ;;  %v478_v12 = vld [vmem:[#allocation3 + $0x10] sm:$0x11]  ;;  %v503_v29 = vsel %vm8383_vm14, 0, %v502_v38  ;;  %v508_v38 = vld [vmem:[#allocation3 + $0x38] sm:$0x11] }
 0x29f   : > { %v3143_v27 = vpop.f32.mrb[53].mxu0  ;;  %v479_v23 = vsel %vm8369_vm11, 0, %v478_v12  ;;  %504 = vst [vmem:[#allocation3 + $0x18] sm:$0x11] %v503_v29  ;;  %v484_v29 = vld [vmem:[#allocation3 + $0x30] sm:$0x11] }
 0x2a0   : > { %v2708_v36 = vpop.f32.mrb[16].mxu1  ;;  %v3144_v59 = vpop.f32.mrb[54].mxu0  ;;  %480 = vst [vmem:[#allocation3 + $0x10] sm:$0x11] %v479_v23 }
 0x2a1   : > { %v10078_v56 = vadd.f32 %v3133_v48, %v2708_v36  ;;  %v2710_v35 = vpop.f32.mrb[17].mxu1  ;;  %v3146_v11 = vpop.f32.mrb[55].mxu0  ;;  %v476_v48 = vsel %vm8369_vm11, 0, %v475_v8 }
 0x2a2   : > { %v2711_v52 = vpop.f32.mrb[18].mxu1  ;;  %477 = vst [vmem:[#allocation3] sm:$0x11] %v476_v48 }
 0x2a3   : > { %v10080_v25 = vadd.f32 %v3136_v37, %v2711_v52  ;;  %v2713_v43 = vpop.f32.mrb[19].mxu1  ;;  %v482_v37 = vsel %vm8369_vm11, 0, %v481_v54 }
 0x2a4   : > { %483 = vst [vmem:[#allocation3 + $0x20] sm:$0x11] %v482_v37 }
 0x2a5   : > { %3801 = vmatmul.mubr.bf16.gmra.mrb[124].mxu1 %v7151_v51 }
 0x2a6   : > { %v3149_v7 = vpop.f32.mrb[56].mxu0 }
 0x2a7   : > { %v3151_v17 = vpop.f32.mrb[57].mxu0 }
 0x2a8   : > { %v2716_v61 = vpop.f32.mrb[20].mxu1  ;;  %v3152_v19 = vpop.f32.mrb[58].mxu0 }
 0x2a9   : > { %v10089_v6 = vadd.f32 %v3141_v33, %v2716_v61  ;;  %v2718_v16 = vpop.f32.mrb[21].mxu1  ;;  %v3154_v4 = vpop.f32.mrb[59].mxu0 }
 0x2aa   : > { %v2719_v49 = vpop.f32.mrb[22].mxu1 }
 0x2ab   : > { %v10091_v42 = vadd.f32 %v3144_v59, %v2719_v49  ;;  %v2721_v51 = vpop.f32.mrb[23].mxu1  ;;  %v485_v49 = vsel %vm8369_vm11, 0, %v484_v29  ;;  %v514_v29 = vld [vmem:[#allocation3 + $0x58] sm:$0x11] }
 0x2ac   : > { %486 = vst [vmem:[#allocation3 + $0x30] sm:$0x11] %v485_v49  ;;  %v515_v49 = vsel %vm8383_vm14, 0, %v514_v29 }
 0x2ad   : > { %516 = vst [vmem:[#allocation3 + $0x58] sm:$0x11] %v515_v49 }
 0x2ae   : > { %v3157_v46 = vpop.f32.mrb[60].mxu0 }
 0x2af   : > { %v3159_v10 = vpop.f32.mrb[61].mxu0 }
 0x2b0   : > { %v2724_v14 = vpop.f32.mrb[24].mxu1  ;;  %v3160_v18 = vpop.f32.mrb[62].mxu0 }
 0x2b1   : > { %v10093_v20 = vadd.f32 %v3149_v7, %v2724_v14  ;;  %v2726_v30 = vpop.f32.mrb[25].mxu1  ;;  %v3162_v41 = vpop.f32.mrb[63].mxu0 }
 0x2b2   : > { %v2727_v40 = vpop.f32.mrb[26].mxu1 }
 0x2b3   : > { %v10095_v13 = vadd.f32 %v3152_v19, %v2727_v40  ;;  %v2729_v63 = vpop.f32.mrb[27].mxu1  ;;  %v509_v19 = vsel %vm8383_vm14, 0, %v508_v38 }
 0x2b4   : > { %510 = vst [vmem:[#allocation3 + $0x38] sm:$0x11] %v509_v19 }
 0x2b6   : > { %v3165_v3 = vpop.f32.mrb[64].mxu0 }
 0x2b7   : > { %v3167_v31 = vpop.f32.mrb[65].mxu0 }
 0x2b8   : > { %v2732_v26 = vpop.f32.mrb[28].mxu1  ;;  %v3168_v44 = vpop.f32.mrb[66].mxu0 }
 0x2b9   : > { %v10101_v55 = vadd.f32 %v3157_v46, %v2732_v26  ;;  %v2734_v34 = vpop.f32.mrb[29].mxu1  ;;  %v3170_v62 = vpop.f32.mrb[67].mxu0 }
 0x2ba   : > { %v2735_v39 = vpop.f32.mrb[30].mxu1  ;;  %v512_v34 = vsel %vm8383_vm14, 0, %v511_v50  ;;  %v487_v62 = vld [vmem:[#allocation3 + $0x40] sm:$0x11] }
 0x2bb   : > { %v10107_v5 = vadd.f32 %v3160_v18, %v2735_v39  ;;  %v2737_v45 = vpop.f32.mrb[31].mxu1  ;;  %513 = vst [vmem:[#allocation3 + $0x48] sm:$0x11] %v512_v34  ;;  %v488_v37 = vsel %vm8369_vm11, 0, %v487_v62 }
 0x2bc   : > { %489 = vst [vmem:[#allocation3 + $0x40] sm:$0x11] %v488_v37  ;;  %v517_v37 = vld [vmem:[#allocation3 + $0x68] sm:$0x11] }
 0x2bf   : > { %v3173_v1 = vpop.f32.mrb[68].mxu0 }
 0x2c0   : > { %v3175_v2 = vpop.f32.mrb[69].mxu0  ;;  %v2740_v33 = vpop.f32.mrb[32].mxu1 }
 0x2c1   : > { %v3176_v27 = vpop.f32.mrb[70].mxu0  ;;  %v10109_v36 = vadd.f32 %v3165_v3, %v2740_v33  ;;  %v2742_v59 = vpop.f32.mrb[33].mxu1 }
 0x2c2   : > { %v3178_v35 = vpop.f32.mrb[71].mxu0  ;;  %v2743_v11 = vpop.f32.mrb[34].mxu1 }
 0x2c3   : > { %v10111_v52 = vadd.f32 %v3168_v44, %v2743_v11  ;;  %v2745_v43 = vpop.f32.mrb[35].mxu1 }
 0x2c7   : > { %v3181_v7 = vpop.f32.mrb[72].mxu0 }
 0x2c8   : > { %v3183_v17 = vpop.f32.mrb[73].mxu0  ;;  %v2748_v12 = vpop.f32.mrb[36].mxu1 }
 0x2c9   : > { %v3184_v61 = vpop.f32.mrb[74].mxu0  ;;  %v10115_v23 = vadd.f32 %v3173_v1, %v2748_v12  ;;  %v2750_v16 = vpop.f32.mrb[37].mxu1 }
 0x2ca   : > { %v3186_v4 = vpop.f32.mrb[75].mxu0  ;;  %v2751_v51 = vpop.f32.mrb[38].mxu1 }
 0x2cb   : > { %v10119_v46 = vadd.f32 %v3176_v27, %v2751_v51  ;;  %v2753_v10 = vpop.f32.mrb[39].mxu1  ;;  %v490_v51 = vld [vmem:[#allocation3 + $0x50] sm:$0x11] }
 0x2cf   : > { %v3189_v14 = vpop.f32.mrb[76].mxu0 }
 0x2d0   : > { %v3191_v18 = vpop.f32.mrb[77].mxu0  ;;  %v2756_v30 = vpop.f32.mrb[40].mxu1 }
 0x2d1   : > { %v3192_v41 = vpop.f32.mrb[78].mxu0  ;;  %v10121_v40 = vadd.f32 %v3181_v7, %v2756_v30  ;;  %v2758_v63 = vpop.f32.mrb[41].mxu1  ;;  %v491_v30 = vsel %vm8369_vm11, 0, %v490_v51  ;;  %v7947_v51 = vld [vmem:[#allocation6 + $0x68] sm:$0xff]  }
 0x2d2   : > { %v3194_v3 = vpop.f32.mrb[79].mxu0  ;;  %v2759_v31 = vpop.f32.mrb[42].mxu1  ;;  %492 = vst [vmem:[#allocation3 + $0x50] sm:$0x11] %v491_v30  ;;  %v10165_v30 = vld [vmem:[%s11452_s4] ss:$0 sm:$0xff] }
 0x2d3   : > { %v10123_v60 = vadd.f32 %v3184_v61, %v2759_v31  ;;  %v2761_v22 = vpop.f32.mrb[43].mxu1 }
 0x2d7   : > { %v3197_v26 = vpop.f32.mrb[80].mxu0 }
 0x2d8   : > { %v3199_v44 = vpop.f32.mrb[81].mxu0  ;;  %v2764_v47 = vpop.f32.mrb[44].mxu1 }
 0x2d9   : > { %v3200_v8 = vpop.f32.mrb[82].mxu0  ;;  %v10127_v48 = vadd.f32 %v3189_v14, %v2764_v47  ;;  %v2766_v54 = vpop.f32.mrb[45].mxu1 }
 0x2da   : > { %v3202_v39 = vpop.f32.mrb[83].mxu0  ;;  %v2767_v45 = vpop.f32.mrb[46].mxu1 }
 0x2db   : > { %v10131_v1 = vadd.f32 %v3192_v41, %v2767_v45  ;;  %v2769_v2 = vpop.f32.mrb[47].mxu1  ;;  %v7946_v39 = vld [vmem:[#allocation6 + $0x60] sm:$0xff]  }
 0x2dc   : > { %4571 = vmatpush1.bf16.msra.mxu0 %v7946_v39  ;;  %v493_v45 = vld [vmem:[#allocation3 + $0x60] sm:$0x11] }
 0x2df   : > { %v3205_v33 = vpop.f32.mrb[84].mxu0 }
 0x2e0   : > { %v3207_v27 = vpop.f32.mrb[85].mxu0  ;;  %v2772_v59 = vpop.f32.mrb[48].mxu1 }
 0x2e1   : > { %v3208_v35 = vpop.f32.mrb[86].mxu0  ;;  %v10133_v11 = vadd.f32 %v3197_v26, %v2772_v59  ;;  %v2774_v43 = vpop.f32.mrb[49].mxu1  ;;  %v494_v27 = vsel %vm8369_vm11, 0, %v493_v45  ;;  %v11567_v59 = vmov 0  }
 0x2e2   : > { %v3210_v7 = vpop.f32.mrb[87].mxu0  ;;  %v2775_v17 = vpop.f32.mrb[50].mxu1  ;;  %4572 = vmatprep.subr.bf16.mxu0 %v11567_v59  ;;  %495 = vst [vmem:[#allocation3 + $0x60] sm:$0x11] %v494_v27 }
 0x2e3   : > { %v10135_v38 = vadd.f32 %v3200_v8, %v2775_v17  ;;  %v2777_v12 = vpop.f32.mrb[51].mxu1  ;;  %4573 = vmatpush1.bf16.msra.mxu0 %v7947_v51 }
 0x2e4   : > { %4574 = vmatprep.subr.bf16.mxu0 %v11567_v59 }
 0x2e7   : > { %v3213_v61 = vpop.f32.mrb[88].mxu0 }
 0x2e8   : > { %v3215_v19 = vpop.f32.mrb[89].mxu0  ;;  %v2780_v16 = vpop.f32.mrb[52].mxu1 }
 0x2e9   : > { %v3216_v4 = vpop.f32.mrb[90].mxu0  ;;  %v10139_v10 = vadd.f32 %v3205_v33, %v2780_v16  ;;  %v2782_v14 = vpop.f32.mrb[53].mxu1  ;;  %v518_v33 = vsel %vm8383_vm14, 0, %v517_v37 }
 0x2ea   : > { %v3218_v18 = vpop.f32.mrb[91].mxu0  ;;  %v2783_v41 = vpop.f32.mrb[54].mxu1  ;;  %519 = vst [vmem:[#allocation3 + $0x68] sm:$0x11] %v518_v33  ;;  %v520_v14 = vld [vmem:[#allocation3 + $0x78] sm:$0x11] }
 0x2eb   : > { %v10143_v63 = vadd.f32 %v3208_v35, %v2783_v41  ;;  %v2785_v3 = vpop.f32.mrb[55].mxu1  ;;  %v521_v18 = vsel %vm8383_vm14, 0, %v520_v14  ;;  %v496_v41 = vld [vmem:[#allocation3 + $0x70] sm:$0x11]  ;;  %v526_v14 = vld [vmem:[#allocation3 + $0x8] sm:$0x1]  ;;  %vm11576_vm14 = vmmov %vm11572_vm6 }
 0x2ec   : > { %522 = vst [vmem:[#allocation3 + $0x78] sm:$0x11] %v521_v18  ;;  %v527_v18 = vsel %vm8492_vm3, 0, %v526_v14 }
 0x2ed   : > { %528 = vst [vmem:[#allocation3 + $0x8] sm:$0x1] %v527_v18 }
 0x2ef   : > { %v3221_v31 = vpop.f32.mrb[92].mxu0 }
 0x2f0   : > { %v3223_v22 = vpop.f32.mrb[93].mxu0  ;;  %v2788_v26 = vpop.f32.mrb[56].mxu1 }
 0x2f1   : > { %v3224_v44 = vpop.f32.mrb[94].mxu0  ;;  %v10145_v50 = vadd.f32 %v3213_v61, %v2788_v26  ;;  %v2790_v47 = vpop.f32.mrb[57].mxu1  ;;  %v7949_v26 = vld [vmem:[#allocation6 + $0x78] sm:$0xff]  }
 0x2f2   : > { %v3226_v8 = vpop.f32.mrb[95].mxu0  ;;  %v2791_v34 = vpop.f32.mrb[58].mxu1 }
 0x2f3   : > { %v10147_v62 = vadd.f32 %v3216_v4, %v2791_v34  ;;  %v2793_v54 = vpop.f32.mrb[59].mxu1 }
 0x2f4   : > { %v533_v54 = vld [vmem:[#allocation3 + $0x7c] sm:$0x1] }
 0x2f8   : > { %v2796_v2 = vpop.f32.mrb[60].mxu1 }
 0x2f9   : > { %v10154_v35 = vadd.f32 %v3221_v31, %v2796_v2  ;;  %v2798_v43 = vpop.f32.mrb[61].mxu1 }
 0x2fa   : > { %v2799_v7 = vpop.f32.mrb[62].mxu1 }
 0x2fb   : > { %v10156_v17 = vadd.f32 %v3224_v44, %v2799_v7  ;;  %v2801_v12 = vpop.f32.mrb[63].mxu1 }
 0x300   : > { %v3682_v61 = vpop.f32.mrb[64].mxu1 }
 0x301   : > { %v3809_v19 = vadd.f32 %v3682_v61, %v10034_v0  ;;  %v3684_v29 = vpop.f32.mrb[65].mxu1  ;;  %v497_v0 = vsel %vm8369_vm11, 0, %v496_v41  ;;  %vm11575_vm11 = vmmov %vm11572_vm6 }
 0x302   : > { %v3685_v16 = vpop.f32.mrb[66].mxu1  ;;  %498 = vst [vmem:[#allocation3 + $0x70] sm:$0x11] %v497_v0 }
 0x303   : > { %v3810_v4 = vadd.f32 %v3685_v16, %v10036_v58  ;;  %v3687_v49 = vpop.f32.mrb[67].mxu1  ;;  %v7948_v58 = vld [vmem:[#allocation6 + $0x70] sm:$0xff]   ;;  %v3848_v31 = vadd.f32 %v10165_v30, %v3809_v19 }
 0x304   : > { %4575 = vmatpush1.bf16.msra.mxu0 %v7948_v58 }
 0x305   : > { %4576 = vmatprep.subr.bf16.mxu0 %v11567_v59  ;;  %v3849_v47 = vadd.f32 %v10165_v30, %v3810_v4  ;;  %v3880_v39 = vmax.f32 %v3848_v31, 0.0  ;;  %v7950_v31 = vld [vmem:[#allocation6 + $0x80] sm:$0xff]  }
 0x307   : > { %v3881_v33 = vmax.f32 %v3849_v47, 0.0 }
 0x308   : > { %v3690_v3 = vpop.f32.mrb[68].mxu1  ;;  %4577 = vmatpush1.bf16.msra.mxu0 %v7949_v26 }
 0x309   : > { %v3811_v53 = vadd.f32 %v3690_v3, %v10045_v9  ;;  %v3692_v22 = vpop.f32.mrb[69].mxu1  ;;  %v534_v9 = vsel %vm8492_vm3, 0, %v533_v54  ;;  %4578 = vmatprep.subr.bf16.mxu0 %v11567_v59  ;;  %v530_v7 = vld [vmem:[#allocation3 + $0x74] sm:$0xf] }
 0x30a   : > { %v3693_v44 = vpop.f32.mrb[70].mxu1  ;;  %535 = vst [vmem:[#allocation3 + $0x7c] sm:$0x1] %v534_v9 }
 0x30b   : > { %v3850_v8 = vadd.f32 %v10165_v30, %v3811_v53  ;;  %v3812_v57 = vadd.f32 %v3693_v44, %v10047_v32  ;;  %v3695_v34 = vpop.f32.mrb[71].mxu1  ;;  %v531_v32 = vsel %vm8471_vm0, 0, %v530_v7  ;;  %v7952_v7 = vld [vmem:[#allocation6 + $0x90] sm:$0xff]  }
 0x30c   : > { %532 = vst [vmem:[#allocation3 + $0x74] sm:$0xf] %v531_v32  ;;  %4579 = vmatpush1.bf16.msra.mxu0 %v7950_v31 }
 0x30d   : > { %v3882_v37 = vmax.f32 %v3850_v8, 0.0  ;;  %v3851_v45 = vadd.f32 %v10165_v30, %v3812_v57  ;;  %4580 = vmatprep.subr.bf16.mxu0 %v11567_v59 }
 0x30f   : > { %v3912_v27 = vmax.f32 %v3880_v39, %v3882_v37  ;;  %v3883_v43 = vmax.f32 %v3851_v45, 0.0 }
 0x310   : > { %v3698_v12 = vpop.f32.mrb[72].mxu1 }
 0x311   : > { %3928 = vst.msk [vmem:[#allocation5] sm:$0xff] %vm2593_vm8, %v3912_v27  ;;  %v3913_v19 = vmax.f32 %v3881_v33, %v3883_v43  ;;  %v3813_v29 = vadd.f32 %v3698_v12, %v10056_v21  ;;  %v3700_v16 = vpop.f32.mrb[73].mxu1  ;;  %v523_v21 = vld [vmem:[#allocation3] sm:$0xf] }
 0x312   : > { %v3701_v4 = vpop.f32.mrb[74].mxu1 }
 0x313   : > { %3929 = vst.msk [vmem:[#allocation5 + $0x8] sm:$0xff] %vm2593_vm8, %v3913_v19  ;;  %v3814_v49 = vadd.f32 %v3701_v4, %v10058_v28  ;;  %v3703_v51 = vpop.f32.mrb[75].mxu1  ;;  %v3852_v0 = vadd.f32 %v10165_v30, %v3813_v29  ;;  %v524_v28 = vsel %vm8471_vm0, 0, %v523_v21 }
 0x314   : > { %525 = vst [vmem:[#allocation3] sm:$0xf] %v524_v28  ;;  %v4083_v51 = vld [vmem:[#allocation3 + $0x10] sm:$0xf] }
 0x315   : > { %v3853_v44 = vadd.f32 %v10165_v30, %v3814_v49  ;;  %v3884_v54 = vmax.f32 %v3852_v0, 0.0  ;;  %v4086_v49 = vld [vmem:[#allocation3 + $0x18] sm:$0x1] }
 0x317   : > { %v3885_v9 = vmax.f32 %v3853_v44, 0.0 }
 0x318   : > { %v3706_v41 = vpop.f32.mrb[76].mxu1 }
 0x319   : > { %v3815_v58 = vadd.f32 %v3706_v41, %v10067_v15  ;;  %v3708_v3 = vpop.f32.mrb[77].mxu1  ;;  %v7951_v15 = vld [vmem:[#allocation6 + $0x88] sm:$0xff]  }
 0x31a   : > { %v3709_v53 = vpop.f32.mrb[78].mxu1  ;;  %v3944_v22 = vld [vmem:[#allocation5] ss:$2 sm:$0xff]  ;;  %v3960_v26 = vld [vmem:[#allocation5 + $0x1] ss:$2 sm:$0xff]  ;;  %4581 = vmatpush1.bf16.msra.mxu0 %v7951_v15 }
 0x31b   : > { %v3854_v47 = vadd.f32 %v10165_v30, %v3815_v58  ;;  %v3816_v8 = vadd.f32 %v3709_v53, %v10069_v24  ;;  %v3711_v57 = vpop.f32.mrb[79].mxu1  ;;  %v3975_v34 = vmax.f32 %v3944_v22, %v3960_v26  ;;  %4582 = vmatprep.subr.bf16.mxu0 %v11567_v59  ;;  %v7953_v58 = vld [vmem:[#allocation6 + $0x98] sm:$0xff]   ;;  %v7954_v22 = vld [vmem:[#allocation6 + $0xa0] sm:$0xff]  }
 0x31d   : > { %v3886_v39 = vmax.f32 %v3854_v47, 0.0  ;;  %v3855_v37 = vadd.f32 %v10165_v30, %v3816_v8  ;;  %v7474_v45 = vpack.c.bf16 %v3975_v34, %v3975_v34 }
 0x31e   : > { %4583 = vmatpush1.bf16.msra.mxu0 %v7952_v7  ;;  %v7956_v7 = vld [vmem:[#allocation6 + $0xb0] sm:$0xff]  }
 0x31f   : > { %v3914_v33 = vmax.f32 %v3884_v54, %v3886_v39  ;;  %v3887_v27 = vmax.f32 %v3855_v37, 0.0  ;;  %v4013_v43 = vshrl.u32 %v7474_v45, 16  ;;  %v4016_v16 = vshll.u32 %v7474_v45, 16  ;;  %4584 = vmatprep.subr.bf16.mxu0 %v11567_v59  ;;  %v7955_v54 = vld [vmem:[#allocation6 + $0xa8] sm:$0xff]  }
 0x320   : > { %v3714_v12 = vpop.f32.mrb[80].mxu1 }
 0x321   : > { %3930 = vst.msk [vmem:[#allocation5 + $0x10] sm:$0xff] %vm2593_vm8, %v3914_v33  ;;  %v3915_v24 = vmax.f32 %v3885_v9, %v3887_v27  ;;  %v3817_v32 = vadd.f32 %v3714_v12, %v10078_v56  ;;  %v3716_v19 = vpop.f32.mrb[81].mxu1  ;;  %v4015_v29 = vrot.slane %v4013_v43, 7 }
 0x322   : > { %v3717_v4 = vpop.f32.mrb[82].mxu1  ;;  %4585 = vmatpush1.bf16.msra.mxu0 %v7953_v58  ;;  %v4089_v58 = vld [vmem:[#allocation3 + $0x20] sm:$0xf] }
 0x323   : > { %3931 = vst.msk [vmem:[#allocation5 + $0x18] sm:$0xff] %vm2593_vm8, %v3915_v24  ;;  %v3818_v14 = vadd.f32 %v3717_v4, %v10080_v25  ;;  %v3719_v18 = vpop.f32.mrb[83].mxu1  ;;  %v4019_v41 = vrot.slane %v4015_v29, 4  ;;  %v4018_v0 = vor.u32 %v4016_v16, %v4015_v29  ;;  %4586 = vmatprep.subr.bf16.mxu0 %v11567_v59  ;;  %v3856_v21 = vadd.f32 %v10165_v30, %v3817_v32  ;;  %v4092_v29 = vld [vmem:[#allocation3 + $0x28] sm:$0x1] }
 0x325   : > { %4138 = vrot.lane.b32.xlu1 %v4019_v41, %s8178_s23  ;;  %v4087_v56 = vsel %vm8492_vm3, %v4019_v41, %v4086_v49  ;;  %4136 = vrot.lane.b32.xlu0 %v4018_v0, %s8178_s23  ;;  %v4084_v3 = vsel %vm8471_vm0, %v4018_v0, %v4083_v51  ;;  %v3857_v47 = vadd.f32 %v10165_v30, %v3818_v14  ;;  %v3888_v39 = vmax.f32 %v3856_v21, 0.0  ;;  %v4237_v49 = vld [vmem:[#allocation3 + $0xc] sm:$0x1]  ;;  %v4234_v51 = vld [vmem:[#allocation3 + $0x4] sm:$0xf] }
 0x326   : > { %4088 = vst [vmem:[#allocation3 + $0x18] sm:$0x1] %v4087_v56  ;;  %4085 = vst [vmem:[#allocation3 + $0x10] sm:$0xf] %v4084_v3  ;;  %4587 = vmatpush1.bf16.msra.mxu0 %v7954_v22  ;;  %v7957_v56 = vld [vmem:[#allocation6 + $0xb8] sm:$0xff]  }
 0x327   : > { %4588 = vmatprep.subr.bf16.mxu0 %v11567_v59  ;;  %v3889_v9 = vmax.f32 %v3857_v47, 0.0 }
 0x328   : > { %v3722_v25 = vpop.f32.mrb[84].mxu1 }
 0x329   : > { %v3819_v31 = vadd.f32 %v3722_v25, %v10089_v6  ;;  %v3724_v53 = vpop.f32.mrb[85].mxu1 }
 0x32a   : > { %v3725_v26 = vpop.f32.mrb[86].mxu1  ;;  %v3946_v28 = vld [vmem:[#allocation5 + $0x10] ss:$2 sm:$0xff]  ;;  %v3962_v44 = vld [vmem:[#allocation5 + $0x11] ss:$2 sm:$0xff]  ;;  %4589 = vmatpush1.bf16.msra.mxu0 %v7955_v54 }
 0x32b   : > { %v3858_v8 = vadd.f32 %v10165_v30, %v3819_v31  ;;  %v3820_v57 = vadd.f32 %v3725_v26, %v10091_v42  ;;  %v3727_v34 = vpop.f32.mrb[87].mxu1  ;;  %v3976_v15 = vmax.f32 %v3946_v28, %v3962_v44  ;;  %4590 = vmatprep.subr.bf16.mxu0 %v11567_v59 }
 0x32d   : > { %v3890_v37 = vmax.f32 %v3858_v8, 0.0  ;;  %v3859_v6 = vadd.f32 %v10165_v30, %v3820_v57  ;;  %v7475_v45 = vpack.c.bf16 %v3976_v15, %v3976_v15 }
 0x32e   : > { %4591 = vmatpush1.bf16.msra.mxu0 %v7956_v7 }
 0x32f   : > { %v3916_v33 = vmax.f32 %v3888_v39, %v3890_v37  ;;  %v3891_v27 = vmax.f32 %v3859_v6, 0.0  ;;  %v4021_v43 = vshrl.u32 %v7475_v45, 16  ;;  %v4024_v16 = vshll.u32 %v7475_v45, 16  ;;  %4592 = vmatprep.subr.bf16.mxu0 %v11567_v59 }
 0x330   : > { %v3730_v12 = vpop.f32.mrb[88].mxu1 }
 0x331   : > { %3932 = vst.msk [vmem:[#allocation5 + $0x20] sm:$0xff] %vm2593_vm8, %v3916_v33  ;;  %v3917_v42 = vmax.f32 %v3889_v9, %v3891_v27  ;;  %v3821_v24 = vadd.f32 %v3730_v12, %v10093_v20  ;;  %v3732_v32 = vpop.f32.mrb[89].mxu1  ;;  %v4023_v19 = vrot.slane %v4021_v43, 7 }
 0x332   : > { %v3733_v4 = vpop.f32.mrb[90].mxu1  ;;  %4593 = vmatpush1.bf16.msra.mxu0 %v7957_v56  ;;  %v4098_v32 = vld [vmem:[#allocation3 + $0x38] sm:$0x1] }
 0x333   : > { %3933 = vst.msk [vmem:[#allocation5 + $0x28] sm:$0xff] %vm2593_vm8, %v3917_v42  ;;  %v3822_v14 = vadd.f32 %v3733_v4, %v10095_v13  ;;  %v3735_v18 = vpop.f32.mrb[91].mxu1  ;;  %v4027_v41 = vrot.slane %v4023_v19, 4  ;;  %v4026_v0 = vor.u32 %v4024_v16, %v4023_v19  ;;  %4719 = vmatprep.subr.bf16.mxu0 %v11567_v59  ;;  %v3860_v31 = vadd.f32 %v10165_v30, %v3821_v24  ;;  %v4243_v19 = vld [vmem:[#allocation3 + $0x1c] sm:$0x1] }
 0x335   : > { %4142 = vrot.lane.b32.xlu1 %v4027_v41, %s8178_s23  ;;  %v4093_v20 = vsel %vm8492_vm3, %v4027_v41, %v4092_v29  ;;  %v4238_v3 = vsel %vm8492_vm3, %v4027_v41, %v4237_v49  ;;  %4140 = vrot.lane.b32.xlu0 %v4026_v0, %s8178_s23  ;;  %v4090_v13 = vsel %vm8471_vm0, %v4026_v0, %v4089_v58  ;;  %v3892_v54 = vmax.f32 %v3860_v31, 0.0 }
 0x336   : > { %4094 = vst [vmem:[#allocation3 + $0x28] sm:$0x1] %v4093_v20  ;;  %4239 = vst [vmem:[#allocation3 + $0xc] sm:$0x1] %v4238_v3  ;;  %v4235_v25 = vsel %vm8471_vm0, %v4026_v0, %v4234_v51  ;;  %v3861_v47 = vadd.f32 %v10165_v30, %v3822_v14  ;;  %v4095_v51 = vld [vmem:[#allocation3 + $0x30] sm:$0xf] }
 0x337   : > { %4091 = vst [vmem:[#allocation3 + $0x20] sm:$0xf] %v4090_v13  ;;  %4236 = vst [vmem:[#allocation3 + $0x4] sm:$0xf] %v4235_v25  ;;  %v4240_v14 = vld [vmem:[#allocation3 + $0x14] sm:$0xf] }
 0x338   : > { %v3738_v21 = vpop.f32.mrb[92].mxu1  ;;  %v3893_v45 = vmax.f32 %v3861_v47, 0.0 }
 0x339   : > { %v3823_v53 = vadd.f32 %v3738_v21, %v10101_v55  ;;  %v3740_v22 = vpop.f32.mrb[93].mxu1 }
 0x33a   : > { %v3741_v26 = vpop.f32.mrb[94].mxu1  ;;  %v3948_v28 = vld [vmem:[#allocation5 + $0x20] ss:$2 sm:$0xff]  ;;  %v3964_v44 = vld [vmem:[#allocation5 + $0x21] ss:$2 sm:$0xff] }
 0x33b   : > { %v3862_v8 = vadd.f32 %v10165_v30, %v3823_v53  ;;  %v3824_v57 = vadd.f32 %v3741_v26, %v10107_v5  ;;  %v3743_v34 = vpop.f32.mrb[95].mxu1  ;;  %v3977_v15 = vmax.f32 %v3948_v28, %v3964_v44 }
 0x33d   : > { %v3894_v39 = vmax.f32 %v3862_v8, 0.0  ;;  %v3863_v37 = vadd.f32 %v10165_v30, %v3824_v57  ;;  %v7476_v6 = vpack.c.bf16 %v3977_v15, %v3977_v15 }
 0x33f   : > { %v3918_v9 = vmax.f32 %v3892_v54, %v3894_v39  ;;  %v3895_v55 = vmax.f32 %v3863_v37, 0.0  ;;  %v4029_v33 = vshrl.u32 %v7476_v6, 16  ;;  %v4032_v5 = vshll.u32 %v7476_v6, 16 }
 0x340   : > { %v3746_v27 = vpop.f32.mrb[96].mxu1 }
 0x341   : > { %3934 = vst.msk [vmem:[#allocation5 + $0x30] sm:$0xff] %vm2593_vm8, %v3918_v9  ;;  %v3919_v43 = vmax.f32 %v3893_v45, %v3895_v55  ;;  %v3825_v7 = vadd.f32 %v3746_v27, %v10109_v36  ;;  %v3748_v12 = vpop.f32.mrb[97].mxu1  ;;  %v4031_v42 = vrot.slane %v4029_v33, 7  ;;  %v4104_v55 = vld [vmem:[#allocation3 + $0x48] sm:$0x1] }
 0x342   : > { %v3749_v24 = vpop.f32.mrb[98].mxu1  ;;  %v4249_v33 = vld [vmem:[#allocation3 + $0x2c] sm:$0x1] }
 0x343   : > { %3935 = vst.msk [vmem:[#allocation5 + $0x38] sm:$0xff] %vm2593_vm8, %v3919_v43  ;;  %v3826_v29 = vadd.f32 %v3749_v24, %v10111_v52  ;;  %v3751_v16 = vpop.f32.mrb[99].mxu1  ;;  %v4035_v4 = vrot.slane %v4031_v42, 4  ;;  %v4034_v49 = vor.u32 %v4032_v5, %v4031_v42  ;;  %v3864_v58 = vadd.f32 %v10165_v30, %v3825_v7  ;;  %v4101_v42 = vld [vmem:[#allocation3 + $0x40] sm:$0xf] }
 0x344   : > { %v4246_v5 = vld [vmem:[#allocation3 + $0x24] sm:$0xf] }
 0x345   : > { %4146 = vrot.lane.b32.xlu1 %v4035_v4, %s8178_s23  ;;  %v4099_v36 = vsel %vm8492_vm3, %v4035_v4, %v4098_v32  ;;  %v4244_v18 = vsel %vm8492_vm3, %v4035_v4, %v4243_v19  ;;  %4144 = vrot.lane.b32.xlu0 %v4034_v49, %s8178_s23  ;;  %v4096_v52 = vsel %vm8471_vm0, %v4034_v49, %v4095_v51  ;;  %v3896_v28 = vmax.f32 %v3864_v58, 0.0 }
 0x346   : > { %4100 = vst [vmem:[#allocation3 + $0x38] sm:$0x1] %v4099_v36  ;;  %4245 = vst [vmem:[#allocation3 + $0x1c] sm:$0x1] %v4244_v18  ;;  %v4241_v41 = vsel %vm8471_vm0, %v4034_v49, %v4240_v14  ;;  %v3865_v21 = vadd.f32 %v10165_v30, %v3826_v29 }
 0x347   : > { %4097 = vst [vmem:[#allocation3 + $0x30] sm:$0xf] %v4096_v52  ;;  %4242 = vst [vmem:[#allocation3 + $0x14] sm:$0xf] %v4241_v41 }
 0x348   : > { %v3754_v0 = vpop.f32.mrb[100].mxu1  ;;  %v3897_v57 = vmax.f32 %v3865_v21, 0.0 }
 0x349   : > { %v3827_v56 = vadd.f32 %v3754_v0, %v10115_v23  ;;  %v3756_v20 = vpop.f32.mrb[101].mxu1 }
 0x34a   : > { %v3757_v3 = vpop.f32.mrb[102].mxu1  ;;  %v3950_v13 = vld [vmem:[#allocation5 + $0x30] ss:$2 sm:$0xff]  ;;  %v3966_v25 = vld [vmem:[#allocation5 + $0x31] ss:$2 sm:$0xff] }
 0x34b   : > { %v3866_v31 = vadd.f32 %v10165_v30, %v3827_v56  ;;  %v3828_v53 = vadd.f32 %v3757_v3, %v10119_v46  ;;  %v3759_v22 = vpop.f32.mrb[103].mxu1  ;;  %v3978_v26 = vmax.f32 %v3950_v13, %v3966_v25 }
 0x34d   : > { %v3898_v44 = vmax.f32 %v3866_v31, 0.0  ;;  %v3867_v47 = vadd.f32 %v10165_v30, %v3828_v53  ;;  %v7477_v8 = vpack.c.bf16 %v3978_v26, %v3978_v26 }
 0x34f   : > { %v3920_v34 = vmax.f32 %v3896_v28, %v3898_v44  ;;  %v3899_v23 = vmax.f32 %v3867_v47, 0.0  ;;  %v4037_v15 = vshrl.u32 %v7477_v8, 16  ;;  %v4040_v46 = vshll.u32 %v7477_v8, 16  ;;  %v4110_v47 = vld [vmem:[#allocation3 + $0x58] sm:$0x1] }
 0x350   : > { %v3762_v54 = vpop.f32.mrb[104].mxu1  ;;  %v4255_v8 = vld [vmem:[#allocation3 + $0x3c] sm:$0x1] }
 0x351   : > { %3936 = vst.msk [vmem:[#allocation5 + $0x40] sm:$0xff] %vm2593_vm8, %v3920_v34  ;;  %v3921_v39 = vmax.f32 %v3897_v57, %v3899_v23  ;;  %v3829_v37 = vadd.f32 %v3762_v54, %v10121_v40  ;;  %v3764_v6 = vpop.f32.mrb[105].mxu1  ;;  %v4039_v45 = vrot.slane %v4037_v15, 7  ;;  %v4107_v54 = vld [vmem:[#allocation3 + $0x50] sm:$0xf] }
 0x352   : > { %v3765_v9 = vpop.f32.mrb[106].mxu1 }
 0x353   : > { %3937 = vst.msk [vmem:[#allocation5 + $0x48] sm:$0xff] %vm2593_vm8, %v3921_v39  ;;  %v3830_v27 = vadd.f32 %v3765_v9, %v10123_v60  ;;  %v3767_v43 = vpop.f32.mrb[107].mxu1  ;;  %v4043_v7 = vrot.slane %v4039_v45, 4  ;;  %v4042_v12 = vor.u32 %v4040_v46, %v4039_v45  ;;  %v3868_v29 = vadd.f32 %v10165_v30, %v3829_v37  ;;  %v4252_v39 = vld [vmem:[#allocation3 + $0x34] sm:$0xf] }
 0x355   : > { %4150 = vrot.lane.b32.xlu1 %v4043_v7, %s8178_s23  ;;  %v4105_v40 = vsel %vm8492_vm3, %v4043_v7, %v4104_v55  ;;  %v4250_v24 = vsel %vm8492_vm3, %v4043_v7, %v4249_v33  ;;  %4148 = vrot.lane.b32.xlu0 %v4042_v12, %s8178_s23  ;;  %v4102_v60 = vsel %vm8471_vm0, %v4042_v12, %v4101_v42  ;;  %v3900_v58 = vmax.f32 %v3868_v29, 0.0 }
 0x356   : > { %4106 = vst [vmem:[#allocation3 + $0x48] sm:$0x1] %v4105_v40  ;;  %4251 = vst [vmem:[#allocation3 + $0x2c] sm:$0x1] %v4250_v24  ;;  %v4247_v32 = vsel %vm8471_vm0, %v4042_v12, %v4246_v5  ;;  %v3869_v36 = vadd.f32 %v10165_v30, %v3830_v27 }
 0x357   : > { %4103 = vst [vmem:[#allocation3 + $0x40] sm:$0xf] %v4102_v60  ;;  %4248 = vst [vmem:[#allocation3 + $0x24] sm:$0xf] %v4247_v32 }
 0x358   : > { %v3770_v19 = vpop.f32.mrb[108].mxu1  ;;  %v3901_v13 = vmax.f32 %v3869_v36, 0.0 }
 0x359   : > { %v3831_v16 = vadd.f32 %v3770_v19, %v10127_v48  ;;  %v3772_v4 = vpop.f32.mrb[109].mxu1 }
 0x35a   : > { %v3773_v49 = vpop.f32.mrb[110].mxu1  ;;  %v3952_v51 = vld [vmem:[#allocation5 + $0x40] ss:$2 sm:$0xff]  ;;  %v3968_v14 = vld [vmem:[#allocation5 + $0x41] ss:$2 sm:$0xff] }
 0x35b   : > { %v3870_v18 = vadd.f32 %v10165_v30, %v3831_v16  ;;  %v3832_v52 = vadd.f32 %v3773_v49, %v10131_v1  ;;  %v3775_v41 = vpop.f32.mrb[111].mxu1  ;;  %v3979_v0 = vmax.f32 %v3952_v51, %v3968_v14 }
 0x35c   : > { %v4116_v41 = vld [vmem:[#allocation3 + $0x68] sm:$0x1] }
 0x35d   : > { %v3902_v56 = vmax.f32 %v3870_v18, 0.0  ;;  %v3871_v20 = vadd.f32 %v10165_v30, %v3832_v52  ;;  %v7478_v3 = vpack.c.bf16 %v3979_v0, %v3979_v0  ;;  %v4261_v0 = vld [vmem:[#allocation3 + $0x4c] sm:$0x1] }
 0x35f   : > { %v3922_v25 = vmax.f32 %v3900_v58, %v3902_v56  ;;  %v3903_v48 = vmax.f32 %v3871_v20, 0.0  ;;  %v4045_v21 = vshrl.u32 %v7478_v3, 16  ;;  %v4048_v1 = vshll.u32 %v7478_v3, 16 }
 0x360   : > { %v3778_v31 = vpop.f32.mrb[112].mxu1 }
 0x361   : > { %3938 = vst.msk [vmem:[#allocation5 + $0x50] sm:$0xff] %vm2593_vm8, %v3922_v25  ;;  %v3923_v53 = vmax.f32 %v3901_v13, %v3903_v48  ;;  %v3833_v22 = vadd.f32 %v3778_v31, %v10133_v11  ;;  %v3780_v26 = vpop.f32.mrb[113].mxu1  ;;  %v4047_v28 = vrot.slane %v4045_v21, 7  ;;  %v4113_v13 = vld [vmem:[#allocation3 + $0x60] sm:$0xf] }
 0x362   : > { %v3781_v44 = vpop.f32.mrb[114].mxu1  ;;  %v4258_v25 = vld [vmem:[#allocation3 + $0x44] sm:$0xf] }
 0x363   : > { %3939 = vst.msk [vmem:[#allocation5 + $0x58] sm:$0xff] %vm2593_vm8, %v3923_v53  ;;  %v3834_v57 = vadd.f32 %v3781_v44, %v10135_v38  ;;  %v3783_v34 = vpop.f32.mrb[115].mxu1  ;;  %v4051_v23 = vrot.slane %v4047_v28, 4  ;;  %v4050_v15 = vor.u32 %v4048_v1, %v4047_v28  ;;  %v3872_v46 = vadd.f32 %v10165_v30, %v3833_v22 }
 0x365   : > { %4154 = vrot.lane.b32.xlu1 %v4051_v23, %s8178_s23  ;;  %v4111_v11 = vsel %vm8492_vm3, %v4051_v23, %v4110_v47  ;;  %v4256_v37 = vsel %vm8492_vm3, %v4051_v23, %v4255_v8  ;;  %4152 = vrot.lane.b32.xlu0 %v4050_v15, %s8178_s23  ;;  %v4108_v38 = vsel %vm8471_vm0, %v4050_v15, %v4107_v54  ;;  %v3904_v24 = vmax.f32 %v3872_v46, 0.0 }
 0x366   : > { %4112 = vst [vmem:[#allocation3 + $0x58] sm:$0x1] %v4111_v11  ;;  %4257 = vst [vmem:[#allocation3 + $0x3c] sm:$0x1] %v4256_v37  ;;  %v4253_v6 = vsel %vm8471_vm0, %v4050_v15, %v4252_v39  ;;  %v3873_v7 = vadd.f32 %v10165_v30, %v3834_v57 }
 0x367   : > { %4109 = vst [vmem:[#allocation3 + $0x50] sm:$0xf] %v4108_v38  ;;  %4254 = vst [vmem:[#allocation3 + $0x34] sm:$0xf] %v4253_v6 }
 0x368   : > { %v3786_v45 = vpop.f32.mrb[116].mxu1  ;;  %v3905_v29 = vmax.f32 %v3873_v7, 0.0  ;;  %v4264_v7 = vld [vmem:[#allocation3 + $0x54] sm:$0xf] }
 0x369   : > { %v3835_v9 = vadd.f32 %v3786_v45, %v10139_v10  ;;  %v3788_v55 = vpop.f32.mrb[117].mxu1 }
 0x36a   : > { %v3789_v33 = vpop.f32.mrb[118].mxu1  ;;  %v3954_v27 = vld [vmem:[#allocation5 + $0x50] ss:$2 sm:$0xff]  ;;  %v3970_v43 = vld [vmem:[#allocation5 + $0x51] ss:$2 sm:$0xff] }
 0x36b   : > { %v3874_v12 = vadd.f32 %v10165_v30, %v3835_v9  ;;  %v3836_v42 = vadd.f32 %v3789_v33, %v10143_v63  ;;  %v3791_v5 = vpop.f32.mrb[119].mxu1  ;;  %v3980_v40 = vmax.f32 %v3954_v27, %v3970_v43  ;;  %v4122_v55 = vld [vmem:[#allocation3 + $0x78] sm:$0x1]  ;;  %v4267_v33 = vld [vmem:[#allocation3 + $0x5c] sm:$0x1] }
 0x36c   : > { %v4119_v27 = vld [vmem:[#allocation3 + $0x70] sm:$0xf] }
 0x36d   : > { %v3906_v60 = vmax.f32 %v3874_v12, 0.0  ;;  %v3875_v32 = vadd.f32 %v10165_v30, %v3836_v42  ;;  %v7479_v19 = vpack.c.bf16 %v3980_v40, %v3980_v40 }
 0x36f   : > { %v3924_v16 = vmax.f32 %v3904_v24, %v3906_v60  ;;  %v3907_v10 = vmax.f32 %v3875_v32, 0.0  ;;  %v4053_v4 = vshrl.u32 %v7479_v19, 16  ;;  %v4056_v63 = vshll.u32 %v7479_v19, 16 }
 0x370   : > { %v3794_v49 = vpop.f32.mrb[120].mxu1 }
 0x371   : > { %3940 = vst.msk [vmem:[#allocation5 + $0x60] sm:$0xff] %vm2593_vm8, %v3924_v16  ;;  %v3925_v51 = vmax.f32 %v3905_v29, %v3907_v10  ;;  %v3837_v14 = vadd.f32 %v3794_v49, %v10145_v50  ;;  %v3796_v36 = vpop.f32.mrb[121].mxu1  ;;  %v4055_v18 = vrot.slane %v4053_v4, 7  ;;  %v4273_v10 = vld [vmem:[#allocation3 + $0x6c] sm:$0x1] }
 0x372   : > { %v3797_v52 = vpop.f32.mrb[122].mxu1  ;;  %v4270_v4 = vld [vmem:[#allocation3 + $0x64] sm:$0xf] }
 0x373   : > { %3941 = vst.msk [vmem:[#allocation5 + $0x68] sm:$0xff] %vm2593_vm8, %v3925_v51  ;;  %v3838_v58 = vadd.f32 %v3797_v52, %v10147_v62  ;;  %v3799_v56 = vpop.f32.mrb[123].mxu1  ;;  %v4059_v20 = vrot.slane %v4055_v18, 4  ;;  %v4058_v3 = vor.u32 %v4056_v63, %v4055_v18  ;;  %v3876_v53 = vadd.f32 %v10165_v30, %v3837_v14  ;;  %v4187_v18 = vld [vmem:[#allocation3 + $0x8] sm:$0x1] }
 0x374   : > { %v4184_v63 = vld [vmem:[#allocation3] sm:$0xf] }
 0x375   : > { %4158 = vrot.lane.b32.xlu1 %v4059_v20, %s8178_s23  ;;  %v4117_v50 = vsel %vm8492_vm3, %v4059_v20, %v4116_v41  ;;  %v4262_v48 = vsel %vm8492_vm3, %v4059_v20, %v4261_v0  ;;  %4156 = vrot.lane.b32.xlu0 %v4058_v3, %s8178_s23  ;;  %v4114_v62 = vsel %vm8471_vm0, %v4058_v3, %v4113_v13  ;;  %v3908_v15 = vmax.f32 %v3876_v53, 0.0  ;;  %v4193_v13 = vld [vmem:[#allocation3 + $0x18] sm:$0x1] }
 0x376   : > { %4118 = vst [vmem:[#allocation3 + $0x68] sm:$0x1] %v4117_v50  ;;  %4263 = vst [vmem:[#allocation3 + $0x4c] sm:$0x1] %v4262_v48  ;;  %v4259_v21 = vsel %vm8471_vm0, %v4058_v3, %v4258_v25  ;;  %v3877_v47 = vadd.f32 %v10165_v30, %v3838_v58  ;;  %v4190_v25 = vld [vmem:[#allocation3 + $0x10] sm:$0xf] }
 0x377   : > { %4115 = vst [vmem:[#allocation3 + $0x60] sm:$0xf] %v4114_v62  ;;  %4260 = vst [vmem:[#allocation3 + $0x44] sm:$0xf] %v4259_v21 }
 0x378   : > { %v3802_v31 = vpop.f32.mrb[124].mxu1  ;;  %v3909_v37 = vmax.f32 %v3877_v47, 0.0 }
 0x379   : > { %v3839_v22 = vadd.f32 %v3802_v31, %v10154_v35  ;;  %v3804_v26 = vpop.f32.mrb[125].mxu1 }
 0x37a   : > { %v3805_v28 = vpop.f32.mrb[126].mxu1  ;;  %v3956_v1 = vld [vmem:[#allocation5 + $0x60] ss:$2 sm:$0xff]  ;;  %v3972_v44 = vld [vmem:[#allocation5 + $0x61] ss:$2 sm:$0xff] }
 0x37b   : > { %v3878_v8 = vadd.f32 %v10165_v30, %v3839_v22  ;;  %v3840_v57 = vadd.f32 %v3805_v28, %v10156_v17  ;;  %v3807_v34 = vpop.f32.mrb[127].mxu1  ;;  %v3981_v23 = vmax.f32 %v3956_v1, %v3972_v44 }
 0x37d   : > { %v3910_v54 = vmax.f32 %v3878_v8, 0.0  ;;  %v3879_v39 = vadd.f32 %v10165_v30, %v3840_v57  ;;  %v7480_v11 = vpack.c.bf16 %v3981_v23, %v3981_v23 }
 0x37f   : > { %v3926_v38 = vmax.f32 %v3908_v15, %v3910_v54  ;;  %v3911_v35 = vmax.f32 %v3879_v39, 0.0  ;;  %v4061_v6 = vshrl.u32 %v7480_v11, 16  ;;  %v4064_v9 = vshll.u32 %v7480_v11, 16 }
 0x381   : > { %3942 = vst.msk [vmem:[#allocation5 + $0x70] sm:$0xff] %vm2593_vm8, %v3926_v38  ;;  %v3927_v45 = vmax.f32 %v3909_v37, %v3911_v35  ;;  %v4063_v46 = vrot.slane %v4061_v6, 7 }
 0x383   : > { %3943 = vst.msk [vmem:[#allocation5 + $0x78] sm:$0xff] %vm2593_vm8, %v3927_v45  ;;  %v4067_v17 = vrot.slane %v4063_v46, 4  ;;  %v4066_v43 = vor.u32 %v4064_v9, %v4063_v46 }
 0x385   : > { %4162 = vrot.lane.b32.xlu1 %v4067_v17, %s8178_s23  ;;  %v4123_v30 = vsel %vm8492_vm3, %v4067_v17, %v4122_v55  ;;  %v4268_v12 = vsel %vm8492_vm3, %v4067_v17, %v4267_v33  ;;  %4160 = vrot.lane.b32.xlu0 %v4066_v43, %s8178_s23  ;;  %v4120_v42 = vsel %vm8471_vm0, %v4066_v43, %v4119_v27 }
 0x386   : > { %4124 = vst [vmem:[#allocation3 + $0x78] sm:$0x1] %v4123_v30  ;;  %4269 = vst [vmem:[#allocation3 + $0x5c] sm:$0x1] %v4268_v12  ;;  %v4265_v5 = vsel %vm8471_vm0, %v4066_v43, %v4264_v7 }
 0x387   : > { %4121 = vst [vmem:[#allocation3 + $0x70] sm:$0xf] %v4120_v42  ;;  %4266 = vst [vmem:[#allocation3 + $0x54] sm:$0xf] %v4265_v5 }
 0x38a   : > { %v3958_v40 = vld [vmem:[#allocation5 + $0x70] ss:$2 sm:$0xff]  ;;  %v3974_v24 = vld [vmem:[#allocation5 + $0x71] ss:$2 sm:$0xff] }
 0x38b   : > { %v3982_v60 = vmax.f32 %v3958_v40, %v3974_v24 }
 0x38d   : > { %v7481_v32 = vpack.c.bf16 %v3982_v60, %v3982_v60 }
 0x38f   : > { %v4129_v19 = vshrl.u32 %v7481_v32, 16  ;;  %v4132_v16 = vshll.u32 %v7481_v32, 16 }
 0x391   : > { %v4131_v29 = vrot.slane %v4129_v19, 7 }
 0x393   : > { %v4135_v49 = vrot.slane %v4131_v29, 4  ;;  %v4134_v51 = vor.u32 %v4132_v16, %v4131_v29 }
 0x395   : > { %4166 = vrot.lane.b32.xlu1 %v4135_v49, %s8178_s23  ;;  %v4274_v14 = vsel %vm8492_vm3, %v4135_v49, %v4273_v10  ;;  %4164 = vrot.lane.b32.xlu0 %v4134_v51, %s8178_s23  ;;  %v4271_v36 = vsel %vm8471_vm0, %v4134_v51, %v4270_v4  ;;  %v7958_v4 = vld [vmem:[#allocation6] sm:$0xff]   ;;  %vm11577_vm0 = vmmov %vm11572_vm6  ;;  %s11407_s23 = scalar_lea.sflag [#allocation8], %s338_s16 }
 0x396   : > { %4275 = vst [vmem:[#allocation3 + $0x6c] sm:$0x1] %v4274_v14  ;;  %4272 = vst [vmem:[#allocation3 + $0x64] sm:$0xf] %v4271_v36  ;;  %v4199_v14 = vld [vmem:[#allocation3 + $0x28] sm:$0x1] }
 0x397   : > { %v4139_v52 = vpop.permute.xlu1 %4138  ;;  %v4137_v41 = vpop.permute.xlu0 %4136  ;;  %vm11578_vm3 = vmmov %vm11577_vm0 }
 0x398   : > { %v4188_v58 = vsel %vm9085_vm5, %v4139_v52, %v4187_v18  ;;  %v4185_v20 = vsel %vm9080_vm2, %v4137_v41, %v4184_v63  ;;  %v4196_v18 = vld [vmem:[#allocation3 + $0x20] sm:$0xf]  ;;  %vm11579_vm13 = vmmov %vm11577_vm0 }
 0x399   : > { %4189 = vst [vmem:[#allocation3 + $0x8] sm:$0x1] %v4188_v58  ;;  %4186 = vst [vmem:[#allocation3] sm:$0xf] %v4185_v20 }
 0x39a   : > { %vm11580_vm4 = vmmov %vm11577_vm0 }
 0x39b   : > { %vm11581_vm15 = vmmov %vm11577_vm0 }
 0x3a0   : > { %v10342_v2 = vld [vmem:[#allocation3] sm:$0xff]  ;;  %v4332_v3 = vld [vmem:[#allocation3 + $0x8] sm:$0x11] }
 0x3a1   : > { %v4285_v48 = vunpack.c.h.bf16 %v10342_v2  ;;  %v4340_v62 = vunpack.c.l.bf16 %v4332_v3  ;;  %v4341_v53 = vunpack.c.h.bf16 %v4332_v3  ;;  %v4284_v22 = vunpack.c.l.bf16 %v10342_v2  ;;  %v4784_v26 = vld [vmem:[#allocation3] sm:$0xee]  ;;  %v7959_v3 = vld [vmem:[#allocation6 + $0x8] sm:$0xff]  }
 0x3a2   : > { %v4792_v28 = vunpack.c.l.bf16 %v4784_v26  ;;  %v4793_v1 = vunpack.c.h.bf16 %v4784_v26 }
 0x3a3   : > { %v4392_v44 = vrot.slane %v4285_v48, 1  ;;  %v4393_v47 = vrot.slane %v4341_v53, 1  ;;  %v4389_v8 = vrot.slane %v4284_v22, 1  ;;  %v4390_v57 = vrot.slane %v4340_v62, 1  ;;  %v7962_v48 = vld [vmem:[#allocation6 + $0x20] sm:$0xff]  }
 0x3a4   : > { %v4824_v34 = vrot.slane %v4792_v28, 2  ;;  %v4827_v23 = vrot.slane %v4793_v1, 2  ;;  %v4828_v15 = vrot.slane %v4341_v53, 2  ;;  %v4825_v35 = vrot.slane %v4340_v62, 2  ;;  %v4205_v62 = vld [vmem:[#allocation3 + $0x38] sm:$0x1] }
 0x3a5   : > { %v4394_v11 = vsel %vm4388_vm1, %v4392_v44, %v4393_v47  ;;  %v4391_v37 = vsel %vm4388_vm1, %v4389_v8, %v4390_v57  ;;  %v7963_v57 = vld [vmem:[#allocation6 + $0x28] sm:$0xff]  }
 0x3a6   : > { %v10363_v19 = vsel %vm11572_vm6, %v4827_v23, %v4828_v15  ;;  %v10366_v29 = vsel %vm11573_vm9, %v4824_v34, %v4825_v35  ;;  %vm11582_vm6 = vmmov %vm11577_vm0 }
 0x3a7   : > { %v4143_v61 = vpop.permute.xlu1 %4142  ;;  %v4141_v50 = vpop.permute.xlu0 %4140  ;;  %vm11583_vm9 = vmmov %vm11577_vm0 }
 0x3a8   : > { %v4194_v21 = vsel %vm9085_vm5, %v4143_v61, %v4193_v13  ;;  %v4191_v31 = vsel %vm9080_vm2, %v4141_v50, %v4190_v25  ;;  %v7960_v13 = vld [vmem:[#allocation6 + $0x10] sm:$0xff]   ;;  %v7961_v61 = vld [vmem:[#allocation6 + $0x18] sm:$0xff]  }
 0x3a9   : > { %4195 = vst [vmem:[#allocation3 + $0x18] sm:$0x1] %v4194_v21  ;;  %4192 = vst [vmem:[#allocation3 + $0x10] sm:$0xf] %v4191_v31  ;;  %v4202_v31 = vld [vmem:[#allocation3 + $0x30] sm:$0xf] }
 0x3b0   : > { %v10350_v54 = vld [vmem:[#allocation3 + $0x10] sm:$0xff]  ;;  %v4333_v39 = vld [vmem:[#allocation3 + $0x18] sm:$0x11] }
 0x3b1   : > { %v4785_v38 = vld [vmem:[#allocation3 + $0x10] sm:$0xee]  ;;  %v4287_v6 = vunpack.c.h.bf16 %v10350_v54  ;;  %v4342_v45 = vunpack.c.l.bf16 %v4333_v39  ;;  %v4343_v46 = vunpack.c.h.bf16 %v4333_v39  ;;  %v4286_v9 = vunpack.c.l.bf16 %v10350_v54 }
 0x3b2   : > { %v7191_v55 = vcombine.high %v10342_v2, %v10350_v54  ;;  %v7190_v33 = vcombine.low %v10342_v2, %v10350_v54  ;;  %v4794_v27 = vunpack.c.l.bf16 %v4785_v38  ;;  %v4795_v17 = vunpack.c.h.bf16 %v4785_v38  ;;  %v7964_v38 = vld [vmem:[#allocation6 + $0x30] sm:$0xff]   ;;  %v7978_v2 = vld [vmem:[#allocation6 + $0xd8] sm:$0xff]   ;;  %v7980_v54 = vld [vmem:[#allocation6 + $0xe0] sm:$0xff]  }
 0x3b3   : > { %v4398_v43 = vrot.slane %v4287_v6, 1  ;;  %v4399_v7 = vrot.slane %v4343_v46, 1  ;;  %v4395_v30 = vrot.slane %v4286_v9, 1  ;;  %v4396_v12 = vrot.slane %v4342_v45, 1 }
 0x3b4   : > { %v4830_v42 = vrot.slane %v4794_v27, 2  ;;  %v4833_v5 = vrot.slane %v4795_v17, 2  ;;  %v4834_v40 = vrot.slane %v4343_v46, 2  ;;  %v4831_v24 = vrot.slane %v4342_v45, 2 }
 0x3b5   : > { %v4400_v60 = vsel %vm4388_vm1, %v4398_v43, %v4399_v7  ;;  %v4397_v32 = vsel %vm4388_vm1, %v4395_v30, %v4396_v12 }
 0x3b6   : > { %v4454_v16 = vpack.c.bf16 %v4400_v60, %v4394_v11  ;;  %v4453_v10 = vpack.c.bf16 %v4397_v32, %v4391_v37  ;;  %v10369_v49 = vsel %vm11574_vm10, %v4833_v5, %v4834_v40  ;;  %v10372_v51 = vsel %vm11575_vm11, %v4830_v42, %v4831_v24  ;;  %v7965_v40 = vld [vmem:[#allocation6 + $0x38] sm:$0xff]   ;;  %vm11586_vm10 = vmmov %vm11577_vm0 }
 0x3b7   : > { %v4147_v36 = vpop.permute.xlu1 %4146  ;;  %v4145_v63 = vpop.permute.xlu0 %4144  ;;  %v4889_v52 = vpack.c.bf16 %v10369_v49, %v10363_v19  ;;  %v4888_v41 = vpack.c.bf16 %v10372_v51, %v10366_v29  ;;  %vm11587_vm11 = vmmov %vm11577_vm0  ;;  %v7992_v19 = vld [vmem:[%s11455_s7 + $0x108] sm:$0xff]   ;;  %v7996_v29 = vld [vmem:[%s11455_s7 + $0x118] sm:$0xff]  }
 0x3b8   : > { %v4200_v58 = vsel %vm9085_vm5, %v4147_v36, %v4199_v14  ;;  %v4197_v20 = vsel %vm9080_vm2, %v4145_v63, %v4196_v18  ;;  %7210 = vmatprep.mubr.msk.bf16.mxu0 %vm2593_vm8, %v4454_v16  ;;  %v7993_v49 = vld [vmem:[%s11455_s7 + $0xc8] sm:$0xff]   ;;  %v7997_v51 = vld [vmem:[%s11455_s7 + $0xd8] sm:$0xff]  }
 0x3b9   : > { %4201 = vst [vmem:[#allocation3 + $0x28] sm:$0x1] %v4200_v58  ;;  %4198 = vst [vmem:[#allocation3 + $0x20] sm:$0xf] %v4197_v20  ;;  %4603 = vmatmul.mubr.bf16.vlgmr.msra.gmra.mrb[96].mxu0 %v4453_v10 }
 0x3ba   : > { %4720 = vmatpush1.bf16.msra.mxu0 %v7958_v4 }
 0x3bb   : > { %4721 = vmatprep.subr.bf16.mxu0 %v11567_v59 }
 0x3be   : > { %4722 = vmatpush1.bf16.msra.mxu0 %v7959_v3 }
 0x3bf   : > { %4723 = vmatprep.subr.bf16.mxu0 %v11567_v59 }
 0x3c0   : > { %v10386_v25 = vld [vmem:[#allocation3 + $0x20] sm:$0xff]  ;;  %v4334_v50 = vld [vmem:[#allocation3 + $0x28] sm:$0x11] }
 0x3c1   : > { %v4289_v22 = vunpack.c.h.bf16 %v10386_v25  ;;  %v4345_v26 = vunpack.c.h.bf16 %v4334_v50  ;;  %v4288_v44 = vunpack.c.l.bf16 %v10386_v25  ;;  %v4344_v47 = vunpack.c.l.bf16 %v4334_v50  ;;  %v4786_v8 = vld [vmem:[#allocation3 + $0x20] sm:$0xee] }
 0x3c2   : > { %4724 = vmatpush1.bf16.msra.mxu0 %v7960_v13  ;;  %v4797_v34 = vunpack.c.h.bf16 %v4786_v8  ;;  %v4796_v23 = vunpack.c.l.bf16 %v4786_v8 }
 0x3c3   : > { %4725 = vmatprep.subr.bf16.mxu0 %v11567_v59  ;;  %v4404_v15 = vrot.slane %v4289_v22, 1  ;;  %v4405_v39 = vrot.slane %v4345_v26, 1  ;;  %v4401_v11 = vrot.slane %v4288_v44, 1  ;;  %v4402_v37 = vrot.slane %v4344_v47, 1  ;;  %v4211_v22 = vld [vmem:[#allocation3 + $0x48] sm:$0x1] }
 0x3c4   : > { %v4839_v35 = vrot.slane %v4797_v34, 2  ;;  %v4840_v6 = vrot.slane %v4345_v26, 2  ;;  %v4836_v45 = vrot.slane %v4796_v23, 2  ;;  %v4837_v7 = vrot.slane %v4344_v47, 2  ;;  %v7967_v34 = vld [vmem:[#allocation6 + $0x48] sm:$0xff]   ;;  %v7968_v23 = vld [vmem:[#allocation6 + $0x50] sm:$0xff]  }
 0x3c5   : > { %v4406_v27 = vsel %vm4388_vm1, %v4404_v15, %v4405_v39  ;;  %v4403_v17 = vsel %vm4388_vm1, %v4401_v11, %v4402_v37  ;;  %v7970_v15 = vld [vmem:[#allocation6 + $0x58] sm:$0xff]   ;;  %v4214_v37 = vld [vmem:[#allocation3 + $0x50] sm:$0xf] }
 0x3c6   : > { %4726 = vmatpush1.bf16.msra.mxu0 %v7961_v61  ;;  %v10411_v61 = vsel %vm11576_vm14, %v4839_v35, %v4840_v6  ;;  %v10414_v50 = vsel %vm11577_vm0, %v4836_v45, %v4837_v7  ;;  %v4217_v39 = vld [vmem:[#allocation3 + $0x58] sm:$0x1]  ;;  %vm11588_vm14 = vsmask.f32 4352 }
 0x3c7   : > { %v4151_v21 = vpop.permute.xlu1 %4150  ;;  %v4149_v53 = vpop.permute.xlu0 %4148  ;;  %4727 = vmatprep.subr.bf16.mxu0 %v11567_v59 }
 0x3c8   : > { %v4206_v28 = vsel %vm9085_vm5, %v4151_v21, %v4205_v62  ;;  %v4203_v1 = vsel %vm9080_vm2, %v4149_v53, %v4202_v31  ;;  %v7966_v21 = vld [vmem:[#allocation6 + $0x40] sm:$0xff]  }
 0x3c9   : > { %4207 = vst [vmem:[#allocation3 + $0x38] sm:$0x1] %v4206_v28  ;;  %4204 = vst [vmem:[#allocation3 + $0x30] sm:$0xf] %v4203_v1  ;;  %v4208_v28 = vld [vmem:[#allocation3 + $0x40] sm:$0xf] }
 0x3ca   : > { %4728 = vmatpush1.bf16.msra.mxu0 %v7962_v48 }
 0x3cb   : > { %4729 = vmatprep.subr.bf16.mxu0 %v11567_v59 }
 0x3ce   : > { %4730 = vmatpush1.bf16.msra.mxu0 %v7963_v57 }
 0x3cf   : > { %4731 = vmatprep.subr.bf16.mxu0 %v11567_v59 }
 0x3d0   : > { %v10397_v46 = vld [vmem:[#allocation3 + $0x30] sm:$0xff]  ;;  %v4335_v9 = vld [vmem:[#allocation3 + $0x38] sm:$0x11] }
 0x3d1   : > { %v4787_v43 = vld [vmem:[#allocation3 + $0x30] sm:$0xee]  ;;  %v4291_v30 = vunpack.c.h.bf16 %v10397_v46  ;;  %v4347_v12 = vunpack.c.h.bf16 %v4335_v9  ;;  %v4290_v42 = vunpack.c.l.bf16 %v10397_v46  ;;  %v4346_v5 = vunpack.c.l.bf16 %v4335_v9 }
 0x3d2   : > { %4732 = vmatpush1.bf16.msra.mxu0 %v7964_v38  ;;  %v7193_v24 = vcombine.high %v10386_v25, %v10397_v46  ;;  %v7192_v60 = vcombine.low %v10386_v25, %v10397_v46  ;;  %v4799_v32 = vunpack.c.h.bf16 %v4787_v43  ;;  %v4798_v16 = vunpack.c.l.bf16 %v4787_v43  ;;  %v7991_v25 = vld [vmem:[%s11455_s7 + $0xc0] sm:$0xff]  }
 0x3d3   : > { %v4410_v10 = vrot.slane %v4291_v30, 1  ;;  %v4411_v4 = vrot.slane %v4347_v12, 1  ;;  %v4407_v14 = vrot.slane %v4290_v42, 1  ;;  %v4408_v36 = vrot.slane %v4346_v5, 1  ;;  %4733 = vmatprep.subr.bf16.mxu0 %v11567_v59 }
 0x3d4   : > { %v4845_v18 = vrot.slane %v4799_v32, 2  ;;  %v4846_v63 = vrot.slane %v4347_v12, 2  ;;  %v4842_v58 = vrot.slane %v4798_v16, 2  ;;  %v4843_v20 = vrot.slane %v4346_v5, 2 }
 0x3d5   : > { %v4412_v3 = vsel %vm4388_vm1, %v4410_v10, %v4411_v4  ;;  %v4409_v13 = vsel %vm4388_vm1, %v4407_v14, %v4408_v36 }
 0x3d6   : > { %v4456_v48 = vpack.c.bf16 %v4412_v3, %v4406_v27  ;;  %v4455_v62 = vpack.c.bf16 %v4409_v13, %v4403_v17  ;;  %4734 = vmatpush1.bf16.msra.mxu0 %v7965_v40  ;;  %v10417_v31 = vsel %vm11578_vm3, %v4845_v18, %v4846_v63  ;;  %v10420_v53 = vsel %vm11579_vm13, %v4842_v58, %v4843_v20 }
 0x3d7   : > { %v4155_v26 = vpop.permute.xlu1 %4154  ;;  %v4153_v1 = vpop.permute.xlu0 %4152  ;;  %4735 = vmatprep.subr.bf16.mxu0 %v11567_v59  ;;  %v4891_v44 = vpack.c.bf16 %v10417_v31, %v10411_v61  ;;  %v4890_v47 = vpack.c.bf16 %v10420_v53, %v10414_v50  ;;  %v7999_v61 = vld [vmem:[%s11455_s7 + $0xe0] sm:$0xff]   ;;  %vm11592_vm13 = vsmask.f32 7954 }
 0x3d8   : > { %v4212_v8 = vsel %vm9085_vm5, %v4155_v26, %v4211_v22  ;;  %v4209_v57 = vsel %vm9080_vm2, %v4153_v1, %v4208_v28  ;;  %7211 = vmatprep.mubr.msk.bf16.mxu0 %vm2593_vm8, %v4456_v48 }
 0x3d9   : > { %4213 = vst [vmem:[#allocation3 + $0x48] sm:$0x1] %v4212_v8  ;;  %4210 = vst [vmem:[#allocation3 + $0x40] sm:$0xf] %v4209_v57  ;;  %4611 = vmatmul.mubr.bf16.gmra.mrb[100].mxu0 %v4455_v62 }
 0x3da   : > { %4736 = vmatpush1.bf16.msra.mxu0 %v7966_v21 }
 0x3db   : > { %4737 = vmatprep.subr.bf16.mxu0 %v11567_v59 }
 0x3de   : > { %4738 = vmatpush1.bf16.msra.mxu0 %v7967_v34 }
 0x3df   : > { %4739 = vmatprep.subr.bf16.mxu0 %v11567_v59 }
 0x3e0   : > { %v10435_v35 = vld [vmem:[#allocation3 + $0x40] sm:$0xff]  ;;  %v4336_v6 = vld [vmem:[#allocation3 + $0x48] sm:$0x11] }
 0x3e1   : > { %v4788_v27 = vld [vmem:[#allocation3 + $0x40] sm:$0xee]  ;;  %v4293_v17 = vunpack.c.h.bf16 %v10435_v35  ;;  %v4349_v43 = vunpack.c.h.bf16 %v4336_v6  ;;  %v4292_v7 = vunpack.c.l.bf16 %v10435_v35  ;;  %v4348_v30 = vunpack.c.l.bf16 %v4336_v6 }
 0x3e2   : > { %4740 = vmatpush1.bf16.msra.mxu0 %v7968_v23  ;;  %v4801_v12 = vunpack.c.h.bf16 %v4788_v27  ;;  %v4800_v42 = vunpack.c.l.bf16 %v4788_v27 }
 0x3e3   : > { %4741 = vmatprep.subr.bf16.mxu0 %v11567_v59  ;;  %v4416_v5 = vrot.slane %v4293_v17, 1  ;;  %v4417_v40 = vrot.slane %v4349_v43, 1  ;;  %v4413_v32 = vrot.slane %v4292_v7, 1  ;;  %v4414_v16 = vrot.slane %v4348_v30, 1 }
 0x3e4   : > { %v4851_v10 = vrot.slane %v4801_v12, 2  ;;  %v4852_v4 = vrot.slane %v4349_v43, 2  ;;  %v4848_v14 = vrot.slane %v4800_v42, 2  ;;  %v4849_v58 = vrot.slane %v4348_v30, 2  ;;  %v4223_v43 = vld [vmem:[#allocation3 + $0x68] sm:$0x1] }
 0x3e5   : > { %v4418_v62 = vsel %vm4388_vm1, %v4416_v5, %v4417_v40  ;;  %v4415_v21 = vsel %vm4388_vm1, %v4413_v32, %v4414_v16  ;;  %v4220_v30 = vld [vmem:[#allocation3 + $0x60] sm:$0xf]  ;;  %v4229_v16 = vld [vmem:[#allocation3 + $0x78] sm:$0x1] }
 0x3e6   : > { %4742 = vmatpush1.bf16.msra.mxu0 %v7970_v15  ;;  %v10456_v6 = vsel %vm11581_vm15, %v4848_v14, %v4849_v58 }
 0x3e7   : > { %v4159_v11 = vpop.permute.xlu1 %4158  ;;  %v4157_v38 = vpop.permute.xlu0 %4156  ;;  %5005 = vmatprep.subr.bf16.mxu0 %v11567_v59 }
 0x3e8   : > { %v4218_v45 = vsel %vm9085_vm5, %v4159_v11, %v4217_v39  ;;  %v4215_v9 = vsel %vm9080_vm2, %v4157_v38, %v4214_v37  ;;  %v10453_v38 = vsel %vm11580_vm4, %v4851_v10, %v4852_v4  ;;  %v4226_v4 = vld [vmem:[#allocation3 + $0x70] sm:$0xf] }
 0x3e9   : > { %4219 = vst [vmem:[#allocation3 + $0x58] sm:$0x1] %v4218_v45  ;;  %4216 = vst [vmem:[#allocation3 + $0x50] sm:$0xf] %v4215_v9 }
 0x3f0   : > { %v10444_v36 = vld [vmem:[#allocation3 + $0x50] sm:$0xff]  ;;  %v4337_v18 = vld [vmem:[#allocation3 + $0x58] sm:$0x11] }
 0x3f1   : > { %v4789_v63 = vld [vmem:[#allocation3 + $0x50] sm:$0xee]  ;;  %v4295_v20 = vunpack.c.h.bf16 %v10444_v36  ;;  %v4351_v3 = vunpack.c.h.bf16 %v4337_v18  ;;  %v4294_v13 = vunpack.c.l.bf16 %v10444_v36  ;;  %v4350_v48 = vunpack.c.l.bf16 %v4337_v18 }
 0x3f2   : > { %v4803_v22 = vunpack.c.h.bf16 %v4789_v63  ;;  %v4802_v26 = vunpack.c.l.bf16 %v4789_v63 }
 0x3f3   : > { %v4422_v28 = vrot.slane %v4295_v20, 1  ;;  %v4423_v1 = vrot.slane %v4351_v3, 1  ;;  %v4419_v8 = vrot.slane %v4294_v13, 1  ;;  %v4420_v57 = vrot.slane %v4350_v48, 1 }
 0x3f4   : > { %v4857_v34 = vrot.slane %v4803_v22, 2  ;;  %v4858_v23 = vrot.slane %v4351_v3, 2  ;;  %v4854_v15 = vrot.slane %v4802_v26, 2  ;;  %v4855_v39 = vrot.slane %v4350_v48, 2 }
 0x3f5   : > { %v4424_v11 = vsel %vm4388_vm1, %v4422_v28, %v4423_v1  ;;  %v4421_v37 = vsel %vm4388_vm1, %v4419_v8, %v4420_v57 }
 0x3f6   : > { %v4458_v45 = vpack.c.bf16 %v4424_v11, %v4418_v62  ;;  %v4457_v9 = vpack.c.bf16 %v4421_v37, %v4415_v21  ;;  %v10459_v27 = vsel %vm11582_vm6, %v4857_v34, %v4858_v23  ;;  %v10462_v17 = vsel %vm11583_vm9, %v4854_v15, %v4855_v39 }
 0x3f7   : > { %v4163_v7 = vpop.permute.xlu1 %4162  ;;  %v4161_v12 = vpop.permute.xlu0 %4160  ;;  %v4893_v42 = vpack.c.bf16 %v10459_v27, %v10453_v38  ;;  %v4892_v5 = vpack.c.bf16 %v10462_v17, %v10456_v6  ;;  %v8001_v38 = vld [vmem:[%s11455_s7 + $0xe8] sm:$0xff]   ;;  %v539_v6 = vld [vmem:[#allocation4] sm:$0x11]  ;;  %v545_v27 = vld [vmem:[#allocation4 + $0x18] sm:$0x11]  ;;  %vm637_vm6 = vcmask 1043456  }
 0x3f8   : > { %v4224_v40 = vsel %vm9085_vm5, %v4163_v7, %v4223_v43  ;;  %v4221_v32 = vsel %vm9080_vm2, %v4161_v12, %v4220_v30  ;;  %7212 = vmatprep.mubr.msk.bf16.mxu0 %vm2593_vm8, %v4458_v45  ;;  %vm11596_vm9 = vsmask.f32 7938 }
 0x3f9   : > { %4225 = vst [vmem:[#allocation3 + $0x68] sm:$0x1] %v4224_v40  ;;  %4222 = vst [vmem:[#allocation3 + $0x60] sm:$0xf] %v4221_v32  ;;  %4619 = vmatmul.mubr.bf16.gmra.mrb[104].mxu0 %v4457_v9 }
 0x400   : > { %v10473_v18 = vld [vmem:[#allocation3 + $0x60] sm:$0xff]  ;;  %v4338_v63 = vld [vmem:[#allocation3 + $0x68] sm:$0x11] }
 0x401   : > { %v4790_v3 = vld [vmem:[#allocation3 + $0x60] sm:$0xee]  ;;  %v4297_v13 = vunpack.c.h.bf16 %v10473_v18  ;;  %v4353_v48 = vunpack.c.h.bf16 %v4338_v63  ;;  %v4296_v62 = vunpack.c.l.bf16 %v10473_v18  ;;  %v4352_v21 = vunpack.c.l.bf16 %v4338_v63 }
 0x402   : > { %v4805_v22 = vunpack.c.h.bf16 %v4790_v3  ;;  %v4804_v26 = vunpack.c.l.bf16 %v4790_v3 }
 0x403   : > { %v4428_v28 = vrot.slane %v4297_v13, 1  ;;  %v4429_v1 = vrot.slane %v4353_v48, 1  ;;  %v4425_v8 = vrot.slane %v4296_v62, 1  ;;  %v4426_v57 = vrot.slane %v4352_v21, 1 }
 0x404   : > { %v4863_v0 = vrot.slane %v4805_v22, 2  ;;  %v4864_v34 = vrot.slane %v4353_v48, 2  ;;  %v4860_v23 = vrot.slane %v4804_v26, 2  ;;  %v4861_v11 = vrot.slane %v4352_v21, 2 }
 0x405   : > { %v4430_v7 = vsel %vm4388_vm1, %v4428_v28, %v4429_v1  ;;  %v4427_v30 = vsel %vm4388_vm1, %v4425_v8, %v4426_v57  ;;  %v7972_v57 = vld [vmem:[#allocation6 + $0xc0] sm:$0xff]  }
 0x407   : > { %v4167_v10 = vpop.permute.xlu1 %4166  ;;  %v4165_v14 = vpop.permute.xlu0 %4164 }
 0x408   : > { %v4230_v58 = vsel %vm9085_vm5, %v4167_v10, %v4229_v16  ;;  %v4227_v20 = vsel %vm9080_vm2, %v4165_v14, %v4226_v4  ;;  %vm11584_vm2 = vmmov %vm11577_vm0 }
 0x409   : > { %4231 = vst [vmem:[#allocation3 + $0x78] sm:$0x1] %v4230_v58  ;;  %4228 = vst [vmem:[#allocation3 + $0x70] sm:$0xf] %v4227_v20  ;;  %v10490_v48 = vsel %vm11584_vm2, %v4863_v0, %v4864_v34  ;;  %v7974_v0 = vld [vmem:[#allocation6 + $0xc8] sm:$0xff]   ;;  %v7976_v34 = vld [vmem:[#allocation6 + $0xd0] sm:$0xff]  }
 0x40a   : > { %vm11585_vm5 = vmmov %vm11577_vm0 }
 0x40b   : > { %v10493_v62 = vsel %vm11585_vm5, %v4860_v23, %v4861_v11  ;;  %v7985_v23 = vld [vmem:[#allocation6 + $0xf8] sm:$0xff]   ;;  %v595_v11 = vld [vmem:[#allocation4 + $0x24] sm:$0x11]  ;;  %vm10632_vm2 = vmand %vm637_vm6, %vm11596_vm9 }
 0x410   : > { %v10481_v56 = vld [vmem:[#allocation3 + $0x70] sm:$0xff]  ;;  %v4339_v15 = vld [vmem:[#allocation3 + $0x78] sm:$0x11] }
 0x411   : > { %v4791_v39 = vld [vmem:[#allocation3 + $0x70] sm:$0xee]  ;;  %v4299_v37 = vunpack.c.h.bf16 %v10481_v56  ;;  %v4355_v45 = vunpack.c.h.bf16 %v4339_v15  ;;  %v4298_v9 = vunpack.c.l.bf16 %v10481_v56  ;;  %v4354_v43 = vunpack.c.l.bf16 %v4339_v15  ;;  %v7986_v15 = vld [vmem:[#allocation6 + $0x100] sm:$0xff]  }
 0x412   : > { %v4807_v12 = vunpack.c.h.bf16 %v4791_v39  ;;  %v4806_v40 = vunpack.c.l.bf16 %v4791_v39  ;;  %v7197_v46 = vcombine.high %v10473_v18, %v10481_v56  ;;  %v7987_v39 = vld [vmem:[#allocation6 + $0x108] sm:$0xff]  }
 0x413   : > { %v4434_v32 = vrot.slane %v4299_v37, 1  ;;  %v4435_v16 = vrot.slane %v4355_v45, 1  ;;  %v4431_v10 = vrot.slane %v4298_v9, 1  ;;  %v4432_v4 = vrot.slane %v4354_v43, 1 }
 0x414   : > { %v4869_v14 = vrot.slane %v4807_v12, 2  ;;  %v4870_v63 = vrot.slane %v4355_v45, 2  ;;  %v4866_v58 = vrot.slane %v4806_v40, 2  ;;  %v4867_v20 = vrot.slane %v4354_v43, 2  ;;  %v8011_v43 = vld [vmem:[%s11455_s7 + $0x40] sm:$0xff]  }
 0x415   : > { %v4436_v3 = vsel %vm4388_vm1, %v4434_v32, %v4435_v16  ;;  %v4433_v13 = vsel %vm4388_vm1, %v4431_v10, %v4432_v4  ;;  %v8013_v12 = vld [vmem:[%s11455_s7] sm:$0xff]  }
 0x416   : > { %v4460_v21 = vpack.c.bf16 %v4436_v3, %v4430_v7  ;;  %v4459_v22 = vpack.c.bf16 %v4433_v13, %v4427_v30  ;;  %v10496_v26 = vsel %vm11586_vm10, %v4869_v14, %v4870_v63  ;;  %v10499_v28 = vsel %vm11587_vm11, %v4866_v58, %v4867_v20  ;;  %v8002_v20 = vld [vmem:[%s11455_s7 + $0x130] sm:$0xff]   ;;  %v542_v3 = vld [vmem:[#allocation4 + $0x8] sm:$0x1] }
 0x417   : > { %v4895_v1 = vpack.c.bf16 %v10496_v26, %v10490_v48  ;;  %v4894_v8 = vpack.c.bf16 %v10499_v28, %v10493_v62  ;;  %v551_v13 = vld [vmem:[#allocation4 + $0x30] sm:$0x11]  ;;  %v543_v48 = vsel %vm8362_vm7, 0, %v542_v3 }
 0x418   : > { %7213 = vmatprep.mubr.msk.bf16.mxu0 %vm2593_vm8, %v4460_v21  ;;  %v592_v21 = vld [vmem:[#allocation4 + $0x14] sm:$0x1]  ;;  %544 = vst [vmem:[#allocation4 + $0x8] sm:$0x1] %v543_v48 }
 0x419   : > { %4627 = vmatmul.mubr.bf16.gmra.mrb[108].mxu0 %v4459_v22  ;;  %v601_v22 = vld [vmem:[#allocation4 + $0x3c] sm:$0x11]  ;;  %v593_v26 = vsel %vm8376_vm12, 0, %v592_v21  ;;  %v628_v21 = vld [vmem:[#allocation4 + $0xa4] sm:$0x1] }
 0x41a   : > { %7226 = vmatprep.mubr.msk.bf16.mxu0 %vm2593_vm8, %v7191_v55  ;;  %v7195_v55 = vcombine.high %v10435_v35, %v10444_v36  ;;  %594 = vst [vmem:[#allocation4 + $0x14] sm:$0x1] %v593_v26  ;;  %v8009_v26 = vld [vmem:[%s11455_s7 + $0x158] sm:$0xff]  }
 0x421   : > { %4752 = vmatmul.mubr.bf16.vlgmr.msra.gmra.mrb[112].mxu0 %v7190_v33  ;;  %v7194_v33 = vcombine.low %v10435_v35, %v10444_v36  ;;  %v7984_v35 = vld [vmem:[#allocation6 + $0xf0] sm:$0xff]   ;;  %v7196_v36 = vcombine.low %v10473_v18, %v10481_v56  ;;  %v7989_v56 = vld [vmem:[#allocation6 + $0x118] sm:$0xff]  }
 0x422   : > { %5006 = vmatpush1.bf16.msra.mxu0 %v7972_v57  ;;  %7227 = vmatprep.mubr.msk.bf16.mxu0 %vm2593_vm8, %v7193_v24  ;;  %v7990_v24 = vld [vmem:[%s11455_s7 + $0x100] sm:$0xff]   ;;  %v7988_v18 = vld [vmem:[#allocation6 + $0x110] sm:$0xff]   ;;  %v557_v57 = vld [vmem:[#allocation4 + $0x48] sm:$0x11] }
 0x423   : > { %5007 = vmatprep.subr.bf16.mxu0 %v11567_v59  ;;  %7509 = vmatprep.subr.bf16.mxu1 %v7990_v24  ;;  %v554_v24 = vld [vmem:[#allocation4 + $0x38] sm:$0x1] }
 0x424   : > { %7510 = vmatpush3.bf16.msra.mxu1 %v7991_v25  ;;  %v563_v25 = vld [vmem:[#allocation4 + $0x60] sm:$0x11] }
 0x425   : > { %7511 = vmatprep.subr.bf16.mxu1 %v7992_v19 }
 0x426   : > { %5008 = vmatpush1.bf16.msra.mxu0 %v7974_v0 }
 0x427   : > { %5009 = vmatprep.subr.bf16.mxu0 %v11567_v59 }
 0x428   : > { %7512 = vmatpush3.bf16.msra.mxu1 %v7993_v49 }
 0x429   : > { %4760 = vmatmul.mubr.bf16.gmra.mrb[116].mxu0 %v7192_v60  ;;  %v7982_v60 = vld [vmem:[#allocation6 + $0xe8] sm:$0xff]  }
 0x42a   : > { %5010 = vmatpush1.bf16.msra.mxu0 %v7976_v34  ;;  %7228 = vmatprep.mubr.msk.bf16.mxu0 %vm2593_vm8, %v7195_v55  ;;  %v598_v55 = vld [vmem:[#allocation4 + $0x2c] sm:$0x1] }
 0x42b   : > { %5011 = vmatprep.subr.bf16.mxu0 %v11567_v59 }
 0x42e   : > { %5012 = vmatpush1.bf16.msra.mxu0 %v7978_v2  ;;  %v607_v2 = vld [vmem:[#allocation4 + $0x54] sm:$0x11] }
 0x42f   : > { %5013 = vmatprep.subr.bf16.mxu0 %v11567_v59 }
 0x431   : > { %4768 = vmatmul.mubr.bf16.gmra.mrb[120].mxu0 %v7194_v33 }
 0x432   : > { %5014 = vmatpush1.bf16.msra.mxu0 %v7980_v54  ;;  %7229 = vmatprep.mubr.msk.bf16.mxu0 %vm2593_vm8, %v7197_v46  ;;  %v599_v54 = vsel %vm8376_vm12, 0, %v598_v55  ;;  %v604_v46 = vld [vmem:[#allocation4 + $0x44] sm:$0x1] }
 0x433   : > { %5015 = vmatprep.subr.bf16.mxu0 %v11567_v59  ;;  %600 = vst [vmem:[#allocation4 + $0x2c] sm:$0x1] %v599_v54  ;;  %v634_v54 = vld [vmem:[#allocation4 + $0xbc] sm:$0x1] }
 0x436   : > { %5016 = vmatpush1.bf16.msra.mxu0 %v7982_v60  ;;  %v555_v60 = vsel %vm8362_vm7, 0, %v554_v24 }
 0x437   : > { %5017 = vmatprep.subr.bf16.mxu0 %v11567_v59  ;;  %556 = vst [vmem:[#allocation4 + $0x38] sm:$0x1] %v555_v60 }
 0x439   : > { %4776 = vmatmul.mubr.bf16.gmra.mrb[124].mxu0 %v7196_v36  ;;  %v605_v36 = vsel %vm8376_vm12, 0, %v604_v46 }
 0x43a   : > { %5018 = vmatpush1.bf16.msra.mxu0 %v7984_v35  ;;  %7242 = vmatprep.mubr.msk.bf16.mxu0 %vm2593_vm8, %v4889_v52  ;;  %v7994_v52 = vld [vmem:[%s11455_s7 + $0x110] sm:$0xff]   ;;  %606 = vst [vmem:[#allocation4 + $0x44] sm:$0x1] %v605_v36 }
 0x43b   : > { %5019 = vmatprep.subr.bf16.mxu0 %v11567_v59  ;;  %7513 = vmatprep.subr.bf16.mxu1 %v7994_v52  ;;  %v610_v52 = vld [vmem:[#allocation4 + $0x5c] sm:$0x1] }
 0x43e   : > { %5020 = vmatpush1.bf16.msra.mxu0 %v7985_v23  ;;  %v8004_v23 = vld [vmem:[%s11455_s7 + $0x140] sm:$0xff]  }
 0x43f   : > { %5021 = vmatprep.subr.bf16.mxu0 %v11567_v59 }
 0x442   : > { %5022 = vmatpush1.bf16.msra.mxu0 %v7986_v15  ;;  %v613_v15 = vld [vmem:[#allocation4 + $0x6c] sm:$0x11] }
 0x443   : > { %5023 = vmatprep.subr.bf16.mxu0 %v11567_v59 }
 0x446   : > { %5024 = vmatpush1.bf16.msra.mxu0 %v7987_v39 }
 0x447   : > { %5025 = vmatprep.subr.bf16.mxu0 %v11567_v59 }
 0x44a   : > { %5026 = vmatpush1.bf16.msra.mxu0 %v7988_v18  ;;  %v560_v18 = vld [vmem:[#allocation4 + $0x50] sm:$0x1] }
 0x44b   : > { %5027 = vmatprep.subr.bf16.mxu0 %v11567_v59  ;;  %v7995_v59 = vld [vmem:[%s11455_s7 + $0xd0] sm:$0xff]   ;;  %v561_v19 = vsel %vm8362_vm7, 0, %v560_v18 }
 0x44c   : > { %7514 = vmatpush3.bf16.msra.mxu1 %v7995_v59  ;;  %v619_v59 = vld [vmem:[#allocation4 + $0x84] sm:$0x11]  ;;  %562 = vst [vmem:[#allocation4 + $0x50] sm:$0x1] %v561_v19 }
 0x44d   : > { %7515 = vmatprep.subr.bf16.mxu1 %v7996_v29  ;;  %v611_v29 = vsel %vm8376_vm12, 0, %v610_v52 }
 0x44e   : > { %5028 = vmatpush1.bf16.msra.mxu0 %v7989_v56  ;;  %v569_v56 = vld [vmem:[#allocation4 + $0x78] sm:$0x11]  ;;  %612 = vst [vmem:[#allocation4 + $0x5c] sm:$0x1] %v611_v29 }
 0x44f   : > { %7701 = vmatprep.subr.bf16.mxu0 %v8004_v23 }
 0x450   : > { %7516 = vmatpush3.bf16.msra.mxu1 %v7997_v51 }
 0x451   : > { %5038 = vmatmul.mubr.bf16.vlgmr.msra.gmra.mrb[128].mxu0 %v4888_v41  ;;  %v7998_v41 = vld [vmem:[%s11455_s7 + $0x120] sm:$0xff]  }
 0x452   : > { %7243 = vmatprep.mubr.msk.bf16.mxu0 %vm2593_vm8, %v4891_v44  ;;  %7517 = vmatprep.subr.bf16.mxu1 %v7998_v41  ;;  %v8005_v41 = vld [vmem:[%s11455_s7 + $0x138] sm:$0xff]  }
 0x453   : > { %7702 = vmatpush3.bf16.msra.mxu0 %v8004_v23 }
 0x454   : > { %7518 = vmatpush3.bf16.msra.mxu1 %v7999_v61  ;;  %v566_v61 = vld [vmem:[#allocation4 + $0x68] sm:$0x1] }
 0x459   : > { %5046 = vmatmul.mubr.bf16.gmra.mrb[132].mxu0 %v4890_v47  ;;  %v8000_v47 = vld [vmem:[%s11455_s7 + $0x128] sm:$0xff]  }
 0x45a   : > { %7244 = vmatprep.mubr.msk.bf16.mxu0 %vm2593_vm8, %v4893_v42  ;;  %7519 = vmatprep.subr.bf16.mxu1 %v8000_v47 }
 0x45b   : > { %7520 = vmatpush3.bf16.msra.mxu1 %v8001_v38  ;;  %v616_v38 = vld [vmem:[#allocation4 + $0x74] sm:$0x1] }
 0x45c   : > { %7521 = vmatprep.subr.bf16.mxu1 %v8002_v20  ;;  %v622_v20 = vld [vmem:[#allocation4 + $0x8c] sm:$0x1] }
 0x45d   : > { %v623_v3 = vsel %vm8376_vm12, 0, %v622_v20 }
 0x45e   : > { %624 = vst [vmem:[#allocation4 + $0x8c] sm:$0x1] %v623_v3 }
 0x461   : > { %5054 = vmatmul.mubr.bf16.gmra.mrb[136].mxu0 %v4892_v5  ;;  %v589_v5 = vld [vmem:[#allocation4 + $0xc] sm:$0x11] }
 0x462   : > { %7245 = vmatprep.mubr.msk.bf16.mxu0 %vm2593_vm8, %v4895_v1  ;;  %vm536_vm8 = vcmask 1044484   ;;  %v8003_v1 = vld [vmem:[%s11455_s7 + $0xf0] sm:$0xff]  }
 0x463   : > { %vm537_vm0 = vmand %vm536_vm8, %vm11588_vm14  ;;  %7522 = vmatpush3.bf16.msra.mxu1 %v8003_v1  ;;  %v8012_v1 = vld [vmem:[%s11455_s7 + $0x168] sm:$0xff]  }
 0x464   : > { %vm10612_vm3 = vmor %vm537_vm0, %vm8362_vm7  ;;  %7523 = vmatprep.subr.bf16.mxu1 %v8005_v41 }
 0x465   : > { %v540_v37 = vsel %vm10612_vm3, 0, %v539_v6  ;;  %v546_v45 = vsel %vm10612_vm3, 0, %v545_v27  ;;  %vm587_vm4 = vmand %vm536_vm8, %vm11592_vm13  ;;  %v552_v62 = vsel %vm10612_vm3, 0, %v551_v13  ;;  %v558_v34 = vsel %vm10612_vm3, 0, %v557_v57  ;;  %v625_v6 = vld [vmem:[#allocation4 + $0x9c] sm:$0x11] }
 0x466   : > { %541 = vst [vmem:[#allocation4] sm:$0x11] %v540_v37  ;;  %547 = vst [vmem:[#allocation4 + $0x18] sm:$0x11] %v546_v45  ;;  %v564_v35 = vsel %vm10612_vm3, 0, %v563_v25  ;;  %v570_v49 = vsel %vm10612_vm3, 0, %v569_v56 }
 0x467   : > { %vm10623_vm15 = vmor %vm587_vm4, %vm8376_vm12  ;;  %553 = vst [vmem:[#allocation4 + $0x30] sm:$0x11] %v552_v62  ;;  %v617_v27 = vsel %vm8376_vm12, 0, %v616_v38  ;;  %v8007_v37 = vld [vmem:[%s11455_s7 + $0x148] sm:$0xff]   ;;  %v8008_v45 = vld [vmem:[%s11455_s7 + $0x150] sm:$0xff]   ;;  %v635_v25 = vsel %vm8376_vm12, 0, %v634_v54 }
 0x468   : > { %v590_v7 = vsel %vm10623_vm15, 0, %v589_v5  ;;  %v596_v30 = vsel %vm10623_vm15, 0, %v595_v11  ;;  %v602_v28 = vsel %vm10623_vm15, 0, %v601_v22  ;;  %559 = vst [vmem:[#allocation4 + $0x48] sm:$0x11] %v558_v34  ;;  %v608_v33 = vsel %vm10623_vm15, 0, %v607_v2  ;;  %7703 = vmatprep.subr.bf16.mxu0 %v8007_v37 }
 0x469   : > { %5062 = vmatmul.mubr.bf16.gmra.mrb[140].mxu0 %v4894_v8  ;;  %591 = vst [vmem:[#allocation4 + $0xc] sm:$0x11] %v590_v7  ;;  %597 = vst [vmem:[#allocation4 + $0x24] sm:$0x11] %v596_v30  ;;  %v548_v8 = vld [vmem:[#allocation4 + $0x20] sm:$0x1] }
 0x46a   : > { %603 = vst [vmem:[#allocation4 + $0x3c] sm:$0x11] %v602_v28  ;;  %v549_v0 = vsel %vm8362_vm7, 0, %v548_v8  ;;  %609 = vst [vmem:[#allocation4 + $0x54] sm:$0x11] %v608_v33  ;;  %v614_v39 = vsel %vm10623_vm15, 0, %v613_v15  ;;  %7704 = vmatpush3.bf16.msra.mxu0 %v8007_v37 }
 0x46b   : > { %550 = vst [vmem:[#allocation4 + $0x20] sm:$0x1] %v549_v0  ;;  %565 = vst [vmem:[#allocation4 + $0x60] sm:$0x11] %v564_v35  ;;  %v620_v51 = vsel %vm10623_vm15, 0, %v619_v59  ;;  %v626_v5 = vsel %vm10623_vm15, 0, %v625_v6  ;;  %7705 = vmatprep.subr.bf16.mxu0 %v8008_v45 }
 0x46c   : > { %615 = vst [vmem:[#allocation4 + $0x6c] sm:$0x11] %v614_v39  ;;  %571 = vst [vmem:[#allocation4 + $0x78] sm:$0x11] %v570_v49  ;;  %v8006_v11 = vld [vmem:[%s11455_s7 + $0xf8] sm:$0xff]   ;;  %v629_v22 = vsel %vm8376_vm12, 0, %v628_v21 }
 0x46d   : > { %v639_v40 = vld [vmem:[#allocation4] sm:$0xf]  ;;  %621 = vst [vmem:[#allocation4 + $0x84] sm:$0x11] %v620_v51  ;;  %618 = vst [vmem:[#allocation4 + $0x74] sm:$0x1] %v617_v27  ;;  %7524 = vmatpush3.bf16.msra.mxu1 %v8006_v11 }
 0x46e   : > { %v640_v32 = vsel %vm10632_vm2, 0, %v639_v40  ;;  %627 = vst [vmem:[#allocation4 + $0x9c] sm:$0x11] %v626_v5  ;;  %v572_v7 = vld [vmem:[#allocation4 + $0x80] sm:$0x1]  ;;  %7706 = vmatpush3.bf16.msra.mxu0 %v8008_v45  ;;  %7561 = vmatprep.subr.bf16.mxu1 %v8011_v43  ;;  %v8015_v8 = vld [vmem:[%s11455_s7 + $0x170] sm:$0xff]   ;;  %vm11600_vm12 = vmmov %vm11585_vm5 }
 0x46f   : > { %641 = vst [vmem:[#allocation4] sm:$0xf] %v640_v32  ;;  %v581_v30 = vld [vmem:[#allocation4 + $0xa8] sm:$0x11]  ;;  %v573_v32 = vsel %vm8362_vm7, 0, %v572_v7  ;;  %v8010_v28 = vld [vmem:[%s11455_s7 + $0x160] sm:$0xff]   ;;  %7707 = vmatprep.subr.bf16.mxu0 %v8009_v26 }
 0x470   : > { %v642_v16 = vld [vmem:[#allocation4 + $0xc] sm:$0x1]  ;;  %574 = vst [vmem:[#allocation4 + $0x80] sm:$0x1] %v573_v32  ;;  %v631_v13 = vld [vmem:[#allocation4 + $0xb4] sm:$0x11] }
 0x471   : > { %v643_v10 = vsel %vm8362_vm7, 0, %v642_v16  ;;  %v632_v48 = vsel %vm10623_vm15, 0, %v631_v13  ;;  %v578_v62 = vld [vmem:[#allocation4 + $0x98] sm:$0x1]  ;;  %630 = vst [vmem:[#allocation4 + $0xa4] sm:$0x1] %v629_v22 }
 0x472   : > { %644 = vst [vmem:[#allocation4 + $0xc] sm:$0x1] %v643_v10  ;;  %v582_v10 = vsel %vm10612_vm3, 0, %v581_v30  ;;  %633 = vst [vmem:[#allocation4 + $0xb4] sm:$0x11] %v632_v48  ;;  %v579_v42 = vsel %vm8362_vm7, 0, %v578_v62  ;;  %7708 = vmatpush3.bf16.msra.mxu0 %v8009_v26 }
 0x473   : > { %583 = vst [vmem:[#allocation4 + $0xa8] sm:$0x11] %v582_v10  ;;  %580 = vst [vmem:[#allocation4 + $0x98] sm:$0x1] %v579_v42  ;;  %7709 = vmatprep.subr.bf16.mxu0 %v8010_v28  ;;  %v8018_v57 = vld [vmem:[%s11455_s7 + $0x178] sm:$0xff]   ;;  %v10742_v0 = vld [vmem:[%s11455_s7 + $0x80] sm:$0xff]  }
 0x474   : > { %v584_v2 = vld [vmem:[#allocation4 + $0xb0] sm:$0x1]  ;;  %636 = vst [vmem:[#allocation4 + $0xbc] sm:$0x1] %v635_v25  ;;  %v10770_v37 = vld [vmem:[%s11454_s6] ss:$0 sm:$0xff] }
 0x475   : > { %v585_v24 = vsel %vm8362_vm7, 0, %v584_v2  ;;  %v5262_v25 = vld [vmem:[#allocation4 + $0x1c] sm:$0xf] }
 0x476   : > { %7710 = vmatpush3.bf16.msra.mxu0 %v8010_v28  ;;  %586 = vst [vmem:[#allocation4 + $0xb0] sm:$0x1] %v585_v24  ;;  %v5201_v28 = vld [vmem:[#allocation4 + $0x18] sm:$0xf] }
 0x477   : > { %7711 = vmatprep.subr.bf16.mxu0 %v8012_v1 }
 0x47a   : > { %7712 = vmatpush3.bf16.msra.mxu0 %v8012_v1 }
 0x47b   : > { %7713 = vmatprep.subr.bf16.mxu0 %v8015_v8  ;;  %v649_v39 = vld [vmem:[#allocation4 + $0xbc] sm:$0x1] }
 0x47c   : > { %v650_v9 = vsel %vm8362_vm7, 0, %v649_v39 }
 0x47d   : > { %v646_v15 = vld [vmem:[#allocation4 + $0xb0] sm:$0xf]  ;;  %651 = vst [vmem:[#allocation4 + $0xbc] sm:$0x1] %v650_v9  ;;  %v5210_v9 = vld [vmem:[#allocation4 + $0x3c] sm:$0x1] }
 0x47e   : > { %7714 = vmatpush3.bf16.msra.mxu0 %v8015_v8  ;;  %v647_v19 = vsel %vm10632_vm2, 0, %v646_v15 }
 0x47f   : > { %7715 = vmatprep.subr.bf16.mxu0 %v8018_v57  ;;  %648 = vst [vmem:[#allocation4 + $0xb0] sm:$0xf] %v647_v19 }
 0x482   : > { %7716 = vmatpush3.bf16.msra.mxu0 %v8018_v57  ;;  %v5204_v57 = vld [vmem:[#allocation4 + $0x24] sm:$0x1] }
 0x483   : > { %7725 = vmatprep.subr.bf16.mxu0 %v10742_v0 }
 0x486   : > { %v5361_v15 = vld [vmem:[#allocation4 + $0xb0] sm:$0xf] }
 0x48c   : > { %v10599_v50 = vpop.f32.mrb[96].mxu0 }
 0x48d   : > { %v4606_v31 = vpop.f32.mrb[97].mxu0 }
 0x48e   : > { %v10601_v53 = vpop.f32.mrb[98].mxu0  ;;  %v575_v31 = vld [vmem:[#allocation4 + $0x90] sm:$0x11] }
 0x48f   : > { %v4609_v44 = vpop.f32.mrb[99].mxu0  ;;  %v576_v47 = vsel %vm10612_vm3, 0, %v575_v31 }
 0x490   : > { %v567_v44 = vsel %vm8362_vm7, 0, %v566_v61  ;;  %577 = vst [vmem:[#allocation4 + $0x90] sm:$0x11] %v576_v47 }
 0x491   : > { %568 = vst [vmem:[#allocation4 + $0x68] sm:$0x1] %v567_v44 }
 0x4ac   : > { %v10640_v4 = vpop.f32.mrb[100].mxu0 }
 0x4ad   : > { %v4614_v14 = vpop.f32.mrb[101].mxu0 }
 0x4ae   : > { %v10642_v63 = vpop.f32.mrb[102].mxu0 }
 0x4af   : > { %v4617_v58 = vpop.f32.mrb[103].mxu0 }
 0x4cc   : > { %v10705_v40 = vpop.f32.mrb[104].mxu0 }
 0x4cd   : > { %v4622_v16 = vpop.f32.mrb[105].mxu0 }
 0x4ce   : > { %v10711_v14 = vpop.f32.mrb[106].mxu0 }
 0x4cf   : > { %v4625_v58 = vpop.f32.mrb[107].mxu0 }
 0x4ec   : > { %v4628_v34 = vpop.f32.mrb[108].mxu0 }
 0x4ed   : > { %v4630_v55 = vpop.f32.mrb[109].mxu0 }
 0x4ee   : > { %v4631_v33 = vpop.f32.mrb[110].mxu0  ;;  %v5259_v55 = vld [vmem:[#allocation4 + $0x10] sm:$0x1] }
 0x4ef   : > { %v4633_v46 = vpop.f32.mrb[111].mxu0 }
 0x4f0   : > { %v5265_v46 = vld [vmem:[#allocation4 + $0x28] sm:$0x1] }
 0x4f4   : > { %v4753_v60 = vpop.f32.mrb[112].mxu0 }
 0x4f5   : > { %v4754_v35 = vadd.f32 %v4753_v60, %v10599_v50  ;;  %v4755_v36 = vpop.f32.mrb[113].mxu0 }
 0x4f6   : > { %v4756_v23 = vpop.f32.mrb[114].mxu0  ;;  %v5207_v36 = vld [vmem:[#allocation4 + $0x30] sm:$0xf] }
 0x4f7   : > { %v4757_v18 = vadd.f32 %v4756_v23, %v10601_v53  ;;  %v4758_v56 = vpop.f32.mrb[115].mxu0 }
 0x4fc   : > { %v4761_v49 = vpop.f32.mrb[116].mxu0 }
 0x4fd   : > { %v4762_v52 = vadd.f32 %v4761_v49, %v10640_v4  ;;  %v4763_v59 = vpop.f32.mrb[117].mxu0  ;;  %v5304_v49 = vld [vmem:[#allocation4 + $0x8] sm:$0xf] }
 0x4fe   : > { %v4764_v50 = vpop.f32.mrb[118].mxu0 }
 0x4ff   : > { %v4765_v29 = vadd.f32 %v4764_v50, %v10642_v63  ;;  %v4766_v51 = vpop.f32.mrb[119].mxu0 }
 0x504   : > { %v4769_v41 = vpop.f32.mrb[120].mxu0 }
 0x505   : > { %v10758_v53 = vadd.f32 %v4769_v41, %v10705_v40  ;;  %v4771_v61 = vpop.f32.mrb[121].mxu0 }
 0x506   : > { %v4772_v31 = vpop.f32.mrb[122].mxu0  ;;  %v10784_v61 = vld [vmem:[#allocation4 + $0xbc] sm:$0x1] }
 0x507   : > { %v10761_v44 = vadd.f32 %v4772_v31, %v10711_v14  ;;  %v4774_v47 = vpop.f32.mrb[123].mxu0 }
 0x50c   : > { %v4777_v38 = vpop.f32.mrb[124].mxu0 }
 0x50d   : > { %v10763_v6 = vadd.f32 %v4777_v38, %v4628_v34  ;;  %v4779_v27 = vpop.f32.mrb[125].mxu0  ;;  %v5256_v34 = vld [vmem:[#allocation4 + $0x4] sm:$0xf]  ;;  %v5385_v38 = vunpack.c.l.bf16 %v5361_v15 }
 0x50e   : > { %v4780_v4 = vpop.f32.mrb[126].mxu0 }
 0x50f   : > { %v10765_v5 = vadd.f32 %v4780_v4, %v4631_v33  ;;  %v4782_v11 = vpop.f32.mrb[127].mxu0 }
 0x524   : > { %v5039_v63 = vpop.f32.mrb[128].mxu0 }
 0x525   : > { %v5070_v45 = vadd.f32 %v5039_v63, %v4754_v35  ;;  %v5041_v7 = vpop.f32.mrb[129].mxu0 }
 0x526   : > { %v5042_v30 = vpop.f32.mrb[130].mxu0 }
 0x527   : > { %v5085_v40 = vadd.f32 %v10770_v37, %v5070_v45  ;;  %v5071_v32 = vadd.f32 %v5042_v30, %v4757_v18  ;;  %v5044_v16 = vpop.f32.mrb[131].mxu0 }
 0x528   : > { %v5268_v16 = vld [vmem:[#allocation4 + $0x34] sm:$0xf] }
 0x529   : > { %v5093_v10 = vmax.f32 %v5085_v40, 0.0  ;;  %v5086_v14 = vadd.f32 %v10770_v37, %v5071_v32  ;;  %v11486_v32 = vunpack.c.l.bf16 %v10784_v61 }
 0x52b   : > { %v7482_v58 = vpack.c.bf16 %v5093_v10, %v5093_v10  ;;  %v5094_v20 = vmax.f32 %v5086_v14, 0.0  ;;  %v5271_v10 = vld [vmem:[#allocation4 + $0x40] sm:$0x1] }
 0x52c   : > { %v5047_v3 = vpop.f32.mrb[132].mxu0 }
 0x52d   : > { %v5131_v13 = vshrl.u32 %v7482_v58, 16  ;;  %v7483_v48 = vpack.c.bf16 %v5094_v20, %v5094_v20  ;;  %v5072_v62 = vadd.f32 %v5047_v3, %v4762_v52  ;;  %v5049_v21 = vpop.f32.mrb[133].mxu0  ;;  %v5134_v26 = vshll.u32 %v7482_v58, 16  ;;  %v5307_v52 = vld [vmem:[#allocation4 + $0x14] sm:$0x1] }
 0x52e   : > { %v5050_v42 = vpop.f32.mrb[134].mxu0  ;;  %v5216_v21 = vld [vmem:[#allocation4 + $0x54] sm:$0x1] }
 0x52f   : > { %v5133_v22 = vrot.slane %v5131_v13, 7  ;;  %v5139_v43 = vshrl.u32 %v7483_v48, 16  ;;  %v5087_v1 = vadd.f32 %v10770_v37, %v5072_v62  ;;  %v5052_v8 = vpop.f32.mrb[135].mxu0  ;;  %v5073_v2 = vadd.f32 %v5050_v42, %v4765_v29  ;;  %v5310_v62 = vld [vmem:[#allocation4 + $0x20] sm:$0xf] }
 0x530   : > { %v5142_v35 = vshll.u32 %v7483_v48, 16  ;;  %v5213_v48 = vld [vmem:[#allocation4 + $0x48] sm:$0xf]  ;;  %v5313_v42 = vld [vmem:[#allocation4 + $0x2c] sm:$0x1] }
 0x531   : > { %v5136_v54 = vor.u32 %v5134_v26, %v5133_v22  ;;  %v5137_v33 = vrot.slane %v5133_v22, 4  ;;  %v5141_v24 = vrot.slane %v5139_v43, 7  ;;  %v5095_v60 = vmax.f32 %v5087_v1, 0.0  ;;  %v5274_v8 = vld [vmem:[#allocation4 + $0x4c] sm:$0xf] }
 0x532   : > { %v5088_v23 = vadd.f32 %v10770_v37, %v5073_v2  ;;  %v5277_v2 = vld [vmem:[#allocation4 + $0x58] sm:$0x1] }
 0x533   : > { %v5202_v39 = vsel %vm10632_vm2, %v5136_v54, %v5201_v28  ;;  %v5205_v18 = vsel %vm8362_vm7, %v5137_v33, %v5204_v57  ;;  %v5257_v56 = vsel %vm10632_vm2, %v5136_v54, %v5256_v34  ;;  %v5260_v19 = vsel %vm8362_vm7, %v5137_v33, %v5259_v55 }
 0x534   : > { %5203 = vst [vmem:[#allocation4 + $0x18] sm:$0xf] %v5202_v39  ;;  %5206 = vst [vmem:[#allocation4 + $0x24] sm:$0x1] %v5205_v18  ;;  %v5144_v59 = vor.u32 %v5142_v35, %v5141_v24  ;;  %v5145_v50 = vrot.slane %v5141_v24, 4  ;;  %v7484_v29 = vpack.c.bf16 %v5095_v60, %v5095_v60  ;;  %v5096_v51 = vmax.f32 %v5088_v23, 0.0 }
 0x535   : > { %5258 = vst [vmem:[#allocation4 + $0x4] sm:$0xf] %v5257_v56  ;;  %5261 = vst [vmem:[#allocation4 + $0x10] sm:$0x1] %v5260_v19  ;;  %v5055_v41 = vpop.f32.mrb[136].mxu0  ;;  %v10803_v57 = vrot.slane %v5385_v38, 1 }
 0x536   : > { %v5074_v31 = vadd.f32 %v5055_v41, %v10758_v53  ;;  %v5057_v47 = vpop.f32.mrb[137].mxu0  ;;  %v5208_v27 = vsel %vm10632_vm2, %v5144_v59, %v5207_v36  ;;  %v5211_v4 = vsel %vm8362_vm7, %v5145_v50, %v5210_v9  ;;  %v5263_v11 = vsel %vm10632_vm2, %v5144_v59, %v5262_v25  ;;  %v5219_v36 = vld [vmem:[#allocation4 + $0x60] sm:$0xf]  ;;  %v5222_v23 = vld [vmem:[#allocation4 + $0x6c] sm:$0x1] }
 0x537   : > { %v5266_v63 = vsel %vm8362_vm7, %v5145_v50, %v5265_v46  ;;  %v5058_v45 = vpop.f32.mrb[138].mxu0  ;;  %5209 = vst [vmem:[#allocation4 + $0x30] sm:$0xf] %v5208_v27  ;;  %5212 = vst [vmem:[#allocation4 + $0x3c] sm:$0x1] %v5211_v4  ;;  %v5305_v53 = vsel %vm10632_vm2, %v5144_v59, %v5304_v49  ;;  %v5308_v7 = vsel %vm8362_vm7, %v5145_v50, %v5307_v52  ;;  %v5147_v30 = vshrl.u32 %v7484_v29, 16 }
 0x538   : > { %5264 = vst [vmem:[#allocation4 + $0x1c] sm:$0xf] %v5263_v11  ;;  %5267 = vst [vmem:[#allocation4 + $0x28] sm:$0x1] %v5266_v63  ;;  %v5060_v40 = vpop.f32.mrb[139].mxu0  ;;  %v7485_v14 = vpack.c.bf16 %v5096_v51, %v5096_v51  ;;  %v5089_v58 = vadd.f32 %v10770_v37, %v5074_v31  ;;  %v5075_v20 = vadd.f32 %v5058_v45, %v10761_v44  ;;  %v5150_v13 = vshll.u32 %v7484_v29, 16 }
 0x539   : > { %5306 = vst [vmem:[#allocation4 + $0x8] sm:$0xf] %v5305_v53  ;;  %5309 = vst [vmem:[#allocation4 + $0x14] sm:$0x1] %v5308_v7  ;;  %v5149_v3 = vrot.slane %v5147_v30, 7  ;;  %v10807_v34 = vrot.slane %v11486_v32, 1 }
 0x53a   : > { %v5155_v22 = vshrl.u32 %v7485_v14, 16  ;;  %v5097_v26 = vmax.f32 %v5089_v58, 0.0  ;;  %v5090_v28 = vadd.f32 %v10770_v37, %v5075_v20  ;;  %v5158_v55 = vshll.u32 %v7485_v14, 16  ;;  %v5316_v9 = vld [vmem:[#allocation4 + $0x38] sm:$0xf] }
 0x53b   : > { %v5152_v43 = vor.u32 %v5150_v13, %v5149_v3  ;;  %v5153_v1 = vrot.slane %v5149_v3, 4  ;;  %v5319_v49 = vld [vmem:[#allocation4 + $0x44] sm:$0x1]  ;;  %v5283_v7 = vld [vmem:[#allocation4 + $0x70] sm:$0x1] }
 0x53c   : > { %v5157_v44 = vrot.slane %v5155_v22, 7  ;;  %v7486_v54 = vpack.c.bf16 %v5097_v26, %v5097_v26  ;;  %v5098_v33 = vmax.f32 %v5090_v28, 0.0  ;;  %v5063_v24 = vpop.f32.mrb[140].mxu0  ;;  %v10822_v31 = vld [vmem:[#allocation4] sm:$0xff]  ;;  %v10838_v40 = vld [vmem:[#allocation4 + $0xc] sm:$0x11] }
 0x53d   : > { %v5214_v25 = vsel %vm10632_vm2, %v5152_v43, %v5213_v48  ;;  %v5217_v46 = vsel %vm8362_vm7, %v5153_v1, %v5216_v21  ;;  %v5269_v60 = vsel %vm10632_vm2, %v5152_v43, %v5268_v16  ;;  %v5272_v35 = vsel %vm8362_vm7, %v5153_v1, %v5271_v10  ;;  %v5065_v15 = vpop.f32.mrb[141].mxu0  ;;  %v5280_v11 = vld [vmem:[#allocation4 + $0x64] sm:$0xf]  ;;  %v5225_v16 = vld [vmem:[#allocation4 + $0x78] sm:$0xf] }
 0x53e   : > { %5215 = vst [vmem:[#allocation4 + $0x48] sm:$0xf] %v5214_v25  ;;  %5218 = vst [vmem:[#allocation4 + $0x54] sm:$0x1] %v5217_v46  ;;  %v5311_v39 = vsel %vm10632_vm2, %v5152_v43, %v5310_v62  ;;  %v5314_v18 = vsel %vm8362_vm7, %v5153_v1, %v5313_v42  ;;  %v5160_v56 = vor.u32 %v5158_v55, %v5157_v44  ;;  %v5161_v19 = vrot.slane %v5157_v44, 4  ;;  %v5066_v52 = vpop.f32.mrb[142].mxu0 }
 0x53f   : > { %5270 = vst [vmem:[#allocation4 + $0x34] sm:$0xf] %v5269_v60  ;;  %5273 = vst [vmem:[#allocation4 + $0x40] sm:$0x1] %v5272_v35  ;;  %v5163_v59 = vshrl.u32 %v7486_v54, 16  ;;  %v5166_v50 = vshll.u32 %v7486_v54, 16  ;;  %v7487_v29 = vpack.c.bf16 %v5098_v33, %v5098_v33  ;;  %v5076_v51 = vadd.f32 %v5063_v24, %v10763_v6 }
 0x540   : > { %5312 = vst [vmem:[#allocation4 + $0x20] sm:$0xf] %v5311_v39  ;;  %5315 = vst [vmem:[#allocation4 + $0x2c] sm:$0x1] %v5314_v18  ;;  %v5068_v41 = vpop.f32.mrb[143].mxu0  ;;  %v5220_v47 = vsel %vm10632_vm2, %v5160_v56, %v5219_v36  ;;  %v5223_v38 = vsel %vm8362_vm7, %v5161_v19, %v5222_v23  ;;  %v5275_v27 = vsel %vm10632_vm2, %v5160_v56, %v5274_v8  ;;  %v10832_v63 = vld [vmem:[#allocation4 + $0x18] sm:$0xff]  ;;  %v5363_v3 = vunpack.c.h.bf16 %v10822_v31 }
 0x541   : > { %v5278_v4 = vsel %vm8362_vm7, %v5161_v19, %v5277_v2  ;;  %5221 = vst [vmem:[#allocation4 + $0x60] sm:$0xf] %v5220_v47  ;;  %5224 = vst [vmem:[#allocation4 + $0x6c] sm:$0x1] %v5223_v38  ;;  %v5317_v6 = vsel %vm10632_vm2, %v5160_v56, %v5316_v9  ;;  %v5320_v45 = vsel %vm8362_vm7, %v5161_v19, %v5319_v49  ;;  %v5165_v53 = vrot.slane %v5163_v59, 7 }
 0x542   : > { %5276 = vst [vmem:[#allocation4 + $0x4c] sm:$0xf] %v5275_v27  ;;  %5279 = vst [vmem:[#allocation4 + $0x58] sm:$0x1] %v5278_v4  ;;  %v5171_v30 = vshrl.u32 %v7487_v29, 16  ;;  %v5174_v14 = vshll.u32 %v7487_v29, 16  ;;  %v5091_v58 = vadd.f32 %v10770_v37, %v5076_v51  ;;  %v5077_v20 = vadd.f32 %v5066_v52, %v10765_v5 }
 0x543   : > { %5318 = vst [vmem:[#allocation4 + $0x38] sm:$0xf] %v5317_v6  ;;  %5321 = vst [vmem:[#allocation4 + $0x44] sm:$0x1] %v5320_v45  ;;  %v5228_v10 = vld [vmem:[#allocation4 + $0x84] sm:$0x1]  ;;  %v5168_v13 = vor.u32 %v5166_v50, %v5165_v53  ;;  %v5366_v22 = vunpack.c.h.bf16 %v10832_v63  ;;  %v5462_v8 = vunpack.c.l.bf16 %v10838_v40  ;;  %v5463_v44 = vunpack.c.h.bf16 %v10838_v40 }
 0x544   : > { %v5169_v48 = vrot.slane %v5165_v53, 4  ;;  %v5322_v62 = vld [vmem:[#allocation4 + $0x50] sm:$0xf]  ;;  %v5325_v21 = vld [vmem:[#allocation4 + $0x5c] sm:$0x1]  ;;  %v5173_v42 = vrot.slane %v5171_v30, 7  ;;  %v5092_v43 = vadd.f32 %v10770_v37, %v5077_v20  ;;  %v10878_v51 = vsel %vm4388_vm1, %v10803_v57, %v10807_v34 }
 0x545   : > { %v5286_v26 = vld [vmem:[#allocation4 + $0x7c] sm:$0xf]  ;;  %v5099_v28 = vmax.f32 %v5091_v58, 0.0  ;;  %v10845_v1 = vld [vmem:[#allocation4 + $0x24] sm:$0x11]  ;;  %v5226_v5 = vsel %vm10632_vm2, %v5168_v13, %v5225_v16  ;;  %v5281_v2 = vsel %vm10632_vm2, %v5168_v13, %v5280_v11  ;;  %v5323_v25 = vsel %vm10632_vm2, %v5168_v13, %v5322_v62 }
 0x546   : > { %v5229_v55 = vsel %vm8362_vm7, %v5169_v48, %v5228_v10  ;;  %v5284_v54 = vsel %vm8362_vm7, %v5169_v48, %v5283_v7  ;;  %v5231_v33 = vld [vmem:[#allocation4 + $0x90] sm:$0xf]  ;;  %v5234_v37 = vld [vmem:[#allocation4 + $0x9c] sm:$0x1]  ;;  %v5289_v24 = vld [vmem:[#allocation4 + $0x88] sm:$0x1]  ;;  %v5326_v46 = vsel %vm8362_vm7, %v5169_v48, %v5325_v21  ;;  %v5176_v60 = vor.u32 %v5174_v14, %v5173_v42 }
 0x547   : > { %5227 = vst [vmem:[#allocation4 + $0x78] sm:$0xf] %v5226_v5  ;;  %5230 = vst [vmem:[#allocation4 + $0x84] sm:$0x1] %v5229_v55  ;;  %v5177_v35 = vrot.slane %v5173_v42, 4  ;;  %v7488_v15 = vpack.c.bf16 %v5099_v28, %v5099_v28  ;;  %v5100_v39 = vmax.f32 %v5092_v43, 0.0  ;;  %v5465_v18 = vunpack.c.l.bf16 %v10845_v1 }
 0x548   : > { %5282 = vst [vmem:[#allocation4 + $0x64] sm:$0xf] %v5281_v2  ;;  %5285 = vst [vmem:[#allocation4 + $0x70] sm:$0x1] %v5284_v54  ;;  %v5328_v36 = vld [vmem:[#allocation4 + $0x68] sm:$0xf]  ;;  %v5466_v56 = vunpack.c.h.bf16 %v10845_v1  ;;  %v5232_v19 = vsel %vm10632_vm2, %v5176_v60, %v5231_v33  ;;  %v5287_v49 = vsel %vm10632_vm2, %v5176_v60, %v5286_v26  ;;  %v5362_v42 = vunpack.c.l.bf16 %v10822_v31 }
 0x549   : > { %v5331_v23 = vld [vmem:[#allocation4 + $0x74] sm:$0x1]  ;;  %5324 = vst [vmem:[#allocation4 + $0x50] sm:$0xf] %v5323_v25  ;;  %5327 = vst [vmem:[#allocation4 + $0x5c] sm:$0x1] %v5326_v46  ;;  %v5235_v9 = vsel %vm8362_vm7, %v5177_v35, %v5234_v37  ;;  %v5290_v52 = vsel %vm8362_vm7, %v5177_v35, %v5289_v24  ;;  %v5329_v59 = vsel %vm10632_vm2, %v5176_v60, %v5328_v36  ;;  %v5365_v28 = vunpack.c.l.bf16 %v10832_v63 }
 0x54a   : > { %5233 = vst [vmem:[#allocation4 + $0x90] sm:$0xf] %v5232_v19  ;;  %5236 = vst [vmem:[#allocation4 + $0x9c] sm:$0x1] %v5235_v9  ;;  %v5332_v50 = vsel %vm8362_vm7, %v5177_v35, %v5331_v23  ;;  %v5179_v29 = vshrl.u32 %v7488_v15, 16  ;;  %v7489_v27 = vpack.c.bf16 %v5100_v39, %v5100_v39  ;;  %v5535_v4 = vrot.slane %v5462_v8, 1 }
 0x54b   : > { %5288 = vst [vmem:[#allocation4 + $0x7c] sm:$0xf] %v5287_v49  ;;  %5291 = vst [vmem:[#allocation4 + $0x88] sm:$0x1] %v5290_v52  ;;  %v5237_v41 = vld [vmem:[#allocation4 + $0xa8] sm:$0xf] }
 0x54c   : > { %5330 = vst [vmem:[#allocation4 + $0x68] sm:$0xf] %v5329_v59  ;;  %5333 = vst [vmem:[#allocation4 + $0x74] sm:$0x1] %v5332_v50  ;;  %v5292_v47 = vld [vmem:[#allocation4 + $0x94] sm:$0xf] }
 0x54d   : > { %v5295_v38 = vld [vmem:[#allocation4 + $0xa0] sm:$0x1]  ;;  %v5537_v11 = vrot.slane %v5363_v3, 1  ;;  %v5538_v6 = vrot.slane %v5463_v44, 1  ;;  %v5181_v45 = vrot.slane %v5179_v29, 7  ;;  %v5182_v53 = vshll.u32 %v7488_v15, 16 }
 0x54e   : > { %v5334_v7 = vld [vmem:[#allocation4 + $0x80] sm:$0xf]  ;;  %v5546_v30 = vrot.slane %v5366_v22, 1  ;;  %v5547_v57 = vrot.slane %v5466_v56, 1  ;;  %v10886_v34 = vld [vmem:[#allocation4 + $0x8] sm:$0xf] }
 0x54f   : > { %v5240_v16 = vld [vmem:[#allocation4 + $0xb4] sm:$0x1]  ;;  %v5247_v10 = vshrl.u32 %v7489_v27, 16  ;;  %v5250_v14 = vshll.u32 %v7489_v27, 16  ;;  %v5539_v58 = vsel %vm4388_vm1, %v5537_v11, %v5538_v6  ;;  %v5544_v20 = vrot.slane %v5465_v18, 1  ;;  %v8040_v40 = vld [vmem:[%s11455_s7 + $0x180] sm:$0xff]  }
 0x550   : > { %v5184_v3 = vor.u32 %v5182_v53, %v5181_v45  ;;  %v5185_v13 = vrot.slane %v5181_v45, 4  ;;  %v5337_v48 = vld [vmem:[#allocation4 + $0x8c] sm:$0x1]  ;;  %v5548_v21 = vsel %vm4388_vm1, %v5546_v30, %v5547_v57  ;;  %v10894_v43 = vld [vmem:[#allocation4 + $0x20] sm:$0xf]  ;;  %v5364_v5 = vunpack.c.l.bf16 %v10886_v34  ;;  %v10915_v52 = vld [vmem:[#allocation4 + $0x30] sm:$0xff] }
 0x551   : > { %v5298_v62 = vld [vmem:[#allocation4 + $0xac] sm:$0xf]  ;;  %v5249_v22 = vrot.slane %v5247_v10, 7  ;;  %v5631_v26 = vpack.c.bf16 %v5548_v21, %v5539_v58  ;;  %v10897_v55 = vld [vmem:[#allocation4 + $0x14] sm:$0x1]  ;;  %v5534_v39 = vrot.slane %v5362_v42, 1  ;;  %v5367_v9 = vunpack.c.l.bf16 %v10894_v43 }
 0x552   : > { %v5238_v2 = vsel %vm10632_vm2, %v5184_v3, %v5237_v41  ;;  %v5241_v54 = vsel %vm8362_vm7, %v5185_v13, %v5240_v16  ;;  %v5293_v33 = vsel %vm10632_vm2, %v5184_v3, %v5292_v47  ;;  %v5296_v37 = vsel %vm8362_vm7, %v5185_v13, %v5295_v38  ;;  %v5301_v24 = vld [vmem:[#allocation4 + $0xb8] sm:$0x1]  ;;  %v5343_v46 = vld [vmem:[#allocation4 + $0xa4] sm:$0x1]  ;;  %v10911_v15 = vld [vmem:[#allocation4 + $0x2c] sm:$0x1] }
 0x553   : > { %v5340_v25 = vld [vmem:[#allocation4 + $0x98] sm:$0xf]  ;;  %5239 = vst [vmem:[#allocation4 + $0xa8] sm:$0xf] %v5238_v2  ;;  %5242 = vst [vmem:[#allocation4 + $0xb4] sm:$0x1] %v5241_v54  ;;  %v5335_v60 = vsel %vm10632_vm2, %v5184_v3, %v5334_v7  ;;  %v5338_v35 = vsel %vm8362_vm7, %v5185_v13, %v5337_v48  ;;  %v5252_v36 = vor.u32 %v5250_v14, %v5249_v22  ;;  %5867 = vmatprep.mubr.bf16.mxu1 %v5631_v26 }
 0x554   : > { %5294 = vst [vmem:[#allocation4 + $0x94] sm:$0xf] %v5293_v33  ;;  %5297 = vst [vmem:[#allocation4 + $0xa0] sm:$0x1] %v5296_v37  ;;  %v5253_v23 = vrot.slane %v5249_v22, 4  ;;  %v5543_v19 = vrot.slane %v5365_v28, 1  ;;  %v11493_v49 = vunpack.c.l.bf16 %v10897_v55  ;;  %v5536_v11 = vsel %vm4388_vm1, %v5534_v39, %v5535_v4 }
 0x555   : > { %5336 = vst [vmem:[#allocation4 + $0x80] sm:$0xf] %v5335_v60  ;;  %5339 = vst [vmem:[#allocation4 + $0x8c] sm:$0x1] %v5338_v35  ;;  %v5299_v59 = vsel %vm10632_vm2, %v5252_v36, %v5298_v62  ;;  %v5341_v29 = vsel %vm10632_vm2, %v5252_v36, %v5340_v25  ;;  %v10925_v47 = vld [vmem:[#allocation4 + $0x48] sm:$0xff]  ;;  %v11497_v17 = vunpack.c.l.bf16 %v10911_v15  ;;  %v5540_v45 = vrot.slane %v5364_v5, 1 }
 0x556   : > { %v5302_v50 = vsel %vm8362_vm7, %v5253_v23, %v5301_v24  ;;  %v5344_v41 = vsel %vm8362_vm7, %v5253_v23, %v5343_v46  ;;  %v10927_v38 = vld [vmem:[#allocation4 + $0x3c] sm:$0x11]  ;;  %v10929_v27 = vld [vmem:[#allocation4 + $0x54] sm:$0x11]  ;;  %5300 = vst [vmem:[#allocation4 + $0xac] sm:$0xf] %v5299_v59  ;;  %v5545_v6 = vsel %vm4388_vm1, %v5543_v19, %v5544_v20  ;;  %v5369_v4 = vunpack.c.h.bf16 %v10915_v52  ;;  %vm11599_vm7 = vmmov %vm11585_vm5 }
 0x557   : > { %5303 = vst [vmem:[#allocation4 + $0xb8] sm:$0x1] %v5302_v50  ;;  %5342 = vst [vmem:[#allocation4 + $0x98] sm:$0xf] %v5341_v29  ;;  %v5630_v53 = vpack.c.bf16 %v5545_v6, %v5536_v11  ;;  %v8014_v7 = vld [vmem:[%s11455_s7 + $0x48] sm:$0xff]   ;;  %v5541_v30 = vrot.slane %v11493_v49, 1  ;;  %v5372_v10 = vunpack.c.h.bf16 %v10925_v47  ;;  %v11489_v14 = vunpack.c.h.bf16 %v10927_v38 }
 0x558   : > { %5345 = vst [vmem:[#allocation4 + $0xa4] sm:$0x1] %v5344_v41  ;;  %v5549_v57 = vrot.slane %v5367_v9, 1  ;;  %v5550_v16 = vrot.slane %v11497_v17, 1  ;;  %v11490_v58 = vunpack.c.h.bf16 %v10929_v27  ;;  %v8016_v20 = vld [vmem:[%s11455_s7 + $0x8] sm:$0xff]   ;;  %v5555_v13 = vrot.slane %v5369_v4, 1 }
 0x559   : > { %5868 = vmatmul.mubr.bf16.vlgmr.msra.gmra.mrb[128].mxu1 %v5630_v53  ;;  %v5542_v3 = vsel %vm4388_vm1, %v5540_v45, %v5541_v30  ;;  %v5368_v48 = vunpack.c.l.bf16 %v10915_v52  ;;  %v5371_v62 = vunpack.c.l.bf16 %v10925_v47  ;;  %v10954_v21 = vld [vmem:[#allocation4 + $0x38] sm:$0xf]  ;;  %v5556_v22 = vrot.slane %v11489_v14, 1  ;;  %v8017_v5 = vld [vmem:[%s11455_s7 + $0x50] sm:$0xff]   ;;  %v10968_v25 = vld [vmem:[#allocation4 + $0x44] sm:$0x1] }
 0x55a   : > { %7562 = vmatpush3.bf16.msra.mxu1 %v8013_v12  ;;  %v5551_v42 = vsel %vm4388_vm1, %v5549_v57, %v5550_v16  ;;  %v5564_v26 = vrot.slane %v5372_v10, 1  ;;  %v5565_v28 = vrot.slane %v11490_v58, 1  ;;  %v10964_v2 = vld [vmem:[#allocation4 + $0x50] sm:$0xf]  ;;  %v5468_v33 = vunpack.c.l.bf16 %v10927_v38  ;;  %v10970_v46 = vld [vmem:[#allocation4 + $0x5c] sm:$0x1] }
 0x55b   : > { %7563 = vmatprep.subr.bf16.mxu1 %v8014_v7  ;;  %v5632_v54 = vpack.c.bf16 %v5551_v42, %v5542_v3  ;;  %v5471_v37 = vunpack.c.l.bf16 %v10929_v27  ;;  %v5552_v24 = vrot.slane %v5368_v48, 1  ;;  %v10972_v60 = vld [vmem:[#allocation4 + $0x60] sm:$0xff]  ;;  %v5557_v35 = vsel %vm4388_vm1, %v5555_v13, %v5556_v22  ;;  %v10977_v19 = vld [vmem:[#allocation4 + $0x78] sm:$0xff]  ;;  %v10984_v41 = vld [vmem:[#allocation4 + $0x6c] sm:$0x11] }
 0x55c   : > { %v5566_v36 = vsel %vm4388_vm1, %v5564_v26, %v5565_v28  ;;  %v5561_v23 = vrot.slane %v5371_v62, 1  ;;  %v5370_v39 = vunpack.c.l.bf16 %v10954_v21  ;;  %v5553_v59 = vrot.slane %v5468_v33, 1  ;;  %v10989_v53 = vld [vmem:[#allocation4 + $0x84] sm:$0x11]  ;;  %v8019_v57 = vld [vmem:[%s11455_s7 + $0x10] sm:$0xff]  }
 0x55d   : > { %7717 = vmatprep.mubr.bf16.mxu0 %v5632_v54  ;;  %v5634_v9 = vpack.c.bf16 %v5566_v36, %v5557_v35  ;;  %v5562_v50 = vrot.slane %v5471_v37, 1  ;;  %v5373_v29 = vunpack.c.l.bf16 %v10964_v2  ;;  %v5470_v11 = vunpack.c.l.bf16 %v10968_v25  ;;  %v11007_v28 = vld [vmem:[#allocation4 + $0x68] sm:$0xf] }
 0x55e   : > { %7564 = vmatpush3.bf16.msra.mxu1 %v8016_v20  ;;  %v5473_v6 = vunpack.c.l.bf16 %v10970_v46  ;;  %v5558_v12 = vrot.slane %v5370_v39, 1  ;;  %v5375_v45 = vunpack.c.h.bf16 %v10972_v60  ;;  %v5554_v7 = vsel %vm4388_vm1, %v5552_v24, %v5553_v59  ;;  %v8020_v20 = vld [vmem:[%s11455_s7 + $0x58] sm:$0xff]  }
 0x55f   : > { %5875 = vmatprep.mubr.bf16.mxu1 %v5634_v9  ;;  %7565 = vmatprep.subr.bf16.mxu1 %v8017_v5  ;;  %v5563_v30 = vsel %vm4388_vm1, %v5561_v23, %v5562_v50  ;;  %v5567_v4 = vrot.slane %v5373_v29, 1  ;;  %v5378_v16 = vunpack.c.h.bf16 %v10977_v19  ;;  %v5559_v3 = vrot.slane %v5470_v11, 1  ;;  %v8021_v5 = vld [vmem:[%s11455_s7 + $0x18] sm:$0xff]   ;;  %v11017_v23 = vld [vmem:[#allocation4 + $0x80] sm:$0xf]  ;;  %v8025_v29 = vld [vmem:[%s11455_s7 + $0x88] sm:$0xff]  }
 0x560   : > { %v5633_v10 = vpack.c.bf16 %v5563_v30, %v5554_v7  ;;  %v5568_v13 = vrot.slane %v5473_v6, 1  ;;  %v11487_v48 = vunpack.c.h.bf16 %v10984_v41  ;;  %v11488_v62 = vunpack.c.h.bf16 %v10989_v53  ;;  %v8023_v30 = vld [vmem:[%s11455_s7 + $0x60] sm:$0xff]  }
 0x561   : > { %v5573_v42 = vrot.slane %v5375_v45, 1  ;;  %v5582_v22 = vrot.slane %v5378_v16, 1  ;;  %v5374_v26 = vunpack.c.l.bf16 %v10972_v60  ;;  %v5560_v54 = vsel %vm4388_vm1, %v5558_v12, %v5559_v3  ;;  %v11026_v12 = vld [vmem:[#allocation4 + $0x74] sm:$0x1]  ;;  %v11028_v45 = vld [vmem:[#allocation4 + $0x8c] sm:$0x1] }
 0x562   : > { %5876 = vmatmul.mubr.bf16.gmra.mrb[132].mxu1 %v5633_v10  ;;  %v5569_v24 = vsel %vm4388_vm1, %v5567_v4, %v5568_v13  ;;  %v5574_v35 = vrot.slane %v11487_v48, 1  ;;  %v5377_v36 = vunpack.c.l.bf16 %v10977_v19  ;;  %v5583_v9 = vrot.slane %v11488_v62, 1  ;;  %v11035_v10 = vld [vmem:[#allocation4 + $0x90] sm:$0xff]  ;;  %v8024_v62 = vld [vmem:[%s11455_s7 + $0x20] sm:$0xff]  }
 0x563   : > { %7566 = vmatpush3.bf16.msra.mxu1 %v8019_v57  ;;  %v5635_v39 = vpack.c.bf16 %v5569_v24, %v5560_v54  ;;  %v5474_v59 = vunpack.c.l.bf16 %v10984_v41  ;;  %v11498_v50 = vunpack.c.l.bf16 %v10989_v53  ;;  %v5570_v57 = vrot.slane %v5374_v26, 1  ;;  %v11043_v54 = vld [vmem:[#allocation4 + $0xa8] sm:$0xff]  ;;  %v11045_v24 = vld [vmem:[#allocation4 + $0x9c] sm:$0x11] }
 0x564   : > { %7567 = vmatprep.subr.bf16.mxu1 %v8020_v20  ;;  %v5575_v7 = vsel %vm4388_vm1, %v5573_v42, %v5574_v35  ;;  %v5579_v4 = vrot.slane %v5377_v36, 1  ;;  %v5376_v16 = vunpack.c.l.bf16 %v11007_v28  ;;  %v5584_v3 = vsel %vm4388_vm1, %v5582_v22, %v5583_v9  ;;  %v11052_v9 = vld [vmem:[#allocation4 + $0x98] sm:$0xf] }
 0x565   : > { %7718 = vmatmul.mubr.bf16.vlgmr.msra.gmra.mrb[144].mxu0 %v5635_v39  ;;  %v5571_v13 = vrot.slane %v5474_v59, 1  ;;  %v5580_v20 = vrot.slane %v11498_v50, 1  ;;  %v5379_v42 = vunpack.c.l.bf16 %v11017_v23  ;;  %v5637_v26 = vpack.c.bf16 %v5584_v3, %v5575_v7  ;;  %v11050_v39 = vld [vmem:[#allocation4 + $0xb4] sm:$0x11]  ;;  %v11063_v3 = vld [vmem:[#allocation4 + $0xa4] sm:$0x1] }
 0x566   : > { %7726 = vmatpush3.bf16.msra.mxu0 %v10742_v0  ;;  %v11491_v35 = vunpack.c.l.bf16 %v11026_v12  ;;  %v11492_v36 = vunpack.c.l.bf16 %v11028_v45  ;;  %v5576_v22 = vrot.slane %v5376_v16, 1  ;;  %v8028_v0 = vld [vmem:[%s11455_s7 + $0x90] sm:$0xff]   ;;  %v5381_v16 = vunpack.c.h.bf16 %v11035_v10 }
 0x567   : > { %7568 = vmatpush3.bf16.msra.mxu1 %v8021_v5  ;;  %v5572_v32 = vsel %vm4388_vm1, %v5570_v57, %v5571_v13  ;;  %v5581_v48 = vsel %vm4388_vm1, %v5579_v4, %v5580_v20  ;;  %7727 = vmatprep.subr.bf16.mxu0 %v8025_v29  ;;  %v5585_v7 = vrot.slane %v5379_v42, 1  ;;  %v8026_v57 = vld [vmem:[%s11455_s7 + $0x68] sm:$0xff]   ;;  %v5384_v20 = vunpack.c.h.bf16 %v11043_v54 }
 0x568   : > { %5883 = vmatprep.mubr.bf16.mxu1 %v5637_v26  ;;  %7569 = vmatprep.subr.bf16.mxu1 %v8023_v30  ;;  %v5636_v5 = vpack.c.bf16 %v5581_v48, %v5572_v32  ;;  %v5577_v4 = vrot.slane %v11491_v35, 1  ;;  %v5586_v13 = vrot.slane %v11492_v36, 1  ;;  %v11494_v42 = vunpack.c.h.bf16 %v11045_v24  ;;  %v8027_v36 = vld [vmem:[%s11455_s7 + $0x28] sm:$0xff]  }
 0x569   : > { %v11496_v14 = vunpack.c.h.bf16 %v11050_v39  ;;  %v5591_v58 = vrot.slane %v5381_v16, 1  ;;  %v5382_v30 = vunpack.c.l.bf16 %v11052_v9  ;;  %v5600_v26 = vrot.slane %v5384_v20, 1 }
 0x56a   : > { %5884 = vmatmul.mubr.bf16.gmra.mrb[136].mxu1 %v5636_v5  ;;  %7728 = vmatpush3.bf16.msra.mxu0 %v8025_v29  ;;  %v5578_v32 = vsel %vm4388_vm1, %v5576_v22, %v5577_v4  ;;  %v5587_v48 = vsel %vm4388_vm1, %v5585_v7, %v5586_v13  ;;  %v11495_v35 = vunpack.c.l.bf16 %v11063_v3  ;;  %v5592_v16 = vrot.slane %v11494_v42, 1  ;;  %v8031_v22 = vld [vmem:[%s11455_s7 + $0x98] sm:$0xff]   ;;  %v8029_v7 = vld [vmem:[%s11455_s7 + $0x70] sm:$0xff]  }
 0x56b   : > { %7570 = vmatpush3.bf16.msra.mxu1 %v8024_v62  ;;  %7729 = vmatprep.subr.bf16.mxu0 %v8028_v0  ;;  %v5638_v49 = vpack.c.bf16 %v5587_v48, %v5578_v32  ;;  %v5601_v29 = vrot.slane %v11496_v14, 1  ;;  %v5594_v5 = vrot.slane %v5382_v30, 1  ;;  %v5380_v4 = vunpack.c.l.bf16 %v11035_v10 }
 0x56c   : > { %7571 = vmatprep.subr.bf16.mxu1 %v8026_v57  ;;  %v5595_v62 = vrot.slane %v11495_v35, 1  ;;  %v5383_v13 = vunpack.c.l.bf16 %v11043_v54  ;;  %v5480_v20 = vunpack.c.l.bf16 %v11045_v24  ;;  %v5593_v30 = vsel %vm4388_vm1, %v5591_v58, %v5592_v16  ;;  %v8030_v58 = vld [vmem:[%s11455_s7 + $0x30] sm:$0xff]   ;;  %v6239_v16 = vld [vmem:[#allocation4] sm:$0xee] }
 0x56d   : > { %7721 = vmatprep.mubr.bf16.mxu0 %v5638_v49  ;;  %v5602_v32 = vsel %vm4388_vm1, %v5600_v26, %v5601_v29  ;;  %v5483_v57 = vunpack.c.l.bf16 %v11050_v39  ;;  %v5588_v35 = vrot.slane %v5380_v4, 1  ;;  %v7258_v25 = vcombine.low %v10915_v52, %v10925_v47 }
 0x56e   : > { %7730 = vmatpush3.bf16.msra.mxu0 %v8028_v0  ;;  %v5640_v48 = vpack.c.bf16 %v5602_v32, %v5593_v30  ;;  %v5596_v42 = vsel %vm4388_vm1, %v5594_v5, %v5595_v62  ;;  %v5589_v14 = vrot.slane %v5480_v20, 1  ;;  %v5597_v50 = vrot.slane %v5383_v13, 1  ;;  %v8036_v0 = vld [vmem:[%s11455_s7 + $0xa0] sm:$0xff]   ;;  %v6241_v5 = vld [vmem:[#allocation4 + $0x18] sm:$0xee]  ;;  %v8043_v32 = vld [vmem:[%s11455_s7 + $0xb0] sm:$0xff]  }
 0x56f   : > { %7572 = vmatpush3.bf16.msra.mxu1 %v8027_v36  ;;  %v5641_v17 = vpack.c.bf16 %v10878_v51, %v5596_v42  ;;  %v5598_v49 = vrot.slane %v5483_v57, 1  ;;  %7731 = vmatprep.subr.bf16.mxu0 %v8031_v22  ;;  %v7257_v36 = vcombine.low %v10886_v34, %v10894_v43  ;;  %v8034_v51 = vld [vmem:[%s11455_s7 + $0x78] sm:$0xff]   ;;  %v7256_v62 = vcombine.high %v10822_v31, %v10832_v63  ;;  %v8039_v43 = vld [vmem:[%s11455_s7 + $0xa8] sm:$0xff]  }
 0x570   : > { %5891 = vmatprep.mubr.bf16.mxu1 %v5640_v48  ;;  %7573 = vmatprep.subr.bf16.mxu1 %v8029_v7  ;;  %v5590_v42 = vsel %vm4388_vm1, %v5588_v35, %v5589_v14  ;;  %v8035_v34 = vld [vmem:[%s11455_s7 + $0x38] sm:$0xff]   ;;  %v8037_v14 = vld [vmem:[%s11455_s7 + $0x1c0] sm:$0xff]   ;;  %v6313_v35 = vrot.slane %v5465_v18, 2  ;;  %v6258_v7 = vunpack.c.l.bf16 %v6241_v5  ;;  %v6259_v4 = vunpack.c.h.bf16 %v6241_v5 }
 0x571   : > { %7722 = vmatmul.mubr.bf16.gmra.mrb[148].mxu0 %v5641_v17  ;;  %v5599_v26 = vsel %vm4388_vm1, %v5597_v50, %v5598_v49  ;;  %v6304_v17 = vrot.slane %v5462_v8, 2  ;;  %v6255_v50 = vunpack.c.l.bf16 %v6239_v16  ;;  %v6307_v30 = vrot.slane %v5463_v44, 2  ;;  %vm11601_vm1 = vmmov %vm11585_vm5  ;;  %v8047_v5 = vld [vmem:[%s11455_s7 + $0xb8] sm:$0xff]  }
 0x572   : > { %v5639_v29 = vpack.c.bf16 %v5599_v26, %v5590_v42  ;;  %7741 = vmatprep.mubr.bf16.mxu0 %v7257_v36  ;;  %7732 = vmatpush3.bf16.msra.mxu0 %v8031_v22  ;;  %v6256_v22 = vunpack.c.h.bf16 %v6239_v16  ;;  %v6316_v8 = vrot.slane %v5466_v56, 2  ;;  %v6312_v18 = vrot.slane %v6258_v7, 2  ;;  %vm11602_vm5 = vmmov %vm11601_vm1  ;;  %v8042_v26 = vld [vmem:[%s11455_s7 + $0x1c8] sm:$0xff]  }
 0x573   : > { %7574 = vmatpush3.bf16.msra.mxu1 %v8030_v58  ;;  %7733 = vmatprep.subr.bf16.mxu0 %v8036_v0  ;;  %v6303_v13 = vrot.slane %v6255_v50, 2  ;;  %v6315_v49 = vrot.slane %v6259_v4, 2  ;;  %v11141_v58 = vld [vmem:[#allocation4 + $0x30] sm:$0xee]  ;;  %v7259_v42 = vcombine.high %v10915_v52, %v10925_v47  ;;  %v6240_v7 = vld [vmem:[#allocation4 + $0x8] sm:$0xe]  ;;  %vm11603_vm10 = vmmov %vm11601_vm1  ;;  %v7260_v47 = vcombine.low %v10954_v21, %v10964_v2 }
 0x574   : > { %5892 = vmatmul.mubr.bf16.gmra.mrb[140].mxu1 %v5639_v29  ;;  %7575 = vmatprep.subr.bf16.mxu1 %v8034_v51  ;;  %v6306_v48 = vrot.slane %v6256_v22, 2  ;;  %v11158_v36 = vsel %vm11602_vm5, %v6312_v18, %v6313_v35  ;;  %v7255_v51 = vcombine.low %v10822_v31, %v10832_v63  ;;  %v6261_v31 = vunpack.c.l.bf16 %v11141_v58  ;;  %v6242_v4 = vld [vmem:[#allocation4 + $0x20] sm:$0xe]  ;;  %vm11604_vm11 = vmmov %vm11601_vm1 }
 0x575   : > { %6141 = vmatprep.mubr.bf16.mxu1 %v7256_v62  ;;  %v11152_v44 = vsel %vm11600_vm12, %v6315_v49, %v6316_v8  ;;  %v11155_v56 = vsel %vm11601_vm1, %v6303_v13, %v6304_v17  ;;  %v6322_v62 = vrot.slane %v5468_v33, 2  ;;  %v6246_v17 = vld [vmem:[#allocation4 + $0x50] sm:$0xe]  ;;  %v11199_v18 = vld [vmem:[#allocation4 + $0x60] sm:$0xee]  ;;  %vm11605_vm8 = vmmov %vm11601_vm1  ;;  %v7263_v21 = vcombine.low %v11007_v28, %v11017_v23 }
 0x576   : > { %7734 = vmatpush3.bf16.msra.mxu0 %v8036_v0  ;;  %v11143_v0 = vld [vmem:[#allocation4 + $0x48] sm:$0xee]  ;;  %v11149_v1 = vsel %vm11599_vm7, %v6306_v48, %v6307_v30  ;;  %v6399_v29 = vpack.c.bf16 %v11158_v36, %v11155_v56  ;;  %v6321_v50 = vrot.slane %v6261_v31, 2  ;;  %v8045_v33 = vld [vmem:[%s11455_s7 + $0x1d0] sm:$0xff]   ;;  %v6266_v8 = vunpack.c.l.bf16 %v6246_v17  ;;  %v11201_v49 = vld [vmem:[#allocation4 + $0x78] sm:$0xee] }
 0x577   : > { %7576 = vmatpush3.bf16.msra.mxu1 %v8035_v34  ;;  %7735 = vmatprep.subr.bf16.mxu0 %v8039_v43  ;;  %v6400_v16 = vpack.c.bf16 %v11152_v44, %v11149_v1  ;;  %v6264_v63 = vunpack.c.l.bf16 %v11143_v0  ;;  %v6331_v34 = vrot.slane %v5471_v37, 2  ;;  %v8053_v37 = vld [vmem:[%s11455_s7 + $0x200] sm:$0xff]   ;;  %v8050_v31 = vld [vmem:[%s11455_s7 + $0x1d8] sm:$0xff]   ;;  %vm11606_vm14 = vmmov %vm11601_vm1  ;;  %v6270_v52 = vunpack.c.l.bf16 %v11201_v49 }
 0x578   : > { %7613 = vmatprep.subr.bf16.mxu1 %v8037_v14  ;;  %v8044_v14 = vld [vmem:[%s11455_s7 + $0x188] sm:$0xff]   ;;  %v11190_v13 = vsel %vm11603_vm10, %v6321_v50, %v6322_v62  ;;  %v6260_v62 = vunpack.c.l.bf16 %v6242_v4  ;;  %v6340_v17 = vrot.slane %v5474_v59, 2  ;;  %v8055_v2 = vld [vmem:[%s11455_s7 + $0x1e0] sm:$0xff]   ;;  %vm11609_vm0 = vmmov %vm11601_vm1  ;;  %v6271_v1 = vunpack.c.h.bf16 %v11201_v49 }
 0x579   : > { %v6330_v35 = vrot.slane %v6264_v63, 2  ;;  %v6257_v63 = vunpack.c.l.bf16 %v6240_v7  ;;  %v11608_v7 = vunpack.c.l.bf16 %v10911_v15  ;;  %vm11610_vm3 = vmmov %vm11609_vm0  ;;  %v11611_v15 = vunpack.c.l.bf16 %v10897_v55  ;;  %v6248_v44 = vld [vmem:[#allocation4 + $0x68] sm:$0xe] }
 0x57a   : > { %7736 = vmatpush3.bf16.msra.mxu0 %v8039_v43  ;;  %v6244_v43 = vld [vmem:[#allocation4 + $0x38] sm:$0xe]  ;;  %v6318_v59 = vrot.slane %v6260_v62, 2  ;;  %v7261_v55 = vcombine.low %v10972_v60, %v10977_v19  ;;  %vm11612_vm13 = vmmov %vm11609_vm0  ;;  %v11620_v49 = vunpack.c.h.bf16 %v10989_v53  ;;  %v11622_v56 = vunpack.c.l.bf16 %v11028_v45 }
 0x57b   : > { %7737 = vmatprep.subr.bf16.mxu0 %v8043_v32  ;;  %v6263_v22 = vunpack.c.l.bf16 %v6244_v43  ;;  %v11193_v30 = vsel %vm11604_vm11, %v6330_v35, %v6331_v34  ;;  %v8052_v35 = vld [vmem:[%s11455_s7 + $0x198] sm:$0xff]   ;;  %v6319_v4 = vrot.slane %v11608_v7, 2  ;;  %vm11613_vm4 = vmmov %vm11609_vm0 }
 0x57c   : > { %6142 = vmatmul.mubr.bf16.vlgmr.msra.gmra.mrb[144].mxu1 %v7255_v51  ;;  %v6402_v48 = vpack.c.bf16 %v11193_v30, %v11190_v13  ;;  %v8048_v51 = vld [vmem:[%s11455_s7 + $0x190] sm:$0xff]   ;;  %vm11614_vm15 = vmmov %vm11609_vm0  ;;  %v8068_v7 = vld [vmem:[%s11455_s7 + $0x1f8] sm:$0xff]   ;;  %v6355_v36 = vrot.slane %v11622_v56, 2  ;;  %v11631_v30 = vunpack.c.h.bf16 %v11045_v24 }
 0x57d   : > { %7614 = vmatpush3.bf16.msra.mxu1 %v8040_v40  ;;  %6149 = vmatprep.mubr.bf16.mxu1 %v7259_v42  ;;  %v6327_v40 = vrot.slane %v6263_v22, 2  ;;  %v6336_v42 = vrot.slane %v6266_v8, 2  ;;  %v6348_v22 = vrot.slane %v6270_v52, 2  ;;  %v11244_v8 = vld [vmem:[#allocation4 + $0x90] sm:$0xee]  ;;  %v6320_v62 = vsel %vm11612_vm13, %v6318_v59, %v6319_v4  ;;  %vm11615_vm6 = vmmov %vm11609_vm0 }
 0x57e   : > { %7615 = vmatprep.subr.bf16.mxu1 %v8042_v26  ;;  %7738 = vmatpush3.bf16.msra.mxu0 %v8043_v32  ;;  %v6328_v32 = vrot.slane %v5470_v11, 2  ;;  %v6337_v26 = vrot.slane %v5473_v6, 2  ;;  %v7262_v11 = vcombine.high %v10972_v60, %v10977_v19  ;;  %v6267_v6 = vunpack.c.l.bf16 %v11199_v18  ;;  %v8067_v19 = vld [vmem:[%s11455_s7 + $0x218] sm:$0xff]   ;;  %vm11618_vm9 = vmmov %vm11609_vm0 }
 0x57f   : > { %7739 = vmatprep.subr.bf16.mxu0 %v8047_v5  ;;  %v7265_v52 = vcombine.high %v11035_v10, %v11043_v54  ;;  %v7264_v59 = vcombine.low %v11035_v10, %v11043_v54  ;;  %v6262_v4 = vunpack.c.h.bf16 %v11141_v58  ;;  %v8069_v10 = vld [vmem:[%s11455_s7 + $0x1b8] sm:$0xff]   ;;  %v11617_v58 = vunpack.c.h.bf16 %v10927_v38  ;;  %vm11619_vm2 = vmmov %vm11609_vm0 }
 0x580   : > { %v11216_v34 = vsel %vm11605_vm8, %v6327_v40, %v6328_v32  ;;  %v11219_v46 = vsel %vm11606_vm14, %v6336_v42, %v6337_v26  ;;  %v11246_v32 = vld [vmem:[#allocation4 + $0xa8] sm:$0xee]  ;;  %v8063_v40 = vld [vmem:[%s11455_s7 + $0x210] sm:$0xff]   ;;  %v6310_v42 = vrot.slane %v11611_v15, 2  ;;  %vm11623_vm7 = vmmov %vm11609_vm0  ;;  %v6274_v45 = vunpack.c.h.bf16 %v11244_v8 }
 0x581   : > { %7616 = vmatpush3.bf16.msra.mxu1 %v8044_v14  ;;  %v6404_v43 = vpack.c.bf16 %v11219_v46, %v11216_v34  ;;  %v11607_v14 = vunpack.c.l.bf16 %v10989_v53  ;;  %v6324_v54 = vrot.slane %v6262_v4, 2  ;;  %v11624_v53 = vunpack.c.l.bf16 %v11026_v12  ;;  %vm11625_vm12 = vmmov %vm11609_vm0 }
 0x582   : > { %7617 = vmatprep.subr.bf16.mxu1 %v8045_v33  ;;  %7740 = vmatpush3.bf16.msra.mxu0 %v8047_v5  ;;  %v8058_v5 = vld [vmem:[%s11455_s7 + $0x208] sm:$0xff]   ;;  %v6339_v33 = vrot.slane %v6267_v6, 2  ;;  %v6367_v6 = vrot.slane %v5483_v57, 2  ;;  %vm11626_vm1 = vmmov %vm11609_vm0  ;;  %v11628_v12 = vunpack.c.h.bf16 %v11050_v39  ;;  %v6360_v13 = vrot.slane %v6274_v45, 2 }
 0x583   : > { %7749 = vmatprep.subr.bf16.mxu0 %v8053_v37  ;;  %v6349_v50 = vrot.slane %v11607_v14, 2  ;;  %v8062_v57 = vld [vmem:[%s11455_s7 + $0x1a8] sm:$0xff]   ;;  %vm11627_vm5 = vmmov %vm11609_vm0 }
 0x584   : > { %6150 = vmatmul.mubr.bf16.gmra.mrb[148].mxu1 %v7258_v25  ;;  %v11249_v28 = vsel %vm11609_vm0, %v6339_v33, %v6340_v17  ;;  %v6273_v25 = vunpack.c.l.bf16 %v11244_v8  ;;  %v6265_v33 = vunpack.c.h.bf16 %v11143_v0  ;;  %v8071_v0 = vld [vmem:[%s11455_s7 + $0x228] sm:$0xff]   ;;  %v11630_v8 = vunpack.c.l.bf16 %v10784_v61  ;;  %vm11632_vm10 = vmmov %vm11609_vm0 }
 0x585   : > { %7618 = vmatpush3.bf16.msra.mxu1 %v8048_v51  ;;  %6157 = vmatprep.mubr.bf16.mxu1 %v7262_v11  ;;  %v11252_v23 = vsel %vm11610_vm3, %v6348_v22, %v6349_v50  ;;  %v6309_v51 = vrot.slane %v6257_v63, 2  ;;  %v6276_v11 = vunpack.c.l.bf16 %v11246_v32  ;;  %v8060_v63 = vld [vmem:[%s11455_s7 + $0x1e8] sm:$0xff]   ;;  %v8066_v22 = vld [vmem:[%s11455_s7 + $0x1b0] sm:$0xff]   ;;  %vm11633_vm11 = vmmov %vm11609_vm0 }
 0x586   : > { %7619 = vmatprep.subr.bf16.mxu1 %v8050_v31  ;;  %7742 = vmatmul.mubr.bf16.vlgmr.msra.gmra.mrb[144].mxu0 %v7260_v47  ;;  %v6405_v26 = vpack.c.bf16 %v11252_v23, %v11249_v28  ;;  %v6358_v31 = vrot.slane %v5480_v20, 2  ;;  %v6357_v47 = vrot.slane %v6273_v25, 2  ;;  %v8076_v20 = vld [vmem:[#allocation4 + $0xb0] sm:$0xf]  ;;  %vm11634_vm8 = vmmov %vm11609_vm0 }
 0x587   : > { %7745 = vmatprep.mubr.bf16.mxu0 %v7263_v21  ;;  %7750 = vmatpush3.bf16.msra.mxu0 %v8053_v37  ;;  %v8057_v37 = vld [vmem:[%s11455_s7 + $0x1a0] sm:$0xff]   ;;  %v6366_v17 = vrot.slane %v6276_v11, 2  ;;  %v7266_v14 = vcombine.low %v11052_v9, %v8076_v20  ;;  %v6311_v60 = vsel %vm11613_vm4, %v6309_v51, %v6310_v42  ;;  %v8064_v9 = vld [vmem:[%s11455_s7 + $0x1f0] sm:$0xff]   ;;  %v11616_v51 = vunpack.c.h.bf16 %v10929_v27  ;;  %vm11635_vm14 = vmmov %vm11609_vm0 }
 0x588   : > { %7751 = vmatprep.subr.bf16.mxu0 %v8058_v5  ;;  %v11287_v50 = vsel %vm11614_vm15, %v6357_v47, %v6358_v31  ;;  %v6325_v42 = vrot.slane %v11617_v58, 2  ;;  %v8072_v25 = vld [vmem:[%s11455_s7 + $0x230] sm:$0xff]   ;;  %v6268_v11 = vunpack.c.h.bf16 %v11199_v18  ;;  %v11621_v47 = vunpack.c.h.bf16 %v10984_v41 }
 0x589   : > { %7620 = vmatpush3.bf16.msra.mxu1 %v8052_v35  ;;  %v11290_v35 = vsel %vm11615_vm6, %v6366_v17, %v6367_v6  ;;  %v6334_v15 = vrot.slane %v11616_v51, 2  ;;  %v6269_v6 = vunpack.c.l.bf16 %v6248_v44 }
 0x58a   : > { %7621 = vmatprep.subr.bf16.mxu1 %v8055_v2  ;;  %v6408_v21 = vpack.c.bf16 %v11290_v35, %v11287_v50  ;;  %v8070_v2 = vld [vmem:[%s11455_s7 + $0x220] sm:$0xff]   ;;  %v6342_v18 = vrot.slane %v6268_v11, 2  ;;  %v6343_v17 = vrot.slane %v11621_v47, 2 }
 0x58b   : > { %7752 = vmatpush3.bf16.msra.mxu0 %v8058_v5  ;;  %v6401_v5 = vpack.c.bf16 %v6320_v62, %v6311_v60  ;;  %v6352_v62 = vrot.slane %v11620_v49, 2 }
 0x58c   : > { %6158 = vmatmul.mubr.bf16.gmra.mrb[152].mxu1 %v7261_v55  ;;  %7753 = vmatprep.subr.bf16.mxu0 %v8063_v40  ;;  %v8073_v55 = vld [vmem:[%s11455_s7 + $0x238] sm:$0xff]   ;;  %v6344_v41 = vsel %vm11625_vm12, %v6342_v18, %v6343_v17 }
 0x58d   : > { %7622 = vmatpush3.bf16.msra.mxu1 %v8057_v37  ;;  %6165 = vmatprep.mubr.bf16.mxu1 %v7265_v52  ;;  %v6250_v37 = vld [vmem:[#allocation4 + $0x80] sm:$0xe]  ;;  %v6254_v52 = vld [vmem:[#allocation4 + $0xb0] sm:$0xe] }
 0x58e   : > { %7623 = vmatprep.subr.bf16.mxu1 %v8060_v63  ;;  %7746 = vmatmul.mubr.bf16.gmra.mrb[148].mxu0 %v7266_v14  ;;  %v6272_v31 = vunpack.c.l.bf16 %v6250_v37  ;;  %v6351_v63 = vrot.slane %v6271_v1, 2  ;;  %v6278_v14 = vunpack.c.l.bf16 %v6254_v52 }
 0x58f   : > { %7754 = vmatpush3.bf16.msra.mxu0 %v8063_v40  ;;  %7765 = vmatprep.mubr.bf16.mxu0 %v6401_v5  ;;  %v6333_v40 = vrot.slane %v6265_v33, 2  ;;  %v6277_v5 = vunpack.c.h.bf16 %v11246_v32 }
 0x590   : > { %7755 = vmatprep.subr.bf16.mxu0 %v8067_v19  ;;  %v6354_v20 = vrot.slane %v6272_v31, 2  ;;  %v6353_v60 = vsel %vm11623_vm7, %v6351_v63, %v6352_v62  ;;  %v6372_v32 = vrot.slane %v6278_v14, 2 }
 0x591   : > { %7624 = vmatpush3.bf16.msra.mxu1 %v8062_v57  ;;  %v6335_v27 = vsel %vm11618_vm9, %v6333_v40, %v6334_v15  ;;  %v6346_v57 = vrot.slane %v11624_v53, 2  ;;  %v6406_v33 = vpack.c.bf16 %v6353_v60, %v6344_v41  ;;  %v11629_v40 = vunpack.c.l.bf16 %v11063_v3 }
 0x592   : > { %7625 = vmatprep.subr.bf16.mxu1 %v8064_v9  ;;  %v6373_v15 = vrot.slane %v11630_v8, 2 }
 0x593   : > { %7756 = vmatpush3.bf16.msra.mxu0 %v8067_v19  ;;  %v6345_v19 = vrot.slane %v6269_v6, 2  ;;  %v6364_v51 = vrot.slane %v11629_v40, 2 }
 0x594   : > { %6166 = vmatmul.mubr.bf16.gmra.mrb[156].mxu1 %v7264_v59  ;;  %7757 = vmatprep.subr.bf16.mxu0 %v8070_v2  ;;  %v6369_v59 = vrot.slane %v6277_v5, 2 }
 0x595   : > { %7626 = vmatpush3.bf16.msra.mxu1 %v8066_v22  ;;  %6636 = vmatprep.mubr.bf16.mxu1 %v6400_v16  ;;  %v6326_v16 = vsel %vm11619_vm2, %v6324_v54, %v6325_v42  ;;  %v6347_v22 = vsel %vm11627_vm5, %v6345_v19, %v6346_v57  ;;  %v6374_v54 = vsel %vm11634_vm8, %v6372_v32, %v6373_v15 }
 0x596   : > { %7627 = vmatprep.subr.bf16.mxu1 %v8068_v7  ;;  %v6403_v38 = vpack.c.bf16 %v6335_v27, %v6326_v16  ;;  %v6370_v7 = vrot.slane %v11628_v12, 2 }
 0x597   : > { %7758 = vmatpush3.bf16.msra.mxu0 %v8070_v2  ;;  %v6356_v2 = vsel %vm11626_vm1, %v6354_v20, %v6355_v36 }
 0x598   : > { %7759 = vmatprep.subr.bf16.mxu0 %v8071_v0  ;;  %v6407_v4 = vpack.c.bf16 %v6356_v2, %v6347_v22  ;;  %v6371_v39 = vsel %vm11632_vm10, %v6369_v59, %v6370_v7 }
 0x599   : > { %7628 = vmatpush3.bf16.msra.mxu1 %v8069_v10 }
 0x59b   : > { %7760 = vmatpush3.bf16.msra.mxu0 %v8071_v0 }
 0x59c   : > { %6637 = vmatmul.mubr.bf16.vlgmr.msra.gmra.mrb[160].mxu1 %v6399_v29  ;;  %7761 = vmatprep.subr.bf16.mxu0 %v8072_v25  ;;  %v6252_v29 = vld [vmem:[#allocation4 + $0x98] sm:$0xe] }
 0x59d   : > { %6644 = vmatprep.mubr.bf16.mxu1 %v6403_v38  ;;  %v6275_v9 = vunpack.c.l.bf16 %v6252_v29 }
 0x59f   : > { %7762 = vmatpush3.bf16.msra.mxu0 %v8072_v25  ;;  %v6363_v0 = vrot.slane %v6275_v9, 2 }
 0x5a0   : > { %7763 = vmatprep.subr.bf16.mxu0 %v8073_v55 }
 0x5a1   : > { %v6365_v10 = vsel %vm11633_vm11, %v6363_v0, %v6364_v51 }
 0x5a2   : > { %v6410_v61 = vpack.c.bf16 %v6374_v54, %v6365_v10 }
 0x5a3   : > { %7764 = vmatpush3.bf16.msra.mxu0 %v8073_v55 }
 0x5a4   : > { %6645 = vmatmul.mubr.bf16.gmra.mrb[164].mxu1 %v6402_v48  ;;  %v6361_v48 = vrot.slane %v11631_v30, 2 }
 0x5a5   : > { %6652 = vmatprep.mubr.bf16.mxu1 %v6406_v33 }
 0x5a6   : > { %7766 = vmatmul.mubr.bf16.vlgmr.msra.gmra.mrb[144].mxu0 %v6404_v43  ;;  %v6362_v3 = vsel %vm11635_vm14, %v6360_v13, %v6361_v48 }
 0x5a7   : > { %7769 = vmatprep.mubr.bf16.mxu0 %v6407_v4  ;;  %v6409_v58 = vpack.c.bf16 %v6371_v39, %v6362_v3 }
 0x5ac   : > { %6653 = vmatmul.mubr.bf16.gmra.mrb[168].mxu1 %v6405_v26 }
 0x5ad   : > { %6660 = vmatprep.mubr.bf16.mxu1 %v6409_v58 }
 0x5ae   : > { %7770 = vmatmul.mubr.bf16.gmra.mrb[148].mxu0 %v6410_v61 }
 0x5b4   : > { %6661 = vmatmul.mubr.bf16.gmra.mrb[172].mxu1 %v6408_v21 }
 0x62c   : > { %v7525_v24 = vpop.f32.mrb[128].mxu1 }
 0x62d   : > { %v7526_v34 = vpop.f32.mrb[129].mxu1 }
 0x62e   : > { %v7527_v46 = vadd.f32 %v7526_v34, %v7525_v24  ;;  %v7528_v43 = vpop.f32.mrb[130].mxu1 }
 0x62f   : > { %v7529_v42 = vpop.f32.mrb[131].mxu1 }
 0x630   : > { %v7530_v37 = vadd.f32 %v7529_v42, %v7528_v43 }
 0x635   : > { %v7531_v27 = vpop.f32.mrb[132].mxu1 }
 0x636   : > { %v7532_v25 = vpop.f32.mrb[133].mxu1 }
 0x637   : > { %v7533_v1 = vadd.f32 %v7532_v25, %v7531_v27  ;;  %v7534_v44 = vpop.f32.mrb[134].mxu1  ;;  %v7435_v27 = vld [vmem:[%s11456_s8] ss:$0 sm:$0xff] }
 0x638   : > { %v7535_v16 = vpop.f32.mrb[135].mxu1 }
 0x639   : > { %v7536_v28 = vadd.f32 %v7535_v16, %v7534_v44 }
 0x63d   : > { %v7537_v23 = vpop.f32.mrb[136].mxu1 }
 0x63e   : > { %v7538_v26 = vpop.f32.mrb[137].mxu1 }
 0x63f   : > { %v7539_v11 = vadd.f32 %v7538_v26, %v7537_v23  ;;  %v7540_v31 = vpop.f32.mrb[138].mxu1 }
 0x640   : > { %v7541_v38 = vpop.f32.mrb[139].mxu1 }
 0x641   : > { %v7542_v55 = vadd.f32 %v7541_v38, %v7540_v31 }
 0x647   : > { %v7543_v50 = vpop.f32.mrb[140].mxu1 }
 0x648   : > { %v7544_v35 = vpop.f32.mrb[141].mxu1 }
 0x649   : > { %v7545_v21 = vadd.f32 %v7544_v35, %v7543_v50  ;;  %v7546_v63 = vpop.f32.mrb[142].mxu1 }
 0x64a   : > { %v7547_v49 = vpop.f32.mrb[143].mxu1 }
 0x64b   : > { %v7548_v62 = vadd.f32 %v7547_v49, %v7546_v63 }
 0x64f   : > { %v7577_v6 = vpop.f32.mrb[144].mxu1 }
 0x650   : > { %v7578_v52 = vpop.f32.mrb[145].mxu1 }
 0x651   : > { %v7579_v18 = vadd.f32 %v7578_v52, %v7577_v6  ;;  %v7580_v47 = vpop.f32.mrb[146].mxu1 }
 0x652   : > { %v7581_v17 = vpop.f32.mrb[147].mxu1 }
 0x653   : > { %v7776_v20 = vadd.f32 %v7579_v18, %v7527_v46  ;;  %v7582_v56 = vadd.f32 %v7581_v17, %v7580_v47 }
 0x655   : > { %v7782_v36 = vadd.f32 %v7582_v56, %v7530_v37 }
 0x657   : > { %v7583_v29 = vpop.f32.mrb[148].mxu1 }
 0x658   : > { %v7584_v14 = vpop.f32.mrb[149].mxu1 }
 0x659   : > { %v7585_v60 = vadd.f32 %v7584_v14, %v7583_v29  ;;  %v7586_v19 = vpop.f32.mrb[150].mxu1 }
 0x65a   : > { %v7587_v53 = vpop.f32.mrb[151].mxu1 }
 0x65b   : > { %v7773_v57 = vadd.f32 %v7585_v60, %v7533_v1  ;;  %v7588_v5 = vadd.f32 %v7587_v53, %v7586_v19 }
 0x65d   : > { %v7779_v9 = vadd.f32 %v7588_v5, %v7536_v28 }
 0x65f   : > { %v7589_v41 = vpop.f32.mrb[152].mxu1 }
 0x660   : > { %v7590_v2 = vpop.f32.mrb[153].mxu1 }
 0x661   : > { %v7591_v45 = vadd.f32 %v7590_v2, %v7589_v41  ;;  %v7592_v33 = vpop.f32.mrb[154].mxu1 }
 0x662   : > { %v7593_v22 = vpop.f32.mrb[155].mxu1 }
 0x663   : > { %v7788_v59 = vadd.f32 %v7591_v45, %v7539_v11  ;;  %v7594_v12 = vadd.f32 %v7593_v22, %v7592_v33 }
 0x665   : > { %v7794_v7 = vadd.f32 %v7594_v12, %v7542_v55 }
 0x667   : > { %v7595_v32 = vpop.f32.mrb[156].mxu1 }
 0x668   : > { %v7596_v4 = vpop.f32.mrb[157].mxu1 }
 0x669   : > { %v7597_v0 = vadd.f32 %v7596_v4, %v7595_v32  ;;  %v7598_v40 = vpop.f32.mrb[158].mxu1 }
 0x66a   : > { %v7599_v51 = vpop.f32.mrb[159].mxu1 }
 0x66b   : > { %v11374_v8 = vadd.f32 %v7597_v0, %v7545_v21  ;;  %v7600_v15 = vadd.f32 %v7599_v51, %v7598_v40 }
 0x66d   : > { %v11376_v13 = vadd.f32 %v7600_v15, %v7548_v62 }
 0x66f   : > { %v7629_v30 = vpop.f32.mrb[160].mxu1 }
 0x670   : > { %v7630_v48 = vpop.f32.mrb[161].mxu1 }
 0x671   : > { %v7631_v39 = vadd.f32 %v7630_v48, %v7629_v30  ;;  %v7632_v10 = vpop.f32.mrb[162].mxu1 }
 0x672   : > { %v7633_v54 = vpop.f32.mrb[163].mxu1 }
 0x673   : > { %v7634_v3 = vadd.f32 %v7633_v54, %v7632_v10  ;;  %v7777_v58 = vadd.f32 %v7776_v20, %v7631_v39 }
 0x675   : > { %v7783_v61 = vadd.f32 %v7782_v36, %v7634_v3 }
 0x677   : > { %v7635_v24 = vpop.f32.mrb[164].mxu1 }
 0x678   : > { %v7636_v34 = vpop.f32.mrb[165].mxu1 }
 0x679   : > { %v7637_v46 = vadd.f32 %v7636_v34, %v7635_v24  ;;  %v7638_v43 = vpop.f32.mrb[166].mxu1  ;;  %v7767_v42 = vpop.f32.mrb[144].mxu0 }
 0x67a   : > { %v7639_v37 = vpop.f32.mrb[167].mxu1  ;;  %v6703_v25 = vpop.f32.mrb[145].mxu0 }
 0x67b   : > { %v7640_v1 = vadd.f32 %v7639_v37, %v7638_v43  ;;  %v7774_v44 = vadd.f32 %v7773_v57, %v7637_v46  ;;  %v7778_v16 = vadd.f32 %v7777_v58, %v6703_v25  ;;  %v7768_v28 = vpop.f32.mrb[146].mxu0 }
 0x67c   : > { %v6706_v23 = vpop.f32.mrb[147].mxu0 }
 0x67d   : > { %v7775_v26 = vadd.f32 %v7774_v44, %v7767_v42  ;;  %v6749_v11 = vadd.f32 %v7778_v16, %v7435_v27  ;;  %v7780_v31 = vadd.f32 %v7779_v9, %v7640_v1  ;;  %v7784_v38 = vadd.f32 %v7783_v61, %v6706_v23 }
 0x67f   : > { %v6751_v55 = vadd.f32 %v7775_v26, %v7435_v27  ;;  %v6757_v50 = vmax.f32 %v6749_v11, 0.0  ;;  %v7781_v35 = vadd.f32 %v7780_v31, %v7768_v28  ;;  %v6750_v21 = vadd.f32 %v7784_v38, %v7435_v27  ;;  %v7641_v63 = vpop.f32.mrb[168].mxu1 }
 0x680   : > { %v7642_v49 = vpop.f32.mrb[169].mxu1 }
 0x681   : > { %v6759_v62 = vmax.f32 %v6751_v55, 0.0  ;;  %6765 = vst [vmem:[%s11384_s26] sm:$0xff] %v6757_v50  ;;  %v6752_v6 = vadd.f32 %v7781_v35, %v7435_v27  ;;  %v6758_v52 = vmax.f32 %v6750_v21, 0.0  ;;  %v7643_v18 = vadd.f32 %v7642_v49, %v7641_v63  ;;  %v7644_v47 = vpop.f32.mrb[170].mxu1  ;;  %v7771_v17 = vpop.f32.mrb[148].mxu0 }
 0x682   : > { %v7645_v20 = vpop.f32.mrb[171].mxu1  ;;  %v6719_v56 = vpop.f32.mrb[149].mxu0 }
 0x683   : > { %6767 = vst [vmem:[%s11384_s26 + $0x10] sm:$0xff] %v6759_v62  ;;  %v6760_v36 = vmax.f32 %v6752_v6, 0.0  ;;  %6766 = vst [vmem:[%s11384_s26 + $0x8] sm:$0xff] %v6758_v52  ;;  %v7646_v29 = vadd.f32 %v7645_v20, %v7644_v47  ;;  %v7789_v14 = vadd.f32 %v7788_v59, %v7643_v18  ;;  %v7772_v60 = vpop.f32.mrb[150].mxu0 }
 0x684   : > { %v6722_v19 = vpop.f32.mrb[151].mxu0 }
 0x685   : > { %6768 = vst [vmem:[%s11384_s26 + $0x18] sm:$0xff] %v6760_v36  ;;  %v7790_v53 = vadd.f32 %v7789_v14, %v6719_v56  ;;  %v7795_v57 = vadd.f32 %v7794_v7, %v7646_v29 }
 0x687   : > { %v6753_v5 = vadd.f32 %v7790_v53, %v7435_v27  ;;  %v7796_v9 = vadd.f32 %v7795_v57, %v6722_v19  ;;  %v7647_v41 = vpop.f32.mrb[172].mxu1 }
 0x688   : > { %v7648_v2 = vpop.f32.mrb[173].mxu1 }
 0x689   : > { %v6761_v45 = vmax.f32 %v6753_v5, 0.0  ;;  %v6754_v33 = vadd.f32 %v7796_v9, %v7435_v27  ;;  %v7649_v22 = vadd.f32 %v7648_v2, %v7647_v41  ;;  %v7650_v12 = vpop.f32.mrb[174].mxu1 }
 0x68a   : > { %v7651_v32 = vpop.f32.mrb[175].mxu1 }
 0x68b   : > { %6769 = vst [vmem:[%s11384_s26 + $0x20] sm:$0xff] %v6761_v45  ;;  %v6762_v59 = vmax.f32 %v6754_v33, 0.0  ;;  %v7786_v4 = vadd.f32 %v11374_v8, %v7649_v22  ;;  %v7652_v0 = vadd.f32 %v7651_v32, %v7650_v12 }
 0x68d   : > { %6770 = vst [vmem:[%s11384_s26 + $0x28] sm:$0xff] %v6762_v59  ;;  %v7787_v7 = vadd.f32 %v7786_v4, %v7771_v17  ;;  %v7792_v40 = vadd.f32 %v11376_v13, %v7652_v0 }
 0x68f   : > { %v6755_v51 = vadd.f32 %v7787_v7, %v7435_v27  ;;  %v7793_v15 = vadd.f32 %v7792_v40, %v7772_v60 }
 0x691   : > { %v6763_v30 = vmax.f32 %v6755_v51, 0.0  ;;  %v6756_v48 = vadd.f32 %v7793_v15, %v7435_v27 }
 0x693   : > { %6771 = vst [vmem:[%s11384_s26 + $0x30] sm:$0xff] %v6763_v30  ;;  %v6764_v8 = vmax.f32 %v6756_v48, 0.0 }
 0x695   : > { %6772 = vst [vmem:[%s11384_s26 + $0x38] sm:$0xff] %v6764_v8 }
 0x696   : > { %8118 = shalt.err (!%p8115_p7)
}
 0x697   : > { %s8119_s16 = scalar_lea.hbm %s11402_s21, 1024  ;;  %s8123_s27 = scalar_lea.hbm %s11457_s9, 2048 }
 0x698   : > { %p8120_p8 = scmp.ne.s32.totalorder %s11402_s21, %s8119_s16  ;;  %p8124_p1 = scmp.lt.u32.totalorder %s11402_s21, %s11457_s9 }
 0x699   : > { %p8125_p0 = scmp.lt.u32.totalorder %s8123_s27, %s8119_s16  ;;  %p8127_p6 = scmp.lt.u32.totalorder %s8119_s16, %s11402_s21 }
 0x69a   : > { %p8121_p11 = pnand %p8120_p8, %p11636_p9 }
 0x69b   : > { %p8126_p5 = por %p8125_p0, %p8124_p1 }
 0x69c   : > { %p8122_p13 = pneg %p8121_p11 }
 0x69d   : > { %p8128_p10 = por %p8127_p6, %p8126_p5 }
 0x69f   : > { %p8129_p12 = pnand %p8128_p10, %p8122_p13 }
 0x6a1   : > { %8132 = shalt.err (!%p8129_p12)
}
 0x6a2   : > { %s8180_s14 = smov 128   ;;  %s8181_s13 = smov 8  }
 0x6a3   : > { %7817 = dma.vmem_to_hbm [thread:$0]  (%p11636_p9), %s11396_s28, 1024, %s11402_s21, %s11407_s23, %s8180_s14, %s8180_s14, %s8181_s13  }
 0x6a4 PF: > { %p7829_p2 = scmp.ge.s32.totalorder %s8171_s12, 2  ;;  %s6802_s17 = sand.u32 1, %s8159_s30  }
 0x6a5   : > { %p11637_p3 = scmp.ne.s32.totalorder %s11500_s20, 0  ;;  %s6803_s22 = scalar_lea.sflag [#allocation8], %s6802_s17 }
 0x6a7   : > { %p7824_p4 = pnand %p7829_p2, %p11637_p3 }
 0x6a9   : > { %8154 = dma.done.wait (!%p7824_p4), %s6803_s22, 1024  }
 0x6aa   : > { %8156 = vsyncadd (!%p7824_p4), %s6803_s22, 4294966272  ;;  %p20_p7 = scmp.ge.s32.totalorder %s8257_s15, 4   ;;  %s11638_s30 = smov %s8163_s10 }
 0x6ab   : > { %s11639_s10 = smov %s8167_s11  ;;  %s11640_s11 = smov %s8268_s18 }
 0x6ac   : > { %s11641_s12 = smov %s8257_s15  ;;  %22 = sbr.rel (!%p20_p7) target bundleno = 4 (0x4), region = 123 }
 0x6b3   :  { %6808 = vsyncpa [#allocation7], 1 }
 0x6b4   :  { %6810 = vsyncpa [#allocation7 + $0x1], 1 }
 0x6b5   :  { %6811 = vsyncpa [#allocation8], 1 }
 0x6b6   :  { %6813 = vsyncpa [#allocation8 + $0x1], 1 }

</bundles_post_ra>
